<compile_context>
chip_gen: v7x
topology: tpu7x:2x2x1
jax: 0.10.0
libtpu: 0.0.40
codegen_flags: <defaults>
</compile_context>

<pallas_src>
import jax
import jax.numpy as jnp
from jax.experimental import pallas as pl
from jax.experimental.pallas import tpu as pltpu


def _round_up(x, m):
    return ((x + m - 1) // m) * m


# ----------------------------- Pallas kernel ------------------------------ #
def neumf_kernel(u_idx_ref, i_idx_ref,
                 tu_mlp_ref, ti_mlp_ref, tu_mf_ref, ti_mf_ref,
                 w0u_ref, w0i_ref, b0_ref,
                 w1_ref, b1_ref,
                 wah_ref, wam_ref, ba_ref,
                 out_ref):
    tm = out_ref.shape[-1]                     # batch tile
    num_users = tu_mlp_ref.shape[0]
    num_items = ti_mlp_ref.shape[0]
    emb_dt = tu_mlp_ref.dtype

    # ---- Fused embedding gather via one-hot MXU matmul (exact). ----
    u_idx = u_idx_ref[...]                     # (TM, 1) int32
    i_idx = i_idx_ref[...]                     # (TM, 1) int32
    u_oh = (u_idx == jax.lax.broadcasted_iota(jnp.int32, (tm, num_users), 1)
            ).astype(emb_dt)                   # (TM, U)
    i_oh = (i_idx == jax.lax.broadcasted_iota(jnp.int32, (tm, num_items), 1)
            ).astype(emb_dt)                   # (TM, I)

    u_mlp = jnp.dot(u_oh, tu_mlp_ref[...], preferred_element_type=jnp.float32)
    i_mlp = jnp.dot(i_oh, ti_mlp_ref[...], preferred_element_type=jnp.float32)
    u_mf = jnp.dot(u_oh, tu_mf_ref[...], preferred_element_type=jnp.float32)
    i_mf = jnp.dot(i_oh, ti_mf_ref[...], preferred_element_type=jnp.float32)

    # MF branch: elementwise product (f32 on VPU).               (TM, d_mf)
    mf = u_mf * i_mf

    # fc layer 0 with split weights (== concat([u,i]) @ W0) + ReLU. (TM, l1)
    h = (jnp.dot(u_mlp, w0u_ref[...], preferred_element_type=jnp.float32)
         + jnp.dot(i_mlp, w0i_ref[...], preferred_element_type=jnp.float32)
         + b0_ref[...])
    h = jnp.maximum(h, 0.0)

    # fc layer 1 + ReLU.                                           (TM, l2)
    h = jnp.dot(h, w1_ref[...], preferred_element_type=jnp.float32) + b1_ref[...]
    h = jnp.maximum(h, 0.0)

    # Final affine (out_features=1): VPU multiply + lane reduce over split
    # affine weights instead of an N=1 MXU matmul; scalar bias from SMEM.
    logit = (jnp.sum(h * wah_ref[...], axis=-1)
             + jnp.sum(mf * wam_ref[...], axis=-1)
             + ba_ref[0])

    # Lane-dense store: one (1, 1, TM) row per grid step.
    out_ref[...] = jax.nn.sigmoid(logit).reshape(out_ref.shape)


# ------------------------------ JAX wrapper -------------------------------- #
def neumf_forward(params, user_indices, item_indices, *, block_m=1024):
    B = user_indices.shape[0]

    # Batch tile: multiple of 128 (lane-dense output rows), clamped to the
    # 128-rounded batch so tiny batches don't over-pad.
    bm = max(128, min(_round_up(block_m, 128), _round_up(B, 128)))
    num_tiles = -(-B // bm)
    b_pad = num_tiles * bm

    # Pad the index streams (padded rows gather row 0 and are sliced off).
    u_idx = user_indices.astype(jnp.int32)
    i_idx = item_indices.astype(jnp.int32)
    pad = b_pad - B
    if pad:
        u_idx = jnp.concatenate([u_idx, jnp.zeros((pad,), jnp.int32)])
        i_idx = jnp.concatenate([i_idx, jnp.zeros((pad,), jnp.int32)])
    u_idx = u_idx.reshape(b_pad, 1)
    i_idx = i_idx.reshape(b_pad, 1)

    # Embedding tables stay in their storage dtype (bf16); VMEM-resident.
    tu_mlp = params["emb_user_mlp"]
    ti_mlp = params["emb_item_mlp"]
    tu_mf = params["emb_user_mf"]
    ti_mf = params["emb_item_mf"]
    num_users, d_mlp = tu_mlp.shape
    num_items = ti_mlp.shape[0]
    d_mf = tu_mf.shape[-1]

    # Pre-transpose Linear weights to [in, out] (torch: y = x @ W.T + b) and
    # split fc0 / affine weights so the kernel never concatenates along lanes.
    w0t = params["fc0_w"].T.astype(jnp.float32)     # (2*d_mlp, l1)
    w0u = w0t[:d_mlp]                               # (d_mlp, l1)
    w0i = w0t[d_mlp:]                               # (d_mlp, l1)
    b0 = params["fc0_b"].astype(jnp.float32)[None, :]
    w1t = params["fc1_w"].T.astype(jnp.float32)     # (l1, l2)
    b1 = params["fc1_b"].astype(jnp.float32)[None, :]
    l1 = w0t.shape[-1]
    l2 = w1t.shape[-1]
    wa = params["affine_w"].astype(jnp.float32)     # (1, l2 + d_mf)
    wah = wa[:, :l2]                                # (1, l2)
    wam = wa[:, l2:]                                # (1, d_mf)
    ba = params["affine_b"].astype(jnp.float32).reshape(1)   # (1,) scalar -> SMEM

    # BlockSpecs: indices tiled over the batch; everything else resident.
    idx_spec = pl.BlockSpec((bm, 1), lambda i: (i, 0))

    def resident(arr):
        return pl.BlockSpec(arr.shape, lambda i: (0, 0))

    in_specs = [
        idx_spec, idx_spec,                                   # user / item indices
        resident(tu_mlp), resident(ti_mlp),                   # MLP tables
        resident(tu_mf), resident(ti_mf),                     # MF tables
        resident(w0u), resident(w0i), resident(b0),           # fc0
        resident(w1t), resident(b1),                          # fc1
        resident(wah), resident(wam),                         # affine (split)
        pl.BlockSpec(memory_space=pltpu.MemorySpace.SMEM),    # affine bias scalar
    ]
    out_spec = pl.BlockSpec((1, 1, bm), lambda i: (i, 0, 0))

    # Advisory cost estimate (gathers + fc stack + affine; dominant bytes are
    # the one-time table load plus the streamed indices / output).
    flops = 2 * b_pad * ((num_users + num_items) * (d_mlp + d_mf)
                         + 2 * d_mlp * l1 + l1 * l2 + l2 + d_mf)
    resident_args = (tu_mlp, ti_mlp, tu_mf, ti_mf, w0u, w0i, b0, w1t, b1, wah, wam, ba)
    bytes_accessed = (u_idx.size * 4 + i_idx.size * 4 + b_pad * 4
                      + sum(int(t.size) * t.dtype.itemsize for t in resident_args))
    cost = pl.CostEstimate(flops=int(flops), transcendentals=int(b_pad),
                           bytes_accessed=int(bytes_accessed))

    out = pl.pallas_call(
        neumf_kernel,
        out_shape=jax.ShapeDtypeStruct((num_tiles, 1, bm), jnp.float32),
        grid=(num_tiles,),
        in_specs=in_specs,
        out_specs=out_spec,
        compiler_params=pltpu.CompilerParams(
            dimension_semantics=("parallel",)),
        cost_estimate=cost,
    )(u_idx, i_idx, tu_mlp, ti_mlp, tu_mf, ti_mf,
      w0u, w0i, b0, w1t, b1, wah, wam, ba)

    # (num_tiles, 1, TM) -> (b_pad, 1), drop padded rows.
    return out.reshape(b_pad, 1)[:B]


# --------------------------- deterministic init ----------------------------- #
def init_params(key, num_users, num_items, latent_dim_mlp, latent_dim_mf, layers,
                emb_dtype=jnp.bfloat16):
    ks = jax.random.split(key, 10)
    scale = 0.1
    return {
        # Embedding tables stored in bf16 (halves the HBM table stream).
        "emb_user_mlp": (scale * jax.random.normal(ks[0], (num_users, latent_dim_mlp), jnp.float32)).astype(emb_dtype),
        "emb_item_mlp": (scale * jax.random.normal(ks[1], (num_items, latent_dim_mlp), jnp.float32)).astype(emb_dtype),
        "emb_user_mf":  (scale * jax.random.normal(ks[2], (num_users, latent_dim_mf), jnp.float32)).astype(emb_dtype),
        "emb_item_mf":  (scale * jax.random.normal(ks[3], (num_items, latent_dim_mf), jnp.float32)).astype(emb_dtype),
        # torch.nn.Linear weight shape: (out, in); tiny + resident -> keep f32.
        "fc0_w": scale * jax.random.normal(ks[4], (layers[1], layers[0]), jnp.float32),
        "fc0_b": scale * jax.random.normal(ks[5], (layers[1],), jnp.float32),
        "fc1_w": scale * jax.random.normal(ks[6], (layers[2], layers[1]), jnp.float32),
        "fc1_b": scale * jax.random.normal(ks[7], (layers[2],), jnp.float32),
        "affine_w": scale * jax.random.normal(ks[8], (1, layers[2] + latent_dim_mf), jnp.float32),
        "affine_b": scale * jax.random.normal(ks[9], (1,), jnp.float32),
    }


# -------------------------- pure-JAX reference ------------------------------ #
def neumf_reference(params, user_indices, item_indices):
    f32 = jnp.float32
    u_mlp = params["emb_user_mlp"].astype(f32)[user_indices]
    i_mlp = params["emb_item_mlp"].astype(f32)[item_indices]
    u_mf = params["emb_user_mf"].astype(f32)[user_indices]
    i_mf = params["emb_item_mf"].astype(f32)[item_indices]
    mlp = jnp.concatenate([u_mlp, i_mlp], axis=-1)
    mf = u_mf * i_mf
    h = jnp.maximum(mlp @ params["fc0_w"].T + params["fc0_b"], 0.0)
    h = jnp.maximum(h @ params["fc1_w"].T + params["fc1_b"], 0.0)
    vec = jnp.concatenate([h, mf], axis=-1)
    logits = vec @ params["affine_w"].T + params["affine_b"]
    return jax.nn.sigmoid(logits)


if __name__ == "__main__":
    # Small NeuMF config: layers[0] must equal 2 * latent_dim_mlp.
    num_users, num_items = 64, 96
    latent_dim_mlp, latent_dim_mf = 16, 8
    layers = [32, 16, 8]           # 2 fc layers: 32->16, 16->8
    batch = 2000                   # not a multiple of the tile: exercises padding
    block_m = 512                  # 4 grid steps (3 full + 1 padded)

    key = jax.random.PRNGKey(0)
    kp, ku, ki = jax.random.split(key, 3)
    params = init_params(kp, num_users, num_items, latent_dim_mlp, latent_dim_mf, layers)

    user_indices = jax.random.randint(ku, (batch,), 0, num_users, dtype=jnp.int32)
    item_indices = jax.random.randint(ki, (batch,), 0, num_items, dtype=jnp.int32)

    out = neumf_forward(params, user_indices, item_indices, block_m=block_m)
    out = jax.block_until_ready(out)

    ref = neumf_reference(params, user_indices, item_indices)
    assert out.shape == (batch, 1), out.shape
    assert jnp.allclose(out, ref, atol=1e-5, rtol=1e-5), float(jnp.max(jnp.abs(out - ref)))

    print("KERNEL_OK")
</pallas_src>

<mosaic_0001>
module attributes {stable_mosaic.version = 11 : i64} {
  func.func @neumf_kernel(%arg0: i32, %arg1: memref<512x1xi32, #tpu.memory_space<vmem>>, %arg2: memref<512x1xi32, #tpu.memory_space<vmem>>, %arg3: memref<64x16xbf16, #tpu.memory_space<vmem>>, %arg4: memref<96x16xbf16, #tpu.memory_space<vmem>>, %arg5: memref<64x8xbf16, #tpu.memory_space<vmem>>, %arg6: memref<96x8xbf16, #tpu.memory_space<vmem>>, %arg7: memref<16x16xf32, #tpu.memory_space<vmem>>, %arg8: memref<16x16xf32, #tpu.memory_space<vmem>>, %arg9: memref<1x16xf32, #tpu.memory_space<vmem>>, %arg10: memref<16x8xf32, #tpu.memory_space<vmem>>, %arg11: memref<1x8xf32, #tpu.memory_space<vmem>>, %arg12: memref<1x8xf32, #tpu.memory_space<vmem>>, %arg13: memref<1x8xf32, #tpu.memory_space<vmem>>, %arg14: memref<1xf32, #tpu.memory_space<smem>>, %arg15: memref<1x1x512xf32, #tpu.memory_space<vmem>>) attributes {dimension_semantics = [#tpu.dimension_semantics<parallel>], iteration_bounds = array<i64: 4>, scalar_prefetch = 0 : i64, scratch_operands = 0 : i64, tpu.core_type = #tpu.core_type<tc>, window_params = [{transform_indices = @transform_0, window_bounds = array<i64: 512, 1>}, {transform_indices = @transform_1, window_bounds = array<i64: 512, 1>}, {pipeline_mode = #tpu.pipeline_mode<synchronous>, transform_indices = @transform_2, window_bounds = array<i64: 64, 16>}, {pipeline_mode = #tpu.pipeline_mode<synchronous>, transform_indices = @transform_3, window_bounds = array<i64: 96, 16>}, {pipeline_mode = #tpu.pipeline_mode<synchronous>, transform_indices = @transform_4, window_bounds = array<i64: 64, 8>}, {pipeline_mode = #tpu.pipeline_mode<synchronous>, transform_indices = @transform_5, window_bounds = array<i64: 96, 8>}, {pipeline_mode = #tpu.pipeline_mode<synchronous>, transform_indices = @transform_6, window_bounds = array<i64: 16, 16>}, {pipeline_mode = #tpu.pipeline_mode<synchronous>, transform_indices = @transform_7, window_bounds = array<i64: 16, 16>}, {pipeline_mode = #tpu.pipeline_mode<synchronous>, transform_indices = @transform_8, window_bounds = array<i64: 1, 16>}, {pipeline_mode = #tpu.pipeline_mode<synchronous>, transform_indices = @transform_9, window_bounds = array<i64: 16, 8>}, {pipeline_mode = #tpu.pipeline_mode<synchronous>, transform_indices = @transform_10, window_bounds = array<i64: 1, 8>}, {pipeline_mode = #tpu.pipeline_mode<synchronous>, transform_indices = @transform_11, window_bounds = array<i64: 1, 8>}, {pipeline_mode = #tpu.pipeline_mode<synchronous>, transform_indices = @transform_12, window_bounds = array<i64: 1, 8>}, {transform_indices = @transform_13, window_bounds = array<i64: 1>}, {transform_indices = @transform_14, window_bounds = array<i64: 1, 1, 512>}]} {
    %c0 = arith.constant 0 : index
    %c0_0 = arith.constant 0 : index
    %0 = vector.load %arg1[%c0, %c0_0] : memref<512x1xi32, #tpu.memory_space<vmem>>, vector<512x1xi32>
    %c0_1 = arith.constant 0 : index
    %c0_2 = arith.constant 0 : index
    %1 = vector.load %arg2[%c0_1, %c0_2] : memref<512x1xi32, #tpu.memory_space<vmem>>, vector<512x1xi32>
    %2 = tpu.iota {dimensions = array<i32: 1>} : vector<512x64xi32>
    %3 = vector.broadcast %0 : vector<512x1xi32> to vector<512x64xi32>
    %4 = arith.cmpi eq, %3, %2 : vector<512x64xi32>
    %5 = arith.extui %4 : vector<512x64xi1> to vector<512x64xi32>
    %6 = arith.sitofp %5 : vector<512x64xi32> to vector<512x64xf32>
    %7 = arith.truncf %6 : vector<512x64xf32> to vector<512x64xbf16>
    %8 = tpu.iota {dimensions = array<i32: 1>} : vector<512x96xi32>
    %9 = vector.broadcast %1 : vector<512x1xi32> to vector<512x96xi32>
    %10 = arith.cmpi eq, %9, %8 : vector<512x96xi32>
    %11 = arith.extui %10 : vector<512x96xi1> to vector<512x96xi32>
    %12 = arith.sitofp %11 : vector<512x96xi32> to vector<512x96xf32>
    %13 = arith.truncf %12 : vector<512x96xf32> to vector<512x96xbf16>
    %c0_3 = arith.constant 0 : index
    %c0_4 = arith.constant 0 : index
    %14 = vector.load %arg3[%c0_3, %c0_4] : memref<64x16xbf16, #tpu.memory_space<vmem>>, vector<64x16xbf16>
    %cst = arith.constant dense<0.000000e+00> : vector<512x16xf32>
    %15 = tpu.matmul %7, %14, %cst {dimension_numbers = #tpu.dot_dimension_numbers<[1], [0], [0], [1], [0, 0, 1, 1], [], []>} : vector<512x64xbf16>, vector<64x16xbf16>, vector<512x16xf32> -> vector<512x16xf32>
    %c0_5 = arith.constant 0 : index
    %c0_6 = arith.constant 0 : index
    %16 = vector.load %arg4[%c0_5, %c0_6] : memref<96x16xbf16, #tpu.memory_space<vmem>>, vector<96x16xbf16>
    %cst_7 = arith.constant dense<0.000000e+00> : vector<512x16xf32>
    %17 = tpu.matmul %13, %16, %cst_7 {dimension_numbers = #tpu.dot_dimension_numbers<[1], [0], [0], [1], [0, 0, 1, 1], [], []>} : vector<512x96xbf16>, vector<96x16xbf16>, vector<512x16xf32> -> vector<512x16xf32>
    %c0_8 = arith.constant 0 : index
    %c0_9 = arith.constant 0 : index
    %18 = vector.load %arg5[%c0_8, %c0_9] : memref<64x8xbf16, #tpu.memory_space<vmem>>, vector<64x8xbf16>
    %cst_10 = arith.constant dense<0.000000e+00> : vector<512x8xf32>
    %19 = tpu.matmul %7, %18, %cst_10 {dimension_numbers = #tpu.dot_dimension_numbers<[1], [0], [0], [1], [0, 0, 1, 1], [], []>} : vector<512x64xbf16>, vector<64x8xbf16>, vector<512x8xf32> -> vector<512x8xf32>
    %c0_11 = arith.constant 0 : index
    %c0_12 = arith.constant 0 : index
    %20 = vector.load %arg6[%c0_11, %c0_12] : memref<96x8xbf16, #tpu.memory_space<vmem>>, vector<96x8xbf16>
    %cst_13 = arith.constant dense<0.000000e+00> : vector<512x8xf32>
    %21 = tpu.matmul %13, %20, %cst_13 {dimension_numbers = #tpu.dot_dimension_numbers<[1], [0], [0], [1], [0, 0, 1, 1], [], []>} : vector<512x96xbf16>, vector<96x8xbf16>, vector<512x8xf32> -> vector<512x8xf32>
    %22 = arith.mulf %19, %21 : vector<512x8xf32>
    %c0_14 = arith.constant 0 : index
    %c0_15 = arith.constant 0 : index
    %23 = vector.load %arg7[%c0_14, %c0_15] : memref<16x16xf32, #tpu.memory_space<vmem>>, vector<16x16xf32>
    %cst_16 = arith.constant dense<0.000000e+00> : vector<512x16xf32>
    %24 = tpu.matmul %15, %23, %cst_16 {dimension_numbers = #tpu.dot_dimension_numbers<[1], [0], [0], [1], [0, 0, 1, 1], [], []>} : vector<512x16xf32>, vector<16x16xf32>, vector<512x16xf32> -> vector<512x16xf32>
    %c0_17 = arith.constant 0 : index
    %c0_18 = arith.constant 0 : index
    %25 = vector.load %arg8[%c0_17, %c0_18] : memref<16x16xf32, #tpu.memory_space<vmem>>, vector<16x16xf32>
    %cst_19 = arith.constant dense<0.000000e+00> : vector<512x16xf32>
    %26 = tpu.matmul %17, %25, %cst_19 {dimension_numbers = #tpu.dot_dimension_numbers<[1], [0], [0], [1], [0, 0, 1, 1], [], []>} : vector<512x16xf32>, vector<16x16xf32>, vector<512x16xf32> -> vector<512x16xf32>
    %27 = arith.addf %24, %26 : vector<512x16xf32>
    %c0_20 = arith.constant 0 : index
    %c0_21 = arith.constant 0 : index
    %28 = vector.load %arg9[%c0_20, %c0_21] : memref<1x16xf32, #tpu.memory_space<vmem>>, vector<1x16xf32>
    %29 = vector.broadcast %28 : vector<1x16xf32> to vector<512x16xf32>
    %30 = arith.addf %27, %29 : vector<512x16xf32>
    %cst_22 = arith.constant 0.000000e+00 : f32
    %31 = vector.broadcast %cst_22 : f32 to vector<512x16xf32>
    %32 = arith.maximumf %30, %31 : vector<512x16xf32>
    %c0_23 = arith.constant 0 : index
    %c0_24 = arith.constant 0 : index
    %33 = vector.load %arg10[%c0_23, %c0_24] : memref<16x8xf32, #tpu.memory_space<vmem>>, vector<16x8xf32>
    %cst_25 = arith.constant dense<0.000000e+00> : vector<512x8xf32>
    %34 = tpu.matmul %32, %33, %cst_25 {dimension_numbers = #tpu.dot_dimension_numbers<[1], [0], [0], [1], [0, 0, 1, 1], [], []>} : vector<512x16xf32>, vector<16x8xf32>, vector<512x8xf32> -> vector<512x8xf32>
    %c0_26 = arith.constant 0 : index
    %c0_27 = arith.constant 0 : index
    %35 = vector.load %arg11[%c0_26, %c0_27] : memref<1x8xf32, #tpu.memory_space<vmem>>, vector<1x8xf32>
    %36 = vector.broadcast %35 : vector<1x8xf32> to vector<512x8xf32>
    %37 = arith.addf %34, %36 : vector<512x8xf32>
    %cst_28 = arith.constant 0.000000e+00 : f32
    %38 = vector.broadcast %cst_28 : f32 to vector<512x8xf32>
    %39 = arith.maximumf %37, %38 : vector<512x8xf32>
    %c0_29 = arith.constant 0 : index
    %c0_30 = arith.constant 0 : index
    %40 = vector.load %arg12[%c0_29, %c0_30] : memref<1x8xf32, #tpu.memory_space<vmem>>, vector<1x8xf32>
    %41 = vector.broadcast %40 : vector<1x8xf32> to vector<512x8xf32>
    %42 = arith.mulf %39, %41 : vector<512x8xf32>
    %cst_31 = arith.constant dense<0.000000e+00> : vector<512xf32>
    %43 = vector.multi_reduction <add>, %42, %cst_31 [1] : vector<512x8xf32> to vector<512xf32>
    %c0_32 = arith.constant 0 : index
    %c0_33 = arith.constant 0 : index
    %44 = vector.load %arg13[%c0_32, %c0_33] : memref<1x8xf32, #tpu.memory_space<vmem>>, vector<1x8xf32>
    %45 = vector.broadcast %44 : vector<1x8xf32> to vector<512x8xf32>
    %46 = arith.mulf %22, %45 : vector<512x8xf32>
    %cst_34 = arith.constant dense<0.000000e+00> : vector<512xf32>
    %47 = vector.multi_reduction <add>, %46, %cst_34 [1] : vector<512x8xf32> to vector<512xf32>
    %48 = arith.addf %43, %47 : vector<512xf32>
    %c0_35 = arith.constant 0 : index
    %49 = memref.load %arg14[%c0_35] : memref<1xf32, #tpu.memory_space<smem>>
    %50 = vector.broadcast %49 : f32 to vector<512xf32>
    %51 = arith.addf %48, %50 : vector<512xf32>
    %52 = arith.negf %51 : vector<512xf32>
    %53 = math.exp %52 : vector<512xf32>
    %cst_36 = arith.constant 1.000000e+00 : f32
    %54 = vector.broadcast %cst_36 : f32 to vector<512xf32>
    %55 = arith.addf %54, %53 : vector<512xf32>
    %56 = arith.divf %54, %55 : vector<512xf32>
    %57 = vector.shape_cast %56 : vector<512xf32> to vector<1x1x512xf32>
    %c0_37 = arith.constant 0 : index
    %c0_38 = arith.constant 0 : index
    %c0_39 = arith.constant 0 : index
    %58 = vector.load %arg15[%c0_37, %c0_38, %c0_39] : memref<1x1x512xf32, #tpu.memory_space<vmem>>, vector<1x1x512xf32>
    tpu.vector_store %arg15[%c0_37, %c0_38, %c0_39], %57 {strides = array<i32>} : memref<1x1x512xf32, #tpu.memory_space<vmem>>, vector<1x1x512xf32>,
    return
  }
  func.func @transform_0(%arg0: i32) -> (i32, i32) {
    %c0_i32 = arith.constant 0 : i32
    %c0_i32_0 = arith.constant 0 : i32
    return %arg0, %c0_i32 : i32, i32
  }
  func.func @transform_1(%arg0: i32) -> (i32, i32) {
    %c0_i32 = arith.constant 0 : i32
    %c0_i32_0 = arith.constant 0 : i32
    return %arg0, %c0_i32 : i32, i32
  }
  func.func @transform_2(%arg0: i32) -> (i32, i32) {
    %c0_i32 = arith.constant 0 : i32
    %c0_i32_0 = arith.constant 0 : i32
    %c0_i32_1 = arith.constant 0 : i32
    return %c0_i32, %c0_i32_0 : i32, i32
  }
  func.func @transform_3(%arg0: i32) -> (i32, i32) {
    %c0_i32 = arith.constant 0 : i32
    %c0_i32_0 = arith.constant 0 : i32
    %c0_i32_1 = arith.constant 0 : i32
    return %c0_i32, %c0_i32_0 : i32, i32
  }
  func.func @transform_4(%arg0: i32) -> (i32, i32) {
    %c0_i32 = arith.constant 0 : i32
    %c0_i32_0 = arith.constant 0 : i32
    %c0_i32_1 = arith.constant 0 : i32
    return %c0_i32, %c0_i32_0 : i32, i32
  }
  func.func @transform_5(%arg0: i32) -> (i32, i32) {
    %c0_i32 = arith.constant 0 : i32
    %c0_i32_0 = arith.constant 0 : i32
    %c0_i32_1 = arith.constant 0 : i32
    return %c0_i32, %c0_i32_0 : i32, i32
  }
  func.func @transform_6(%arg0: i32) -> (i32, i32) {
    %c0_i32 = arith.constant 0 : i32
    %c0_i32_0 = arith.constant 0 : i32
    %c0_i32_1 = arith.constant 0 : i32
    return %c0_i32, %c0_i32_0 : i32, i32
  }
  func.func @transform_7(%arg0: i32) -> (i32, i32) {
    %c0_i32 = arith.constant 0 : i32
    %c0_i32_0 = arith.constant 0 : i32
    %c0_i32_1 = arith.constant 0 : i32
    return %c0_i32, %c0_i32_0 : i32, i32
  }
  func.func @transform_8(%arg0: i32) -> (i32, i32) {
    %c0_i32 = arith.constant 0 : i32
    %c0_i32_0 = arith.constant 0 : i32
    %c0_i32_1 = arith.constant 0 : i32
    return %c0_i32, %c0_i32_0 : i32, i32
  }
  func.func @transform_9(%arg0: i32) -> (i32, i32) {
    %c0_i32 = arith.constant 0 : i32
    %c0_i32_0 = arith.constant 0 : i32
    %c0_i32_1 = arith.constant 0 : i32
    return %c0_i32, %c0_i32_0 : i32, i32
  }
  func.func @transform_10(%arg0: i32) -> (i32, i32) {
    %c0_i32 = arith.constant 0 : i32
    %c0_i32_0 = arith.constant 0 : i32
    %c0_i32_1 = arith.constant 0 : i32
    return %c0_i32, %c0_i32_0 : i32, i32
  }
  func.func @transform_11(%arg0: i32) -> (i32, i32) {
    %c0_i32 = arith.constant 0 : i32
    %c0_i32_0 = arith.constant 0 : i32
    %c0_i32_1 = arith.constant 0 : i32
    return %c0_i32, %c0_i32_0 : i32, i32
  }
  func.func @transform_12(%arg0: i32) -> (i32, i32) {
    %c0_i32 = arith.constant 0 : i32
    %c0_i32_0 = arith.constant 0 : i32
    %c0_i32_1 = arith.constant 0 : i32
    return %c0_i32, %c0_i32_0 : i32, i32
  }
  func.func @transform_13(%arg0: i32) -> i32 {
    %c0_i32 = arith.constant 0 : i32
    %c0_i32_0 = arith.constant 0 : i32
    return %c0_i32 : i32
  }
  func.func @transform_14(%arg0: i32) -> (i32, i32, i32) {
    %c0_i32 = arith.constant 0 : i32
    %c0_i32_0 = arith.constant 0 : i32
    %c0_i32_1 = arith.constant 0 : i32
    return %arg0, %c0_i32, %c0_i32_0 : i32, i32, i32
  }
}

</mosaic_0001>

<bundles_post_ra>
// kernel: tpu_custom_call.1
= control target key start
LH: loop header
LB: loop body
LE: loop exit
PB: predicated region body
PF: predicated region fallthrough
CT: control target
= control target key end

     0   :  { %s18070_s0 = inlined_call_operand.vmem [shape: s32[2048,1], index: 0, kind: input, shape index: {}]   ;;  %s18071_s1 = inlined_call_operand.vmem [shape: s32[2048,1], index: 1, kind: input, shape index: {}]   ;;  %s18072_s2 = inlined_call_operand.vmem [shape: bf16[64,16], index: 2, kind: input, shape index: {}]   ;;  %s18073_s3 = inlined_call_operand.vmem [shape: bf16[96,16], index: 3, kind: input, shape index: {}]   ;;  %s18074_s4 = inlined_call_operand.vmem [shape: bf16[64,8], index: 4, kind: input, shape index: {}]   ;;  %s18075_s5 = inlined_call_operand.vmem [shape: bf16[96,8], index: 5, kind: input, shape index: {}]   ;;  %s18076_s6 = inlined_call_operand.vmem [shape: f32[16,16], index: 6, kind: input, shape index: {}]   ;;  %s18077_s7 = inlined_call_operand.vmem [shape: f32[16,16], index: 7, kind: input, shape index: {}]   ;;  %s18078_s8 = inlined_call_operand.vmem [shape: f32[1,16], index: 8, kind: input, shape index: {}]   ;;  %s18079_s9 = inlined_call_operand.vmem [shape: f32[16,8], index: 9, kind: input, shape index: {}]   ;;  %s18080_s10 = inlined_call_operand.vmem [shape: f32[1,8], index: 10, kind: input, shape index: {}]   ;;  %s18081_s11 = inlined_call_operand.vmem [shape: f32[1,8], index: 11, kind: input, shape index: {}]   ;;  %s18082_s12 = inlined_call_operand.vmem [shape: f32[1,8], index: 12, kind: input, shape index: {}]   ;;  %s18083_s13 = inlined_call_operand.<no memory space> [shape: f32[1], index: 13, kind: input, shape index: {}]   ;;  %s18084_s14 = inlined_call_operand.hbm [shape: f32[4,1,512], index: 14, kind: output, shape index: {}]  }
   0x1   :  { %18097 = sst [smem:[#allocation44_spill]] %s18070_s0 }
   0x2   :  { %18098 = sst [smem:[#allocation45_spill]] %s18071_s1 }
   0x3   :  { %18099 = sst [smem:[#allocation46_spill]] %s18072_s2 }
   0x4   :  { %19 = sst [smem:[#allocation2]] %s18083_s13 }
   0x5   :  { %20 = vsyncpa [#allocation4], 0 }
   0x6   :  { %22 = vsyncpa [#allocation4 + $0x1], 0  ;;  %s13958_s15 = smov 0   ;;  %s13960_s16 = smov 0  }
   0x7   :  { %s13962_s17 = smov 0   ;;  %s13964_s18 = smov 0  }
   0x8 LB: > { %s11914_s13 = sadd.s32 4294967295, %s13874_s18   ;;  %s11915_s19 = sadd.s32 4294967294, %s13874_s18   ;;  %s13874_s18 = sphi %s13964_s18, %s18243_s18   ;;  %s13870_s17 = sphi %s13962_s17, %s18242_s17   ;;  %s13866_s16 = sphi %s13960_s16, %s18241_s16   ;;  %s13862_s15 = sphi %s13958_s15, %s18240_s15  }
   0x9   : > { %s13981_s20 = sadd.s32 1, %s13874_s18   ;;  %s339_s21 = sadd.s32 1, %s13870_s17 }
   0xa   : > { %s336_s22 = ssub.s32 %s13874_s18, %s13981_s20  ;;  %p349_p0 = scmp.ne.s32.totalorder %s13870_s17, %s13866_s16 }
   0xb   : > { %p337_p1 = scmp.eq.s32.totalorder %s336_s22, 0  ;;  %p350_p2 = scmp.eq.s32.totalorder %s11914_s13, 3 }
   0xc   : > { %p355_p3 = scmp.ne.s32.totalorder %s13866_s16, %s13862_s15  ;;  %p356_p4 = scmp.eq.s32.totalorder %s11915_s19, 3 }
   0xd   : > { %s13991_s23 = scalar_select %p337_p1, %s13870_s17, %s339_s21  }
   0xe   : > { %p13993_p5 = por %p350_p2, %p349_p0  ;;  %p13997_p6 = por %p356_p4, %p355_p3 }
   0xf   : > { %p11918_p7 = scmp.ge.s32.totalorder %s13874_s18, 1  ;;  %p428_p8 = scmp.lt.s32.totalorder %s13874_s18, 5 }
  0x11   : > { %p429_p9 = pnand %p11918_p7, %p428_p8 }
  0x13   : > { %432 = sbr.rel (%p429_p9) target bundleno = 1831 (0x727), region = 76 }
  0x1a   : > { %s14003_s26 = sshll.u32 %s11914_s13, 6  ;;  %v13876_v0 = vmov 0   ;;  %s18102_s2 = sld [smem:[#allocation46_spill]]  ;;  %v14058_v31 = vld [vmem:[%s18073_s3] sm:$0xff]   ;;  %vm1486_vm4 = vcmask 523264  }
  0x1b   : > { %13535 = vset.pattern.permute.xlu1 %v13876_v0  ;;  %13534 = vset.pattern.permute.xlu0 %v13876_v0  ;;  %p480_p10 = scmp.lt.s32.totalorder %s14003_s26, 255  ;;  %s18103_s0 = sld [smem:[#allocation44_spill]] }
  0x1c   : > { %s18104_s1 = sld [smem:[#allocation45_spill]]  ;;  %s18028_s19 = scalar_lea.hbm %s18084_s14, %s14003_s26 }
  0x1d   : > { %s14010_s29 = scalar_select %p480_p10, %s14003_s26, 255 }
  0x1f   : > { %s11921_s13 = sshll.u32 %s14010_s29, 3  ;;  %s476_s29 = sand.u32 1, %s13866_s16  }
  0x20   : > { %v13536_v1 = vld [vmem:[%s18102_s2] sm:$0xff]   ;;  %v13537_v2 = vld [vmem:[%s18102_s2 + $0x8] sm:$0xff]   ;;  %v13538_v17 = vld [vmem:[%s18102_s2 + $0x10] sm:$0xff]  }
  0x21   : > { %13420 = vmatprep.subr.bf16.mxu1 %v13536_v1  ;;  %12812 = vmatprep.subr.bf16.mxu0 %v13536_v1  ;;  %s14021_s27 = scalar_lea.vmem %s18103_s0, %s11921_s13  ;;  %v13539_v18 = vld [vmem:[%s18102_s2 + $0x18] sm:$0xff]  }
  0x22   : > { %13424 = vmatpush3.bf16.msra.mxu1 %v13536_v1  ;;  %12813 = vmatpush3.bf16.msra.mxu0 %v13536_v1  ;;  %v526_v3 = vld [vmem:[%s14021_s27 + $0x110] sm:$0xff]  ;;  %v524_v4 = vld [vmem:[%s14021_s27 + $0x100] sm:$0xff]  ;;  %v527_v5 = vld [vmem:[%s14021_s27 + $0x118] sm:$0xff]  ;;  %s14072_s21 = scalar_lea.vmem %s18104_s1, %s11921_s13  ;;  %s11919_s13 = sshll.u32 %s476_s29, 2 }
  0x23   : > { %13421 = vmatprep.subr.bf16.mxu1 %v13537_v2  ;;  %12814 = vmatprep.subr.bf16.mxu0 %v13537_v2  ;;  %v525_v6 = vld [vmem:[%s14021_s27 + $0x108] sm:$0xff]  ;;  %v528_v8 = vld [vmem:[%s14021_s27 + $0x120] sm:$0xff]  ;;  %v531_v9 = vld [vmem:[%s14021_s27 + $0x138] sm:$0xff]  ;;  %s478_s22 = scalar_lea.vmem [#allocation3], %s11919_s13  ;;  %s13879_s13 = smov [#allocation3]  }
  0x24   : > { %725 = vperm.xlu1 %13535, %v526_v3   ;;  %719 = vperm.xlu0 %13534, %v524_v4   ;;  %v529_v7 = vld [vmem:[%s14021_s27 + $0x128] sm:$0xff]  ;;  %v530_v10 = vld [vmem:[%s14021_s27 + $0x130] sm:$0xff]  ;;  %v532_v12 = vld [vmem:[%s14021_s27 + $0x140] sm:$0xff]  ;;  %s13816_s1 = sshll.u32 %s13879_s13, 4  ;;  %s13817_s1 = int_to_ptr.vmem [resolvable:$false] %s13816_s1 }
  0x25   : > { %v533_v11 = vld [vmem:[%s14021_s27 + $0x148] sm:$0xff]  ;;  %v535_v13 = vld [vmem:[%s14021_s27 + $0x158] sm:$0xff]  ;;  %v534_v14 = vld [vmem:[%s14021_s27 + $0x150] sm:$0xff]  ;;  %s13818_s2 = scalar_lea.vmem %s13817_s1, 128 }
  0x26   : > { %13425 = vmatpush3.bf16.msra.mxu1 %v13537_v2  ;;  %12815 = vmatpush3.bf16.msra.mxu0 %v13537_v2  ;;  %v537_v15 = vld [vmem:[%s14021_s27 + $0x168] sm:$0xff]  ;;  %v536_v16 = vld [vmem:[%s14021_s27 + $0x160] sm:$0xff]  ;;  %v539_v19 = vld [vmem:[%s14021_s27 + $0x178] sm:$0xff] }
  0x27   : > { %13422 = vmatprep.subr.bf16.mxu1 %v13538_v17  ;;  %12816 = vmatprep.subr.bf16.mxu0 %v13538_v17  ;;  %v538_v20 = vld [vmem:[%s14021_s27 + $0x170] sm:$0xff]  ;;  %v541_v21 = vld [vmem:[%s14021_s27 + $0x188] sm:$0xff]  ;;  %v540_v22 = vld [vmem:[%s14021_s27 + $0x180] sm:$0xff] }
  0x28   : > { %728 = vperm.xlu1 %13535, %v527_v5   ;;  %722 = vperm.xlu0 %13534, %v525_v6   ;;  %v543_v23 = vld [vmem:[%s14021_s27 + $0x198] sm:$0xff]  ;;  %v542_v24 = vld [vmem:[%s14021_s27 + $0x190] sm:$0xff]  ;;  %v545_v25 = vld [vmem:[%s14021_s27 + $0x1a8] sm:$0xff]  ;;  %v18085_v6 = vlaneseq }
  0x29   : > { %v544_v26 = vld [vmem:[%s14021_s27 + $0x1a0] sm:$0xff]  ;;  %v547_v27 = vld [vmem:[%s14021_s27 + $0x1b8] sm:$0xff]  ;;  %v546_v28 = vld [vmem:[%s14021_s27 + $0x1b0] sm:$0xff] }
  0x2a   : > { %13426 = vmatpush3.bf16.msra.mxu1 %v13538_v17  ;;  %12817 = vmatpush3.bf16.msra.mxu0 %v13538_v17  ;;  %v549_v29 = vld [vmem:[%s14021_s27 + $0x1c8] sm:$0xff]  ;;  %v548_v30 = vld [vmem:[%s14021_s27 + $0x1c0] sm:$0xff]  ;;  %v551_v32 = vld [vmem:[%s14021_s27 + $0x1d8] sm:$0xff] }
  0x2b   : > { %13423 = vmatprep.subr.bf16.mxu1 %v13539_v18  ;;  %12818 = vmatprep.subr.bf16.mxu0 %v13539_v18  ;;  %v550_v33 = vld [vmem:[%s14021_s27 + $0x1d0] sm:$0xff]  ;;  %v553_v34 = vld [vmem:[%s14021_s27 + $0x1e8] sm:$0xff]  ;;  %v552_v35 = vld [vmem:[%s14021_s27 + $0x1e0] sm:$0xff] }
  0x2c   : > { %734 = vperm.xlu1 %13535, %v529_v7   ;;  %731 = vperm.xlu0 %13534, %v528_v8   ;;  %v555_v36 = vld [vmem:[%s14021_s27 + $0x1f8] sm:$0xff]  ;;  %v554_v37 = vld [vmem:[%s14021_s27 + $0x1f0] sm:$0xff]  ;;  %v557_v38 = vld [vmem:[%s14072_s21 + $0x8] sm:$0xff] }
  0x2d   : > { %v556_v39 = vld [vmem:[%s14072_s21] sm:$0xff]  ;;  %v559_v40 = vld [vmem:[%s14072_s21 + $0x18] sm:$0xff]  ;;  %v558_v41 = vld [vmem:[%s14072_s21 + $0x10] sm:$0xff] }
  0x2e   : > { %13427 = vmatpush3.bf16.msra.mxu1 %v13539_v18  ;;  %12819 = vmatpush3.bf16.msra.mxu0 %v13539_v18  ;;  %v561_v42 = vld [vmem:[%s14072_s21 + $0x28] sm:$0xff]  ;;  %v560_v43 = vld [vmem:[%s14072_s21 + $0x20] sm:$0xff]  ;;  %v563_v44 = vld [vmem:[%s14072_s21 + $0x38] sm:$0xff] }
  0x2f   : > { %12884 = vmatprep.subr.bf16.mxu1 %v14058_v31  ;;  %v562_v45 = vld [vmem:[%s14072_s21 + $0x30] sm:$0xff]  ;;  %v565_v46 = vld [vmem:[%s14072_s21 + $0x48] sm:$0xff]  ;;  %v564_v47 = vld [vmem:[%s14072_s21 + $0x40] sm:$0xff] }
  0x30   : > { %740 = vperm.xlu1 %13535, %v531_v9   ;;  %737 = vperm.xlu0 %13534, %v530_v10   ;;  %v567_v48 = vld [vmem:[%s14072_s21 + $0x58] sm:$0xff]  ;;  %v566_v49 = vld [vmem:[%s14072_s21 + $0x50] sm:$0xff]  ;;  %v493_v50 = vld [vmem:[%s14021_s27 + $0x8] sm:$0xff]  ;;  %v14109_v9 = vand.u32 127, %v18085_v6 }
  0x31   : > { %v492_v51 = vld [vmem:[%s14021_s27] sm:$0xff]  ;;  %v495_v52 = vld [vmem:[%s14021_s27 + $0x18] sm:$0xff]  ;;  %v494_v53 = vld [vmem:[%s14021_s27 + $0x10] sm:$0xff] }
  0x32   : > { %v569_v54 = vld [vmem:[%s14072_s21 + $0x68] sm:$0xff]  ;;  %v568_v55 = vld [vmem:[%s14072_s21 + $0x60] sm:$0xff]  ;;  %v571_v56 = vld [vmem:[%s14072_s21 + $0x78] sm:$0xff]  ;;  %18105 = vst [vmem:[#allocation6_spill] sm:$0xff] %v14109_v9 }
  0x33   : > { %v570_v57 = vld [vmem:[%s14072_s21 + $0x70] sm:$0xff]  ;;  %v497_v58 = vld [vmem:[%s14021_s27 + $0x28] sm:$0xff]  ;;  %v496_v59 = vld [vmem:[%s14021_s27 + $0x20] sm:$0xff] }
  0x34   : > { %746 = vperm.xlu1 %13535, %v533_v11   ;;  %743 = vperm.xlu0 %13534, %v532_v12   ;;  %v499_v60 = vld [vmem:[%s14021_s27 + $0x38] sm:$0xff]  ;;  %v498_v61 = vld [vmem:[%s14021_s27 + $0x30] sm:$0xff]  ;;  %v573_v62 = vld [vmem:[%s14072_s21 + $0x88] sm:$0xff] }
  0x35   : > { %v572_v63 = vld [vmem:[%s14072_s21 + $0x80] sm:$0xff]  ;;  %v575_v0 = vld [vmem:[%s14072_s21 + $0x98] sm:$0xff]  ;;  %v574_v1 = vld [vmem:[%s14072_s21 + $0x90] sm:$0xff] }
  0x36   : > { %v501_v2 = vld [vmem:[%s14021_s27 + $0x48] sm:$0xff]  ;;  %v500_v3 = vld [vmem:[%s14021_s27 + $0x40] sm:$0xff]  ;;  %v503_v4 = vld [vmem:[%s14021_s27 + $0x58] sm:$0xff] }
  0x37   : > { %v502_v5 = vld [vmem:[%s14021_s27 + $0x50] sm:$0xff]  ;;  %v577_v7 = vld [vmem:[%s14072_s21 + $0xa8] sm:$0xff]  ;;  %v576_v8 = vld [vmem:[%s14072_s21 + $0xa0] sm:$0xff] }
  0x38   : > { %752 = vperm.xlu1 %13535, %v535_v13   ;;  %749 = vperm.xlu0 %13534, %v534_v14   ;;  %v579_v12 = vld [vmem:[%s14072_s21 + $0xb8] sm:$0xff]  ;;  %v578_v13 = vld [vmem:[%s14072_s21 + $0xb0] sm:$0xff] }
  0x3c   : > { %758 = vperm.xlu1 %13535, %v537_v15   ;;  %755 = vperm.xlu0 %13534, %v536_v16   ;;  %v18087_v16 = vmov 0.0  }
  0x40   : > { %764 = vperm.xlu1 %13535, %v539_v19   ;;  %761 = vperm.xlu0 %13534, %v538_v20  }
  0x44   : > { %770 = vperm.xlu1 %13535, %v541_v21   ;;  %767 = vperm.xlu0 %13534, %v540_v22   ;;  %v505_v21 = vld [vmem:[%s14021_s27 + $0x68] sm:$0xff] }
  0x48   : > { %776 = vperm.xlu1 %13535, %v543_v23   ;;  %773 = vperm.xlu0 %13534, %v542_v24   ;;  %v504_v24 = vld [vmem:[%s14021_s27 + $0x60] sm:$0xff] }
  0x4c   : > { %782 = vperm.xlu1 %13535, %v545_v25   ;;  %779 = vperm.xlu0 %13534, %v544_v26  }
  0x50   : > { %788 = vperm.xlu1 %13535, %v547_v27   ;;  %785 = vperm.xlu0 %13534, %v546_v28   ;;  %v13541_v27 = vld [vmem:[%s18073_s3 + $0x8] sm:$0xff]  }
  0x54   : > { %794 = vperm.xlu1 %13535, %v549_v29   ;;  %791 = vperm.xlu0 %13534, %v548_v30   ;;  %v507_v30 = vld [vmem:[%s14021_s27 + $0x78] sm:$0xff] }
  0x58   : > { %800 = vperm.xlu1 %13535, %v551_v32   ;;  %797 = vperm.xlu0 %13534, %v550_v33   ;;  %v506_v33 = vld [vmem:[%s14021_s27 + $0x70] sm:$0xff] }
  0x5c   : > { %806 = vperm.xlu1 %13535, %v553_v34   ;;  %803 = vperm.xlu0 %13534, %v552_v35  }
  0x60   : > { %812 = vperm.xlu1 %13535, %v555_v36   ;;  %809 = vperm.xlu0 %13534, %v554_v37   ;;  %v13542_v36 = vld [vmem:[%s18073_s3 + $0x10] sm:$0xff]  }
  0x64   : > { %1042 = vperm.xlu1 %13535, %v557_v38   ;;  %1039 = vperm.xlu0 %13534, %v556_v39  }
  0x68   : > { %1048 = vperm.xlu1 %13535, %v559_v40   ;;  %1045 = vperm.xlu0 %13534, %v558_v41   ;;  %v580_v40 = vld [vmem:[%s14072_s21 + $0xc0] sm:$0xff] }
  0x6c   : > { %1054 = vperm.xlu1 %13535, %v561_v42   ;;  %1051 = vperm.xlu0 %13534, %v560_v43   ;;  %v13543_v43 = vld [vmem:[%s18073_s3 + $0x18] sm:$0xff]  }
  0x70   : > { %1060 = vperm.xlu1 %13535, %v563_v44   ;;  %1057 = vperm.xlu0 %13534, %v562_v45  }
  0x74   : > { %1066 = vperm.xlu1 %13535, %v565_v46   ;;  %1063 = vperm.xlu0 %13534, %v564_v47   ;;  %v583_v46 = vld [vmem:[%s14072_s21 + $0xd8] sm:$0xff] }
  0x78   : > { %1072 = vperm.xlu1 %13535, %v567_v48   ;;  %1069 = vperm.xlu0 %13534, %v566_v49   ;;  %v582_v48 = vld [vmem:[%s14072_s21 + $0xd0] sm:$0xff] }
  0x7c   : > { %626 = vperm.xlu1 %13535, %v493_v50   ;;  %623 = vperm.xlu0 %13534, %v492_v51   ;;  %v13544_v51 = vld [vmem:[%s18073_s3 + $0x20] sm:$0xff]  }
  0x80   : > { %632 = vperm.xlu1 %13535, %v495_v52   ;;  %629 = vperm.xlu0 %13534, %v494_v53  }
  0x84   : > { %1078 = vperm.xlu1 %13535, %v569_v54   ;;  %1075 = vperm.xlu0 %13534, %v568_v55   ;;  %v509_v54 = vld [vmem:[%s14021_s27 + $0x88] sm:$0xff] }
  0x88   : > { %1084 = vperm.xlu1 %13535, %v571_v56   ;;  %1081 = vperm.xlu0 %13534, %v570_v57   ;;  %v508_v56 = vld [vmem:[%s14021_s27 + $0x80] sm:$0xff] }
  0x8c   : > { %638 = vperm.xlu1 %13535, %v497_v58   ;;  %635 = vperm.xlu0 %13534, %v496_v59   ;;  %v13545_v59 = vld [vmem:[%s18073_s3 + $0x28] sm:$0xff]  }
  0x90   : > { %644 = vperm.xlu1 %13535, %v499_v60   ;;  %641 = vperm.xlu0 %13534, %v498_v61  }
  0x94   : > { %1090 = vperm.xlu1 %13535, %v573_v62   ;;  %1087 = vperm.xlu0 %13534, %v572_v63   ;;  %v511_v62 = vld [vmem:[%s14021_s27 + $0x98] sm:$0xff] }
  0x98   : > { %1096 = vperm.xlu1 %13535, %v575_v0   ;;  %1093 = vperm.xlu0 %13534, %v574_v1   ;;  %v510_v0 = vld [vmem:[%s14021_s27 + $0x90] sm:$0xff] }
  0x9c   : > { %650 = vperm.xlu1 %13535, %v501_v2   ;;  %647 = vperm.xlu0 %13534, %v500_v3  }
  0xa0   : > { %656 = vperm.xlu1 %13535, %v503_v4   ;;  %653 = vperm.xlu0 %13534, %v502_v5   ;;  %v585_v5 = vld [vmem:[%s14072_s21 + $0xe8] sm:$0xff] }
  0xa3   : > { %v726_v10 = vpop.permute.xlu1 %725  ;;  %v720_v11 = vpop.permute.xlu0 %719 }
  0xa4   : > { %1102 = vperm.xlu1 %13535, %v577_v7   ;;  %1099 = vperm.xlu0 %13534, %v576_v8   ;;  %vm848_vm0 = vcmp.eq.s32.totalorder %v726_v10, %v14109_v9  ;;  %vm846_vm1 = vcmp.eq.s32.totalorder %v720_v11, %v14109_v9  ;;  %v584_v8 = vld [vmem:[%s14072_s21 + $0xe0] sm:$0xff] }
  0xa5   : > { %v11958_v17 = vsel %vm848_vm0, 1.0, %v18087_v16  ;;  %v11956_v19 = vsel %vm846_vm1, 1.0, %v18087_v16 }
  0xa7   : > { %v729_v14 = vpop.permute.xlu1 %728  ;;  %v723_v15 = vpop.permute.xlu0 %722 }
  0xa8   : > { %vm849_vm2 = vcmp.eq.s32.totalorder %v729_v14, %v14109_v9  ;;  %vm847_vm3 = vcmp.eq.s32.totalorder %v723_v15, %v14109_v9  ;;  %1108 = vperm.xlu1 %13535, %v579_v12   ;;  %1105 = vperm.xlu0 %13534, %v578_v13   ;;  %v14208_v12 = vld [vmem:[%s18074_s4] sm:$0xff]   ;;  %v587_v15 = vld [vmem:[%s14072_s21 + $0xf8] sm:$0xff] }
  0xa9   : > { %v11959_v18 = vsel %vm849_vm2, 1.0, %v18087_v16  ;;  %v11957_v20 = vsel %vm847_vm3, 1.0, %v18087_v16  ;;  %12960 = vmatprep.subr.bf16.mxu0 %v14208_v12 }
  0xaa   : > { %v14122_v22 = vpack.c.bf16 %v11959_v18, %v11958_v17  ;;  %v14124_v23 = vpack.c.bf16 %v11957_v20, %v11956_v19  ;;  %v586_v18 = vld [vmem:[%s14072_s21 + $0xf0] sm:$0xff] }
  0xab   : > { %v735_v25 = vpop.permute.xlu1 %734  ;;  %v732_v26 = vpop.permute.xlu0 %731 }
  0xac   : > { %vm851_vm5 = vcmp.eq.s32.totalorder %v735_v25, %v14109_v9  ;;  %vm850_vm6 = vcmp.eq.s32.totalorder %v732_v26, %v14109_v9  ;;  %12852 = vmatprep.mubr.msk.bf16.mxu1 %vm1486_vm4, %v14124_v23  ;;  %662 = vperm.xlu1 %13535, %v505_v21   ;;  %v513_v25 = vld [vmem:[%s14021_s27 + $0xa8] sm:$0xff] }
  0xad   : > { %v11961_v28 = vsel %vm851_vm5, 1.0, %v18087_v16  ;;  %v11960_v29 = vsel %vm850_vm6, 1.0, %v18087_v16  ;;  %659 = vperm.xlu0 %13534, %v504_v24   ;;  %12853 = vmatmul.mubr.msk.bf16.vlgmr.msra.gmra.mrb[0].mxu1 %vm1486_vm4, %v14122_v22 }
  0xae   : > { %v14139_v32 = vpack.c.bf16 %v11961_v28, %v11960_v29  ;;  %12885 = vmatpush3.bf16.msra.mxu1 %v14058_v31  ;;  %v581_v31 = vld [vmem:[%s14072_s21 + $0xc8] sm:$0xff] }
  0xaf   : > { %v741_v34 = vpop.permute.xlu1 %740  ;;  %v738_v35 = vpop.permute.xlu0 %737  ;;  %12886 = vmatprep.subr.bf16.mxu1 %v13541_v27 }
  0xb0   : > { %vm853_vm7 = vcmp.eq.s32.totalorder %v741_v34, %v14109_v9  ;;  %vm852_vm8 = vcmp.eq.s32.totalorder %v738_v35, %v14109_v9  ;;  %12856 = vmatprep.mubr.msk.bf16.mxu1 %vm1486_vm4, %v14139_v32  ;;  %668 = vperm.xlu1 %13535, %v507_v30   ;;  %v515_v34 = vld [vmem:[%s14021_s27 + $0xb8] sm:$0xff] }
  0xb1   : > { %v11963_v37 = vsel %vm853_vm7, 1.0, %v18087_v16  ;;  %v11962_v38 = vsel %vm852_vm8, 1.0, %v18087_v16  ;;  %665 = vperm.xlu0 %13534, %v506_v33  }
  0xb2   : > { %v14153_v39 = vpack.c.bf16 %v11963_v37, %v11962_v38  ;;  %12887 = vmatpush3.bf16.msra.mxu1 %v13541_v27  ;;  %v512_v27 = vld [vmem:[%s14021_s27 + $0xa0] sm:$0xff] }
  0xb3   : > { %v747_v41 = vpop.permute.xlu1 %746  ;;  %v744_v42 = vpop.permute.xlu0 %743  ;;  %12888 = vmatprep.subr.bf16.mxu1 %v13542_v36 }
  0xb4   : > { %vm855_vm9 = vcmp.eq.s32.totalorder %v747_v41, %v14109_v9  ;;  %vm854_vm10 = vcmp.eq.s32.totalorder %v744_v42, %v14109_v9  ;;  %1114 = vperm.xlu1 %13535, %v581_v31   ;;  %v589_v41 = vld [vmem:[%s14072_s21 + $0x108] sm:$0xff] }
  0xb5   : > { %v11965_v44 = vsel %vm855_vm9, 1.0, %v18087_v16  ;;  %v11964_v45 = vsel %vm854_vm10, 1.0, %v18087_v16  ;;  %1111 = vperm.xlu0 %13534, %v580_v40   ;;  %12857 = vmatmul.mubr.msk.bf16.gmra.mrb[4].mxu1 %vm1486_vm4, %v14153_v39 }
  0xb6   : > { %v14166_v47 = vpack.c.bf16 %v11965_v44, %v11964_v45  ;;  %12889 = vmatpush3.bf16.msra.mxu1 %v13542_v36  ;;  %v514_v36 = vld [vmem:[%s14021_s27 + $0xb0] sm:$0xff] }
  0xb7   : > { %v753_v49 = vpop.permute.xlu1 %752  ;;  %v750_v50 = vpop.permute.xlu0 %749  ;;  %12890 = vmatprep.subr.bf16.mxu1 %v13543_v43 }
  0xb8   : > { %vm857_vm11 = vcmp.eq.s32.totalorder %v753_v49, %v14109_v9  ;;  %vm856_vm12 = vcmp.eq.s32.totalorder %v750_v50, %v14109_v9  ;;  %12860 = vmatprep.mubr.msk.bf16.mxu1 %vm1486_vm4, %v14166_v47  ;;  %1120 = vperm.xlu1 %13535, %v583_v46   ;;  %v591_v49 = vld [vmem:[%s14072_s21 + $0x118] sm:$0xff] }
  0xb9   : > { %v11967_v52 = vsel %vm857_vm11, 1.0, %v18087_v16  ;;  %v11966_v53 = vsel %vm856_vm12, 1.0, %v18087_v16  ;;  %1117 = vperm.xlu0 %13534, %v582_v48  }
  0xba   : > { %v14179_v55 = vpack.c.bf16 %v11967_v52, %v11966_v53  ;;  %12891 = vmatpush3.bf16.msra.mxu1 %v13543_v43  ;;  %v588_v43 = vld [vmem:[%s14072_s21 + $0x100] sm:$0xff] }
  0xbb   : > { %v759_v57 = vpop.permute.xlu1 %758  ;;  %v756_v58 = vpop.permute.xlu0 %755  ;;  %12892 = vmatprep.subr.bf16.mxu1 %v13544_v51 }
  0xbc   : > { %vm859_vm13 = vcmp.eq.s32.totalorder %v759_v57, %v14109_v9  ;;  %vm858_vm14 = vcmp.eq.s32.totalorder %v756_v58, %v14109_v9  ;;  %674 = vperm.xlu1 %13535, %v509_v54   ;;  %v517_v57 = vld [vmem:[%s14021_s27 + $0xc8] sm:$0xff] }
  0xbd   : > { %v11969_v60 = vsel %vm859_vm13, 1.0, %v18087_v16  ;;  %v11968_v61 = vsel %vm858_vm14, 1.0, %v18087_v16  ;;  %671 = vperm.xlu0 %13534, %v508_v56   ;;  %12861 = vmatmul.mubr.msk.bf16.gmra.mrb[8].mxu1 %vm1486_vm4, %v14179_v55 }
  0xbe   : > { %v14192_v63 = vpack.c.bf16 %v11969_v60, %v11968_v61  ;;  %12893 = vmatpush3.bf16.msra.mxu1 %v13544_v51  ;;  %v590_v51 = vld [vmem:[%s14072_s21 + $0x110] sm:$0xff] }
  0xbf   : > { %v765_v1 = vpop.permute.xlu1 %764  ;;  %v762_v2 = vpop.permute.xlu0 %761  ;;  %12894 = vmatprep.subr.bf16.mxu1 %v13545_v59 }
  0xc0   : > { %vm861_vm15 = vcmp.eq.s32.totalorder %v765_v1, %v14109_v9  ;;  %vm860_vm0 = vcmp.eq.s32.totalorder %v762_v2, %v14109_v9  ;;  %12864 = vmatprep.mubr.msk.bf16.mxu1 %vm1486_vm4, %v14192_v63  ;;  %680 = vperm.xlu1 %13535, %v511_v62   ;;  %v519_v1 = vld [vmem:[%s14021_s27 + $0xd8] sm:$0xff] }
  0xc1   : > { %v11971_v3 = vsel %vm861_vm15, 1.0, %v18087_v16  ;;  %v11970_v4 = vsel %vm860_vm0, 1.0, %v18087_v16  ;;  %677 = vperm.xlu0 %13534, %v510_v0  }
  0xc2   : > { %v14202_v7 = vpack.c.bf16 %v11971_v3, %v11970_v4  ;;  %12895 = vmatpush3.bf16.msra.mxu1 %v13545_v59  ;;  %v516_v59 = vld [vmem:[%s14021_s27 + $0xc0] sm:$0xff]  ;;  %v518_v3 = vld [vmem:[%s14021_s27 + $0xd0] sm:$0xff] }
  0xc3   : > { %v771_v10 = vpop.permute.xlu1 %770  ;;  %v768_v11 = vpop.permute.xlu0 %767 }
  0xc4   : > { %vm863_vm1 = vcmp.eq.s32.totalorder %v771_v10, %v14109_v9  ;;  %vm862_vm2 = vcmp.eq.s32.totalorder %v768_v11, %v14109_v9  ;;  %1126 = vperm.xlu1 %13535, %v585_v5   ;;  %v593_v11 = vld [vmem:[%s14072_s21 + $0x128] sm:$0xff] }
  0xc5   : > { %v11973_v13 = vsel %vm863_vm1, 1.0, %v18087_v16  ;;  %v11972_v14 = vsel %vm862_vm2, 1.0, %v18087_v16  ;;  %1123 = vperm.xlu0 %13534, %v584_v8   ;;  %12865 = vmatmul.mubr.msk.bf16.gmra.mrb[12].mxu1 %vm1486_vm4, %v14202_v7 }
  0xc6   : > { %v14217_v17 = vpack.c.bf16 %v11973_v13, %v11972_v14  ;;  %v592_v14 = vld [vmem:[%s14072_s21 + $0x120] sm:$0xff] }
  0xc7   : > { %v777_v19 = vpop.permute.xlu1 %776  ;;  %v774_v20 = vpop.permute.xlu0 %773 }
  0xc8   : > { %vm865_vm3 = vcmp.eq.s32.totalorder %v777_v19, %v14109_v9  ;;  %vm864_vm5 = vcmp.eq.s32.totalorder %v774_v20, %v14109_v9  ;;  %12868 = vmatprep.mubr.msk.bf16.mxu1 %vm1486_vm4, %v14217_v17  ;;  %1132 = vperm.xlu1 %13535, %v587_v15  }
  0xc9   : > { %v11975_v21 = vsel %vm865_vm3, 1.0, %v18087_v16  ;;  %v11974_v24 = vsel %vm864_vm5, 1.0, %v18087_v16  ;;  %1129 = vperm.xlu0 %13534, %v586_v18   ;;  %vm1920_vm5 = vcmask 785408  }
  0xca   : > { %v14228_v26 = vpack.c.bf16 %v11975_v21, %v11974_v24  ;;  %v595_v21 = vld [vmem:[%s14072_s21 + $0x138] sm:$0xff] }
  0xcb   : > { %v783_v28 = vpop.permute.xlu1 %782  ;;  %v780_v29 = vpop.permute.xlu0 %779 }
  0xcc   : > { %vm867_vm6 = vcmp.eq.s32.totalorder %v783_v28, %v14109_v9  ;;  %vm866_vm7 = vcmp.eq.s32.totalorder %v780_v29, %v14109_v9  ;;  %686 = vperm.xlu1 %13535, %v513_v25   ;;  %v594_v25 = vld [vmem:[%s14072_s21 + $0x130] sm:$0xff] }
  0xcd   : > { %v11977_v30 = vsel %vm867_vm6, 1.0, %v18087_v16  ;;  %v11976_v33 = vsel %vm866_vm7, 1.0, %v18087_v16  ;;  %683 = vperm.xlu0 %13534, %v512_v27   ;;  %12869 = vmatmul.mubr.msk.bf16.gmra.mrb[16].mxu1 %vm1486_vm4, %v14228_v26 }
  0xce   : > { %v14238_v35 = vpack.c.bf16 %v11977_v30, %v11976_v33  ;;  %v521_v33 = vld [vmem:[%s14021_s27 + $0xe8] sm:$0xff] }
  0xcf   : > { %v789_v37 = vpop.permute.xlu1 %788  ;;  %v786_v38 = vpop.permute.xlu0 %785 }
  0xd0   : > { %vm869_vm8 = vcmp.eq.s32.totalorder %v789_v37, %v14109_v9  ;;  %vm868_vm9 = vcmp.eq.s32.totalorder %v786_v38, %v14109_v9  ;;  %12872 = vmatprep.mubr.msk.bf16.mxu1 %vm1486_vm4, %v14238_v35  ;;  %692 = vperm.xlu1 %13535, %v515_v34  }
  0xd1   : > { %v11979_v31 = vsel %vm869_vm8, 1.0, %v18087_v16  ;;  %v11978_v40 = vsel %vm868_vm9, 1.0, %v18087_v16  ;;  %689 = vperm.xlu0 %13534, %v514_v36   ;;  %v520_v36 = vld [vmem:[%s14021_s27 + $0xe0] sm:$0xff] }
  0xd2   : > { %v14248_v42 = vpack.c.bf16 %v11979_v31, %v11978_v40 }
  0xd3   : > { %v795_v44 = vpop.permute.xlu1 %794  ;;  %v792_v45 = vpop.permute.xlu0 %791 }
  0xd4   : > { %vm871_vm10 = vcmp.eq.s32.totalorder %v795_v44, %v14109_v9  ;;  %vm870_vm11 = vcmp.eq.s32.totalorder %v792_v45, %v14109_v9  ;;  %1138 = vperm.xlu1 %13535, %v589_v41   ;;  %v523_v41 = vld [vmem:[%s14021_s27 + $0xf8] sm:$0xff]  ;;  %v522_v44 = vld [vmem:[%s14021_s27 + $0xf0] sm:$0xff]  ;;  %s5563_s27 = sld [smem:[#allocation2]] }
  0xd5   : > { %v11981_v46 = vsel %vm871_vm10, 1.0, %v18087_v16  ;;  %v11980_v48 = vsel %vm870_vm11, 1.0, %v18087_v16  ;;  %1135 = vperm.xlu0 %13534, %v588_v43   ;;  %12873 = vmatmul.mubr.msk.bf16.gmra.mrb[20].mxu1 %vm1486_vm4, %v14248_v42 }
  0xd6   : > { %v14258_v50 = vpack.c.bf16 %v11981_v46, %v11980_v48 }
  0xd7   : > { %v801_v52 = vpop.permute.xlu1 %800  ;;  %v798_v53 = vpop.permute.xlu0 %797 }
  0xd8   : > { %vm873_vm12 = vcmp.eq.s32.totalorder %v801_v52, %v14109_v9  ;;  %vm872_vm13 = vcmp.eq.s32.totalorder %v798_v53, %v14109_v9  ;;  %12876 = vmatprep.mubr.msk.bf16.mxu1 %vm1486_vm4, %v14258_v50  ;;  %1144 = vperm.xlu1 %13535, %v591_v49   ;;  %v596_v53 = vld [vmem:[%s14072_s21 + $0x140] sm:$0xff] }
  0xd9   : > { %v11983_v54 = vsel %vm873_vm12, 1.0, %v18087_v16  ;;  %v11982_v56 = vsel %vm872_vm13, 1.0, %v18087_v16  ;;  %1141 = vperm.xlu0 %13534, %v590_v51   ;;  %v597_v51 = vld [vmem:[%s14072_s21 + $0x148] sm:$0xff] }
  0xda   : > { %v14268_v58 = vpack.c.bf16 %v11983_v54, %v11982_v56 }
  0xdb   : > { %v807_v60 = vpop.permute.xlu1 %806  ;;  %v804_v61 = vpop.permute.xlu0 %803 }
  0xdc   : > { %vm875_vm14 = vcmp.eq.s32.totalorder %v807_v60, %v14109_v9  ;;  %vm874_vm15 = vcmp.eq.s32.totalorder %v804_v61, %v14109_v9  ;;  %698 = vperm.xlu1 %13535, %v517_v57   ;;  %v599_v60 = vld [vmem:[%s14072_s21 + $0x158] sm:$0xff] }
  0xdd   : > { %v11985_v62 = vsel %vm875_vm14, 1.0, %v18087_v16  ;;  %v11984_v0 = vsel %vm874_vm15, 1.0, %v18087_v16  ;;  %695 = vperm.xlu0 %13534, %v516_v59   ;;  %12877 = vmatmul.mubr.msk.bf16.gmra.mrb[24].mxu1 %vm1486_vm4, %v14268_v58 }
  0xde   : > { %v14278_v2 = vpack.c.bf16 %v11985_v62, %v11984_v0  ;;  %v598_v62 = vld [vmem:[%s14072_s21 + $0x150] sm:$0xff] }
  0xdf   : > { %v813_v4 = vpop.permute.xlu1 %812  ;;  %v810_v5 = vpop.permute.xlu0 %809 }
  0xe0   : > { %vm877_vm0 = vcmp.eq.s32.totalorder %v813_v4, %v14109_v9  ;;  %vm876_vm1 = vcmp.eq.s32.totalorder %v810_v5, %v14109_v9  ;;  %12880 = vmatprep.mubr.msk.bf16.mxu1 %vm1486_vm4, %v14278_v2  ;;  %704 = vperm.xlu1 %13535, %v519_v1   ;;  %v601_v5 = vld [vmem:[%s14072_s21 + $0x168] sm:$0xff] }
  0xe1   : > { %v11987_v8 = vsel %vm877_vm0, 1.0, %v18087_v16  ;;  %v11986_v10 = vsel %vm876_vm1, 1.0, %v18087_v16  ;;  %701 = vperm.xlu0 %13534, %v518_v3  }
  0xe2   : > { %v14288_v13 = vpack.c.bf16 %v11987_v8, %v11986_v10  ;;  %v600_v10 = vld [vmem:[%s14072_s21 + $0x160] sm:$0xff] }
  0xe3   : > { %v1043_v15 = vpop.permute.xlu1 %1042  ;;  %v1040_v18 = vpop.permute.xlu0 %1039 }
  0xe4   : > { %vm1231_vm2 = vcmp.eq.s32.totalorder %v1043_v15, %v14109_v9  ;;  %vm1230_vm3 = vcmp.eq.s32.totalorder %v1040_v18, %v14109_v9  ;;  %1150 = vperm.xlu1 %13535, %v593_v11   ;;  %v603_v15 = vld [vmem:[%s14072_s21 + $0x178] sm:$0xff] }
  0xe5   : > { %v11989_v19 = vsel %vm1231_vm2, 1.0, %v18087_v16  ;;  %v11988_v20 = vsel %vm1230_vm3, 1.0, %v18087_v16  ;;  %1147 = vperm.xlu0 %13534, %v592_v14   ;;  %12881 = vmatmul.mubr.msk.bf16.gmra.mrb[28].mxu1 %vm1486_vm4, %v14288_v13 }
  0xe6   : > { %v14298_v24 = vpack.c.bf16 %v11989_v19, %v11988_v20  ;;  %v602_v20 = vld [vmem:[%s14072_s21 + $0x170] sm:$0xff] }
  0xe7   : > { %v1049_v27 = vpop.permute.xlu1 %1048  ;;  %v1046_v28 = vpop.permute.xlu0 %1045 }
  0xe8   : > { %vm1233_vm6 = vcmp.eq.s32.totalorder %v1049_v27, %v14109_v9  ;;  %vm1232_vm7 = vcmp.eq.s32.totalorder %v1046_v28, %v14109_v9  ;;  %12896 = vmatprep.mubr.msk.bf16.mxu1 %vm1920_vm5, %v14298_v24  ;;  %1156 = vperm.xlu1 %13535, %v595_v21  }
  0xe9   : > { %v11991_v29 = vsel %vm1233_vm6, 1.0, %v18087_v16  ;;  %v11990_v30 = vsel %vm1232_vm7, 1.0, %v18087_v16  ;;  %1153 = vperm.xlu0 %13534, %v594_v25  }
  0xea   : > { %v14308_v34 = vpack.c.bf16 %v11991_v29, %v11990_v30  ;;  %v605_v30 = vld [vmem:[%s14072_s21 + $0x188] sm:$0xff] }
  0xeb   : > { %v1055_v37 = vpop.permute.xlu1 %1054  ;;  %v1052_v38 = vpop.permute.xlu0 %1051 }
  0xec   : > { %vm1235_vm8 = vcmp.eq.s32.totalorder %v1055_v37, %v14109_v9  ;;  %vm1234_vm9 = vcmp.eq.s32.totalorder %v1052_v38, %v14109_v9  ;;  %710 = vperm.xlu1 %13535, %v521_v33   ;;  %v13547_v37 = vld [vmem:[%s18074_s4 + $0x8] sm:$0xff]  }
  0xed   : > { %v11993_v31 = vsel %vm1235_vm8, 1.0, %v18087_v16  ;;  %v11992_v40 = vsel %vm1234_vm9, 1.0, %v18087_v16  ;;  %707 = vperm.xlu0 %13534, %v520_v36   ;;  %12897 = vmatmul.mubr.msk.bf16.vlgmr.msra.gmra.mrb[32].mxu1 %vm1920_vm5, %v14308_v34  ;;  %v604_v36 = vld [vmem:[%s14072_s21 + $0x180] sm:$0xff] }
  0xee   : > { %v14318_v43 = vpack.c.bf16 %v11993_v31, %v11992_v40 }
  0xef   : > { %v1061_v45 = vpop.permute.xlu1 %1060  ;;  %v1058_v46 = vpop.permute.xlu0 %1057 }
  0xf0   : > { %vm1237_vm10 = vcmp.eq.s32.totalorder %v1061_v45, %v14109_v9  ;;  %vm1236_vm11 = vcmp.eq.s32.totalorder %v1058_v46, %v14109_v9  ;;  %12900 = vmatprep.mubr.msk.bf16.mxu1 %vm1920_vm5, %v14318_v43  ;;  %716 = vperm.xlu1 %13535, %v523_v41   ;;  %v606_v46 = vld [vmem:[%s14072_s21 + $0x190] sm:$0xff] }
  0xf1   : > { %v11995_v48 = vsel %vm1237_vm10, 1.0, %v18087_v16  ;;  %v11994_v49 = vsel %vm1236_vm11, 1.0, %v18087_v16  ;;  %713 = vperm.xlu0 %13534, %v522_v44   ;;  %v607_v44 = vld [vmem:[%s14072_s21 + $0x198] sm:$0xff] }
  0xf2   : > { %v14328_v52 = vpack.c.bf16 %v11995_v48, %v11994_v49  ;;  %v13548_v48 = vld [vmem:[%s18074_s4 + $0x10] sm:$0xff]  }
  0xf3   : > { %v1067_v54 = vpop.permute.xlu1 %1066  ;;  %v1064_v56 = vpop.permute.xlu0 %1063 }
  0xf4   : > { %vm1239_vm12 = vcmp.eq.s32.totalorder %v1067_v54, %v14109_v9  ;;  %vm1238_vm13 = vcmp.eq.s32.totalorder %v1064_v56, %v14109_v9  ;;  %1162 = vperm.xlu1 %13535, %v597_v51   ;;  %v609_v54 = vld [vmem:[%s14072_s21 + $0x1a8] sm:$0xff] }
  0xf5   : > { %v11997_v57 = vsel %vm1239_vm12, 1.0, %v18087_v16  ;;  %v11996_v59 = vsel %vm1238_vm13, 1.0, %v18087_v16  ;;  %1159 = vperm.xlu0 %13534, %v596_v53   ;;  %12901 = vmatmul.mubr.msk.bf16.gmra.mrb[36].mxu1 %vm1920_vm5, %v14328_v52 }
  0xf6   : > { %v14338_v61 = vpack.c.bf16 %v11997_v57, %v11996_v59  ;;  %v608_v57 = vld [vmem:[%s14072_s21 + $0x1a0] sm:$0xff]  ;;  %v13549_v59 = vld [vmem:[%s18074_s4 + $0x18] sm:$0xff]  }
  0xf7   : > { %v1073_v0 = vpop.permute.xlu1 %1072  ;;  %v1070_v1 = vpop.permute.xlu0 %1069 }
  0xf8   : > { %vm1241_vm14 = vcmp.eq.s32.totalorder %v1073_v0, %v14109_v9  ;;  %vm1240_vm15 = vcmp.eq.s32.totalorder %v1070_v1, %v14109_v9  ;;  %12904 = vmatprep.mubr.msk.bf16.mxu1 %vm1920_vm5, %v14338_v61  ;;  %1168 = vperm.xlu1 %13535, %v599_v60   ;;  %v3030_v0 = vld [vmem:[%s18077_s7] sm:$0xff]  ;;  %v3031_v1 = vld [vmem:[%s18077_s7 + $0x8] sm:$0xff] }
  0xf9   : > { %v11999_v3 = vsel %vm1241_vm14, 1.0, %v18087_v16  ;;  %v11998_v4 = vsel %vm1240_vm15, 1.0, %v18087_v16  ;;  %1165 = vperm.xlu0 %13534, %v598_v62  }
  0xfa   : > { %v14348_v8 = vpack.c.bf16 %v11999_v3, %v11998_v4 }
  0xfb   : > { %v627_v11 = vpop.permute.xlu1 %626  ;;  %v624_v14 = vpop.permute.xlu0 %623 }
  0xfc   : > { %vm815_vm0 = vcmp.eq.s32.totalorder %v627_v11, %v14109_v9  ;;  %vm814_vm1 = vcmp.eq.s32.totalorder %v624_v14, %v14109_v9  ;;  %1174 = vperm.xlu1 %13535, %v601_v5   ;;  %v611_v5 = vld [vmem:[%s14072_s21 + $0x1b8] sm:$0xff]  ;;  %v610_v11 = vld [vmem:[%s14072_s21 + $0x1b0] sm:$0xff]  ;;  %v14417_v14 = vpack.c.bf16 %v3031_v1, %v3030_v0 }
  0xfd   : > { %1171 = vperm.xlu0 %13534, %v600_v10   ;;  %12905 = vmatmul.mubr.msk.bf16.gmra.mrb[40].mxu1 %vm1920_vm5, %v14348_v8  ;;  %v11924_v18 = vsel %vm814_vm1, 1.0, %v18087_v16  ;;  %v11925_v19 = vsel %vm815_vm0, 1.0, %v18087_v16  ;;  %v619_v1 = vld [vmem:[%s14072_s21 + $0x1f8] sm:$0xff] }
  0xfe   : > { %v14359_v21 = vpack.c.bf16 %v11925_v19, %v11924_v18 }
  0xff   : > { %v633_v25 = vpop.permute.xlu1 %632  ;;  %v630_v27 = vpop.permute.xlu0 %629 }
 0x100   : > { %vm817_vm2 = vcmp.eq.s32.totalorder %v633_v25, %v14109_v9  ;;  %vm816_vm3 = vcmp.eq.s32.totalorder %v630_v27, %v14109_v9  ;;  %1180 = vperm.xlu1 %13535, %v603_v15   ;;  %12820 = vmatprep.mubr.msk.bf16.mxu0 %vm1486_vm4, %v14359_v21  ;;  %v613_v25 = vld [vmem:[%s14072_s21 + $0x1c8] sm:$0xff] }
 0x101   : > { %v11927_v28 = vsel %vm817_vm2, 1.0, %v18087_v16  ;;  %v11926_v29 = vsel %vm816_vm3, 1.0, %v18087_v16  ;;  %1177 = vperm.xlu0 %13534, %v602_v20  }
 0x102   : > { %v14368_v33 = vpack.c.bf16 %v11927_v28, %v11926_v29  ;;  %v612_v28 = vld [vmem:[%s14072_s21 + $0x1c0] sm:$0xff] }
 0x103   : > { %v1079_v38 = vpop.permute.xlu1 %1078  ;;  %v1076_v31 = vpop.permute.xlu0 %1075 }
 0x104   : > { %vm1243_vm6 = vcmp.eq.s32.totalorder %v1079_v38, %v14109_v9  ;;  %vm1242_vm7 = vcmp.eq.s32.totalorder %v1076_v31, %v14109_v9  ;;  %1186 = vperm.xlu1 %13535, %v605_v30   ;;  %12821 = vmatmul.mubr.msk.bf16.vlgmr.msra.gmra.mrb[0].mxu0 %vm1486_vm4, %v14368_v33  ;;  %v615_v31 = vld [vmem:[%s14072_s21 + $0x1d8] sm:$0xff] }
 0x105   : > { %v12001_v40 = vsel %vm1243_vm6, 1.0, %v18087_v16  ;;  %v12000_v41 = vsel %vm1242_vm7, 1.0, %v18087_v16  ;;  %1183 = vperm.xlu0 %13534, %v604_v36   ;;  %12961 = vmatpush3.bf16.msra.mxu0 %v14208_v12  ;;  %v13550_v36 = vld [vmem:[%s18075_s5] sm:$0xff]  }
 0x106   : > { %v14382_v45 = vpack.c.bf16 %v12001_v40, %v12000_v41  ;;  %12962 = vmatprep.subr.bf16.mxu0 %v13547_v37  ;;  %13032 = vmatprep.subr.bf16.mxu1 %v13550_v36  ;;  %v614_v41 = vld [vmem:[%s14072_s21 + $0x1d0] sm:$0xff] }
 0x107   : > { %v1085_v49 = vpop.permute.xlu1 %1084  ;;  %v1082_v51 = vpop.permute.xlu0 %1081  ;;  %13033 = vmatpush3.bf16.msra.mxu1 %v13550_v36 }
 0x108   : > { %vm1245_vm8 = vcmp.eq.s32.totalorder %v1085_v49, %v14109_v9  ;;  %vm1244_vm9 = vcmp.eq.s32.totalorder %v1082_v51, %v14109_v9  ;;  %1192 = vperm.xlu1 %13535, %v607_v44   ;;  %12908 = vmatprep.mubr.msk.bf16.mxu1 %vm1920_vm5, %v14382_v45 }
 0x109   : > { %v12003_v12 = vsel %vm1245_vm8, 1.0, %v18087_v16  ;;  %v12002_v53 = vsel %vm1244_vm9, 1.0, %v18087_v16  ;;  %1189 = vperm.xlu0 %13534, %v606_v46   ;;  %12963 = vmatpush3.bf16.msra.mxu0 %v13547_v37 }
 0x10a   : > { %v14395_v56 = vpack.c.bf16 %v12003_v12, %v12002_v53  ;;  %12964 = vmatprep.subr.bf16.mxu0 %v13548_v48  ;;  %v617_v12 = vld [vmem:[%s14072_s21 + $0x1e8] sm:$0xff] }
 0x10b   : > { %v639_v60 = vpop.permute.xlu1 %638  ;;  %v636_v62 = vpop.permute.xlu0 %635 }
 0x10c   : > { %vm819_vm10 = vcmp.eq.s32.totalorder %v639_v60, %v14109_v9  ;;  %vm818_vm11 = vcmp.eq.s32.totalorder %v636_v62, %v14109_v9  ;;  %1198 = vperm.xlu1 %13535, %v609_v54   ;;  %12909 = vmatmul.mubr.msk.bf16.gmra.mrb[44].mxu1 %vm1920_vm5, %v14395_v56  ;;  %v616_v54 = vld [vmem:[%s14072_s21 + $0x1e0] sm:$0xff]  ;;  %v13552_v60 = vld [vmem:[%s18075_s5 + $0x10] sm:$0xff]  }
 0x10d   : > { %v11929_v3 = vsel %vm819_vm10, 1.0, %v18087_v16  ;;  %v11928_v4 = vsel %vm818_vm11, 1.0, %v18087_v16  ;;  %1195 = vperm.xlu0 %13534, %v608_v57   ;;  %12965 = vmatpush3.bf16.msra.mxu0 %v13548_v48  ;;  %v13551_v48 = vld [vmem:[%s18075_s5 + $0x8] sm:$0xff]  }
 0x10e   : > { %v14414_v10 = vpack.c.bf16 %v11929_v3, %v11928_v4  ;;  %12966 = vmatprep.subr.bf16.mxu0 %v13549_v59  ;;  %13034 = vmatprep.subr.bf16.mxu1 %v13551_v48  ;;  %v618_v4 = vld [vmem:[%s14072_s21 + $0x1f0] sm:$0xff]  ;;  %s11844_s21 = sshll.u32 %s478_s22, 4  ;;  %s18030_s21 = int_to_ptr.vmem [resolvable:$true] %s11844_s21 }
 0x10f   : > { %v645_v15 = vpop.permute.xlu1 %644  ;;  %v642_v18 = vpop.permute.xlu0 %641  ;;  %13035 = vmatpush3.bf16.msra.mxu1 %v13551_v48  ;;  %s13812_s0 = scalar_lea.vmem %s18030_s21, 64  ;;  %p13819_p0 = scmp.lt.s32.totalorder %s18030_s21, %s13817_s1 }
 0x110   : > { %vm821_vm12 = vcmp.eq.s32.totalorder %v645_v15, %v14109_v9  ;;  %vm820_vm13 = vcmp.eq.s32.totalorder %v642_v18, %v14109_v9  ;;  %1204 = vperm.xlu1 %13535, %v611_v5   ;;  %12824 = vmatprep.mubr.msk.bf16.mxu0 %vm1486_vm4, %v14414_v10  ;;  %v13553_v15 = vld [vmem:[%s18075_s5 + $0x18] sm:$0xff]   ;;  %p13813_p11 = scmp.ne.s32.totalorder %s18030_s21, %s13812_s0  ;;  %p13820_p1 = scmp.lt.s32.totalorder %s13818_s2, %s13812_s0 }
 0x111   : > { %v11931_v19 = vsel %vm821_vm12, 1.0, %v18087_v16  ;;  %v11930_v20 = vsel %vm820_vm13, 1.0, %v18087_v16  ;;  %1201 = vperm.xlu0 %13534, %v610_v11   ;;  %12967 = vmatpush3.bf16.msra.mxu0 %v13549_v59 }
 0x112   : > { %v14426_v27 = vpack.c.bf16 %v11931_v19, %v11930_v20  ;;  %13409 = vmatprep.subr.bf16.mxu0 %v14417_v14  ;;  %13036 = vmatprep.subr.bf16.mxu1 %v13552_v60  ;;  %p13814_p12 = pnand %p13813_p11, %p13993_p5  ;;  %p13821_p2 = por %p13820_p1, %p13819_p0 }
 0x113   : > { %v1091_v29 = vpop.permute.xlu1 %1090  ;;  %v1088_v30 = vpop.permute.xlu0 %1087  ;;  %13037 = vmatpush3.bf16.msra.mxu1 %v13552_v60 }
 0x114   : > { %vm1247_vm14 = vcmp.eq.s32.totalorder %v1091_v29, %v14109_v9  ;;  %vm1246_vm15 = vcmp.eq.s32.totalorder %v1088_v30, %v14109_v9  ;;  %1210 = vperm.xlu1 %13535, %v613_v25   ;;  %12825 = vmatmul.mubr.msk.bf16.gmra.mrb[4].mxu0 %vm1486_vm4, %v14426_v27  ;;  %v13554_v29 = vld [vmem:[%s18075_s5 + $0x20] sm:$0xff]   ;;  %p13815_p13 = pneg %p13814_p12 }
 0x115   : > { %v12005_v37 = vsel %vm1247_vm14, 1.0, %v18087_v16  ;;  %v12004_v38 = vsel %vm1246_vm15, 1.0, %v18087_v16  ;;  %1207 = vperm.xlu0 %13534, %v612_v28   ;;  %13038 = vmatprep.subr.bf16.mxu1 %v13553_v15 }
 0x116   : > { %v14440_v40 = vpack.c.bf16 %v12005_v37, %v12004_v38  ;;  %p13822_p3 = pnand %p13821_p2, %p13815_p13 }
 0x117   : > { %v1097_v44 = vpop.permute.xlu1 %1096  ;;  %v1094_v46 = vpop.permute.xlu0 %1093  ;;  %13039 = vmatpush3.bf16.msra.mxu1 %v13553_v15 }
 0x118   : > { %vm1249_vm0 = vcmp.eq.s32.totalorder %v1097_v44, %v14109_v9  ;;  %vm1248_vm1 = vcmp.eq.s32.totalorder %v1094_v46, %v14109_v9  ;;  %1216 = vperm.xlu1 %13535, %v615_v31   ;;  %12912 = vmatprep.mubr.msk.bf16.mxu1 %vm1920_vm5, %v14440_v40 }
 0x119   : > { %v12007_v49 = vsel %vm1249_vm0, 1.0, %v18087_v16  ;;  %v12006_v51 = vsel %vm1248_vm1, 1.0, %v18087_v16  ;;  %1213 = vperm.xlu0 %13534, %v614_v41   ;;  %13040 = vmatprep.subr.bf16.mxu1 %v13554_v29  ;;  %v13555_v41 = vld [vmem:[%s18075_s5 + $0x28] sm:$0xff]  }
 0x11a   : > { %v14453_v53 = vpack.c.bf16 %v12007_v49, %v12006_v51 }
 0x11b   : > { %v651_v57 = vpop.permute.xlu1 %650  ;;  %v648_v59 = vpop.permute.xlu0 %647  ;;  %13041 = vmatpush3.bf16.msra.mxu1 %v13554_v29 }
 0x11c   : > { %vm823_vm2 = vcmp.eq.s32.totalorder %v651_v57, %v14109_v9  ;;  %vm822_vm3 = vcmp.eq.s32.totalorder %v648_v59, %v14109_v9  ;;  %1222 = vperm.xlu1 %13535, %v617_v12   ;;  %12913 = vmatmul.mubr.msk.bf16.gmra.mrb[48].mxu1 %vm1920_vm5, %v14453_v53 }
 0x11d   : > { %v11933_v62 = vsel %vm823_vm2, 1.0, %v18087_v16  ;;  %v11932_v0 = vsel %vm822_vm3, 1.0, %v18087_v16  ;;  %1219 = vperm.xlu0 %13534, %v616_v54   ;;  %13042 = vmatprep.subr.bf16.mxu1 %v13555_v41 }
 0x11e   : > { %v14466_v3 = vpack.c.bf16 %v11933_v62, %v11932_v0 }
 0x11f   : > { %v657_v5 = vpop.permute.xlu1 %656  ;;  %v654_v11 = vpop.permute.xlu0 %653  ;;  %13043 = vmatpush3.bf16.msra.mxu1 %v13555_v41 }
 0x120   : > { %vm825_vm6 = vcmp.eq.s32.totalorder %v657_v5, %v14109_v9  ;;  %vm824_vm7 = vcmp.eq.s32.totalorder %v654_v11, %v14109_v9  ;;  %1228 = vperm.xlu1 %13535, %v619_v1   ;;  %12828 = vmatprep.mubr.msk.bf16.mxu0 %vm1486_vm4, %v14466_v3 }
 0x121   : > { %v11935_v18 = vsel %vm825_vm6, 1.0, %v18087_v16  ;;  %v11934_v19 = vsel %vm824_vm7, 1.0, %v18087_v16  ;;  %1225 = vperm.xlu0 %13534, %v618_v4  }
 0x122   : > { %v14478_v20 = vpack.c.bf16 %v11935_v18, %v11934_v19 }
 0x123   : > { %v1103_v25 = vpop.permute.xlu1 %1102  ;;  %v1100_v28 = vpop.permute.xlu0 %1099 }
 0x124   : > { %vm1251_vm8 = vcmp.eq.s32.totalorder %v1103_v25, %v14109_v9  ;;  %vm1250_vm9 = vcmp.eq.s32.totalorder %v1100_v28, %v14109_v9  ;;  %12829 = vmatmul.mubr.msk.bf16.gmra.mrb[8].mxu0 %vm1486_vm4, %v14478_v20 }
 0x125   : > { %v12009_v30 = vsel %vm1251_vm8, 1.0, %v18087_v16  ;;  %v12008_v36 = vsel %vm1250_vm9, 1.0, %v18087_v16 }
 0x126   : > { %v14489_v37 = vpack.c.bf16 %v12009_v30, %v12008_v36 }
 0x127   : > { %v1109_v38 = vpop.permute.xlu1 %1108  ;;  %v1106_v31 = vpop.permute.xlu0 %1105 }
 0x128   : > { %vm1253_vm10 = vcmp.eq.s32.totalorder %v1109_v38, %v14109_v9  ;;  %vm1252_vm11 = vcmp.eq.s32.totalorder %v1106_v31, %v14109_v9  ;;  %12916 = vmatprep.mubr.msk.bf16.mxu1 %vm1920_vm5, %v14489_v37 }
 0x129   : > { %v12011_v44 = vsel %vm1253_vm10, 1.0, %v18087_v16  ;;  %v12010_v46 = vsel %vm1252_vm11, 1.0, %v18087_v16 }
 0x12a   : > { %v14500_v48 = vpack.c.bf16 %v12011_v44, %v12010_v46 }
 0x12b   : > { %v663_v49 = vpop.permute.xlu1 %662 }
 0x12c   : > { %vm827_vm12 = vcmp.eq.s32.totalorder %v663_v49, %v14109_v9  ;;  %v660_v51 = vpop.permute.xlu0 %659  ;;  %12917 = vmatmul.mubr.msk.bf16.gmra.mrb[52].mxu1 %vm1920_vm5, %v14500_v48 }
 0x12d   : > { %v11937_v12 = vsel %vm827_vm12, 1.0, %v18087_v16  ;;  %vm826_vm13 = vcmp.eq.s32.totalorder %v660_v51, %v14109_v9 }
 0x12e   : > { %v11936_v54 = vsel %vm826_vm13, 1.0, %v18087_v16 }
 0x12f   : > { %v14508_v57 = vpack.c.bf16 %v11937_v12, %v11936_v54  ;;  %v669_v59 = vpop.permute.xlu1 %668 }
 0x130   : > { %vm829_vm14 = vcmp.eq.s32.totalorder %v669_v59, %v14109_v9  ;;  %v666_v60 = vpop.permute.xlu0 %665 }
 0x131   : > { %v11939_v62 = vsel %vm829_vm14, 1.0, %v18087_v16  ;;  %vm828_vm15 = vcmp.eq.s32.totalorder %v666_v60, %v14109_v9  ;;  %12832 = vmatprep.mubr.msk.bf16.mxu0 %vm1486_vm4, %v14508_v57 }
 0x132   : > { %v11938_v0 = vsel %vm828_vm15, 1.0, %v18087_v16 }
 0x133   : > { %v14516_v1 = vpack.c.bf16 %v11939_v62, %v11938_v0  ;;  %v1115_v4 = vpop.permute.xlu1 %1114 }
 0x134   : > { %vm1255_vm0 = vcmp.eq.s32.totalorder %v1115_v4, %v14109_v9  ;;  %v1112_v5 = vpop.permute.xlu0 %1111 }
 0x135   : > { %v12013_v11 = vsel %vm1255_vm0, 1.0, %v18087_v16  ;;  %vm1254_vm1 = vcmp.eq.s32.totalorder %v1112_v5, %v14109_v9  ;;  %12833 = vmatmul.mubr.msk.bf16.gmra.mrb[12].mxu0 %vm1486_vm4, %v14516_v1 }
 0x136   : > { %v12012_v15 = vsel %vm1254_vm1, 1.0, %v18087_v16 }
 0x137   : > { %v14524_v18 = vpack.c.bf16 %v12013_v11, %v12012_v15  ;;  %v1121_v19 = vpop.permute.xlu1 %1120 }
 0x138   : > { %vm1257_vm2 = vcmp.eq.s32.totalorder %v1121_v19, %v14109_v9  ;;  %v1118_v25 = vpop.permute.xlu0 %1117 }
 0x139   : > { %v12015_v28 = vsel %vm1257_vm2, 1.0, %v18087_v16  ;;  %vm1256_vm3 = vcmp.eq.s32.totalorder %v1118_v25, %v14109_v9  ;;  %12920 = vmatprep.mubr.msk.bf16.mxu1 %vm1920_vm5, %v14524_v18 }
 0x13a   : > { %v12014_v29 = vsel %vm1256_vm3, 1.0, %v18087_v16 }
 0x13b   : > { %v14532_v30 = vpack.c.bf16 %v12015_v28, %v12014_v29  ;;  %v675_v36 = vpop.permute.xlu1 %674 }
 0x13c   : > { %vm831_vm6 = vcmp.eq.s32.totalorder %v675_v36, %v14109_v9  ;;  %v672_v38 = vpop.permute.xlu0 %671 }
 0x13d   : > { %v11941_v31 = vsel %vm831_vm6, 1.0, %v18087_v16  ;;  %vm830_vm7 = vcmp.eq.s32.totalorder %v672_v38, %v14109_v9  ;;  %12921 = vmatmul.mubr.msk.bf16.gmra.mrb[56].mxu1 %vm1920_vm5, %v14532_v30 }
 0x13e   : > { %v11940_v41 = vsel %vm830_vm7, 1.0, %v18087_v16 }
 0x13f   : > { %v14540_v44 = vpack.c.bf16 %v11941_v31, %v11940_v41  ;;  %v681_v46 = vpop.permute.xlu1 %680 }
 0x140   : > { %vm833_vm8 = vcmp.eq.s32.totalorder %v681_v46, %v14109_v9  ;;  %v678_v49 = vpop.permute.xlu0 %677 }
 0x141   : > { %v11943_v51 = vsel %vm833_vm8, 1.0, %v18087_v16  ;;  %vm832_vm9 = vcmp.eq.s32.totalorder %v678_v49, %v14109_v9  ;;  %12836 = vmatprep.mubr.msk.bf16.mxu0 %vm1486_vm4, %v14540_v44 }
 0x142   : > { %v11942_v12 = vsel %vm832_vm9, 1.0, %v18087_v16 }
 0x143   : > { %v14548_v54 = vpack.c.bf16 %v11943_v51, %v11942_v12  ;;  %v1127_v59 = vpop.permute.xlu1 %1126 }
 0x144   : > { %vm1259_vm10 = vcmp.eq.s32.totalorder %v1127_v59, %v14109_v9  ;;  %v1124_v60 = vpop.permute.xlu0 %1123 }
 0x145   : > { %v12017_v62 = vsel %vm1259_vm10, 1.0, %v18087_v16  ;;  %vm1258_vm11 = vcmp.eq.s32.totalorder %v1124_v60, %v14109_v9  ;;  %12837 = vmatmul.mubr.msk.bf16.gmra.mrb[16].mxu0 %vm1486_vm4, %v14548_v54 }
 0x146   : > { %v12016_v0 = vsel %vm1258_vm11, 1.0, %v18087_v16 }
 0x147   : > { %v14556_v4 = vpack.c.bf16 %v12017_v62, %v12016_v0  ;;  %v1133_v5 = vpop.permute.xlu1 %1132 }
 0x148   : > { %vm1261_vm12 = vcmp.eq.s32.totalorder %v1133_v5, %v14109_v9  ;;  %v1130_v11 = vpop.permute.xlu0 %1129 }
 0x149   : > { %v12019_v15 = vsel %vm1261_vm12, 1.0, %v18087_v16  ;;  %vm1260_vm13 = vcmp.eq.s32.totalorder %v1130_v11, %v14109_v9  ;;  %12924 = vmatprep.mubr.msk.bf16.mxu1 %vm1920_vm5, %v14556_v4 }
 0x14a   : > { %v12018_v19 = vsel %vm1260_vm13, 1.0, %v18087_v16 }
 0x14b   : > { %v14564_v25 = vpack.c.bf16 %v12019_v15, %v12018_v19  ;;  %v687_v28 = vpop.permute.xlu1 %686 }
 0x14c   : > { %vm835_vm14 = vcmp.eq.s32.totalorder %v687_v28, %v14109_v9  ;;  %v684_v29 = vpop.permute.xlu0 %683 }
 0x14d   : > { %v11945_v36 = vsel %vm835_vm14, 1.0, %v18087_v16  ;;  %vm834_vm15 = vcmp.eq.s32.totalorder %v684_v29, %v14109_v9  ;;  %12925 = vmatmul.mubr.msk.bf16.gmra.mrb[60].mxu1 %vm1920_vm5, %v14564_v25 }
 0x14e   : > { %v11944_v38 = vsel %vm834_vm15, 1.0, %v18087_v16 }
 0x14f   : > { %v14572_v31 = vpack.c.bf16 %v11945_v36, %v11944_v38  ;;  %v693_v41 = vpop.permute.xlu1 %692 }
 0x150   : > { %vm837_vm0 = vcmp.eq.s32.totalorder %v693_v41, %v14109_v9  ;;  %v690_v46 = vpop.permute.xlu0 %689 }
 0x151   : > { %v11947_v49 = vsel %vm837_vm0, 1.0, %v18087_v16  ;;  %vm836_vm1 = vcmp.eq.s32.totalorder %v690_v46, %v14109_v9  ;;  %12840 = vmatprep.mubr.msk.bf16.mxu0 %vm1486_vm4, %v14572_v31 }
 0x152   : > { %v11946_v51 = vsel %vm836_vm1, 1.0, %v18087_v16 }
 0x153   : > { %v14580_v12 = vpack.c.bf16 %v11947_v49, %v11946_v51  ;;  %v1139_v59 = vpop.permute.xlu1 %1138 }
 0x154   : > { %vm1263_vm2 = vcmp.eq.s32.totalorder %v1139_v59, %v14109_v9  ;;  %v1136_v60 = vpop.permute.xlu0 %1135 }
 0x155   : > { %v12021_v62 = vsel %vm1263_vm2, 1.0, %v18087_v16  ;;  %vm1262_vm3 = vcmp.eq.s32.totalorder %v1136_v60, %v14109_v9  ;;  %12841 = vmatmul.mubr.msk.bf16.gmra.mrb[20].mxu0 %vm1486_vm4, %v14580_v12 }
 0x156   : > { %v12020_v0 = vsel %vm1262_vm3, 1.0, %v18087_v16 }
 0x157   : > { %v14588_v5 = vpack.c.bf16 %v12021_v62, %v12020_v0  ;;  %v1145_v11 = vpop.permute.xlu1 %1144 }
 0x158   : > { %vm1265_vm6 = vcmp.eq.s32.totalorder %v1145_v11, %v14109_v9  ;;  %v1142_v15 = vpop.permute.xlu0 %1141 }
 0x159   : > { %v12023_v19 = vsel %vm1265_vm6, 1.0, %v18087_v16  ;;  %vm1264_vm7 = vcmp.eq.s32.totalorder %v1142_v15, %v14109_v9  ;;  %12928 = vmatprep.mubr.msk.bf16.mxu1 %vm1920_vm5, %v14588_v5 }
 0x15a   : > { %v12022_v28 = vsel %vm1264_vm7, 1.0, %v18087_v16 }
 0x15b   : > { %v14596_v29 = vpack.c.bf16 %v12023_v19, %v12022_v28  ;;  %v699_v36 = vpop.permute.xlu1 %698 }
 0x15c   : > { %vm839_vm8 = vcmp.eq.s32.totalorder %v699_v36, %v14109_v9  ;;  %v696_v38 = vpop.permute.xlu0 %695 }
 0x15d   : > { %v11949_v41 = vsel %vm839_vm8, 1.0, %v18087_v16  ;;  %vm838_vm9 = vcmp.eq.s32.totalorder %v696_v38, %v14109_v9  ;;  %12929 = vmatmul.mubr.msk.bf16.gmra.mrb[64].mxu1 %vm1920_vm5, %v14596_v29 }
 0x15e   : > { %v11948_v46 = vsel %vm838_vm9, 1.0, %v18087_v16 }
 0x15f   : > { %v14604_v49 = vpack.c.bf16 %v11949_v41, %v11948_v46  ;;  %v705_v51 = vpop.permute.xlu1 %704 }
 0x160   : > { %vm841_vm10 = vcmp.eq.s32.totalorder %v705_v51, %v14109_v9  ;;  %v702_v59 = vpop.permute.xlu0 %701 }
 0x161   : > { %v11951_v60 = vsel %vm841_vm10, 1.0, %v18087_v16  ;;  %vm840_vm11 = vcmp.eq.s32.totalorder %v702_v59, %v14109_v9  ;;  %12844 = vmatprep.mubr.msk.bf16.mxu0 %vm1486_vm4, %v14604_v49 }
 0x162   : > { %v11950_v62 = vsel %vm840_vm11, 1.0, %v18087_v16 }
 0x163   : > { %v14612_v0 = vpack.c.bf16 %v11951_v60, %v11950_v62  ;;  %v1151_v11 = vpop.permute.xlu1 %1150 }
 0x164   : > { %vm1267_vm12 = vcmp.eq.s32.totalorder %v1151_v11, %v14109_v9  ;;  %v1148_v15 = vpop.permute.xlu0 %1147 }
 0x165   : > { %v12025_v19 = vsel %vm1267_vm12, 1.0, %v18087_v16  ;;  %vm1266_vm13 = vcmp.eq.s32.totalorder %v1148_v15, %v14109_v9  ;;  %12845 = vmatmul.mubr.msk.bf16.gmra.mrb[24].mxu0 %vm1486_vm4, %v14612_v0 }
 0x166   : > { %v12024_v28 = vsel %vm1266_vm13, 1.0, %v18087_v16 }
 0x167   : > { %v14620_v36 = vpack.c.bf16 %v12025_v19, %v12024_v28  ;;  %v1157_v38 = vpop.permute.xlu1 %1156 }
 0x168   : > { %vm1269_vm14 = vcmp.eq.s32.totalorder %v1157_v38, %v14109_v9  ;;  %v1154_v41 = vpop.permute.xlu0 %1153 }
 0x169   : > { %v12027_v46 = vsel %vm1269_vm14, 1.0, %v18087_v16  ;;  %vm1268_vm15 = vcmp.eq.s32.totalorder %v1154_v41, %v14109_v9  ;;  %12932 = vmatprep.mubr.msk.bf16.mxu1 %vm1920_vm5, %v14620_v36 }
 0x16a   : > { %v12026_v51 = vsel %vm1268_vm15, 1.0, %v18087_v16 }
 0x16b   : > { %v14628_v59 = vpack.c.bf16 %v12027_v46, %v12026_v51  ;;  %v711_v60 = vpop.permute.xlu1 %710 }
 0x16c   : > { %vm843_vm0 = vcmp.eq.s32.totalorder %v711_v60, %v14109_v9  ;;  %v708_v62 = vpop.permute.xlu0 %707 }
 0x16d   : > { %v11953_v11 = vsel %vm843_vm0, 1.0, %v18087_v16  ;;  %vm842_vm1 = vcmp.eq.s32.totalorder %v708_v62, %v14109_v9  ;;  %12933 = vmatmul.mubr.msk.bf16.gmra.mrb[68].mxu1 %vm1920_vm5, %v14628_v59 }
 0x16e   : > { %v11952_v15 = vsel %vm842_vm1, 1.0, %v18087_v16 }
 0x16f   : > { %v14636_v19 = vpack.c.bf16 %v11953_v11, %v11952_v15  ;;  %v717_v28 = vpop.permute.xlu1 %716 }
 0x170   : > { %vm845_vm2 = vcmp.eq.s32.totalorder %v717_v28, %v14109_v9  ;;  %v714_v38 = vpop.permute.xlu0 %713 }
 0x171   : > { %v11955_v41 = vsel %vm845_vm2, 1.0, %v18087_v16  ;;  %vm844_vm3 = vcmp.eq.s32.totalorder %v714_v38, %v14109_v9  ;;  %12848 = vmatprep.mubr.msk.bf16.mxu0 %vm1486_vm4, %v14636_v19 }
 0x172   : > { %v11954_v46 = vsel %vm844_vm3, 1.0, %v18087_v16 }
 0x173   : > { %v14644_v51 = vpack.c.bf16 %v11955_v41, %v11954_v46  ;;  %v1163_v60 = vpop.permute.xlu1 %1162 }
 0x174   : > { %vm1271_vm6 = vcmp.eq.s32.totalorder %v1163_v60, %v14109_v9  ;;  %v1160_v62 = vpop.permute.xlu0 %1159 }
 0x175   : > { %v12029_v11 = vsel %vm1271_vm6, 1.0, %v18087_v16  ;;  %vm1270_vm7 = vcmp.eq.s32.totalorder %v1160_v62, %v14109_v9  ;;  %12849 = vmatmul.mubr.msk.bf16.gmra.mrb[28].mxu0 %vm1486_vm4, %v14644_v51 }
 0x176   : > { %v12028_v15 = vsel %vm1270_vm7, 1.0, %v18087_v16  ;;  %12968 = vmatprep.mubr.msk.bf16.mxu0 %vm1486_vm4, %v14359_v21 }
 0x177   : > { %v14654_v28 = vpack.c.bf16 %v12029_v11, %v12028_v15  ;;  %v1169_v38 = vpop.permute.xlu1 %1168 }
 0x178   : > { %vm1273_vm8 = vcmp.eq.s32.totalorder %v1169_v38, %v14109_v9  ;;  %v1166_v41 = vpop.permute.xlu0 %1165 }
 0x179   : > { %v12031_v46 = vsel %vm1273_vm8, 1.0, %v18087_v16  ;;  %vm1272_vm9 = vcmp.eq.s32.totalorder %v1166_v41, %v14109_v9  ;;  %12936 = vmatprep.mubr.msk.bf16.mxu1 %vm1920_vm5, %v14654_v28 }
 0x17a   : > { %v12030_v60 = vsel %vm1272_vm9, 1.0, %v18087_v16 }
 0x17b   : > { %v14662_v62 = vpack.c.bf16 %v12031_v46, %v12030_v60  ;;  %v1175_v6 = vpop.permute.xlu1 %1174 }
 0x17c   : > { %vm1275_vm10 = vcmp.eq.s32.totalorder %v1175_v6, %v14109_v9  ;;  %v1172_v21 = vpop.permute.xlu0 %1171 }
 0x17d   : > { %v12033_v11 = vsel %vm1275_vm10, 1.0, %v18087_v16  ;;  %vm1274_vm11 = vcmp.eq.s32.totalorder %v1172_v21, %v14109_v9  ;;  %12937 = vmatmul.mubr.msk.bf16.gmra.mrb[72].mxu1 %vm1920_vm5, %v14662_v62  ;;  %12969 = vmatmul.mubr.msk.bf16.vlgmr.msra.gmra.mrb[32].mxu0 %vm1486_vm4, %v14368_v33  ;;  %v3028_v21 = vld [vmem:[%s18076_s6] sm:$0xff] }
 0x17e   : > { %v12032_v15 = vsel %vm1274_vm11, 1.0, %v18087_v16  ;;  %12972 = vmatprep.mubr.msk.bf16.mxu0 %vm1486_vm4, %v14414_v10  ;;  %13411 = vmatpush3.bf16.msra.mxu0 %v14417_v14 }
 0x17f   : > { %v14675_v38 = vpack.c.bf16 %v12033_v11, %v12032_v15  ;;  %v1181_v6 = vpop.permute.xlu1 %1180  ;;  %v3029_v11 = vld [vmem:[%s18076_s6 + $0x8] sm:$0xff] }
 0x180   : > { %vm1277_vm12 = vcmp.eq.s32.totalorder %v1181_v6, %v14109_v9  ;;  %v1178_v41 = vpop.permute.xlu0 %1177  ;;  %v14678_v46 = vpop.f32.mrb[0].mxu1 }
 0x181   : > { %18106 = vst [vmem:[#allocation7_spill] sm:$0xff] %v14678_v46  ;;  %v12035_v60 = vsel %vm1277_vm12, 1.0, %v18087_v16  ;;  %vm1276_vm13 = vcmp.eq.s32.totalorder %v1178_v41, %v14109_v9  ;;  %12940 = vmatprep.mubr.msk.bf16.mxu1 %vm1920_vm5, %v14675_v38  ;;  %v14684_v33 = vpop.f32.mrb[1].mxu1  ;;  %v14699_v46 = vpack.c.bf16 %v3029_v11, %v3028_v21 }
 0x182   : > { %18107 = vst [vmem:[#allocation8_spill] sm:$0xff] %v14684_v33  ;;  %v12034_v10 = vsel %vm1276_vm13, 1.0, %v18087_v16  ;;  %v14687_v14 = vpop.f32.mrb[2].mxu1  ;;  %v18111_v33 = vmov 0.0  }
 0x183   : > { %18108 = vst [vmem:[#allocation9_spill] sm:$0xff] %v14687_v14  ;;  %v14695_v15 = vpack.c.bf16 %v12035_v60, %v12034_v10  ;;  %v14697_v6 = vpop.f32.mrb[3].mxu1  ;;  %v1187_v41 = vpop.permute.xlu1 %1186  ;;  %13413 = vmatprep.subr.bf16.mxu0 %v14699_v46 }
 0x184   : > { %18110 = vst [vmem:[#allocation11_spill] sm:$0xff] %v14697_v6  ;;  %vm1279_vm14 = vcmp.eq.s32.totalorder %v1187_v41, %v14109_v9  ;;  %v1184_v16 = vpop.permute.xlu0 %1183 }
 0x185   : > { %18109 = vst [vmem:[#allocation10_spill] sm:$0xff] %v14695_v15  ;;  %v12037_v14 = vsel %vm1279_vm14, 1.0, %v18111_v33  ;;  %vm1278_vm15 = vcmp.eq.s32.totalorder %v1184_v16, %v14109_v9  ;;  %12941 = vmatmul.mubr.msk.bf16.gmra.mrb[76].mxu1 %vm1920_vm5, %v14695_v15  ;;  %12973 = vmatmul.mubr.msk.bf16.gmra.mrb[36].mxu0 %vm1486_vm4, %v14426_v27 }
 0x186   : > { %v12036_v60 = vsel %vm1278_vm15, 1.0, %v18111_v33  ;;  %12976 = vmatprep.mubr.msk.bf16.mxu0 %vm1486_vm4, %v14466_v3 }
 0x187   : > { %v14712_v10 = vpack.c.bf16 %v12037_v14, %v12036_v60  ;;  %v1193_v21 = vpop.permute.xlu1 %1192 }
 0x188   : > { %vm1281_vm0 = vcmp.eq.s32.totalorder %v1193_v21, %v14109_v9  ;;  %v1190_v11 = vpop.permute.xlu0 %1189  ;;  %v14715_v16 = vpop.f32.mrb[4].mxu1 }
 0x189   : > { %18112 = vst [vmem:[#allocation12_spill] sm:$0xff] %v14715_v16  ;;  %v12039_v41 = vsel %vm1281_vm0, 1.0, %v18111_v33  ;;  %vm1280_vm1 = vcmp.eq.s32.totalorder %v1190_v11, %v14109_v9  ;;  %12944 = vmatprep.mubr.msk.bf16.mxu1 %vm1920_vm5, %v14712_v10  ;;  %v14721_v27 = vpop.f32.mrb[5].mxu1  ;;  %vm3032_vm0 = vcmask 130048  }
 0x18a   : > { %18113 = vst [vmem:[#allocation13_spill] sm:$0xff] %v14721_v27  ;;  %v12038_v3 = vsel %vm1280_vm1, 1.0, %v18111_v33  ;;  %v14724_v6 = vpop.f32.mrb[6].mxu1  ;;  %vm11469_vm1 = vcmask 195712  }
 0x18b   : > { %18114 = vst [vmem:[#allocation14_spill] sm:$0xff] %v14724_v6  ;;  %v14726_v14 = vpack.c.bf16 %v12039_v41, %v12038_v3  ;;  %v14728_v60 = vpop.f32.mrb[7].mxu1  ;;  %v1199_v21 = vpop.permute.xlu1 %1198 }
 0x18c   : > { %18115 = vst [vmem:[#allocation15_spill] sm:$0xff] %v14728_v60  ;;  %vm1283_vm2 = vcmp.eq.s32.totalorder %v1199_v21, %v14109_v9  ;;  %v1196_v16 = vpop.permute.xlu0 %1195 }
 0x18d   : > { %v12041_v15 = vsel %vm1283_vm2, 1.0, %v18111_v33  ;;  %vm1282_vm3 = vcmp.eq.s32.totalorder %v1196_v16, %v14109_v9  ;;  %12945 = vmatmul.mubr.msk.bf16.gmra.mrb[80].mxu1 %vm1920_vm5, %v14726_v14  ;;  %12977 = vmatmul.mubr.msk.bf16.gmra.mrb[40].mxu0 %vm1486_vm4, %v14478_v20  ;;  %vm11476_vm2 = vcmask 261312  }
 0x18e   : > { %v12040_v11 = vsel %vm1282_vm3, 1.0, %v18111_v33  ;;  %12980 = vmatprep.mubr.msk.bf16.mxu0 %vm1486_vm4, %v14508_v57  ;;  %vm11483_vm3 = vcmask 326912  }
 0x18f   : > { %v14740_v41 = vpack.c.bf16 %v12041_v15, %v12040_v11  ;;  %v1205_v3 = vpop.permute.xlu1 %1204 }
 0x190   : > { %vm1285_vm6 = vcmp.eq.s32.totalorder %v1205_v3, %v14109_v9  ;;  %v1202_v21 = vpop.permute.xlu0 %1201  ;;  %v14743_v6 = vpop.f32.mrb[8].mxu1 }
 0x191   : > { %18116 = vst [vmem:[#allocation16_spill] sm:$0xff] %v14743_v6  ;;  %v12043_v16 = vsel %vm1285_vm6, 1.0, %v18111_v33  ;;  %vm1284_vm7 = vcmp.eq.s32.totalorder %v1202_v21, %v14109_v9  ;;  %12948 = vmatprep.mubr.msk.bf16.mxu1 %vm1920_vm5, %v14740_v41  ;;  %v14749_v20 = vpop.f32.mrb[9].mxu1  ;;  %vm11490_vm6 = vcmask 392512  }
 0x192   : > { %18117 = vst [vmem:[#allocation17_spill] sm:$0xff] %v14749_v20  ;;  %v12042_v60 = vsel %vm1284_vm7, 1.0, %v18111_v33  ;;  %v14752_v57 = vpop.f32.mrb[10].mxu1  ;;  %vm11497_vm7 = vcmask 458112  }
 0x193   : > { %18118 = vst [vmem:[#allocation18_spill] sm:$0xff] %v14752_v57  ;;  %v14754_v15 = vpack.c.bf16 %v12043_v16, %v12042_v60  ;;  %v14756_v11 = vpop.f32.mrb[11].mxu1  ;;  %v1211_v3 = vpop.permute.xlu1 %1210 }
 0x194   : > { %18119 = vst [vmem:[#allocation19_spill] sm:$0xff] %v14756_v11  ;;  %vm1287_vm8 = vcmp.eq.s32.totalorder %v1211_v3, %v14109_v9  ;;  %v1208_v6 = vpop.permute.xlu0 %1207 }
 0x195   : > { %v12045_v27 = vsel %vm1287_vm8, 1.0, %v18111_v33  ;;  %vm1286_vm9 = vcmp.eq.s32.totalorder %v1208_v6, %v14109_v9  ;;  %12949 = vmatmul.mubr.msk.bf16.gmra.mrb[84].mxu1 %vm1920_vm5, %v14754_v15  ;;  %12981 = vmatmul.mubr.msk.bf16.gmra.mrb[44].mxu0 %vm1486_vm4, %v14516_v1  ;;  %vm11504_vm8 = vcmask 523712  }
 0x196   : > { %v12044_v21 = vsel %vm1286_vm9, 1.0, %v18111_v33  ;;  %12984 = vmatprep.mubr.msk.bf16.mxu0 %vm1486_vm4, %v14540_v44  ;;  %vm11511_vm9 = vcmask 589312  }
 0x197   : > { %v14768_v60 = vpack.c.bf16 %v12045_v27, %v12044_v21  ;;  %v1217_v16 = vpop.permute.xlu1 %1216 }
 0x198   : > { %vm1289_vm10 = vcmp.eq.s32.totalorder %v1217_v16, %v14109_v9  ;;  %v1214_v3 = vpop.permute.xlu0 %1213  ;;  %v14771_v57 = vpop.f32.mrb[12].mxu1 }
 0x199   : > { %18120 = vst [vmem:[#allocation20_spill] sm:$0xff] %v14771_v57  ;;  %v12047_v6 = vsel %vm1289_vm10, 1.0, %v18111_v33  ;;  %vm1288_vm11 = vcmp.eq.s32.totalorder %v1214_v3, %v14109_v9  ;;  %12952 = vmatprep.mubr.msk.bf16.mxu1 %vm1920_vm5, %v14768_v60  ;;  %v14777_v1 = vpop.f32.mrb[13].mxu1  ;;  %vm11518_vm10 = vcmask 654912  }
 0x19a   : > { %18121 = vst [vmem:[#allocation21_spill] sm:$0xff] %v14777_v1  ;;  %v12046_v11 = vsel %vm1288_vm11, 1.0, %v18111_v33  ;;  %v14780_v44 = vpop.f32.mrb[14].mxu1  ;;  %vm11525_vm11 = vcmask 720512  }
 0x19b   : > { %18122 = vst [vmem:[#allocation22_spill] sm:$0xff] %v14780_v44  ;;  %v14782_v27 = vpack.c.bf16 %v12047_v6, %v12046_v11  ;;  %v14784_v21 = vpop.f32.mrb[15].mxu1  ;;  %v1223_v16 = vpop.permute.xlu1 %1222 }
 0x19c   : > { %18123 = vst [vmem:[#allocation23_spill] sm:$0xff] %v14784_v21  ;;  %vm1291_vm12 = vcmp.eq.s32.totalorder %v1223_v16, %v14109_v9  ;;  %v1220_v57 = vpop.permute.xlu0 %1219 }
 0x19d   : > { %v12049_v20 = vsel %vm1291_vm12, 1.0, %v18111_v33  ;;  %vm1290_vm13 = vcmp.eq.s32.totalorder %v1220_v57, %v14109_v9  ;;  %12953 = vmatmul.mubr.msk.bf16.gmra.mrb[88].mxu1 %vm1920_vm5, %v14782_v27  ;;  %12985 = vmatmul.mubr.msk.bf16.gmra.mrb[48].mxu0 %vm1486_vm4, %v14548_v54  ;;  %vm11532_vm12 = vcmask 786112  }
 0x19e   : > { %v12048_v3 = vsel %vm1290_vm13, 1.0, %v18111_v33  ;;  %12988 = vmatprep.mubr.msk.bf16.mxu0 %vm1486_vm4, %v14572_v31  ;;  %vm11539_vm13 = vcmask 851712  }
 0x19f   : > { %v14796_v11 = vpack.c.bf16 %v12049_v20, %v12048_v3  ;;  %v1229_v6 = vpop.permute.xlu1 %1228 }
 0x1a0   : > { %vm1293_vm14 = vcmp.eq.s32.totalorder %v1229_v6, %v14109_v9  ;;  %v1226_v16 = vpop.permute.xlu0 %1225  ;;  %v14799_v44 = vpop.f32.mrb[16].mxu1 }
 0x1a1   : > { %18124 = vst [vmem:[#allocation24_spill] sm:$0xff] %v14799_v44  ;;  %v12051_v57 = vsel %vm1293_vm14, 1.0, %v18111_v33  ;;  %vm1292_vm15 = vcmp.eq.s32.totalorder %v1226_v16, %v14109_v9  ;;  %12956 = vmatprep.mubr.msk.bf16.mxu1 %vm1920_vm5, %v14796_v11  ;;  %v14805_v54 = vpop.f32.mrb[17].mxu1  ;;  %vm11546_vm14 = vcmask 917312  }
 0x1a2   : > { %18125 = vst [vmem:[#allocation25_spill] sm:$0xff] %v14805_v54  ;;  %v12050_v21 = vsel %vm1292_vm15, 1.0, %v18111_v33  ;;  %v14808_v31 = vpop.f32.mrb[18].mxu1  ;;  %vm11553_vm15 = vcmask 982912  }
 0x1a3   : > { %18126 = vst [vmem:[#allocation26_spill] sm:$0xff] %v14808_v31  ;;  %v14810_v20 = vpack.c.bf16 %v12051_v57, %v12050_v21  ;;  %v14812_v3 = vpop.f32.mrb[19].mxu1 }
 0x1a4   : > { %18127 = vst [vmem:[#allocation27_spill] sm:$0xff] %v14812_v3 }
 0x1a5   : > { %12957 = vmatmul.mubr.msk.bf16.gmra.mrb[92].mxu1 %vm1920_vm5, %v14810_v20  ;;  %12989 = vmatmul.mubr.msk.bf16.gmra.mrb[52].mxu0 %vm1486_vm4, %v14580_v12 }
 0x1a6   : > { %12992 = vmatprep.mubr.msk.bf16.mxu0 %vm1486_vm4, %v14604_v49  ;;  %13044 = vmatprep.mubr.msk.bf16.mxu1 %vm1920_vm5, %v14298_v24 }
 0x1a8   : > { %v14822_v6 = vpop.f32.mrb[20].mxu1 }
 0x1a9   : > { %18128 = vst [vmem:[#allocation28_spill] sm:$0xff] %v14822_v6  ;;  %v14824_v33 = vpop.f32.mrb[21].mxu1 }
 0x1aa   : > { %18129 = vst [vmem:[#allocation29_spill] sm:$0xff] %v14824_v33  ;;  %v14826_v21 = vpop.f32.mrb[22].mxu1 }
 0x1ab   : > { %18130 = vst [vmem:[#allocation30_spill] sm:$0xff] %v14826_v21  ;;  %v14828_v16 = vpop.f32.mrb[23].mxu1 }
 0x1ac   : > { %18131 = vst [vmem:[#allocation31_spill] sm:$0xff] %v14828_v16 }
 0x1ad   : > { %12993 = vmatmul.mubr.msk.bf16.gmra.mrb[56].mxu0 %vm1486_vm4, %v14612_v0  ;;  %13045 = vmatmul.mubr.msk.bf16.vlgmr.msra.gmra.mrb[96].mxu1 %vm1920_vm5, %v14308_v34 }
 0x1ae   : > { %12996 = vmatprep.mubr.msk.bf16.mxu0 %vm1486_vm4, %v14636_v19  ;;  %13048 = vmatprep.mubr.msk.bf16.mxu1 %vm1920_vm5, %v14318_v43 }
 0x1b0   : > { %v14838_v24 = vpop.f32.mrb[24].mxu1 }
 0x1b1   : > { %18132 = vst [vmem:[#allocation32_spill] sm:$0xff] %v14838_v24  ;;  %v14840_v12 = vpop.f32.mrb[25].mxu1 }
 0x1b2   : > { %18133 = vst [vmem:[#allocation33_spill] sm:$0xff] %v14840_v12  ;;  %v14842_v49 = vpop.f32.mrb[26].mxu1 }
 0x1b3   : > { %18134 = vst [vmem:[#allocation34_spill] sm:$0xff] %v14842_v49  ;;  %v14844_v57 = vpop.f32.mrb[27].mxu1 }
 0x1b4   : > { %18135 = vst [vmem:[#allocation35_spill] sm:$0xff] %v14844_v57 }
 0x1b5   : > { %12997 = vmatmul.mubr.msk.bf16.gmra.mrb[60].mxu0 %vm1486_vm4, %v14644_v51  ;;  %13049 = vmatmul.mubr.msk.bf16.gmra.mrb[100].mxu1 %vm1920_vm5, %v14328_v52 }
 0x1b6   : > { %13000 = vmatprep.mubr.msk.bf16.mxu0 %vm1486_vm4, %v14124_v23  ;;  %13052 = vmatprep.mubr.msk.bf16.mxu1 %vm1920_vm5, %v14338_v61 }
 0x1b8   : > { %v14854_v34 = vpop.f32.mrb[28].mxu1 }
 0x1b9   : > { %18136 = vst [vmem:[#allocation36_spill] sm:$0xff] %v14854_v34  ;;  %v14856_v43 = vpop.f32.mrb[29].mxu1 }
 0x1ba   : > { %18137 = vst [vmem:[#allocation37_spill] sm:$0xff] %v14856_v43  ;;  %v14858_v0 = vpop.f32.mrb[30].mxu1 }
 0x1bb   : > { %18138 = vst [vmem:[#allocation38_spill] sm:$0xff] %v14858_v0  ;;  %v14860_v19 = vpop.f32.mrb[31].mxu1 }
 0x1bc   : > { %18139 = vst [vmem:[#allocation39_spill] sm:$0xff] %v14860_v19 }
 0x1bd   : > { %13001 = vmatmul.mubr.msk.bf16.gmra.mrb[64].mxu0 %vm1486_vm4, %v14122_v22  ;;  %13053 = vmatmul.mubr.msk.bf16.gmra.mrb[104].mxu1 %vm1920_vm5, %v14348_v8 }
 0x1be   : > { %13004 = vmatprep.mubr.msk.bf16.mxu0 %vm1486_vm4, %v14139_v32  ;;  %13056 = vmatprep.mubr.msk.bf16.mxu1 %vm1920_vm5, %v14382_v45 }
 0x1c0   : > { %v14870_v23 = vpop.f32.mrb[32].mxu1 }
 0x1c1   : > { %v2051_v52 = vpop.f32.mrb[33].mxu1 }
 0x1c2   : > { %v14872_v61 = vpop.f32.mrb[34].mxu1 }
 0x1c3   : > { %v2054_v51 = vpop.f32.mrb[35].mxu1 }
 0x1c5   : > { %13005 = vmatmul.mubr.msk.bf16.gmra.mrb[68].mxu0 %vm1486_vm4, %v14153_v39  ;;  %13057 = vmatmul.mubr.msk.bf16.gmra.mrb[108].mxu1 %vm1920_vm5, %v14395_v56 }
 0x1c6   : > { %13008 = vmatprep.mubr.msk.bf16.mxu0 %vm1486_vm4, %v14166_v47  ;;  %13060 = vmatprep.mubr.msk.bf16.mxu1 %vm1920_vm5, %v14440_v40 }
 0x1c8   : > { %v14882_v22 = vpop.f32.mrb[36].mxu1 }
 0x1c9   : > { %v2067_v32 = vpop.f32.mrb[37].mxu1 }
 0x1ca   : > { %v14884_v8 = vpop.f32.mrb[38].mxu1 }
 0x1cb   : > { %v2070_v45 = vpop.f32.mrb[39].mxu1 }
 0x1cd   : > { %13009 = vmatmul.mubr.msk.bf16.gmra.mrb[72].mxu0 %vm1486_vm4, %v14179_v55  ;;  %13061 = vmatmul.mubr.msk.bf16.gmra.mrb[112].mxu1 %vm1920_vm5, %v14453_v53 }
 0x1ce   : > { %13012 = vmatprep.mubr.msk.bf16.mxu0 %vm1486_vm4, %v14192_v63  ;;  %13064 = vmatprep.mubr.msk.bf16.mxu1 %vm1920_vm5, %v14489_v37 }
 0x1d0   : > { %v14894_v39 = vpop.f32.mrb[40].mxu1 }
 0x1d1   : > { %v14896_v47 = vpop.f32.mrb[41].mxu1 }
 0x1d2   : > { %v14898_v56 = vpop.f32.mrb[42].mxu1 }
 0x1d3   : > { %v14900_v40 = vpop.f32.mrb[43].mxu1 }
 0x1d5   : > { %13013 = vmatmul.mubr.msk.bf16.gmra.mrb[76].mxu0 %vm1486_vm4, %v14202_v7  ;;  %13065 = vmatmul.mubr.msk.bf16.gmra.mrb[116].mxu1 %vm1920_vm5, %v14500_v48 }
 0x1d6   : > { %13016 = vmatprep.mubr.msk.bf16.mxu0 %vm1486_vm4, %v14217_v17  ;;  %13068 = vmatprep.mubr.msk.bf16.mxu1 %vm1920_vm5, %v14524_v18 }
 0x1d7   : > { %v14910_v55 = vpop.f32.mrb[0].mxu0 }
 0x1d8   : > { %v14912_v63 = vpop.f32.mrb[1].mxu0 }
 0x1d9   : > { %v14914_v53 = vpop.f32.mrb[2].mxu0 }
 0x1da   : > { %v14916_v37 = vpop.f32.mrb[3].mxu0 }
 0x1dd   : > { %13017 = vmatmul.mubr.msk.bf16.gmra.mrb[80].mxu0 %vm1486_vm4, %v14228_v26  ;;  %13069 = vmatmul.mubr.msk.bf16.gmra.mrb[120].mxu1 %vm1920_vm5, %v14532_v30 }
 0x1de   : > { %13020 = vmatprep.mubr.msk.bf16.mxu0 %vm1486_vm4, %v14238_v35  ;;  %13072 = vmatprep.mubr.msk.bf16.mxu1 %vm1920_vm5, %v14556_v4 }
 0x1df   : > { %v14926_v7 = vpop.f32.mrb[44].mxu1 }
 0x1e0   : > { %v2099_v17 = vpop.f32.mrb[45].mxu1 }
 0x1e1   : > { %v14928_v48 = vpop.f32.mrb[46].mxu1 }
 0x1e2   : > { %v2102_v18 = vpop.f32.mrb[47].mxu1 }
 0x1e5   : > { %13021 = vmatmul.mubr.msk.bf16.gmra.mrb[84].mxu0 %vm1486_vm4, %v14248_v42  ;;  %13073 = vmatmul.mubr.msk.bf16.gmra.mrb[124].mxu1 %vm1920_vm5, %v14564_v25 }
 0x1e6   : > { %13024 = vmatprep.mubr.msk.bf16.mxu0 %vm1486_vm4, %v14258_v50  ;;  %13076 = vmatprep.mubr.msk.bf16.mxu1 %vm1920_vm5, %v14588_v5 }
 0x1e7   : > { %v14938_v26 = vpop.f32.mrb[4].mxu0 }
 0x1e8   : > { %v14940_v35 = vpop.f32.mrb[5].mxu0 }
 0x1e9   : > { %v14942_v30 = vpop.f32.mrb[6].mxu0 }
 0x1ea   : > { %v14944_v4 = vpop.f32.mrb[7].mxu0 }
 0x1ed   : > { %13025 = vmatmul.mubr.msk.bf16.gmra.mrb[88].mxu0 %vm1486_vm4, %v14268_v58  ;;  %13077 = vmatmul.mubr.msk.bf16.gmra.mrb[128].mxu1 %vm1920_vm5, %v14596_v29 }
 0x1ee   : > { %13028 = vmatprep.mubr.msk.bf16.mxu0 %vm1486_vm4, %v14278_v2  ;;  %13080 = vmatprep.mubr.msk.bf16.mxu1 %vm1920_vm5, %v14620_v36 }
 0x1ef   : > { %v12914_v42 = vpop.f32.mrb[48].mxu1 }
 0x1f0   : > { %v2115_v50 = vpop.f32.mrb[49].mxu1 }
 0x1f1   : > { %v12915_v25 = vpop.f32.mrb[50].mxu1 }
 0x1f2   : > { %v2118_v5 = vpop.f32.mrb[51].mxu1 }
 0x1f5   : > { %13029 = vmatmul.mubr.msk.bf16.gmra.mrb[92].mxu0 %vm1486_vm4, %v14288_v13  ;;  %13081 = vmatmul.mubr.msk.bf16.gmra.mrb[132].mxu1 %vm1920_vm5, %v14628_v59  ;;  %vm5043_vm4 = vcmask 64512  }
 0x1f6   : > { %13084 = vmatprep.mubr.msk.bf16.mxu1 %vm1920_vm5, %v14654_v28  ;;  %13112 = vmatprep.mubr.msk.f32.mxu0 %vm3032_vm0, %v2051_v52 }
 0x1f7   : > { %v14961_v58 = vpop.f32.mrb[8].mxu0 }
 0x1f8   : > { %v14963_v2 = vpop.f32.mrb[9].mxu0 }
 0x1f9   : > { %v14965_v29 = vpop.f32.mrb[10].mxu0 }
 0x1fa   : > { %v14967_v36 = vpop.f32.mrb[11].mxu0 }
 0x1fd   : > { %13085 = vmatmul.mubr.msk.bf16.gmra.mrb[136].mxu1 %vm1920_vm5, %v14662_v62  ;;  %13113 = vmatmul.mubr.msk.f32.vlgmr.msra.gmra.mrb[96].mxu0 %vm3032_vm0, %v2054_v51  ;;  %v18140_v62 = vld [vmem:[#allocation10_spill] sm:$0xff] }
 0x1fe   : > { %13088 = vmatprep.mubr.msk.bf16.mxu1 %vm1920_vm5, %v14675_v38  ;;  %13115 = vmatprep.mubr.msk.f32.mxu0 %vm3032_vm0, %v14870_v23 }
 0x1ff   : > { %v12918_v13 = vpop.f32.mrb[52].mxu1  ;;  %13415 = vmatpush3.bf16.msra.mxu0 %v14699_v46 }
 0x200   : > { %v2131_v59 = vpop.f32.mrb[53].mxu1 }
 0x201   : > { %13116 = vmatmul.mubr.msk.f32.gmra.mrb[98].mxu0 %vm3032_vm0, %v14872_v61  ;;  %v12919_v28 = vpop.f32.mrb[54].mxu1 }
 0x202   : > { %13118 = vmatprep.mubr.msk.f32.mxu0 %vm3032_vm0, %v2067_v32  ;;  %v2134_v52 = vpop.f32.mrb[55].mxu1 }
 0x205   : > { %13089 = vmatmul.mubr.msk.bf16.gmra.mrb[140].mxu1 %vm1920_vm5, %v18140_v62  ;;  %13119 = vmatmul.mubr.msk.f32.gmra.mrb[100].mxu0 %vm3032_vm0, %v2070_v45 }
 0x206   : > { %13092 = vmatprep.mubr.msk.bf16.mxu1 %vm1920_vm5, %v14712_v10  ;;  %13121 = vmatprep.mubr.msk.f32.mxu0 %vm3032_vm0, %v14882_v22 }
 0x208   : > { %v14987_v38 = vpop.f32.mrb[12].mxu0 }
 0x209   : > { %v14989_v46 = vpop.f32.mrb[13].mxu0  ;;  %13122 = vmatmul.mubr.msk.f32.gmra.mrb[102].mxu0 %vm3032_vm0, %v14884_v8 }
 0x20a   : > { %v14993_v23 = vpop.f32.mrb[14].mxu0  ;;  %13124 = vmatprep.mubr.msk.f32.mxu0 %vm3032_vm0, %v14896_v47 }
 0x20b   : > { %v14997_v61 = vpop.f32.mrb[15].mxu0 }
 0x20d   : > { %13093 = vmatmul.mubr.msk.bf16.gmra.mrb[144].mxu1 %vm1920_vm5, %v14726_v14  ;;  %13125 = vmatmul.mubr.msk.f32.gmra.mrb[104].mxu0 %vm3032_vm0, %v14900_v40 }
 0x20e   : > { %13096 = vmatprep.mubr.msk.bf16.mxu1 %vm1920_vm5, %v14740_v41  ;;  %13127 = vmatprep.mubr.msk.f32.mxu0 %vm3032_vm0, %v14894_v39 }
 0x210   : > { %v12922_v10 = vpop.f32.mrb[56].mxu1 }
 0x211   : > { %v2147_v51 = vpop.f32.mrb[57].mxu1  ;;  %13128 = vmatmul.mubr.msk.f32.gmra.mrb[106].mxu0 %vm3032_vm0, %v14898_v56 }
 0x212   : > { %v12923_v22 = vpop.f32.mrb[58].mxu1  ;;  %13130 = vmatprep.mubr.msk.f32.mxu0 %vm3032_vm0, %v2099_v17 }
 0x213   : > { %v2150_v32 = vpop.f32.mrb[59].mxu1 }
 0x215   : > { %13097 = vmatmul.mubr.msk.bf16.gmra.mrb[148].mxu1 %vm1920_vm5, %v14754_v15  ;;  %13131 = vmatmul.mubr.msk.f32.gmra.mrb[108].mxu0 %vm3032_vm0, %v2102_v18 }
 0x216   : > { %13100 = vmatprep.mubr.msk.bf16.mxu1 %vm1920_vm5, %v14768_v60  ;;  %13133 = vmatprep.mubr.msk.f32.mxu0 %vm3032_vm0, %v14926_v7 }
 0x218   : > { %v15017_v14 = vpop.f32.mrb[16].mxu0 }
 0x219   : > { %v15019_v41 = vpop.f32.mrb[17].mxu0  ;;  %13134 = vmatmul.mubr.msk.f32.gmra.mrb[110].mxu0 %vm3032_vm0, %v14928_v48 }
 0x21a   : > { %v15023_v8 = vpop.f32.mrb[18].mxu0  ;;  %13136 = vmatprep.mubr.msk.f32.mxu0 %vm3032_vm0, %v2115_v50 }
 0x21b   : > { %v15026_v15 = vpop.f32.mrb[19].mxu0 }
 0x21d   : > { %13101 = vmatmul.mubr.msk.bf16.gmra.mrb[152].mxu1 %vm1920_vm5, %v14782_v27  ;;  %13137 = vmatmul.mubr.msk.f32.gmra.mrb[112].mxu0 %vm3032_vm0, %v2118_v5 }
 0x21e   : > { %13104 = vmatprep.mubr.msk.bf16.mxu1 %vm1920_vm5, %v14796_v11  ;;  %13139 = vmatprep.mubr.msk.f32.mxu0 %vm3032_vm0, %v12914_v42 }
 0x220   : > { %v12926_v60 = vpop.f32.mrb[60].mxu1 }
 0x221   : > { %v2163_v45 = vpop.f32.mrb[61].mxu1  ;;  %13140 = vmatmul.mubr.msk.f32.gmra.mrb[114].mxu0 %vm3032_vm0, %v12915_v25 }
 0x222   : > { %v12927_v39 = vpop.f32.mrb[62].mxu1  ;;  %13142 = vmatprep.mubr.msk.f32.mxu0 %vm3032_vm0, %v2131_v59 }
 0x223   : > { %v2166_v47 = vpop.f32.mrb[63].mxu1 }
 0x225   : > { %13105 = vmatmul.mubr.msk.bf16.gmra.mrb[156].mxu1 %vm1920_vm5, %v14810_v20  ;;  %13143 = vmatmul.mubr.msk.f32.gmra.mrb[116].mxu0 %vm3032_vm0, %v2134_v52  ;;  %vm11462_vm5 = vcmask 130112  }
 0x226   : > { %13145 = vmatprep.mubr.msk.f32.mxu0 %vm3032_vm0, %v12918_v13 }
 0x228   : > { %v15040_v27 = vpop.f32.mrb[20].mxu0 }
 0x229   : > { %v15042_v11 = vpop.f32.mrb[21].mxu0  ;;  %13146 = vmatmul.mubr.msk.f32.gmra.mrb[118].mxu0 %vm3032_vm0, %v12919_v28 }
 0x22a   : > { %v15045_v56 = vpop.f32.mrb[22].mxu0  ;;  %13148 = vmatprep.mubr.msk.f32.mxu0 %vm3032_vm0, %v2147_v51 }
 0x22b   : > { %v15048_v40 = vpop.f32.mrb[23].mxu0 }
 0x22d   : > { %13149 = vmatmul.mubr.msk.f32.gmra.mrb[120].mxu0 %vm3032_vm0, %v2150_v32 }
 0x22e   : > { %13151 = vmatprep.mubr.msk.f32.mxu0 %vm3032_vm0, %v12922_v10 }
 0x230   : > { %v12930_v20 = vpop.f32.mrb[64].mxu1 }
 0x231   : > { %v2179_v7 = vpop.f32.mrb[65].mxu1  ;;  %13152 = vmatmul.mubr.msk.f32.gmra.mrb[122].mxu0 %vm3032_vm0, %v12923_v22 }
 0x232   : > { %v12931_v17 = vpop.f32.mrb[66].mxu1  ;;  %13154 = vmatprep.mubr.msk.f32.mxu0 %vm3032_vm0, %v2163_v45 }
 0x233   : > { %v2182_v48 = vpop.f32.mrb[67].mxu1 }
 0x235   : > { %13155 = vmatmul.mubr.msk.f32.gmra.mrb[124].mxu0 %vm3032_vm0, %v2166_v47 }
 0x236   : > { %13157 = vmatprep.mubr.msk.f32.mxu0 %vm3032_vm0, %v12926_v60 }
 0x238   : > { %v15056_v18 = vpop.f32.mrb[24].mxu0 }
 0x239   : > { %v15058_v42 = vpop.f32.mrb[25].mxu0  ;;  %13158 = vmatmul.mubr.msk.f32.gmra.mrb[126].mxu0 %vm3032_vm0, %v12927_v39 }
 0x23a   : > { %v15061_v50 = vpop.f32.mrb[26].mxu0  ;;  %13160 = vmatprep.mubr.msk.f32.mxu0 %vm3032_vm0, %v2179_v7 }
 0x23b   : > { %18141 = vst [vmem:[#allocation10_spill] sm:$0xff] %v15061_v50  ;;  %v15064_v25 = vpop.f32.mrb[27].mxu0 }
 0x23d   : > { %13161 = vmatmul.mubr.msk.f32.gmra.mrb[128].mxu0 %vm3032_vm0, %v2182_v48 }
 0x23e   : > { %13163 = vmatprep.mubr.msk.f32.mxu0 %vm3032_vm0, %v12930_v20 }
 0x240   : > { %v12934_v5 = vpop.f32.mrb[68].mxu1 }
 0x241   : > { %v2195_v13 = vpop.f32.mrb[69].mxu1  ;;  %13164 = vmatmul.mubr.msk.f32.gmra.mrb[130].mxu0 %vm3032_vm0, %v12931_v17 }
 0x242   : > { %v12935_v59 = vpop.f32.mrb[70].mxu1  ;;  %13166 = vmatprep.mubr.msk.f32.mxu0 %vm3032_vm0, %v2195_v13 }
 0x243   : > { %v2198_v28 = vpop.f32.mrb[71].mxu1 }
 0x245   : > { %13167 = vmatmul.mubr.msk.f32.gmra.mrb[132].mxu0 %vm3032_vm0, %v2198_v28 }
 0x246   : > { %13169 = vmatprep.mubr.msk.f32.mxu0 %vm3032_vm0, %v12934_v5 }
 0x248   : > { %v15072_v52 = vpop.f32.mrb[28].mxu0 }
 0x249   : > { %18142 = vst [vmem:[#allocation40_spill] sm:$0xff] %v15072_v52  ;;  %v15074_v62 = vpop.f32.mrb[29].mxu0  ;;  %13170 = vmatmul.mubr.msk.f32.gmra.mrb[134].mxu0 %vm3032_vm0, %v12935_v59 }
 0x24a   : > { %18143 = vst [vmem:[#allocation41_spill] sm:$0xff] %v15074_v62  ;;  %v15077_v10 = vpop.f32.mrb[30].mxu0 }
 0x24b   : > { %18144 = vst [vmem:[#allocation42_spill] sm:$0xff] %v15077_v10  ;;  %v15079_v51 = vpop.f32.mrb[31].mxu0 }
 0x24c   : > { %18145 = vst [vmem:[#allocation43_spill] sm:$0xff] %v15079_v51 }
 0x250   : > { %v12938_v22 = vpop.f32.mrb[72].mxu1  ;;  %v15081_v32 = vpop.f32.mrb[32].mxu0 }
 0x251   : > { %v2211_v60 = vpop.f32.mrb[73].mxu1  ;;  %v15083_v45 = vpop.f32.mrb[33].mxu0 }
 0x252   : > { %v12939_v39 = vpop.f32.mrb[74].mxu1  ;;  %v15085_v47 = vpop.f32.mrb[34].mxu0  ;;  %13172 = vmatprep.mubr.msk.f32.mxu0 %vm3032_vm0, %v2211_v60 }
 0x253   : > { %v2214_v20 = vpop.f32.mrb[75].mxu1  ;;  %v15088_v7 = vpop.f32.mrb[35].mxu0 }
 0x254   : > { %13173 = vmatmul.mubr.msk.f32.gmra.mrb[136].mxu0 %vm3032_vm0, %v2214_v20 }
 0x255   : > { %13175 = vmatprep.mubr.msk.f32.mxu0 %vm3032_vm0, %v12938_v22  ;;  %v4322_v22 = vld [vmem:[%s18079_s9] sm:$0xff] }
 0x258   : > { %v12942_v17 = vpop.f32.mrb[76].mxu1  ;;  %v15092_v48 = vpop.f32.mrb[36].mxu0  ;;  %13176 = vmatmul.mubr.msk.f32.gmra.mrb[138].mxu0 %vm3032_vm0, %v12939_v39  ;;  %v4323_v39 = vld [vmem:[%s18079_s9 + $0x8] sm:$0xff] }
 0x259   : > { %v2227_v5 = vpop.f32.mrb[77].mxu1  ;;  %v15095_v13 = vpop.f32.mrb[37].mxu0  ;;  %v13416_v20 = vpack.c.bf16 %v4323_v39, %v4322_v22 }
 0x25a   : > { %v12943_v59 = vpop.f32.mrb[78].mxu1  ;;  %v15097_v28 = vpop.f32.mrb[38].mxu0  ;;  %13178 = vmatprep.mubr.msk.f32.mxu0 %vm3032_vm0, %v2227_v5 }
 0x25b   : > { %v2230_v60 = vpop.f32.mrb[79].mxu1  ;;  %v15100_v9 = vpop.f32.mrb[39].mxu0  ;;  %13417 = vmatprep.subr.bf16.mxu1 %v13416_v20 }
 0x25c   : > { %13179 = vmatmul.mubr.msk.f32.gmra.mrb[140].mxu0 %vm3032_vm0, %v2230_v60  ;;  %13419 = vmatpush3.bf16.msra.mxu1 %v13416_v20 }
 0x25d   : > { %13181 = vmatprep.mubr.msk.f32.mxu0 %vm3032_vm0, %v12942_v17 }
 0x260   : > { %v12946_v0 = vpop.f32.mrb[80].mxu1  ;;  %v15110_v34 = vpop.f32.mrb[40].mxu0  ;;  %13182 = vmatmul.mubr.msk.f32.gmra.mrb[142].mxu0 %vm3032_vm0, %v12943_v59 }
 0x261   : > { %v2243_v5 = vpop.f32.mrb[81].mxu1  ;;  %v15113_v19 = vpop.f32.mrb[41].mxu0 }
 0x262   : > { %v12947_v60 = vpop.f32.mrb[82].mxu1  ;;  %v15115_v17 = vpop.f32.mrb[42].mxu0  ;;  %13184 = vmatprep.mubr.msk.f32.mxu0 %vm3032_vm0, %v2243_v5 }
 0x263   : > { %v2246_v43 = vpop.f32.mrb[83].mxu1  ;;  %v15118_v49 = vpop.f32.mrb[43].mxu0 }
 0x264   : > { %13185 = vmatmul.mubr.msk.f32.gmra.mrb[144].mxu0 %vm3032_vm0, %v2246_v43 }
 0x265   : > { %13187 = vmatprep.mubr.msk.f32.mxu0 %vm3032_vm0, %v12946_v0 }
 0x268   : > { %v12950_v22 = vpop.f32.mrb[84].mxu1  ;;  %v15122_v39 = vpop.f32.mrb[44].mxu0  ;;  %13188 = vmatmul.mubr.msk.f32.gmra.mrb[146].mxu0 %vm3032_vm0, %v12947_v60 }
 0x269   : > { %v2259_v59 = vpop.f32.mrb[85].mxu1  ;;  %v15125_v24 = vpop.f32.mrb[45].mxu0 }
 0x26a   : > { %v12951_v57 = vpop.f32.mrb[86].mxu1  ;;  %v15127_v12 = vpop.f32.mrb[46].mxu0  ;;  %13190 = vmatprep.mubr.msk.f32.mxu0 %vm3032_vm0, %v2259_v59 }
 0x26b   : > { %v2262_v20 = vpop.f32.mrb[87].mxu1  ;;  %v15130_v5 = vpop.f32.mrb[47].mxu0 }
 0x26c   : > { %13191 = vmatmul.mubr.msk.f32.gmra.mrb[148].mxu0 %vm3032_vm0, %v2262_v20 }
 0x26d   : > { %13193 = vmatprep.mubr.msk.f32.mxu0 %vm3032_vm0, %v12950_v22 }
 0x270   : > { %v12954_v43 = vpop.f32.mrb[88].mxu1  ;;  %v15134_v0 = vpop.f32.mrb[48].mxu0  ;;  %13194 = vmatmul.mubr.msk.f32.gmra.mrb[150].mxu0 %vm3032_vm0, %v12951_v57 }
 0x271   : > { %v2275_v60 = vpop.f32.mrb[89].mxu1  ;;  %v15137_v21 = vpop.f32.mrb[49].mxu0 }
 0x272   : > { %v12955_v6 = vpop.f32.mrb[90].mxu1  ;;  %v15139_v16 = vpop.f32.mrb[50].mxu0  ;;  %13196 = vmatprep.mubr.msk.f32.mxu0 %vm3032_vm0, %v2275_v60 }
 0x273   : > { %v2278_v59 = vpop.f32.mrb[91].mxu1  ;;  %v15142_v33 = vpop.f32.mrb[51].mxu0 }
 0x274   : > { %13197 = vmatmul.mubr.msk.f32.gmra.mrb[152].mxu0 %vm3032_vm0, %v2278_v59 }
 0x275   : > { %13199 = vmatprep.mubr.msk.f32.mxu0 %vm3032_vm0, %v12954_v43 }
 0x278   : > { %v12958_v22 = vpop.f32.mrb[92].mxu1  ;;  %v15146_v20 = vpop.f32.mrb[52].mxu0  ;;  %13200 = vmatmul.mubr.msk.f32.gmra.mrb[154].mxu0 %vm3032_vm0, %v12955_v6  ;;  %v15163_v6 = vld [vmem:[%s18082_s12] ss:$0 sm:$0xff] }
 0x279   : > { %v2291_v57 = vpop.f32.mrb[93].mxu1  ;;  %v15149_v31 = vpop.f32.mrb[53].mxu0 }
 0x27a   : > { %v12959_v44 = vpop.f32.mrb[94].mxu1  ;;  %v15151_v3 = vpop.f32.mrb[54].mxu0  ;;  %13202 = vmatprep.mubr.msk.f32.mxu0 %vm3032_vm0, %v2291_v57 }
 0x27b   : > { %v2294_v60 = vpop.f32.mrb[95].mxu1  ;;  %v15154_v54 = vpop.f32.mrb[55].mxu0 }
 0x27c   : > { %13203 = vmatmul.mubr.msk.f32.gmra.mrb[156].mxu0 %vm3032_vm0, %v2294_v60 }
 0x27d   : > { %13205 = vmatprep.mubr.msk.f32.mxu0 %vm3032_vm0, %v12958_v22 }
 0x280   : > { %v15158_v43 = vpop.f32.mrb[56].mxu0  ;;  %v13046_v59 = vpop.f32.mrb[96].mxu1  ;;  %13206 = vmatmul.mubr.msk.f32.gmra.mrb[158].mxu0 %vm3032_vm0, %v12959_v44 }
 0x281   : > { %v2966_v1 = vmul.f32 %v13046_v59, %v15081_v32  ;;  %v15167_v57 = vpop.f32.mrb[57].mxu0  ;;  %v2709_v10 = vpop.f32.mrb[97].mxu1  ;;  %13212 = vmatprep.mubr.msk.f32.mxu0 %vm3032_vm0, %v14912_v63 }
 0x282   : > { %v2964_v22 = vmul.f32 %v2709_v10, %v15083_v45  ;;  %v15172_v60 = vpop.f32.mrb[58].mxu0  ;;  %v13047_v52 = vpop.f32.mrb[98].mxu1 }
 0x283   : > { %v5245_v51 = vmul.f32 %v15163_v6, %v2966_v1  ;;  %v2967_v62 = vmul.f32 %v13047_v52, %v15085_v47  ;;  %v15176_v50 = vpop.f32.mrb[59].mxu0  ;;  %v2712_v44 = vpop.f32.mrb[99].mxu1 }
 0x284   : > { %v2965_v32 = vmul.f32 %v2712_v44, %v15088_v7  ;;  %13213 = vmatmul.mubr.msk.f32.vlgmr.msra.gmra.mrb[96].mxu0 %vm3032_vm0, %v14916_v37  ;;  %v5243_v63 = vmul.f32 %v15163_v6, %v2964_v22 }
 0x285   : > { %v5246_v10 = vmul.f32 %v15163_v6, %v2967_v62  ;;  %13215 = vmatprep.mubr.msk.f32.mxu0 %vm3032_vm0, %v14910_v55  ;;  %v5313_v45 = vsel %vm5043_vm4, %v5245_v51, 0.0 }
 0x286   : > { %5314 = vadd.xlane.f32.xlu1 %v5313_v45  ;;  %v5244_v1 = vmul.f32 %v15163_v6, %v2965_v32  ;;  %v5307_v55 = vsel %vm5043_vm4, %v5243_v63, 0.0 }
 0x287   : > { %v5316_v52 = vsel %vm5043_vm4, %v5246_v10, 0.0 }
 0x288   : > { %v15188_v47 = vpop.f32.mrb[60].mxu0  ;;  %13216 = vmatmul.mubr.msk.f32.gmra.mrb[98].mxu0 %vm3032_vm0, %v14914_v53  ;;  %5317 = vadd.xlane.f32.xlu0 %v5316_v52  ;;  %v13050_v37 = vpop.f32.mrb[100].mxu1  ;;  %v5310_v45 = vsel %vm5043_vm4, %v5244_v1, 0.0 }
 0x289   : > { %v2970_v7 = vmul.f32 %v13050_v37, %v15092_v48  ;;  %v15193_v62 = vpop.f32.mrb[61].mxu0  ;;  %v2725_v59 = vpop.f32.mrb[101].mxu1  ;;  %13218 = vmatprep.mubr.msk.f32.mxu0 %vm3032_vm0, %v14940_v35 }
 0x28a   : > { %v2968_v51 = vmul.f32 %v2725_v59, %v15095_v13  ;;  %v15199_v22 = vpop.f32.mrb[62].mxu0  ;;  %5308 = vadd.xlane.f32.xlu1 %v5307_v55  ;;  %v13051_v44 = vpop.f32.mrb[102].mxu1 }
 0x28b   : > { %v5249_v53 = vmul.f32 %v15163_v6, %v2970_v7  ;;  %v2971_v32 = vmul.f32 %v13051_v44, %v15097_v28  ;;  %v15203_v10 = vpop.f32.mrb[63].mxu0  ;;  %v2728_v48 = vpop.f32.mrb[103].mxu1 }
 0x28c   : > { %v2969_v52 = vmul.f32 %v2728_v48, %v15100_v9  ;;  %13219 = vmatmul.mubr.msk.f32.gmra.mrb[100].mxu0 %vm3032_vm0, %v14944_v4  ;;  %5311 = vadd.xlane.f32.xlu0 %v5310_v45  ;;  %v5247_v35 = vmul.f32 %v15163_v6, %v2968_v51 }
 0x28d   : > { %v5250_v13 = vmul.f32 %v15163_v6, %v2971_v32  ;;  %13221 = vmatprep.mubr.msk.f32.mxu0 %vm3032_vm0, %v14938_v26  ;;  %v5325_v28 = vsel %vm5043_vm4, %v5249_v53, 0.0 }
 0x28e   : > { %5326 = vadd.xlane.f32.xlu1 %v5325_v28  ;;  %v5248_v63 = vmul.f32 %v15163_v6, %v2969_v52  ;;  %v5319_v26 = vsel %vm5043_vm4, %v5247_v35, 0.0 }
 0x28f   : > { %v5328_v1 = vsel %vm5043_vm4, %v5250_v13, 0.0 }
 0x290   : > { %v15216_v37 = vpop.f32.mrb[64].mxu0  ;;  %13222 = vmatmul.mubr.msk.f32.gmra.mrb[102].mxu0 %vm3032_vm0, %v14942_v30  ;;  %5329 = vadd.xlane.f32.xlu0 %v5328_v1  ;;  %v13054_v9 = vpop.f32.mrb[104].mxu1  ;;  %v5322_v48 = vsel %vm5043_vm4, %v5248_v63, 0.0 }
 0x291   : > { %v2974_v4 = vmul.f32 %v13054_v9, %v15110_v34  ;;  %v15221_v7 = vpop.f32.mrb[65].mxu0  ;;  %v2741_v59 = vpop.f32.mrb[105].mxu1  ;;  %13224 = vmatprep.mubr.msk.f32.mxu0 %vm3032_vm0, %v14963_v2 }
 0x292   : > { %v2972_v55 = vmul.f32 %v2741_v59, %v15113_v19  ;;  %v15227_v51 = vpop.f32.mrb[66].mxu0  ;;  %5320 = vadd.xlane.f32.xlu1 %v5319_v26  ;;  %v13055_v44 = vpop.f32.mrb[106].mxu1 }
 0x293   : > { %v5253_v30 = vmul.f32 %v15163_v6, %v2974_v4  ;;  %v2975_v53 = vmul.f32 %v13055_v44, %v15115_v17  ;;  %v15231_v32 = vpop.f32.mrb[67].mxu0  ;;  %v2744_v34 = vpop.f32.mrb[107].mxu1 }
 0x294   : > { %v2973_v45 = vmul.f32 %v2744_v34, %v15118_v49  ;;  %13225 = vmatmul.mubr.msk.f32.gmra.mrb[104].mxu0 %vm3032_vm0, %v14967_v36  ;;  %5323 = vadd.xlane.f32.xlu0 %v5322_v48  ;;  %v5251_v19 = vmul.f32 %v15163_v6, %v2972_v55 }
 0x295   : > { %v5254_v2 = vmul.f32 %v15163_v6, %v2975_v53  ;;  %13227 = vmatprep.mubr.msk.f32.mxu0 %vm3032_vm0, %v14961_v58  ;;  %v5337_v17 = vsel %vm5043_vm4, %v5253_v30, 0.0 }
 0x296   : > { %5338 = vadd.xlane.f32.xlu1 %v5337_v17  ;;  %v5252_v52 = vmul.f32 %v15163_v6, %v2973_v45  ;;  %v5331_v58 = vsel %vm5043_vm4, %v5251_v19, 0.0 }
 0x297   : > { %v5340_v35 = vsel %vm5043_vm4, %v5254_v2, 0.0 }
 0x298   : > { %v15244_v13 = vpop.f32.mrb[68].mxu0  ;;  %13228 = vmatmul.mubr.msk.f32.gmra.mrb[106].mxu0 %vm3032_vm0, %v14965_v29  ;;  %5341 = vadd.xlane.f32.xlu0 %v5340_v35  ;;  %v13058_v49 = vpop.f32.mrb[108].mxu1  ;;  %v5334_v55 = vsel %vm5043_vm4, %v5252_v52, 0.0 }
 0x299   : > { %v2978_v36 = vmul.f32 %v13058_v49, %v15122_v39  ;;  %v15249_v28 = vpop.f32.mrb[69].mxu0  ;;  %v2757_v63 = vpop.f32.mrb[109].mxu1  ;;  %13230 = vmatprep.mubr.msk.f32.mxu0 %vm3032_vm0, %v14989_v46 }
 0x29a   : > { %v2976_v1 = vmul.f32 %v2757_v63, %v15125_v24  ;;  %v15255_v9 = vpop.f32.mrb[70].mxu0  ;;  %5332 = vadd.xlane.f32.xlu1 %v5331_v58  ;;  %v13059_v4 = vpop.f32.mrb[110].mxu1 }
 0x29b   : > { %v5257_v29 = vmul.f32 %v15163_v6, %v2978_v36  ;;  %v2979_v59 = vmul.f32 %v13059_v4, %v15127_v12  ;;  %v15259_v26 = vpop.f32.mrb[71].mxu0  ;;  %v2760_v39 = vpop.f32.mrb[111].mxu1 }
 0x29c   : > { %v2977_v44 = vmul.f32 %v2760_v39, %v15130_v5  ;;  %13231 = vmatmul.mubr.msk.f32.gmra.mrb[108].mxu0 %vm3032_vm0, %v14997_v61  ;;  %5335 = vadd.xlane.f32.xlu0 %v5334_v55  ;;  %v5255_v24 = vmul.f32 %v15163_v6, %v2976_v1 }
 0x29d   : > { %v5258_v46 = vmul.f32 %v15163_v6, %v2979_v59  ;;  %13233 = vmatprep.mubr.msk.f32.mxu0 %vm3032_vm0, %v14987_v38  ;;  %v5349_v12 = vsel %vm5043_vm4, %v5257_v29, 0.0 }
 0x29e   : > { %5350 = vadd.xlane.f32.xlu1 %v5349_v12  ;;  %v5256_v30 = vmul.f32 %v15163_v6, %v2977_v44  ;;  %v5343_v38 = vsel %vm5043_vm4, %v5255_v24, 0.0 }
 0x29f   : > { %v5352_v53 = vsel %vm5043_vm4, %v5258_v46, 0.0 }
 0x2a0   : > { %v15272_v34 = vpop.f32.mrb[72].mxu0  ;;  %13234 = vmatmul.mubr.msk.f32.gmra.mrb[110].mxu0 %vm3032_vm0, %v14993_v23  ;;  %5353 = vadd.xlane.f32.xlu0 %v5352_v53  ;;  %v13062_v61 = vpop.f32.mrb[112].mxu1  ;;  %v5346_v49 = vsel %vm5043_vm4, %v5256_v30, 0.0 }
 0x2a1   : > { %v2982_v5 = vmul.f32 %v13062_v61, %v15134_v0  ;;  %v15277_v48 = vpop.f32.mrb[73].mxu0  ;;  %v2773_v45 = vpop.f32.mrb[113].mxu1  ;;  %13236 = vmatprep.mubr.msk.f32.mxu0 %vm3032_vm0, %v15019_v41 }
 0x2a2   : > { %v2980_v19 = vmul.f32 %v2773_v45, %v15137_v21  ;;  %v15283_v2 = vpop.f32.mrb[74].mxu0  ;;  %5344 = vadd.xlane.f32.xlu1 %v5343_v38  ;;  %v13063_v17 = vpop.f32.mrb[114].mxu1 }
 0x2a3   : > { %v5261_v23 = vmul.f32 %v15163_v6, %v2982_v5  ;;  %v2983_v52 = vmul.f32 %v13063_v17, %v15139_v16  ;;  %v15287_v35 = vpop.f32.mrb[75].mxu0  ;;  %v2776_v0 = vpop.f32.mrb[115].mxu1 }
 0x2a4   : > { %v2981_v36 = vmul.f32 %v2776_v0, %v15142_v33  ;;  %13237 = vmatmul.mubr.msk.f32.gmra.mrb[112].mxu0 %vm3032_vm0, %v15026_v15  ;;  %5347 = vadd.xlane.f32.xlu0 %v5346_v49  ;;  %v5259_v21 = vmul.f32 %v15163_v6, %v2980_v19 }
 0x2a5   : > { %v5262_v41 = vmul.f32 %v15163_v6, %v2983_v52  ;;  %13239 = vmatprep.mubr.msk.f32.mxu0 %vm3032_vm0, %v15017_v14  ;;  %v5361_v16 = vsel %vm5043_vm4, %v5261_v23, 0.0 }
 0x2a6   : > { %5362 = vadd.xlane.f32.xlu1 %v5361_v16  ;;  %v5260_v63 = vmul.f32 %v15163_v6, %v2981_v36  ;;  %v5355_v14 = vsel %vm5043_vm4, %v5259_v21, 0.0 }
 0x2a7   : > { %v5364_v58 = vsel %vm5043_vm4, %v5262_v41, 0.0 }
 0x2a8   : > { %v15300_v1 = vpop.f32.mrb[76].mxu0  ;;  %13240 = vmatmul.mubr.msk.f32.gmra.mrb[114].mxu0 %vm3032_vm0, %v15023_v8  ;;  %5365 = vadd.xlane.f32.xlu0 %v5364_v58  ;;  %v13066_v33 = vpop.f32.mrb[116].mxu1  ;;  %v5358_v46 = vsel %vm5043_vm4, %v5260_v63, 0.0 }
 0x2a9   : > { %v2986_v15 = vmul.f32 %v13066_v33, %v15146_v20  ;;  %v15305_v4 = vpop.f32.mrb[77].mxu0  ;;  %v2789_v29 = vpop.f32.mrb[117].mxu1  ;;  %13242 = vmatprep.mubr.msk.f32.mxu0 %vm3032_vm0, %v15042_v11 }
 0x2aa   : > { %v2984_v59 = vmul.f32 %v2789_v29, %v15149_v31  ;;  %v15311_v39 = vpop.f32.mrb[78].mxu0  ;;  %5356 = vadd.xlane.f32.xlu1 %v5355_v14  ;;  %v13067_v55 = vpop.f32.mrb[118].mxu1 }
 0x2ab   : > { %v5265_v8 = vmul.f32 %v15163_v6, %v2986_v15  ;;  %v2987_v44 = vmul.f32 %v13067_v55, %v15151_v3  ;;  %v15315_v24 = vpop.f32.mrb[79].mxu0  ;;  %v2792_v20 = vpop.f32.mrb[119].mxu1 }
 0x2ac   : > { %v2985_v12 = vmul.f32 %v2792_v20, %v15154_v54  ;;  %13243 = vmatmul.mubr.msk.f32.gmra.mrb[116].mxu0 %vm3032_vm0, %v15048_v40  ;;  %5359 = vadd.xlane.f32.xlu0 %v5358_v46  ;;  %v5263_v31 = vmul.f32 %v15163_v6, %v2984_v59  ;;  %v18148_v46 = vld [vmem:[#allocation43_spill] sm:$0xff] }
 0x2ad   : > { %v5266_v11 = vmul.f32 %v15163_v6, %v2987_v44  ;;  %13245 = vmatprep.mubr.msk.f32.mxu0 %vm3032_vm0, %v15040_v27  ;;  %v5373_v3 = vsel %vm5043_vm4, %v5265_v8, 0.0 }
 0x2ae   : > { %5374 = vadd.xlane.f32.xlu1 %v5373_v3  ;;  %v5264_v30 = vmul.f32 %v15163_v6, %v2985_v12  ;;  %v5367_v27 = vsel %vm5043_vm4, %v5263_v31, 0.0  ;;  %v18149_v31 = vld [vmem:[#allocation40_spill] sm:$0xff] }
 0x2af   : > { %v5376_v53 = vsel %vm5043_vm4, %v5266_v11, 0.0 }
 0x2b0   : > { %v15328_v61 = vpop.f32.mrb[80].mxu0  ;;  %13246 = vmatmul.mubr.msk.f32.gmra.mrb[118].mxu0 %vm3032_vm0, %v15045_v56  ;;  %5377 = vadd.xlane.f32.xlu0 %v5376_v53  ;;  %v13070_v54 = vpop.f32.mrb[120].mxu1  ;;  %v5370_v0 = vsel %vm5043_vm4, %v5264_v30, 0.0 }
 0x2b1   : > { %v2990_v40 = vmul.f32 %v13070_v54, %v15158_v43  ;;  %v15333_v5 = vpop.f32.mrb[81].mxu0  ;;  %v2805_v45 = vpop.f32.mrb[121].mxu1  ;;  %13248 = vmatprep.mubr.msk.f32.mxu0 %vm3032_vm0, %v15058_v42 }
 0x2b2   : > { %v2988_v38 = vmul.f32 %v2805_v45, %v15167_v57  ;;  %v15339_v19 = vpop.f32.mrb[82].mxu0  ;;  %5368 = vadd.xlane.f32.xlu1 %v5367_v27  ;;  %v13071_v17 = vpop.f32.mrb[122].mxu1  ;;  %v18151_v27 = vld [vmem:[#allocation8_spill] sm:$0xff] }
 0x2b3   : > { %v5269_v56 = vmul.f32 %v15163_v6, %v2990_v40  ;;  %v2991_v23 = vmul.f32 %v13071_v17, %v15172_v60  ;;  %v15343_v52 = vpop.f32.mrb[83].mxu0  ;;  %v2808_v43 = vpop.f32.mrb[123].mxu1 }
 0x2b4   : > { %v2989_v49 = vmul.f32 %v2808_v43, %v15176_v50  ;;  %13249 = vmatmul.mubr.msk.f32.gmra.mrb[120].mxu0 %vm3032_vm0, %v15064_v25  ;;  %5371 = vadd.xlane.f32.xlu0 %v5370_v0  ;;  %v5267_v42 = vmul.f32 %v15163_v6, %v2988_v38  ;;  %v18146_v50 = vld [vmem:[#allocation10_spill] sm:$0xff] }
 0x2b5   : > { %v5270_v57 = vmul.f32 %v15163_v6, %v2991_v23  ;;  %13251 = vmatprep.mubr.msk.f32.mxu0 %vm3032_vm0, %v15056_v18  ;;  %v5385_v60 = vsel %vm5043_vm4, %v5269_v56, 0.0  ;;  %v18147_v18 = vld [vmem:[#allocation41_spill] sm:$0xff] }
 0x2b6   : > { %5386 = vadd.xlane.f32.xlu1 %v5385_v60  ;;  %v5268_v36 = vmul.f32 %v15163_v6, %v2989_v49  ;;  %v5379_v33 = vsel %vm5043_vm4, %v5267_v42, 0.0  ;;  %v18152_v60 = vld [vmem:[#allocation11_spill] sm:$0xff] }
 0x2b7   : > { %v5388_v21 = vsel %vm5043_vm4, %v5270_v57, 0.0 }
 0x2b8   : > { %v15356_v41 = vpop.f32.mrb[84].mxu0  ;;  %13252 = vmatmul.mubr.msk.f32.gmra.mrb[122].mxu0 %vm3032_vm0, %v18146_v50  ;;  %5389 = vadd.xlane.f32.xlu0 %v5388_v21  ;;  %v13074_v25 = vpop.f32.mrb[124].mxu1  ;;  %v5382_v44 = vsel %vm5043_vm4, %v5268_v36, 0.0  ;;  %v18153_v21 = vld [vmem:[#allocation7_spill] sm:$0xff] }
 0x2b9   : > { %v2994_v16 = vmul.f32 %v13074_v25, %v15188_v47  ;;  %v15361_v63 = vpop.f32.mrb[85].mxu0  ;;  %v2821_v58 = vpop.f32.mrb[125].mxu1  ;;  %13254 = vmatprep.mubr.msk.f32.mxu0 %vm3032_vm0, %v18147_v18 }
 0x2ba   : > { %v2992_v15 = vmul.f32 %v2821_v58, %v15193_v62  ;;  %v15367_v29 = vpop.f32.mrb[86].mxu0  ;;  %5380 = vadd.xlane.f32.xlu1 %v5379_v33  ;;  %v13075_v14 = vpop.f32.mrb[126].mxu1 }
 0x2bb   : > { %v5273_v59 = vmul.f32 %v15163_v6, %v2994_v16  ;;  %v2995_v55 = vmul.f32 %v13075_v14, %v15199_v22  ;;  %v15371_v8 = vpop.f32.mrb[87].mxu0  ;;  %v2824_v47 = vpop.f32.mrb[127].mxu1  ;;  %v18155_v14 = vld [vmem:[#allocation13_spill] sm:$0xff] }
 0x2bc   : > { %v2993_v20 = vmul.f32 %v2824_v47, %v15203_v10  ;;  %13255 = vmatmul.mubr.msk.f32.gmra.mrb[124].mxu0 %vm3032_vm0, %v18148_v46  ;;  %5383 = vadd.xlane.f32.xlu0 %v5382_v44  ;;  %v5271_v62 = vmul.f32 %v15163_v6, %v2992_v15  ;;  %v18150_v10 = vld [vmem:[#allocation42_spill] sm:$0xff] }
 0x2bd   : > { %v5274_v12 = vmul.f32 %v15163_v6, %v2995_v55  ;;  %13257 = vmatprep.mubr.msk.f32.mxu0 %vm3032_vm0, %v18149_v31  ;;  %v5397_v22 = vsel %vm5043_vm4, %v5273_v59, 0.0 }
 0x2be   : > { %5398 = vadd.xlane.f32.xlu1 %v5397_v22  ;;  %v5272_v11 = vmul.f32 %v15163_v6, %v2993_v20  ;;  %v5391_v38 = vsel %vm5043_vm4, %v5271_v62, 0.0  ;;  %v18156_v22 = vld [vmem:[#allocation15_spill] sm:$0xff] }
 0x2bf   : > { %v5400_v3 = vsel %vm5043_vm4, %v5274_v12, 0.0 }
 0x2c0   : > { %v15384_v30 = vpop.f32.mrb[88].mxu0  ;;  %13258 = vmatmul.mubr.msk.f32.gmra.mrb[126].mxu0 %vm3032_vm0, %v18150_v10  ;;  %5401 = vadd.xlane.f32.xlu0 %v5400_v3  ;;  %v13078_v53 = vpop.f32.mrb[128].mxu1  ;;  %v5394_v42 = vsel %vm5043_vm4, %v5272_v11, 0.0  ;;  %v18157_v3 = vld [vmem:[#allocation12_spill] sm:$0xff] }
 0x2c1   : > { %v2998_v54 = vmul.f32 %v13078_v53, %v15216_v37  ;;  %v15389_v40 = vpop.f32.mrb[89].mxu0  ;;  %v2837_v45 = vpop.f32.mrb[129].mxu1  ;;  %13260 = vmatprep.mubr.msk.f32.mxu0 %vm3032_vm0, %v18151_v27 }
 0x2c2   : > { %v2996_v17 = vmul.f32 %v2837_v45, %v15221_v7  ;;  %v15395_v56 = vpop.f32.mrb[90].mxu0  ;;  %5392 = vadd.xlane.f32.xlu1 %v5391_v38  ;;  %v13079_v23 = vpop.f32.mrb[130].mxu1  ;;  %v18159_v38 = vld [vmem:[#allocation17_spill] sm:$0xff] }
 0x2c3   : > { %v5277_v43 = vmul.f32 %v15163_v6, %v2998_v54  ;;  %v2999_v0 = vmul.f32 %v13079_v23, %v15227_v51  ;;  %v15399_v49 = vpop.f32.mrb[91].mxu0  ;;  %v2840_v37 = vpop.f32.mrb[131].mxu1  ;;  %v18158_v54 = vld [vmem:[#allocation14_spill] sm:$0xff] }
 0x2c4   : > { %v2997_v57 = vmul.f32 %v2840_v37, %v15231_v32  ;;  %13261 = vmatmul.mubr.msk.f32.gmra.mrb[128].mxu0 %vm3032_vm0, %v18152_v60  ;;  %5395 = vadd.xlane.f32.xlu0 %v5394_v42  ;;  %v5275_v7 = vmul.f32 %v15163_v6, %v2996_v17  ;;  %v18154_v32 = vld [vmem:[#allocation9_spill] sm:$0xff] }
 0x2c5   : > { %v5278_v36 = vmul.f32 %v15163_v6, %v2999_v0  ;;  %13263 = vmatprep.mubr.msk.f32.mxu0 %vm3032_vm0, %v18153_v21  ;;  %v5409_v51 = vsel %vm5043_vm4, %v5277_v43, 0.0 }
 0x2c6   : > { %5410 = vadd.xlane.f32.xlu1 %v5409_v51  ;;  %v5276_v50 = vmul.f32 %v15163_v6, %v2997_v57  ;;  %v5403_v59 = vsel %vm5043_vm4, %v5275_v7, 0.0 }
 0x2c7   : > { %v5412_v25 = vsel %vm5043_vm4, %v5278_v36, 0.0 }
 0x2c8   : > { %v15412_v16 = vpop.f32.mrb[92].mxu0  ;;  %13264 = vmatmul.mubr.msk.f32.gmra.mrb[130].mxu0 %vm3032_vm0, %v18154_v32  ;;  %5413 = vadd.xlane.f32.xlu0 %v5412_v25  ;;  %v13082_v58 = vpop.f32.mrb[132].mxu1  ;;  %v5406_v12 = vsel %vm5043_vm4, %v5276_v50, 0.0  ;;  %v18162_v50 = vld [vmem:[#allocation18_spill] sm:$0xff] }
 0x2c9   : > { %v3002_v18 = vmul.f32 %v13082_v58, %v15244_v13  ;;  %v15417_v33 = vpop.f32.mrb[93].mxu0  ;;  %v2853_v15 = vpop.f32.mrb[133].mxu1  ;;  %13266 = vmatprep.mubr.msk.f32.mxu0 %vm3032_vm0, %v18155_v14  ;;  %v18163_v58 = vld [vmem:[#allocation21_spill] sm:$0xff] }
 0x2ca   : > { %v3000_v55 = vmul.f32 %v2853_v15, %v15249_v28  ;;  %v15423_v47 = vpop.f32.mrb[94].mxu0  ;;  %5404 = vadd.xlane.f32.xlu1 %v5403_v59  ;;  %v13083_v44 = vpop.f32.mrb[134].mxu1 }
 0x2cb   : > { %v5281_v20 = vmul.f32 %v15163_v6, %v3002_v18  ;;  %v3003_v46 = vmul.f32 %v13083_v44, %v15255_v9  ;;  %v15427_v62 = vpop.f32.mrb[95].mxu0  ;;  %v2856_v13 = vpop.f32.mrb[135].mxu1 }
 0x2cc   : > { %v3001_v31 = vmul.f32 %v2856_v13, %v15259_v26  ;;  %13267 = vmatmul.mubr.msk.f32.gmra.mrb[132].mxu0 %vm3032_vm0, %v18156_v22  ;;  %5407 = vadd.xlane.f32.xlu0 %v5406_v12  ;;  %v5279_v28 = vmul.f32 %v15163_v6, %v3000_v55 }
 0x2cd   : > { %v5282_v11 = vmul.f32 %v15163_v6, %v3003_v46  ;;  %13269 = vmatprep.mubr.msk.f32.mxu0 %vm3032_vm0, %v18157_v3  ;;  %v5421_v9 = vsel %vm5043_vm4, %v5281_v20, 0.0 }
 0x2ce   : > { %5422 = vadd.xlane.f32.xlu1 %v5421_v9  ;;  %v5280_v10 = vmul.f32 %v15163_v6, %v3001_v31  ;;  %v5415_v17 = vsel %vm5043_vm4, %v5279_v28, 0.0  ;;  %v18166_v28 = vld [vmem:[#allocation22_spill] sm:$0xff]  ;;  %v18167_v9 = vld [vmem:[#allocation25_spill] sm:$0xff] }
 0x2cf   : > { %v5424_v53 = vsel %vm5043_vm4, %v5282_v11, 0.0 }
 0x2d0   : > { %13270 = vmatmul.mubr.msk.f32.gmra.mrb[134].mxu0 %vm3032_vm0, %v18158_v54  ;;  %5425 = vadd.xlane.f32.xlu0 %v5424_v53  ;;  %v13086_v26 = vpop.f32.mrb[136].mxu1  ;;  %v5418_v57 = vsel %vm5043_vm4, %v5280_v10, 0.0 }
 0x2d1   : > { %v3006_v45 = vmul.f32 %v13086_v26, %v15272_v34  ;;  %v2869_v27 = vpop.f32.mrb[137].mxu1  ;;  %13272 = vmatprep.mubr.msk.f32.mxu0 %vm3032_vm0, %v18159_v38  ;;  %v18160_v34 = vld [vmem:[#allocation19_spill] sm:$0xff] }
 0x2d2   : > { %v3004_v23 = vmul.f32 %v2869_v27, %v15277_v48  ;;  %5416 = vadd.xlane.f32.xlu1 %v5415_v17  ;;  %v13087_v43 = vpop.f32.mrb[138].mxu1  ;;  %v18161_v48 = vld [vmem:[#allocation16_spill] sm:$0xff] }
 0x2d3   : > { %v5285_v0 = vmul.f32 %v15163_v6, %v3006_v45  ;;  %v3007_v37 = vmul.f32 %v13087_v43, %v15283_v2  ;;  %v2872_v42 = vpop.f32.mrb[139].mxu1 }
 0x2d4   : > { %v3005_v60 = vmul.f32 %v2872_v42, %v15287_v35  ;;  %13273 = vmatmul.mubr.msk.f32.gmra.mrb[136].mxu0 %vm3032_vm0, %v18160_v34  ;;  %5419 = vadd.xlane.f32.xlu0 %v5418_v57  ;;  %v5283_v7 = vmul.f32 %v15163_v6, %v3004_v23  ;;  %v18170_v42 = vld [vmem:[#allocation26_spill] sm:$0xff]  ;;  %v18171_v34 = vld [vmem:[#allocation29_spill] sm:$0xff] }
 0x2d5   : > { %v5286_v36 = vmul.f32 %v15163_v6, %v3007_v37  ;;  %13275 = vmatprep.mubr.msk.f32.mxu0 %vm3032_vm0, %v18161_v48  ;;  %v5433_v21 = vsel %vm5043_vm4, %v5285_v0, 0.0 }
 0x2d6   : > { %5434 = vadd.xlane.f32.xlu1 %v5433_v21  ;;  %v5284_v2 = vmul.f32 %v15163_v6, %v3005_v60  ;;  %v5427_v18 = vsel %vm5043_vm4, %v5283_v7, 0.0 }
 0x2d7   : > { %v5436_v51 = vsel %vm5043_vm4, %v5286_v36, 0.0 }
 0x2d8   : > { %13276 = vmatmul.mubr.msk.f32.gmra.mrb[138].mxu0 %vm3032_vm0, %v18162_v50  ;;  %5437 = vadd.xlane.f32.xlu0 %v5436_v51  ;;  %v13090_v35 = vpop.f32.mrb[140].mxu1  ;;  %v5430_v20 = vsel %vm5043_vm4, %v5284_v2, 0.0 }
 0x2d9   : > { %v3010_v25 = vmul.f32 %v13090_v35, %v15300_v1  ;;  %v2885_v32 = vpop.f32.mrb[141].mxu1  ;;  %13278 = vmatprep.mubr.msk.f32.mxu0 %vm3032_vm0, %v18163_v58  ;;  %v18164_v1 = vld [vmem:[#allocation23_spill] sm:$0xff] }
 0x2da   : > { %v3008_v15 = vmul.f32 %v2885_v32, %v15305_v4  ;;  %5428 = vadd.xlane.f32.xlu1 %v5427_v18  ;;  %v13091_v14 = vpop.f32.mrb[142].mxu1  ;;  %v18165_v4 = vld [vmem:[#allocation20_spill] sm:$0xff] }
 0x2db   : > { %v5289_v59 = vmul.f32 %v15163_v6, %v3010_v25  ;;  %v3011_v55 = vmul.f32 %v13091_v14, %v15311_v39  ;;  %v2888_v44 = vpop.f32.mrb[143].mxu1 }
 0x2dc   : > { %v3009_v46 = vmul.f32 %v2888_v44, %v15315_v24  ;;  %13279 = vmatmul.mubr.msk.f32.gmra.mrb[140].mxu0 %vm3032_vm0, %v18164_v1  ;;  %5431 = vadd.xlane.f32.xlu0 %v5430_v20  ;;  %v5287_v13 = vmul.f32 %v15163_v6, %v3008_v15  ;;  %v18174_v15 = vld [vmem:[#allocation30_spill] sm:$0xff] }
 0x2dd   : > { %v5290_v12 = vmul.f32 %v15163_v6, %v3011_v55  ;;  %13281 = vmatprep.mubr.msk.f32.mxu0 %vm3032_vm0, %v18165_v4  ;;  %v5445_v31 = vsel %vm5043_vm4, %v5289_v59, 0.0  ;;  %v18175_v55 = vld [vmem:[#allocation33_spill] sm:$0xff] }
 0x2de   : > { %5446 = vadd.xlane.f32.xlu1 %v5445_v31  ;;  %v5288_v39 = vmul.f32 %v15163_v6, %v3009_v46  ;;  %v5439_v10 = vsel %vm5043_vm4, %v5287_v13, 0.0 }
 0x2df   : > { %v5448_v22 = vsel %vm5043_vm4, %v5290_v12, 0.0 }
 0x2e0   : > { %13282 = vmatmul.mubr.msk.f32.gmra.mrb[142].mxu0 %vm3032_vm0, %v18166_v28  ;;  %5449 = vadd.xlane.f32.xlu0 %v5448_v22  ;;  %v13094_v24 = vpop.f32.mrb[144].mxu1  ;;  %v5442_v38 = vsel %vm5043_vm4, %v5288_v39, 0.0 }
 0x2e1   : > { %v3014_v11 = vmul.f32 %v13094_v24, %v15328_v61  ;;  %v2901_v3 = vpop.f32.mrb[145].mxu1  ;;  %13284 = vmatprep.mubr.msk.f32.mxu0 %vm3032_vm0, %v18167_v9  ;;  %v18168_v61 = vld [vmem:[#allocation27_spill] sm:$0xff] }
 0x2e2   : > { %v3012_v53 = vmul.f32 %v2901_v3, %v15333_v5  ;;  %5440 = vadd.xlane.f32.xlu1 %v5439_v10  ;;  %v13095_v54 = vpop.f32.mrb[146].mxu1  ;;  %v18169_v5 = vld [vmem:[#allocation24_spill] sm:$0xff]  ;;  %v18179_v10 = vld [vmem:[#allocation37_spill] sm:$0xff] }
 0x2e3   : > { %v5293_v26 = vmul.f32 %v15163_v6, %v3014_v11  ;;  %v3015_v45 = vmul.f32 %v13095_v54, %v15339_v19  ;;  %v2904_v27 = vpop.f32.mrb[147].mxu1  ;;  %v18178_v11 = vld [vmem:[#allocation34_spill] sm:$0xff] }
 0x2e4   : > { %v3013_v17 = vmul.f32 %v2904_v27, %v15343_v52  ;;  %13285 = vmatmul.mubr.msk.f32.gmra.mrb[144].mxu0 %vm3032_vm0, %v18168_v61  ;;  %5443 = vadd.xlane.f32.xlu0 %v5442_v38  ;;  %v5291_v23 = vmul.f32 %v15163_v6, %v3012_v53 }
 0x2e5   : > { %v5294_v43 = vmul.f32 %v15163_v6, %v3015_v45  ;;  %13287 = vmatprep.mubr.msk.f32.mxu0 %vm3032_vm0, %v18169_v5  ;;  %v5457_v0 = vsel %vm5043_vm4, %v5293_v26, 0.0 }
 0x2e6   : > { %5458 = vadd.xlane.f32.xlu1 %v5457_v0  ;;  %v5292_v19 = vmul.f32 %v15163_v6, %v3013_v17  ;;  %v5451_v7 = vsel %vm5043_vm4, %v5291_v23, 0.0 }
 0x2e7   : > { %v5460_v37 = vsel %vm5043_vm4, %v5294_v43, 0.0 }
 0x2e8   : > { %13288 = vmatmul.mubr.msk.f32.gmra.mrb[146].mxu0 %vm3032_vm0, %v18170_v42  ;;  %5461 = vadd.xlane.f32.xlu0 %v5460_v37  ;;  %v13098_v52 = vpop.f32.mrb[148].mxu1  ;;  %v5454_v50 = vsel %vm5043_vm4, %v5292_v19, 0.0  ;;  %v18182_v19 = vld [vmem:[#allocation38_spill] sm:$0xff]  ;;  %v15567_v42 = vld [vmem:[%s18078_s8] ss:$0 sm:$0xff] }
 0x2e9   : > { %v3018_v57 = vmul.f32 %v13098_v52, %v15356_v41  ;;  %v2917_v60 = vpop.f32.mrb[149].mxu1  ;;  %13290 = vmatprep.mubr.msk.f32.mxu0 %vm3032_vm0, %v18171_v34  ;;  %v18172_v41 = vld [vmem:[#allocation31_spill] sm:$0xff] }
 0x2ea   : > { %v3016_v36 = vmul.f32 %v2917_v60, %v15361_v63  ;;  %5452 = vadd.xlane.f32.xlu1 %v5451_v7  ;;  %v13099_v48 = vpop.f32.mrb[150].mxu1  ;;  %v18173_v63 = vld [vmem:[#allocation28_spill] sm:$0xff] }
 0x2eb   : > { %v5297_v21 = vmul.f32 %v15163_v6, %v3018_v57  ;;  %v3019_v2 = vmul.f32 %v13099_v48, %v15367_v29  ;;  %v2920_v51 = vpop.f32.mrb[151].mxu1 }
 0x2ec   : > { %v3017_v35 = vmul.f32 %v2920_v51, %v15371_v8  ;;  %13291 = vmatmul.mubr.msk.f32.gmra.mrb[148].mxu0 %vm3032_vm0, %v18172_v41  ;;  %5455 = vadd.xlane.f32.xlu0 %v5454_v50  ;;  %v5295_v25 = vmul.f32 %v15163_v6, %v3016_v36 }
 0x2ed   : > { %v5298_v32 = vmul.f32 %v15163_v6, %v3019_v2  ;;  %13293 = vmatprep.mubr.msk.f32.mxu0 %vm3032_vm0, %v18173_v63  ;;  %v5469_v58 = vsel %vm5043_vm4, %v5297_v21, 0.0 }
 0x2ee   : > { %5470 = vadd.xlane.f32.xlu1 %v5469_v58  ;;  %v5296_v29 = vmul.f32 %v15163_v6, %v3017_v35  ;;  %v5463_v44 = vsel %vm5043_vm4, %v5295_v25, 0.0 }
 0x2ef   : > { %v5472_v18 = vsel %vm5043_vm4, %v5298_v32, 0.0 }
 0x2f0   : > { %13294 = vmatmul.mubr.msk.f32.gmra.mrb[150].mxu0 %vm3032_vm0, %v18174_v15  ;;  %5473 = vadd.xlane.f32.xlu0 %v5472_v18  ;;  %v13102_v8 = vpop.f32.mrb[152].mxu1  ;;  %v5466_v4 = vsel %vm5043_vm4, %v5296_v29, 0.0 }
 0x2f1   : > { %v3022_v14 = vmul.f32 %v13102_v8, %v15384_v30  ;;  %v2933_v59 = vpop.f32.mrb[153].mxu1  ;;  %13296 = vmatprep.mubr.msk.f32.mxu0 %vm3032_vm0, %v18175_v55  ;;  %v18176_v30 = vld [vmem:[#allocation35_spill] sm:$0xff] }
 0x2f2   : > { %v3020_v20 = vmul.f32 %v2933_v59, %v15389_v40  ;;  %5464 = vadd.xlane.f32.xlu1 %v5463_v44  ;;  %v13103_v46 = vpop.f32.mrb[154].mxu1  ;;  %v18177_v40 = vld [vmem:[#allocation32_spill] sm:$0xff] }
 0x2f3   : > { %v5301_v1 = vmul.f32 %v15163_v6, %v3022_v14  ;;  %v3023_v13 = vmul.f32 %v13103_v46, %v15395_v56  ;;  %v2936_v12 = vpop.f32.mrb[155].mxu1 }
 0x2f4   : > { %v3021_v31 = vmul.f32 %v2936_v12, %v15399_v49  ;;  %13297 = vmatmul.mubr.msk.f32.gmra.mrb[152].mxu0 %vm3032_vm0, %v18176_v30  ;;  %5467 = vadd.xlane.f32.xlu0 %v5466_v4  ;;  %v5299_v39 = vmul.f32 %v15163_v6, %v3020_v20 }
 0x2f5   : > { %v5302_v22 = vmul.f32 %v15163_v6, %v3023_v13  ;;  %13299 = vmatprep.mubr.msk.f32.mxu0 %vm3032_vm0, %v18177_v40  ;;  %v5481_v28 = vsel %vm5043_vm4, %v5301_v1, 0.0 }
 0x2f6   : > { %5482 = vadd.xlane.f32.xlu1 %v5481_v28  ;;  %v5300_v56 = vmul.f32 %v15163_v6, %v3021_v31  ;;  %v5475_v53 = vsel %vm5043_vm4, %v5299_v39, 0.0 }
 0x2f7   : > { %v5484_v24 = vsel %vm5043_vm4, %v5302_v22, 0.0 }
 0x2f8   : > { %13300 = vmatmul.mubr.msk.f32.gmra.mrb[154].mxu0 %vm3032_vm0, %v18178_v11  ;;  %5485 = vadd.xlane.f32.xlu0 %v5484_v24  ;;  %v13106_v49 = vpop.f32.mrb[156].mxu1  ;;  %v5478_v17 = vsel %vm5043_vm4, %v5300_v56, 0.0 }
 0x2f9   : > { %v3026_v3 = vmul.f32 %v13106_v49, %v15412_v16  ;;  %v2949_v9 = vpop.f32.mrb[157].mxu1  ;;  %13302 = vmatprep.mubr.msk.f32.mxu0 %vm3032_vm0, %v18179_v10  ;;  %v18180_v16 = vld [vmem:[#allocation39_spill] sm:$0xff] }
 0x2fa   : > { %v3024_v54 = vmul.f32 %v2949_v9, %v15417_v33  ;;  %5476 = vadd.xlane.f32.xlu1 %v5475_v53  ;;  %v13107_v26 = vpop.f32.mrb[158].mxu1  ;;  %v18181_v33 = vld [vmem:[#allocation36_spill] sm:$0xff] }
 0x2fb   : > { %v5305_v45 = vmul.f32 %v15163_v6, %v3026_v3  ;;  %v3027_v27 = vmul.f32 %v13107_v26, %v15423_v47  ;;  %v2952_v38 = vpop.f32.mrb[159].mxu1 }
 0x2fc   : > { %v3025_v61 = vmul.f32 %v2952_v38, %v15427_v62  ;;  %13303 = vmatmul.mubr.msk.f32.gmra.mrb[156].mxu0 %vm3032_vm0, %v18180_v16  ;;  %5479 = vadd.xlane.f32.xlu0 %v5478_v17  ;;  %v5303_v23 = vmul.f32 %v15163_v6, %v3024_v54 }
 0x2fd   : > { %v5306_v43 = vmul.f32 %v15163_v6, %v3027_v27  ;;  %13305 = vmatprep.mubr.msk.f32.mxu0 %vm3032_vm0, %v18181_v33  ;;  %v5493_v5 = vsel %vm5043_vm4, %v5305_v45, 0.0 }
 0x2fe   : > { %5494 = vadd.xlane.f32.xlu1 %v5493_v5  ;;  %v5304_v47 = vmul.f32 %v15163_v6, %v3025_v61  ;;  %v5487_v62 = vsel %vm5043_vm4, %v5303_v23, 0.0 }
 0x2ff   : > { %v5496_v0 = vsel %vm5043_vm4, %v5306_v43, 0.0 }
 0x300   : > { %13306 = vmatmul.mubr.msk.f32.gmra.mrb[158].mxu0 %vm3032_vm0, %v18182_v19  ;;  %5497 = vadd.xlane.f32.xlu0 %v5496_v0  ;;  %v5490_v37 = vsel %vm5043_vm4, %v5304_v47, 0.0 }
 0x302   : > { %5488 = vadd.xlane.f32.xlu1 %v5487_v62 }
 0x304   : > { %5491 = vadd.xlane.f32.xlu0 %v5490_v37 }
 0x357   : > { %v13214_v52 = vpop.f32.mrb[96].mxu0 }
 0x358   : > { %v4195_v6 = vadd.f32 %v13214_v52, %v15567_v42  ;;  %v3868_v57 = vpop.f32.mrb[97].mxu0 }
 0x359   : > { %v4194_v60 = vadd.f32 %v15567_v42, %v3868_v57 }
 0x35a   : > { %v4259_v36 = vmax.f32 %v4195_v6, 0.0 }
 0x35b   : > { %v4258_v34 = vmax.f32 %v4194_v60, 0.0  ;;  %v13217_v7 = vpop.f32.mrb[98].mxu0 }
 0x35c   : > { %v4197_v48 = vadd.f32 %v13217_v7, %v15567_v42  ;;  %v3878_v21 = vpop.f32.mrb[99].mxu0 }
 0x35d   : > { %v4196_v2 = vadd.f32 %v15567_v42, %v3878_v21  ;;  %13312 = vmatprep.mubr.msk.f32.mxu1 %vm3032_vm0, %v4258_v34 }
 0x35e   : > { %13313 = vmatmul.mubr.msk.f32.vlgmr.msra.gmra.mrb[160].mxu1 %vm3032_vm0, %v4259_v36  ;;  %v4261_v35 = vmax.f32 %v4197_v48, 0.0 }
 0x35f   : > { %v4260_v51 = vmax.f32 %v4196_v2, 0.0  ;;  %v13220_v50 = vpop.f32.mrb[100].mxu0 }
 0x360   : > { %v4199_v41 = vadd.f32 %v13220_v50, %v15567_v42  ;;  %v3888_v25 = vpop.f32.mrb[101].mxu0 }
 0x361   : > { %v4198_v32 = vadd.f32 %v15567_v42, %v3888_v25  ;;  %13315 = vmatprep.mubr.msk.f32.mxu1 %vm3032_vm0, %v4260_v51 }
 0x362   : > { %13316 = vmatmul.mubr.msk.f32.gmra.mrb[162].mxu1 %vm3032_vm0, %v4261_v35  ;;  %v4263_v29 = vmax.f32 %v4199_v41, 0.0 }
 0x363   : > { %v4262_v63 = vmax.f32 %v4198_v32, 0.0  ;;  %v13223_v58 = vpop.f32.mrb[102].mxu0 }
 0x364   : > { %v4201_v18 = vadd.f32 %v13223_v58, %v15567_v42  ;;  %v3898_v15 = vpop.f32.mrb[103].mxu0 }
 0x365   : > { %v4200_v8 = vadd.f32 %v15567_v42, %v3898_v15  ;;  %13318 = vmatprep.mubr.msk.f32.mxu1 %vm3032_vm0, %v4262_v63 }
 0x366   : > { %13319 = vmatmul.mubr.msk.f32.gmra.mrb[164].mxu1 %vm3032_vm0, %v4263_v29  ;;  %v4265_v55 = vmax.f32 %v4201_v18, 0.0 }
 0x367   : > { %v4264_v14 = vmax.f32 %v4200_v8, 0.0  ;;  %v13226_v59 = vpop.f32.mrb[104].mxu0 }
 0x368   : > { %v4203_v44 = vadd.f32 %v13226_v59, %v15567_v42  ;;  %v3908_v20 = vpop.f32.mrb[105].mxu0 }
 0x369   : > { %v4202_v46 = vadd.f32 %v15567_v42, %v3908_v20  ;;  %13321 = vmatprep.mubr.msk.f32.mxu1 %vm3032_vm0, %v4264_v14 }
 0x36a   : > { %13322 = vmatmul.mubr.msk.f32.gmra.mrb[166].mxu1 %vm3032_vm0, %v4265_v55  ;;  %v4267_v12 = vmax.f32 %v4203_v44, 0.0 }
 0x36b   : > { %v4266_v1 = vmax.f32 %v4202_v46, 0.0  ;;  %v13229_v13 = vpop.f32.mrb[106].mxu0 }
 0x36c   : > { %v4205_v4 = vadd.f32 %v13229_v13, %v15567_v42  ;;  %v3918_v31 = vpop.f32.mrb[107].mxu0 }
 0x36d   : > { %v4204_v30 = vadd.f32 %v15567_v42, %v3918_v31  ;;  %13324 = vmatprep.mubr.msk.f32.mxu1 %vm3032_vm0, %v4266_v1 }
 0x36e   : > { %13325 = vmatmul.mubr.msk.f32.gmra.mrb[168].mxu1 %vm3032_vm0, %v4267_v12  ;;  %v4269_v40 = vmax.f32 %v4205_v4, 0.0 }
 0x36f   : > { %v4268_v39 = vmax.f32 %v4204_v30, 0.0  ;;  %v13232_v22 = vpop.f32.mrb[108].mxu0 }
 0x370   : > { %v4207_v28 = vadd.f32 %v13232_v22, %v15567_v42  ;;  %v3928_v56 = vpop.f32.mrb[109].mxu0 }
 0x371   : > { %v4206_v24 = vadd.f32 %v15567_v42, %v3928_v56  ;;  %13327 = vmatprep.mubr.msk.f32.mxu1 %vm3032_vm0, %v4268_v39 }
 0x372   : > { %13328 = vmatmul.mubr.msk.f32.gmra.mrb[170].mxu1 %vm3032_vm0, %v4269_v40  ;;  %v4271_v3 = vmax.f32 %v4207_v28, 0.0 }
 0x373   : > { %v4270_v11 = vmax.f32 %v4206_v24, 0.0  ;;  %v13235_v49 = vpop.f32.mrb[110].mxu0 }
 0x374   : > { %v4209_v9 = vadd.f32 %v13235_v49, %v15567_v42  ;;  %v3938_v10 = vpop.f32.mrb[111].mxu0 }
 0x375   : > { %v4208_v53 = vadd.f32 %v15567_v42, %v3938_v10  ;;  %13330 = vmatprep.mubr.msk.f32.mxu1 %vm3032_vm0, %v4270_v11 }
 0x376   : > { %13331 = vmatmul.mubr.msk.f32.gmra.mrb[172].mxu1 %vm3032_vm0, %v4271_v3  ;;  %v4273_v45 = vmax.f32 %v4209_v9, 0.0 }
 0x377   : > { %v4272_v54 = vmax.f32 %v4208_v53, 0.0  ;;  %v13238_v26 = vpop.f32.mrb[112].mxu0 }
 0x378   : > { %v4211_v27 = vadd.f32 %v13238_v26, %v15567_v42  ;;  %v3948_v38 = vpop.f32.mrb[113].mxu0 }
 0x379   : > { %v4210_v17 = vadd.f32 %v15567_v42, %v3948_v38  ;;  %13333 = vmatprep.mubr.msk.f32.mxu1 %vm3032_vm0, %v4272_v54 }
 0x37a   : > { %13334 = vmatmul.mubr.msk.f32.gmra.mrb[174].mxu1 %vm3032_vm0, %v4273_v45  ;;  %v4275_v23 = vmax.f32 %v4211_v27, 0.0 }
 0x37b   : > { %v4274_v61 = vmax.f32 %v4210_v17, 0.0  ;;  %v13241_v16 = vpop.f32.mrb[114].mxu0 }
 0x37c   : > { %v4213_v43 = vadd.f32 %v13241_v16, %v15567_v42  ;;  %v3958_v33 = vpop.f32.mrb[115].mxu0 }
 0x37d   : > { %v4212_v5 = vadd.f32 %v15567_v42, %v3958_v33  ;;  %13336 = vmatprep.mubr.msk.f32.mxu1 %vm3032_vm0, %v4274_v61 }
 0x37e   : > { %13337 = vmatmul.mubr.msk.f32.gmra.mrb[176].mxu1 %vm3032_vm0, %v4275_v23  ;;  %v4277_v19 = vmax.f32 %v4213_v43, 0.0 }
 0x37f   : > { %v4276_v47 = vmax.f32 %v4212_v5, 0.0  ;;  %v13244_v0 = vpop.f32.mrb[116].mxu0 }
 0x380   : > { %v4215_v62 = vadd.f32 %v13244_v0, %v15567_v42  ;;  %v3968_v37 = vpop.f32.mrb[117].mxu0 }
 0x381   : > { %v4214_v52 = vadd.f32 %v15567_v42, %v3968_v37  ;;  %13339 = vmatprep.mubr.msk.f32.mxu1 %vm3032_vm0, %v4276_v47 }
 0x382   : > { %13340 = vmatmul.mubr.msk.f32.gmra.mrb[178].mxu1 %vm3032_vm0, %v4277_v19  ;;  %v4279_v60 = vmax.f32 %v4215_v62, 0.0 }
 0x383   : > { %v4278_v6 = vmax.f32 %v4214_v52, 0.0  ;;  %v13247_v57 = vpop.f32.mrb[118].mxu0 }
 0x384   : > { %v4217_v34 = vadd.f32 %v13247_v57, %v15567_v42  ;;  %v3978_v7 = vpop.f32.mrb[119].mxu0 }
 0x385   : > { %v4216_v36 = vadd.f32 %v15567_v42, %v3978_v7  ;;  %13342 = vmatprep.mubr.msk.f32.mxu1 %vm3032_vm0, %v4278_v6 }
 0x386   : > { %13343 = vmatmul.mubr.msk.f32.gmra.mrb[180].mxu1 %vm3032_vm0, %v4279_v60  ;;  %v4281_v2 = vmax.f32 %v4217_v34, 0.0 }
 0x387   : > { %v4280_v48 = vmax.f32 %v4216_v36, 0.0  ;;  %v13250_v21 = vpop.f32.mrb[120].mxu0 }
 0x388   : > { %v4219_v51 = vadd.f32 %v13250_v21, %v15567_v42  ;;  %v3988_v50 = vpop.f32.mrb[121].mxu0 }
 0x389   : > { %v4218_v35 = vadd.f32 %v15567_v42, %v3988_v50  ;;  %13345 = vmatprep.mubr.msk.f32.mxu1 %vm3032_vm0, %v4280_v48 }
 0x38a   : > { %13346 = vmatmul.mubr.msk.f32.gmra.mrb[182].mxu1 %vm3032_vm0, %v4281_v2  ;;  %v4283_v32 = vmax.f32 %v4219_v51, 0.0 }
 0x38b   : > { %v4282_v41 = vmax.f32 %v4218_v35, 0.0  ;;  %v13253_v25 = vpop.f32.mrb[122].mxu0 }
 0x38c   : > { %v4221_v63 = vadd.f32 %v13253_v25, %v15567_v42  ;;  %v3998_v58 = vpop.f32.mrb[123].mxu0 }
 0x38d   : > { %v4220_v29 = vadd.f32 %v15567_v42, %v3998_v58  ;;  %13348 = vmatprep.mubr.msk.f32.mxu1 %vm3032_vm0, %v4282_v41 }
 0x38e   : > { %13349 = vmatmul.mubr.msk.f32.gmra.mrb[184].mxu1 %vm3032_vm0, %v4283_v32  ;;  %v4285_v8 = vmax.f32 %v4221_v63, 0.0 }
 0x38f   : > { %v4284_v18 = vmax.f32 %v4220_v29, 0.0  ;;  %v13256_v15 = vpop.f32.mrb[124].mxu0 }
 0x390   : > { %v4223_v14 = vadd.f32 %v13256_v15, %v15567_v42  ;;  %v4008_v59 = vpop.f32.mrb[125].mxu0 }
 0x391   : > { %v4222_v55 = vadd.f32 %v15567_v42, %v4008_v59  ;;  %13351 = vmatprep.mubr.msk.f32.mxu1 %vm3032_vm0, %v4284_v18 }
 0x392   : > { %13352 = vmatmul.mubr.msk.f32.gmra.mrb[186].mxu1 %vm3032_vm0, %v4285_v8  ;;  %v4287_v46 = vmax.f32 %v4223_v14, 0.0 }
 0x393   : > { %v4286_v44 = vmax.f32 %v4222_v55, 0.0  ;;  %v13259_v20 = vpop.f32.mrb[126].mxu0 }
 0x394   : > { %v4225_v1 = vadd.f32 %v13259_v20, %v15567_v42  ;;  %v4018_v13 = vpop.f32.mrb[127].mxu0 }
 0x395   : > { %v4224_v12 = vadd.f32 %v15567_v42, %v4018_v13  ;;  %13354 = vmatprep.mubr.msk.f32.mxu1 %vm3032_vm0, %v4286_v44 }
 0x396   : > { %13355 = vmatmul.mubr.msk.f32.gmra.mrb[188].mxu1 %vm3032_vm0, %v4287_v46  ;;  %v4289_v30 = vmax.f32 %v4225_v1, 0.0 }
 0x397   : > { %v4288_v4 = vmax.f32 %v4224_v12, 0.0  ;;  %v13262_v31 = vpop.f32.mrb[128].mxu0 }
 0x398   : > { %v4227_v39 = vadd.f32 %v13262_v31, %v15567_v42  ;;  %v4028_v22 = vpop.f32.mrb[129].mxu0 }
 0x399   : > { %v4226_v40 = vadd.f32 %v15567_v42, %v4028_v22  ;;  %13357 = vmatprep.mubr.msk.f32.mxu1 %vm3032_vm0, %v4288_v4 }
 0x39a   : > { %13358 = vmatmul.mubr.msk.f32.gmra.mrb[190].mxu1 %vm3032_vm0, %v4289_v30  ;;  %v4291_v24 = vmax.f32 %v4227_v39, 0.0 }
 0x39b   : > { %v4290_v28 = vmax.f32 %v4226_v40, 0.0  ;;  %v13265_v56 = vpop.f32.mrb[130].mxu0 }
 0x39c   : > { %v4229_v11 = vadd.f32 %v13265_v56, %v15567_v42  ;;  %v4038_v49 = vpop.f32.mrb[131].mxu0 }
 0x39d   : > { %v4228_v3 = vadd.f32 %v15567_v42, %v4038_v49  ;;  %13360 = vmatprep.mubr.msk.f32.mxu1 %vm3032_vm0, %v4290_v28 }
 0x39e   : > { %13361 = vmatmul.mubr.msk.f32.gmra.mrb[192].mxu1 %vm3032_vm0, %v4291_v24  ;;  %v4293_v53 = vmax.f32 %v4229_v11, 0.0 }
 0x39f   : > { %v4292_v9 = vmax.f32 %v4228_v3, 0.0  ;;  %v13268_v10 = vpop.f32.mrb[132].mxu0 }
 0x3a0   : > { %v4231_v54 = vadd.f32 %v13268_v10, %v15567_v42  ;;  %v4048_v26 = vpop.f32.mrb[133].mxu0 }
 0x3a1   : > { %v4230_v45 = vadd.f32 %v15567_v42, %v4048_v26  ;;  %13363 = vmatprep.mubr.msk.f32.mxu1 %vm3032_vm0, %v4292_v9 }
 0x3a2   : > { %13364 = vmatmul.mubr.msk.f32.gmra.mrb[194].mxu1 %vm3032_vm0, %v4293_v53  ;;  %v4295_v17 = vmax.f32 %v4231_v54, 0.0 }
 0x3a3   : > { %v4294_v27 = vmax.f32 %v4230_v45, 0.0  ;;  %v13271_v38 = vpop.f32.mrb[134].mxu0 }
 0x3a4   : > { %v4233_v61 = vadd.f32 %v13271_v38, %v15567_v42  ;;  %v4058_v16 = vpop.f32.mrb[135].mxu0 }
 0x3a5   : > { %v4232_v23 = vadd.f32 %v15567_v42, %v4058_v16  ;;  %13366 = vmatprep.mubr.msk.f32.mxu1 %vm3032_vm0, %v4294_v27 }
 0x3a6   : > { %13367 = vmatmul.mubr.msk.f32.gmra.mrb[196].mxu1 %vm3032_vm0, %v4295_v17  ;;  %v4297_v5 = vmax.f32 %v4233_v61, 0.0 }
 0x3a7   : > { %v4296_v43 = vmax.f32 %v4232_v23, 0.0  ;;  %v13274_v33 = vpop.f32.mrb[136].mxu0 }
 0x3a8   : > { %v4235_v47 = vadd.f32 %v13274_v33, %v15567_v42  ;;  %v4068_v0 = vpop.f32.mrb[137].mxu0 }
 0x3a9   : > { %v4234_v19 = vadd.f32 %v15567_v42, %v4068_v0  ;;  %13369 = vmatprep.mubr.msk.f32.mxu1 %vm3032_vm0, %v4296_v43 }
 0x3aa   : > { %13370 = vmatmul.mubr.msk.f32.gmra.mrb[198].mxu1 %vm3032_vm0, %v4297_v5  ;;  %v4299_v52 = vmax.f32 %v4235_v47, 0.0 }
 0x3ab   : > { %v4298_v62 = vmax.f32 %v4234_v19, 0.0  ;;  %v13277_v37 = vpop.f32.mrb[138].mxu0 }
 0x3ac   : > { %v4237_v6 = vadd.f32 %v13277_v37, %v15567_v42  ;;  %v4078_v57 = vpop.f32.mrb[139].mxu0 }
 0x3ad   : > { %v4236_v60 = vadd.f32 %v15567_v42, %v4078_v57  ;;  %13372 = vmatprep.mubr.msk.f32.mxu1 %vm3032_vm0, %v4298_v62 }
 0x3ae   : > { %13373 = vmatmul.mubr.msk.f32.gmra.mrb[200].mxu1 %vm3032_vm0, %v4299_v52  ;;  %v4301_v36 = vmax.f32 %v4237_v6, 0.0 }
 0x3af   : > { %v4300_v34 = vmax.f32 %v4236_v60, 0.0  ;;  %v13280_v7 = vpop.f32.mrb[140].mxu0  ;;  %v15697_v60 = vpop.xlane.xlu1 %5314 }
 0x3b0   : > { %v4239_v48 = vadd.f32 %v13280_v7, %v15567_v42  ;;  %v4088_v21 = vpop.f32.mrb[141].mxu0 }
 0x3b1   : > { %v4238_v2 = vadd.f32 %v15567_v42, %v4088_v21  ;;  %13375 = vmatprep.mubr.msk.f32.mxu1 %vm3032_vm0, %v4300_v34  ;;  %v15699_v34 = vpop.xlane.xlu0 %5317 }
 0x3b2   : > { %13376 = vmatmul.mubr.msk.f32.gmra.mrb[202].mxu1 %vm3032_vm0, %v4301_v36  ;;  %v4303_v35 = vmax.f32 %v4239_v48, 0.0 }
 0x3b3   : > { %v4302_v51 = vmax.f32 %v4238_v2, 0.0  ;;  %v13283_v50 = vpop.f32.mrb[142].mxu0  ;;  %v15701_v7 = vpop.xlane.xlu1 %5308 }
 0x3b4   : > { %v4241_v41 = vadd.f32 %v13283_v50, %v15567_v42  ;;  %v4098_v25 = vpop.f32.mrb[143].mxu0 }
 0x3b5   : > { %v4240_v32 = vadd.f32 %v15567_v42, %v4098_v25  ;;  %13378 = vmatprep.mubr.msk.f32.mxu1 %vm3032_vm0, %v4302_v51  ;;  %v15703_v36 = vpop.xlane.xlu0 %5311 }
 0x3b6   : > { %13379 = vmatmul.mubr.msk.f32.gmra.mrb[204].mxu1 %vm3032_vm0, %v4303_v35  ;;  %v4305_v29 = vmax.f32 %v4241_v41, 0.0 }
 0x3b7   : > { %v4304_v63 = vmax.f32 %v4240_v32, 0.0  ;;  %v13286_v58 = vpop.f32.mrb[144].mxu0  ;;  %v15705_v48 = vpop.xlane.xlu1 %5326 }
 0x3b8   : > { %v4243_v18 = vadd.f32 %v13286_v58, %v15567_v42  ;;  %v4108_v15 = vpop.f32.mrb[145].mxu0 }
 0x3b9   : > { %v4242_v8 = vadd.f32 %v15567_v42, %v4108_v15  ;;  %13381 = vmatprep.mubr.msk.f32.mxu1 %vm3032_vm0, %v4304_v63  ;;  %v15728_v63 = vld [vmem:[%s18080_s10] ss:$0 sm:$0xff] }
 0x3ba   : > { %13382 = vmatmul.mubr.msk.f32.gmra.mrb[206].mxu1 %vm3032_vm0, %v4305_v29  ;;  %v4307_v55 = vmax.f32 %v4243_v18, 0.0 }
 0x3bb   : > { %v4306_v14 = vmax.f32 %v4242_v8, 0.0  ;;  %v13289_v59 = vpop.f32.mrb[146].mxu0  ;;  %v15709_v21 = vpop.xlane.xlu1 %5320 }
 0x3bc   : > { %v4245_v44 = vadd.f32 %v13289_v59, %v15567_v42  ;;  %v4118_v20 = vpop.f32.mrb[147].mxu0 }
 0x3bd   : > { %v4244_v46 = vadd.f32 %v15567_v42, %v4118_v20  ;;  %13384 = vmatprep.mubr.msk.f32.mxu1 %vm3032_vm0, %v4306_v14  ;;  %v15738_v14 = vld [vmem:[%s18081_s11] ss:$0 sm:$0xff] }
 0x3be   : > { %13385 = vmatmul.mubr.msk.f32.gmra.mrb[208].mxu1 %vm3032_vm0, %v4307_v55  ;;  %v4309_v12 = vmax.f32 %v4245_v44, 0.0 }
 0x3bf   : > { %v4308_v1 = vmax.f32 %v4244_v46, 0.0  ;;  %v13292_v13 = vpop.f32.mrb[148].mxu0  ;;  %v15713_v51 = vpop.xlane.xlu1 %5338 }
 0x3c0   : > { %v4247_v4 = vadd.f32 %v13292_v13, %v15567_v42  ;;  %v4128_v31 = vpop.f32.mrb[149].mxu0 }
 0x3c1   : > { %v4246_v30 = vadd.f32 %v15567_v42, %v4128_v31  ;;  %13387 = vmatprep.mubr.msk.f32.mxu1 %vm3032_vm0, %v4308_v1 }
 0x3c2   : > { %13388 = vmatmul.mubr.msk.f32.gmra.mrb[210].mxu1 %vm3032_vm0, %v4309_v12  ;;  %v4311_v40 = vmax.f32 %v4247_v4, 0.0 }
 0x3c3   : > { %v4310_v39 = vmax.f32 %v4246_v30, 0.0  ;;  %v13295_v22 = vpop.f32.mrb[150].mxu0  ;;  %v15717_v35 = vpop.xlane.xlu1 %5332 }
 0x3c4   : > { %v4249_v28 = vadd.f32 %v13295_v22, %v15567_v42  ;;  %v4138_v56 = vpop.f32.mrb[151].mxu0 }
 0x3c5   : > { %v4248_v24 = vadd.f32 %v15567_v42, %v4138_v56  ;;  %13390 = vmatprep.mubr.msk.f32.mxu1 %vm3032_vm0, %v4310_v39 }
 0x3c6   : > { %13391 = vmatmul.mubr.msk.f32.gmra.mrb[212].mxu1 %vm3032_vm0, %v4311_v40  ;;  %v4313_v3 = vmax.f32 %v4249_v28, 0.0 }
 0x3c7   : > { %v4312_v11 = vmax.f32 %v4248_v24, 0.0  ;;  %v13298_v49 = vpop.f32.mrb[152].mxu0  ;;  %v15721_v25 = vpop.xlane.xlu1 %5350 }
 0x3c8   : > { %v4251_v9 = vadd.f32 %v13298_v49, %v15567_v42  ;;  %v4148_v10 = vpop.f32.mrb[153].mxu0 }
 0x3c9   : > { %v4250_v53 = vadd.f32 %v15567_v42, %v4148_v10  ;;  %13393 = vmatprep.mubr.msk.f32.mxu1 %vm3032_vm0, %v4312_v11 }
 0x3ca   : > { %13394 = vmatmul.mubr.msk.f32.gmra.mrb[214].mxu1 %vm3032_vm0, %v4313_v3  ;;  %v4315_v45 = vmax.f32 %v4251_v9, 0.0 }
 0x3cb   : > { %v4314_v54 = vmax.f32 %v4250_v53, 0.0  ;;  %v13301_v26 = vpop.f32.mrb[154].mxu0  ;;  %v15730_v29 = vpop.xlane.xlu1 %5344 }
 0x3cc   : > { %v4253_v27 = vadd.f32 %v13301_v26, %v15567_v42  ;;  %v4158_v38 = vpop.f32.mrb[155].mxu0 }
 0x3cd   : > { %v4252_v17 = vadd.f32 %v15567_v42, %v4158_v38  ;;  %13396 = vmatprep.mubr.msk.f32.mxu1 %vm3032_vm0, %v4314_v54 }
 0x3ce   : > { %13397 = vmatmul.mubr.msk.f32.gmra.mrb[216].mxu1 %vm3032_vm0, %v4315_v45  ;;  %v4317_v23 = vmax.f32 %v4253_v27, 0.0 }
 0x3cf   : > { %v4316_v61 = vmax.f32 %v4252_v17, 0.0  ;;  %v13304_v16 = vpop.f32.mrb[156].mxu0  ;;  %v15745_v31 = vpop.xlane.xlu1 %5362 }
 0x3d0   : > { %v4255_v43 = vadd.f32 %v13304_v16, %v15567_v42  ;;  %v4168_v33 = vpop.f32.mrb[157].mxu0 }
 0x3d1   : > { %v4254_v5 = vadd.f32 %v15567_v42, %v4168_v33  ;;  %13399 = vmatprep.mubr.msk.f32.mxu1 %vm3032_vm0, %v4316_v61 }
 0x3d2   : > { %13400 = vmatmul.mubr.msk.f32.gmra.mrb[218].mxu1 %vm3032_vm0, %v4317_v23  ;;  %v4319_v19 = vmax.f32 %v4255_v43, 0.0 }
 0x3d3   : > { %v4318_v47 = vmax.f32 %v4254_v5, 0.0  ;;  %v13307_v0 = vpop.f32.mrb[158].mxu0  ;;  %v15756_v45 = vpop.xlane.xlu1 %5356 }
 0x3d4   : > { %v4257_v62 = vadd.f32 %v13307_v0, %v15567_v42  ;;  %v4178_v37 = vpop.f32.mrb[159].mxu0 }
 0x3d5   : > { %v4256_v52 = vadd.f32 %v15567_v42, %v4178_v37  ;;  %13402 = vmatprep.mubr.msk.f32.mxu1 %vm3032_vm0, %v4318_v47  ;;  %v15707_v42 = vpop.xlane.xlu0 %5329 }
 0x3d6   : > { %13403 = vmatmul.mubr.msk.f32.gmra.mrb[220].mxu1 %vm3032_vm0, %v4319_v19  ;;  %v4321_v57 = vmax.f32 %v4257_v62, 0.0 }
 0x3d7   : > { %v4320_v6 = vmax.f32 %v4256_v52, 0.0 }
 0x3d9   : > { %13405 = vmatprep.mubr.msk.f32.mxu1 %vm3032_vm0, %v4320_v6  ;;  %v15711_v2 = vpop.xlane.xlu0 %5323  ;;  %v15769_v6 = vpop.xlane.xlu1 %5374 }
 0x3da   : > { %13406 = vmatmul.mubr.msk.f32.gmra.mrb[222].mxu1 %vm3032_vm0, %v4321_v57  ;;  %vm11560_vm0 = vcmask 1048512  }
 0x3dd   : > { %v15715_v50 = vpop.xlane.xlu0 %5341 }
 0x3e1   : > { %v15719_v41 = vpop.xlane.xlu0 %5335 }
 0x3e5   : > { %v15723_v32 = vpop.xlane.xlu0 %5353 }
 0x3e9   : > { %v15733_v8 = vpop.xlane.xlu0 %5347 }
 0x3ed   : > { %v15748_v22 = vpop.xlane.xlu0 %5365 }
 0x3f1   : > { %v15759_v17 = vpop.xlane.xlu0 %5359 }
 0x431   : > { %v13314_v58 = vpop.f32.mrb[160].mxu1 }
 0x432   : > { %v4595_v18 = vadd.f32 %v13314_v58, %v15728_v63  ;;  %v4589_v15 = vpop.f32.mrb[161].mxu1  ;;  %v15772_v58 = vpop.xlane.xlu0 %5377 }
 0x433   : > { %v4590_v59 = vadd.f32 %v15728_v63, %v4589_v15 }
 0x434   : > { %v4909_v55 = vmax.f32 %v4595_v18, 0.0 }
 0x435   : > { %v4908_v44 = vmax.f32 %v4590_v59, 0.0  ;;  %v13317_v20 = vpop.f32.mrb[162].mxu1 }
 0x436   : > { %v4980_v46 = vmul.f32 %v15738_v14, %v4909_v55  ;;  %v4605_v1 = vadd.f32 %v13317_v20, %v15728_v63  ;;  %v4599_v13 = vpop.f32.mrb[163].mxu1 }
 0x437   : > { %v4979_v12 = vmul.f32 %v15738_v14, %v4908_v44  ;;  %v4600_v4 = vadd.f32 %v15728_v63, %v4599_v13 }
 0x438   : > { %v4911_v30 = vmax.f32 %v4605_v1, 0.0  ;;  %v5047_v39 = vsel %vm5043_vm4, %v4980_v46, 0.0 }
 0x439   : > { %v4910_v40 = vmax.f32 %v4600_v4, 0.0  ;;  %5048 = vadd.xlane.f32.xlu1 %v5047_v39  ;;  %v13320_v28 = vpop.f32.mrb[164].mxu1  ;;  %v5044_v56 = vsel %vm5043_vm4, %v4979_v12, 0.0 }
 0x43a   : > { %v4982_v24 = vmul.f32 %v15738_v14, %v4911_v30  ;;  %v4615_v11 = vadd.f32 %v13320_v28, %v15728_v63  ;;  %v4609_v49 = vpop.f32.mrb[165].mxu1  ;;  %5045 = vadd.xlane.f32.xlu0 %v5044_v56  ;;  %v15782_v56 = vpop.xlane.xlu1 %5368 }
 0x43b   : > { %v4610_v3 = vadd.f32 %v15728_v63, %v4609_v49  ;;  %v4981_v53 = vmul.f32 %v15738_v14, %v4910_v40  ;;  %v15785_v49 = vpop.xlane.xlu0 %5371 }
 0x43c   : > { %v4913_v9 = vmax.f32 %v4615_v11, 0.0  ;;  %v5053_v10 = vsel %vm5043_vm4, %v4982_v24, 0.0 }
 0x43d   : > { %v4912_v54 = vmax.f32 %v4610_v3, 0.0  ;;  %v13323_v26 = vpop.f32.mrb[166].mxu1  ;;  %v5050_v0 = vsel %vm5043_vm4, %v4981_v53, 0.0 }
 0x43e   : > { %v4625_v27 = vadd.f32 %v13323_v26, %v15728_v63  ;;  %v4619_v38 = vpop.f32.mrb[167].mxu1  ;;  %5054 = vadd.xlane.f32.xlu0 %v5053_v10  ;;  %v4984_v23 = vmul.f32 %v15738_v14, %v4913_v9 }
 0x43f   : > { %v4983_v61 = vmul.f32 %v15738_v14, %v4912_v54  ;;  %v4620_v16 = vadd.f32 %v15728_v63, %v4619_v38 }
 0x440   : > { %v4915_v43 = vmax.f32 %v4625_v27, 0.0  ;;  %v5059_v57 = vsel %vm5043_vm4, %v4984_v23, 0.0 }
 0x441   : > { %v4914_v33 = vmax.f32 %v4620_v16, 0.0  ;;  %v13326_v5 = vpop.f32.mrb[168].mxu1  ;;  %v5056_v47 = vsel %vm5043_vm4, %v4983_v61, 0.0 }
 0x442   : > { %v4635_v19 = vadd.f32 %v13326_v5, %v15728_v63  ;;  %v4629_v62 = vpop.f32.mrb[169].mxu1  ;;  %5057 = vadd.xlane.f32.xlu1 %v5056_v47  ;;  %5051 = vadd.xlane.f32.xlu0 %v5050_v0  ;;  %v4986_v18 = vmul.f32 %v15738_v14, %v4915_v43  ;;  %v15798_v47 = vpop.xlane.xlu0 %5389 }
 0x443   : > { %v4985_v37 = vmul.f32 %v15738_v14, %v4914_v33  ;;  %v4630_v52 = vadd.f32 %v15728_v63, %v4629_v62  ;;  %v15795_v33 = vpop.xlane.xlu1 %5386 }
 0x444   : > { %v4917_v15 = vmax.f32 %v4635_v19, 0.0  ;;  %v5065_v28 = vsel %vm5043_vm4, %v4986_v18, 0.0 }
 0x445   : > { %v4916_v59 = vmax.f32 %v4630_v52, 0.0  ;;  %v13329_v55 = vpop.f32.mrb[170].mxu1  ;;  %v5062_v44 = vsel %vm5043_vm4, %v4985_v37, 0.0 }
 0x446   : > { %v4645_v20 = vadd.f32 %v13329_v55, %v15728_v63  ;;  %v4639_v46 = vpop.f32.mrb[171].mxu1  ;;  %5063 = vadd.xlane.f32.xlu1 %v5062_v44  ;;  %5060 = vadd.xlane.f32.xlu0 %v5059_v57  ;;  %v4988_v4 = vmul.f32 %v15738_v14, %v4917_v15 }
 0x447   : > { %v4987_v1 = vmul.f32 %v15738_v14, %v4916_v59  ;;  %v4640_v13 = vadd.f32 %v15728_v63, %v4639_v46 }
 0x448   : > { %v4919_v12 = vmax.f32 %v4645_v20, 0.0  ;;  %v5071_v38 = vsel %vm5043_vm4, %v4988_v4, 0.0 }
 0x449   : > { %v4918_v30 = vmax.f32 %v4640_v13, 0.0  ;;  %v13332_v39 = vpop.f32.mrb[172].mxu1  ;;  %v5068_v40 = vsel %vm5043_vm4, %v4987_v1, 0.0 }
 0x44a   : > { %v4655_v24 = vadd.f32 %v13332_v39, %v15728_v63  ;;  %v4649_v11 = vpop.f32.mrb[173].mxu1  ;;  %5069 = vadd.xlane.f32.xlu1 %v5068_v40  ;;  %5066 = vadd.xlane.f32.xlu0 %v5065_v28  ;;  %v4990_v10 = vmul.f32 %v15738_v14, %v4919_v12  ;;  %v15808_v12 = vpop.xlane.xlu1 %5380 }
 0x44b   : > { %v4989_v3 = vmul.f32 %v15738_v14, %v4918_v30  ;;  %v4650_v9 = vadd.f32 %v15728_v63, %v4649_v11  ;;  %v15811_v39 = vpop.xlane.xlu0 %5383 }
 0x44c   : > { %v4921_v53 = vmax.f32 %v4655_v24, 0.0  ;;  %v5077_v5 = vsel %vm5043_vm4, %v4990_v10, 0.0 }
 0x44d   : > { %v4920_v54 = vmax.f32 %v4650_v9, 0.0  ;;  %v13335_v26 = vpop.f32.mrb[174].mxu1  ;;  %v5074_v27 = vsel %vm5043_vm4, %v4989_v3, 0.0 }
 0x44e   : > { %v4665_v61 = vadd.f32 %v13335_v26, %v15728_v63  ;;  %v4659_v16 = vpop.f32.mrb[175].mxu1  ;;  %5075 = vadd.xlane.f32.xlu1 %v5074_v27  ;;  %5072 = vadd.xlane.f32.xlu0 %v5071_v38  ;;  %v4992_v0 = vmul.f32 %v15738_v14, %v4921_v53 }
 0x44f   : > { %v4991_v23 = vmul.f32 %v15738_v14, %v4920_v54  ;;  %v4660_v43 = vadd.f32 %v15728_v63, %v4659_v16 }
 0x450   : > { %v4923_v19 = vmax.f32 %v4665_v61, 0.0  ;;  %v5083_v13 = vsel %vm5043_vm4, %v4992_v0, 0.0  ;;  %v15821_v61 = vpop.xlane.xlu1 %5398 }
 0x451   : > { %v4922_v62 = vmax.f32 %v4660_v43, 0.0  ;;  %v13338_v37 = vpop.f32.mrb[176].mxu1  ;;  %v5080_v52 = vsel %vm5043_vm4, %v4991_v23, 0.0  ;;  %v15824_v23 = vpop.xlane.xlu0 %5401 }
 0x452   : > { %v4675_v57 = vadd.f32 %v13338_v37, %v15728_v63  ;;  %v4669_v18 = vpop.f32.mrb[177].mxu1  ;;  %5081 = vadd.xlane.f32.xlu1 %v5080_v52  ;;  %5078 = vadd.xlane.f32.xlu0 %v5077_v5  ;;  %v4994_v44 = vmul.f32 %v15738_v14, %v4923_v19 }
 0x453   : > { %v4993_v15 = vmul.f32 %v15738_v14, %v4922_v62  ;;  %v4670_v59 = vadd.f32 %v15728_v63, %v4669_v18 }
 0x454   : > { %v4925_v55 = vmax.f32 %v4675_v57, 0.0  ;;  %v5089_v53 = vsel %vm5043_vm4, %v4994_v44, 0.0 }
 0x455   : > { %v4924_v20 = vmax.f32 %v4670_v59, 0.0  ;;  %v13341_v46 = vpop.f32.mrb[178].mxu1  ;;  %v5086_v1 = vsel %vm5043_vm4, %v4993_v15, 0.0 }
 0x456   : > { %v4685_v4 = vadd.f32 %v13341_v46, %v15728_v63  ;;  %v4679_v30 = vpop.f32.mrb[179].mxu1  ;;  %5087 = vadd.xlane.f32.xlu1 %v5086_v1  ;;  %5084 = vadd.xlane.f32.xlu0 %v5083_v13  ;;  %v4996_v24 = vmul.f32 %v15738_v14, %v4925_v55  ;;  %v15834_v1 = vpop.xlane.xlu1 %5392 }
 0x457   : > { %v4995_v40 = vmul.f32 %v15738_v14, %v4924_v20  ;;  %v4680_v28 = vadd.f32 %v15728_v63, %v4679_v30  ;;  %v15837_v30 = vpop.xlane.xlu0 %5395 }
 0x458   : > { %v4927_v11 = vmax.f32 %v4685_v4, 0.0  ;;  %v5095_v16 = vsel %vm5043_vm4, %v4996_v24, 0.0 }
 0x459   : > { %v4926_v3 = vmax.f32 %v4680_v28, 0.0  ;;  %v13344_v9 = vpop.f32.mrb[180].mxu1  ;;  %v5092_v10 = vsel %vm5043_vm4, %v4995_v40, 0.0 }
 0x45a   : > { %v4695_v54 = vadd.f32 %v13344_v9, %v15728_v63  ;;  %v4689_v26 = vpop.f32.mrb[181].mxu1  ;;  %5093 = vadd.xlane.f32.xlu1 %v5092_v10  ;;  %5090 = vadd.xlane.f32.xlu0 %v5089_v53  ;;  %v4998_v43 = vmul.f32 %v15738_v14, %v4927_v11 }
 0x45b   : > { %v4997_v27 = vmul.f32 %v15738_v14, %v4926_v3  ;;  %v4690_v38 = vadd.f32 %v15728_v63, %v4689_v26 }
 0x45c   : > { %v4929_v5 = vmax.f32 %v4695_v54, 0.0  ;;  %v5101_v46 = vsel %vm5043_vm4, %v4998_v43, 0.0 }
 0x45d   : > { %v4928_v0 = vmax.f32 %v4690_v38, 0.0  ;;  %v13347_v19 = vpop.f32.mrb[182].mxu1  ;;  %v5098_v62 = vsel %vm5043_vm4, %v4997_v27, 0.0 }
 0x45e   : > { %v4705_v37 = vadd.f32 %v13347_v19, %v15728_v63  ;;  %v4699_v52 = vpop.f32.mrb[183].mxu1  ;;  %5099 = vadd.xlane.f32.xlu1 %v5098_v62  ;;  %5096 = vadd.xlane.f32.xlu0 %v5095_v16  ;;  %v5000_v59 = vmul.f32 %v15738_v14, %v4929_v5  ;;  %v15847_v16 = vpop.xlane.xlu1 %5410 }
 0x45f   : > { %v4999_v57 = vmul.f32 %v15738_v14, %v4928_v0  ;;  %v4700_v18 = vadd.f32 %v15728_v63, %v4699_v52  ;;  %v15850_v5 = vpop.xlane.xlu0 %5413 }
 0x460   : > { %v4931_v15 = vmax.f32 %v4705_v37, 0.0  ;;  %v5107_v53 = vsel %vm5043_vm4, %v5000_v59, 0.0 }
 0x461   : > { %v4930_v55 = vmax.f32 %v4700_v18, 0.0  ;;  %v13350_v44 = vpop.f32.mrb[184].mxu1  ;;  %v5104_v20 = vsel %vm5043_vm4, %v4999_v57, 0.0 }
 0x462   : > { %v4715_v13 = vadd.f32 %v13350_v44, %v15728_v63  ;;  %v4709_v4 = vpop.f32.mrb[185].mxu1  ;;  %5105 = vadd.xlane.f32.xlu1 %v5104_v20  ;;  %5102 = vadd.xlane.f32.xlu0 %v5101_v46  ;;  %v5002_v24 = vmul.f32 %v15738_v14, %v4931_v15 }
 0x463   : > { %v5001_v40 = vmul.f32 %v15738_v14, %v4930_v55  ;;  %v4710_v28 = vadd.f32 %v15728_v63, %v4709_v4 }
 0x464   : > { %v4933_v11 = vmax.f32 %v4715_v13, 0.0  ;;  %v5113_v43 = vsel %vm5043_vm4, %v5002_v24, 0.0 }
 0x465   : > { %v4932_v3 = vmax.f32 %v4710_v28, 0.0  ;;  %v13353_v9 = vpop.f32.mrb[186].mxu1  ;;  %v5110_v10 = vsel %vm5043_vm4, %v5001_v40, 0.0  ;;  %v15860_v40 = vpop.xlane.xlu1 %5404 }
 0x466   : > { %v4725_v54 = vadd.f32 %v13353_v9, %v15728_v63  ;;  %v4719_v26 = vpop.f32.mrb[187].mxu1  ;;  %5111 = vadd.xlane.f32.xlu1 %v5110_v10  ;;  %5108 = vadd.xlane.f32.xlu0 %v5107_v53  ;;  %v5004_v0 = vmul.f32 %v15738_v14, %v4933_v11  ;;  %v15863_v11 = vpop.xlane.xlu0 %5407 }
 0x467   : > { %v5003_v27 = vmul.f32 %v15738_v14, %v4932_v3  ;;  %v4720_v38 = vadd.f32 %v15728_v63, %v4719_v26 }
 0x468   : > { %v4935_v19 = vmax.f32 %v4725_v54, 0.0  ;;  %v5119_v4 = vsel %vm5043_vm4, %v5004_v0, 0.0 }
 0x469   : > { %v4934_v62 = vmax.f32 %v4720_v38, 0.0  ;;  %v13356_v37 = vpop.f32.mrb[188].mxu1  ;;  %v5116_v52 = vsel %vm5043_vm4, %v5003_v27, 0.0 }
 0x46a   : > { %v4735_v57 = vadd.f32 %v13356_v37, %v15728_v63  ;;  %v4729_v18 = vpop.f32.mrb[189].mxu1  ;;  %5117 = vadd.xlane.f32.xlu1 %v5116_v52  ;;  %5114 = vadd.xlane.f32.xlu0 %v5113_v43  ;;  %v5006_v44 = vmul.f32 %v15738_v14, %v4935_v19  ;;  %v15873_v37 = vpop.xlane.xlu1 %5422 }
 0x46b   : > { %v5005_v15 = vmul.f32 %v15738_v14, %v4934_v62  ;;  %v4730_v59 = vadd.f32 %v15728_v63, %v4729_v18 }
 0x46c   : > { %v4937_v55 = vmax.f32 %v4735_v57, 0.0  ;;  %v5125_v38 = vsel %vm5043_vm4, %v5006_v44, 0.0  ;;  %v15876_v57 = vpop.xlane.xlu0 %5425 }
 0x46d   : > { %v4936_v20 = vmax.f32 %v4730_v59, 0.0  ;;  %v13359_v46 = vpop.f32.mrb[190].mxu1  ;;  %v5122_v13 = vsel %vm5043_vm4, %v5005_v15, 0.0  ;;  %18183 = vst [vmem:[#allocation10_spill] sm:$0xff] %v15876_v57 }
 0x46e   : > { %v4745_v28 = vadd.f32 %v13359_v46, %v15728_v63  ;;  %v4739_v24 = vpop.f32.mrb[191].mxu1  ;;  %5123 = vadd.xlane.f32.xlu1 %v5122_v13  ;;  %5120 = vadd.xlane.f32.xlu0 %v5119_v4  ;;  %v5008_v10 = vmul.f32 %v15738_v14, %v4937_v55 }
 0x46f   : > { %v5007_v3 = vmul.f32 %v15738_v14, %v4936_v20  ;;  %v4740_v9 = vadd.f32 %v15728_v63, %v4739_v24 }
 0x470   : > { %v4939_v53 = vmax.f32 %v4745_v28, 0.0  ;;  %v5131_v52 = vsel %vm5043_vm4, %v5008_v10, 0.0 }
 0x471   : > { %v4938_v54 = vmax.f32 %v4740_v9, 0.0  ;;  %v13362_v26 = vpop.f32.mrb[192].mxu1  ;;  %v5128_v27 = vsel %vm5043_vm4, %v5007_v3, 0.0 }
 0x472   : > { %v4755_v43 = vadd.f32 %v13362_v26, %v15728_v63  ;;  %v4749_v0 = vpop.f32.mrb[193].mxu1  ;;  %5129 = vadd.xlane.f32.xlu1 %v5128_v27  ;;  %5126 = vadd.xlane.f32.xlu0 %v5125_v38  ;;  %v5010_v18 = vmul.f32 %v15738_v14, %v4939_v53  ;;  %v15889_v38 = vpop.xlane.xlu0 %5419 }
 0x473   : > { %v5009_v19 = vmul.f32 %v15738_v14, %v4938_v54  ;;  %v4750_v62 = vadd.f32 %v15728_v63, %v4749_v0  ;;  %v15886_v54 = vpop.xlane.xlu1 %5416 }
 0x474   : > { %v4941_v15 = vmax.f32 %v4755_v43, 0.0  ;;  %v5137_v53 = vsel %vm5043_vm4, %v5010_v18, 0.0 }
 0x475   : > { %v4940_v59 = vmax.f32 %v4750_v62, 0.0  ;;  %v13365_v55 = vpop.f32.mrb[194].mxu1  ;;  %v5134_v44 = vsel %vm5043_vm4, %v5009_v19, 0.0 }
 0x476   : > { %v4765_v20 = vadd.f32 %v13365_v55, %v15728_v63  ;;  %v4759_v46 = vpop.f32.mrb[195].mxu1  ;;  %5135 = vadd.xlane.f32.xlu1 %v5134_v44  ;;  %5132 = vadd.xlane.f32.xlu0 %v5131_v52  ;;  %v5012_v24 = vmul.f32 %v15738_v14, %v4941_v15 }
 0x477   : > { %v5011_v13 = vmul.f32 %v15738_v14, %v4940_v59  ;;  %v4760_v4 = vadd.f32 %v15728_v63, %v4759_v46 }
 0x478   : > { %v4943_v28 = vmax.f32 %v4765_v20, 0.0  ;;  %v5143_v59 = vsel %vm5043_vm4, %v5012_v24, 0.0 }
 0x479   : > { %v4942_v3 = vmax.f32 %v4760_v4, 0.0  ;;  %v13368_v9 = vpop.f32.mrb[196].mxu1  ;;  %v5140_v10 = vsel %vm5043_vm4, %v5011_v13, 0.0  ;;  %v15899_v13 = vpop.xlane.xlu1 %5434 }
 0x47a   : > { %v4775_v26 = vadd.f32 %v13368_v9, %v15728_v63  ;;  %v4769_v27 = vpop.f32.mrb[197].mxu1  ;;  %5141 = vadd.xlane.f32.xlu1 %v5140_v10  ;;  %5138 = vadd.xlane.f32.xlu0 %v5137_v53  ;;  %v5014_v19 = vmul.f32 %v15738_v14, %v4943_v28  ;;  %18184 = vst [vmem:[#allocation41_spill] sm:$0xff] %v15899_v13  ;;  %v15902_v28 = vpop.xlane.xlu0 %5437 }
 0x47b   : > { %v5013_v43 = vmul.f32 %v15738_v14, %v4942_v3  ;;  %v4770_v0 = vadd.f32 %v15728_v63, %v4769_v27  ;;  %18185 = vst [vmem:[#allocation43_spill] sm:$0xff] %v15902_v28 }
 0x47c   : > { %v4945_v62 = vmax.f32 %v4775_v26, 0.0  ;;  %v5149_v4 = vsel %vm5043_vm4, %v5014_v19, 0.0 }
 0x47d   : > { %v4944_v52 = vmax.f32 %v4770_v0, 0.0  ;;  %v13371_v15 = vpop.f32.mrb[198].mxu1  ;;  %v5146_v18 = vsel %vm5043_vm4, %v5013_v43, 0.0 }
 0x47e   : > { %v4785_v55 = vadd.f32 %v13371_v15, %v15728_v63  ;;  %v4779_v44 = vpop.f32.mrb[199].mxu1  ;;  %5147 = vadd.xlane.f32.xlu1 %v5146_v18  ;;  %5144 = vadd.xlane.f32.xlu0 %v5143_v59  ;;  %v5016_v3 = vmul.f32 %v15738_v14, %v4945_v62 }
 0x47f   : > { %v5015_v20 = vmul.f32 %v15738_v14, %v4944_v52  ;;  %v4780_v46 = vadd.f32 %v15728_v63, %v4779_v44 }
 0x480   : > { %v4947_v9 = vmax.f32 %v4785_v55, 0.0  ;;  %v5155_v59 = vsel %vm5043_vm4, %v5016_v3, 0.0  ;;  %v15912_v55 = vpop.xlane.xlu1 %5428 }
 0x481   : > { %v4946_v10 = vmax.f32 %v4780_v46, 0.0  ;;  %v13374_v24 = vpop.f32.mrb[200].mxu1  ;;  %v5152_v53 = vsel %vm5043_vm4, %v5015_v20, 0.0  ;;  %v15915_v46 = vpop.xlane.xlu0 %5431 }
 0x482   : > { %v4795_v26 = vadd.f32 %v13374_v24, %v15728_v63  ;;  %v4789_v27 = vpop.f32.mrb[201].mxu1  ;;  %5153 = vadd.xlane.f32.xlu1 %v5152_v53  ;;  %5150 = vadd.xlane.f32.xlu0 %v5149_v4  ;;  %v5018_v19 = vmul.f32 %v15738_v14, %v4947_v9  ;;  %18186 = vst [vmem:[#allocation40_spill] sm:$0xff] %v15915_v46 }
 0x483   : > { %v5017_v43 = vmul.f32 %v15738_v14, %v4946_v10  ;;  %v4790_v0 = vadd.f32 %v15728_v63, %v4789_v27 }
 0x484   : > { %v4949_v52 = vmax.f32 %v4795_v26, 0.0  ;;  %v5161_v27 = vsel %vm5043_vm4, %v5018_v19, 0.0 }
 0x485   : > { %v4948_v15 = vmax.f32 %v4790_v0, 0.0  ;;  %v13377_v18 = vpop.f32.mrb[202].mxu1  ;;  %v5158_v62 = vsel %vm5043_vm4, %v5017_v43, 0.0 }
 0x486   : > { %v4805_v44 = vadd.f32 %v13377_v18, %v15728_v63  ;;  %v4799_v20 = vpop.f32.mrb[203].mxu1  ;;  %5159 = vadd.xlane.f32.xlu1 %v5158_v62  ;;  %5156 = vadd.xlane.f32.xlu0 %v5155_v59  ;;  %v5020_v9 = vmul.f32 %v15738_v14, %v4949_v52  ;;  %v15925_v62 = vpop.xlane.xlu1 %5446 }
 0x487   : > { %v5019_v4 = vmul.f32 %v15738_v14, %v4948_v15  ;;  %v4800_v10 = vadd.f32 %v15728_v63, %v4799_v20  ;;  %18187 = vst [vmem:[#allocation42_spill] sm:$0xff] %v15925_v62  ;;  %v15928_v59 = vpop.xlane.xlu0 %5449 }
 0x488   : > { %v4951_v24 = vmax.f32 %v4805_v44, 0.0  ;;  %v5167_v52 = vsel %vm5043_vm4, %v5020_v9, 0.0  ;;  %18188 = vst [vmem:[#allocation8_spill] sm:$0xff] %v15928_v59 }
 0x489   : > { %v4950_v53 = vmax.f32 %v4800_v10, 0.0  ;;  %v13380_v26 = vpop.f32.mrb[204].mxu1  ;;  %v5164_v3 = vsel %vm5043_vm4, %v5019_v4, 0.0 }
 0x48a   : > { %v4815_v43 = vadd.f32 %v13380_v26, %v15728_v63  ;;  %v4809_v0 = vpop.f32.mrb[205].mxu1  ;;  %5165 = vadd.xlane.f32.xlu1 %v5164_v3  ;;  %5162 = vadd.xlane.f32.xlu0 %v5161_v27  ;;  %v5022_v44 = vmul.f32 %v15738_v14, %v4951_v24 }
 0x48b   : > { %v5021_v18 = vmul.f32 %v15738_v14, %v4950_v53  ;;  %v4810_v15 = vadd.f32 %v15728_v63, %v4809_v0 }
 0x48c   : > { %v4953_v20 = vmax.f32 %v4815_v43, 0.0  ;;  %v5173_v43 = vsel %vm5043_vm4, %v5022_v44, 0.0 }
 0x48d   : > { %v4952_v4 = vmax.f32 %v4810_v15, 0.0  ;;  %v13383_v19 = vpop.f32.mrb[206].mxu1  ;;  %v5170_v10 = vsel %vm5043_vm4, %v5021_v18, 0.0  ;;  %v15938_v15 = vpop.xlane.xlu1 %5440 }
 0x48e   : > { %v4825_v26 = vadd.f32 %v13383_v19, %v15728_v63  ;;  %v4819_v3 = vpop.f32.mrb[207].mxu1  ;;  %5171 = vadd.xlane.f32.xlu1 %v5170_v10  ;;  %5168 = vadd.xlane.f32.xlu0 %v5167_v52  ;;  %v5024_v9 = vmul.f32 %v15738_v14, %v4953_v20  ;;  %18189 = vst [vmem:[#allocation11_spill] sm:$0xff] %v15938_v15  ;;  %v15941_v52 = vpop.xlane.xlu0 %5443 }
 0x48f   : > { %v5023_v53 = vmul.f32 %v15738_v14, %v4952_v4  ;;  %v4820_v27 = vadd.f32 %v15728_v63, %v4819_v3  ;;  %18190 = vst [vmem:[#allocation7_spill] sm:$0xff] %v15941_v52 }
 0x490   : > { %v4955_v0 = vmax.f32 %v4825_v26, 0.0 }
 0x491   : > { %v4954_v59 = vmax.f32 %v4820_v27, 0.0  ;;  %v13386_v62 = vpop.f32.mrb[208].mxu1  ;;  %v5176_v24 = vsel %vm5043_vm4, %v5023_v53, 0.0  ;;  %v5179_v27 = vsel %vm5043_vm4, %v5024_v9, 0.0 }
 0x492   : > { %v4835_v18 = vadd.f32 %v13386_v62, %v15728_v63  ;;  %v4829_v19 = vpop.f32.mrb[209].mxu1  ;;  %5177 = vadd.xlane.f32.xlu1 %v5176_v24  ;;  %5174 = vadd.xlane.f32.xlu0 %v5173_v43  ;;  %v5026_v20 = vmul.f32 %v15738_v14, %v4955_v0  ;;  %v15951_v43 = vpop.xlane.xlu1 %5458 }
 0x493   : > { %v5025_v4 = vmul.f32 %v15738_v14, %v4954_v59  ;;  %v4830_v10 = vadd.f32 %v15728_v63, %v4829_v19  ;;  %18191 = vst [vmem:[#allocation9_spill] sm:$0xff] %v15951_v43 }
 0x494   : > { %v4957_v26 = vmax.f32 %v4835_v18, 0.0  ;;  %v5185_v0 = vsel %vm5043_vm4, %v5026_v20, 0.0  ;;  %v15954_v18 = vpop.xlane.xlu0 %5461 }
 0x495   : > { %v4956_v3 = vmax.f32 %v4830_v10, 0.0  ;;  %v13389_v53 = vpop.f32.mrb[210].mxu1  ;;  %v5182_v44 = vsel %vm5043_vm4, %v5025_v4, 0.0  ;;  %18192 = vst [vmem:[#allocation13_spill] sm:$0xff] %v15954_v18 }
 0x496   : > { %v4845_v62 = vadd.f32 %v13389_v53, %v15728_v63  ;;  %v4839_v28 = vpop.f32.mrb[211].mxu1  ;;  %5183 = vadd.xlane.f32.xlu1 %v5182_v44  ;;  %5180 = vadd.xlane.f32.xlu0 %v5179_v27  ;;  %v5028_v19 = vmul.f32 %v15738_v14, %v4957_v26 }
 0x497   : > { %v5027_v24 = vmul.f32 %v15738_v14, %v4956_v3  ;;  %v4840_v59 = vadd.f32 %v15728_v63, %v4839_v28 }
 0x498   : > { %v4959_v4 = vmax.f32 %v4845_v62, 0.0  ;;  %v5191_v62 = vsel %vm5043_vm4, %v5028_v19, 0.0 }
 0x499   : > { %v4958_v10 = vmax.f32 %v4840_v59, 0.0  ;;  %v13392_v9 = vpop.f32.mrb[212].mxu1  ;;  %v5188_v53 = vsel %vm5043_vm4, %v5027_v24, 0.0  ;;  %v15964_v59 = vpop.xlane.xlu1 %5452 }
 0x49a   : > { %v4855_v44 = vadd.f32 %v13392_v9, %v15728_v63  ;;  %v4849_v27 = vpop.f32.mrb[213].mxu1  ;;  %5189 = vadd.xlane.f32.xlu1 %v5188_v53  ;;  %5186 = vadd.xlane.f32.xlu0 %v5185_v0  ;;  %v5030_v20 = vmul.f32 %v15738_v14, %v4959_v4  ;;  %18193 = vst [vmem:[#allocation15_spill] sm:$0xff] %v15964_v59  ;;  %v15967_v0 = vpop.xlane.xlu0 %5455 }
 0x49b   : > { %v5029_v28 = vmul.f32 %v15738_v14, %v4958_v10  ;;  %v4850_v3 = vadd.f32 %v15728_v63, %v4849_v27  ;;  %18194 = vst [vmem:[#allocation12_spill] sm:$0xff] %v15967_v0 }
 0x49c   : > { %v4961_v43 = vmax.f32 %v4855_v44, 0.0 }
 0x49d   : > { %v4960_v18 = vmax.f32 %v4850_v3, 0.0  ;;  %v13395_v52 = vpop.f32.mrb[214].mxu1  ;;  %v5194_v26 = vsel %vm5043_vm4, %v5029_v28, 0.0  ;;  %v5197_v3 = vsel %vm5043_vm4, %v5030_v20, 0.0 }
 0x49e   : > { %v4865_v24 = vadd.f32 %v13395_v52, %v15728_v63  ;;  %v4859_v9 = vpop.f32.mrb[215].mxu1  ;;  %5195 = vadd.xlane.f32.xlu1 %v5194_v26  ;;  %5192 = vadd.xlane.f32.xlu0 %v5191_v62  ;;  %v5032_v4 = vmul.f32 %v15738_v14, %v4961_v43  ;;  %v15977_v62 = vpop.xlane.xlu1 %5470 }
 0x49f   : > { %v5031_v10 = vmul.f32 %v15738_v14, %v4960_v18  ;;  %v4860_v53 = vadd.f32 %v15728_v63, %v4859_v9  ;;  %18195 = vst [vmem:[#allocation14_spill] sm:$0xff] %v15977_v62 }
 0x4a0   : > { %v4963_v44 = vmax.f32 %v4865_v24, 0.0  ;;  %v5203_v43 = vsel %vm5043_vm4, %v5032_v4, 0.0  ;;  %v15980_v24 = vpop.xlane.xlu0 %5473 }
 0x4a1   : > { %v4962_v27 = vmax.f32 %v4860_v53, 0.0  ;;  %v13398_v28 = vpop.f32.mrb[216].mxu1  ;;  %v5200_v19 = vsel %vm5043_vm4, %v5031_v10, 0.0  ;;  %18196 = vst [vmem:[#allocation17_spill] sm:$0xff] %v15980_v24 }
 0x4a2   : > { %v4875_v52 = vadd.f32 %v13398_v28, %v15728_v63  ;;  %v4869_v59 = vpop.f32.mrb[217].mxu1  ;;  %5201 = vadd.xlane.f32.xlu1 %v5200_v19  ;;  %5198 = vadd.xlane.f32.xlu0 %v5197_v3  ;;  %v5034_v9 = vmul.f32 %v15738_v14, %v4963_v44 }
 0x4a3   : > { %v5033_v26 = vmul.f32 %v15738_v14, %v4962_v27  ;;  %v4870_v18 = vadd.f32 %v15728_v63, %v4869_v59 }
 0x4a4   : > { %v4965_v10 = vmax.f32 %v4875_v52, 0.0  ;;  %v5209_v52 = vsel %vm5043_vm4, %v5034_v9, 0.0 }
 0x4a5   : > { %v4964_v53 = vmax.f32 %v4870_v18, 0.0  ;;  %v13401_v20 = vpop.f32.mrb[218].mxu1  ;;  %v5206_v28 = vsel %vm5043_vm4, %v5033_v26, 0.0  ;;  %v15990_v18 = vpop.xlane.xlu1 %5464 }
 0x4a6   : > { %v4885_v19 = vadd.f32 %v13401_v20, %v15728_v63  ;;  %v4879_v3 = vpop.f32.mrb[219].mxu1  ;;  %5207 = vadd.xlane.f32.xlu1 %v5206_v28  ;;  %5204 = vadd.xlane.f32.xlu0 %v5203_v43  ;;  %v5036_v4 = vmul.f32 %v15738_v14, %v4965_v10  ;;  %18197 = vst [vmem:[#allocation19_spill] sm:$0xff] %v15990_v18  ;;  %v15993_v43 = vpop.xlane.xlu0 %5467 }
 0x4a7   : > { %v5035_v59 = vmul.f32 %v15738_v14, %v4964_v53  ;;  %v4880_v27 = vadd.f32 %v15728_v63, %v4879_v3  ;;  %18198 = vst [vmem:[#allocation16_spill] sm:$0xff] %v15993_v43 }
 0x4a8   : > { %v4967_v62 = vmax.f32 %v4885_v19, 0.0 }
 0x4a9   : > { %v4966_v24 = vmax.f32 %v4880_v27, 0.0  ;;  %v13404_v0 = vpop.f32.mrb[220].mxu1  ;;  %v5212_v44 = vsel %vm5043_vm4, %v5035_v59, 0.0  ;;  %v5215_v27 = vsel %vm5043_vm4, %v5036_v4, 0.0 }
 0x4aa   : > { %v4895_v26 = vadd.f32 %v13404_v0, %v15728_v63  ;;  %v4889_v20 = vpop.f32.mrb[221].mxu1  ;;  %5213 = vadd.xlane.f32.xlu1 %v5212_v44  ;;  %5210 = vadd.xlane.f32.xlu0 %v5209_v52  ;;  %v5038_v10 = vmul.f32 %v15738_v14, %v4967_v62  ;;  %v16003_v52 = vpop.xlane.xlu1 %5482 }
 0x4ab   : > { %v5037_v53 = vmul.f32 %v15738_v14, %v4966_v24  ;;  %v4890_v28 = vadd.f32 %v15728_v63, %v4889_v20  ;;  %18199 = vst [vmem:[#allocation18_spill] sm:$0xff] %v16003_v52 }
 0x4ac   : > { %v4969_v19 = vmax.f32 %v4895_v26, 0.0  ;;  %v5221_v62 = vsel %vm5043_vm4, %v5038_v10, 0.0  ;;  %v16006_v26 = vpop.xlane.xlu0 %5485 }
 0x4ad   : > { %v4968_v3 = vmax.f32 %v4890_v28, 0.0  ;;  %v13407_v59 = vpop.f32.mrb[222].mxu1  ;;  %v5218_v9 = vsel %vm5043_vm4, %v5037_v53, 0.0  ;;  %18200 = vst [vmem:[#allocation21_spill] sm:$0xff] %v16006_v26 }
 0x4ae   : > { %v4905_v0 = vadd.f32 %v13407_v59, %v15728_v63  ;;  %v4899_v18 = vpop.f32.mrb[223].mxu1  ;;  %5219 = vadd.xlane.f32.xlu1 %v5218_v9  ;;  %5216 = vadd.xlane.f32.xlu0 %v5215_v27  ;;  %v5040_v20 = vmul.f32 %v15738_v14, %v4969_v19  ;;  %v16014_v9 = vpop.xlane.xlu1 %5476 }
 0x4af   : > { %v5039_v44 = vmul.f32 %v15738_v14, %v4968_v3  ;;  %v4900_v24 = vadd.f32 %v15728_v63, %v4899_v18  ;;  %18201 = vst [vmem:[#allocation23_spill] sm:$0xff] %v16014_v9 }
 0x4b0   : > { %v4971_v53 = vmax.f32 %v4905_v0, 0.0  ;;  %v5227_v18 = vsel %vm5043_vm4, %v5040_v20, 0.0  ;;  %v16016_v10 = vpop.xlane.xlu0 %5479 }
 0x4b1   : > { %v4970_v28 = vmax.f32 %v4900_v24, 0.0  ;;  %v5224_v4 = vsel %vm5043_vm4, %v5039_v44, 0.0  ;;  %18202 = vst [vmem:[#allocation20_spill] sm:$0xff] %v16016_v10  ;;  %v16027_v24 = vstv %s5563_s27  ;;  %s11830_s27 = scalar_lea.sflag [#allocation4], %s476_s29 }
 0x4b2   : > { %5225 = vadd.xlane.f32.xlu1 %v5224_v4  ;;  %5222 = vadd.xlane.f32.xlu0 %v5221_v62  ;;  %v5042_v3 = vmul.f32 %v15738_v14, %v4971_v53  ;;  %v16019_v27 = vpop.xlane.xlu1 %5494 }
 0x4b3   : > { %v5041_v59 = vmul.f32 %v15738_v14, %v4970_v28  ;;  %18203 = vst [vmem:[#allocation22_spill] sm:$0xff] %v16019_v27 }
 0x4b4   : > { %v5233_v19 = vsel %vm5043_vm4, %v5042_v3, 0.0  ;;  %v16021_v0 = vpop.xlane.xlu0 %5497 }
 0x4b5   : > { %v5230_v63 = vsel %vm5043_vm4, %v5041_v59, 0.0  ;;  %18204 = vst [vmem:[#allocation25_spill] sm:$0xff] %v16021_v0 }
 0x4b6   : > { %5231 = vadd.xlane.f32.xlu1 %v5230_v63  ;;  %5228 = vadd.xlane.f32.xlu0 %v5227_v18  ;;  %v16023_v44 = vpop.xlane.xlu1 %5488 }
 0x4b7   : > { %18205 = vst [vmem:[#allocation27_spill] sm:$0xff] %v16023_v44 }
 0x4b8   : > { %v16025_v14 = vpop.xlane.xlu0 %5491 }
 0x4b9   : > { %18206 = vst [vmem:[#allocation24_spill] sm:$0xff] %v16025_v14 }
 0x4ba   : > { %5234 = vadd.xlane.f32.xlu0 %v5233_v19 }
 0x4c6   : > { %v5049_v62 = vpop.xlane.xlu1 %5048 }
 0x4c7   : > { %v5500_v20 = vadd.f32 %v15703_v36, %v5049_v62  ;;  %v5046_v53 = vpop.xlane.xlu0 %5045 }
 0x4c8   : > { %v5499_v28 = vadd.f32 %v15701_v7, %v5046_v53 }
 0x4c9   : > { %v5566_v4 = vadd.f32 %v16027_v24, %v5500_v20 }
 0x4ca   : > { %v5565_v59 = vadd.f32 %v16027_v24, %v5499_v28 }
 0x4cb   : > { %v12397_v3 = vmul.f32 -1.442695, %v5566_v4  ;;  %v5055_v63 = vpop.xlane.xlu0 %5054 }
 0x4cc   : > { %v12396_v18 = vmul.f32 -1.442695, %v5565_v59  ;;  %v5502_v19 = vadd.f32 %v15699_v34, %v5055_v63 }
 0x4cd   : > { %13556 = vpow2.f32 %v12397_v3 }
 0x4ce   : > { %13558 = vpow2.f32 %v12396_v18  ;;  %v5568_v0 = vadd.f32 %v16027_v24, %v5502_v19 }
 0x4cf   : > { %v5058_v27 = vpop.xlane.xlu1 %5057  ;;  %v5052_v14 = vpop.xlane.xlu0 %5051 }
 0x4d0   : > { %v12399_v26 = vmul.f32 -1.442695, %v5568_v0  ;;  %v5503_v36 = vadd.f32 %v15709_v21, %v5058_v27  ;;  %v5501_v7 = vadd.f32 %v15697_v60, %v5052_v14  ;;  %v18207_v14 = vlaneseq }
 0x4d2   : > { %13560 = vpow2.f32 %v12399_v26  ;;  %v5569_v62 = vadd.f32 %v16027_v24, %v5503_v36  ;;  %v5567_v20 = vadd.f32 %v16027_v24, %v5501_v7  ;;  %v16044_v63 = vshrl.u32 %v18207_v14, 7 }
 0x4d3   : > { %v5064_v53 = vpop.xlane.xlu1 %5063  ;;  %v5061_v28 = vpop.xlane.xlu0 %5060 }
 0x4d4   : > { %v12400_v4 = vmul.f32 -1.442695, %v5569_v62  ;;  %v12398_v34 = vmul.f32 -1.442695, %v5567_v20  ;;  %v5505_v59 = vadd.f32 %v15705_v48, %v5064_v53  ;;  %v5504_v3 = vadd.f32 %v15711_v2, %v5061_v28  ;;  %18208 = vst [vmem:[#allocation26_spill] sm:$0xff] %v16044_v63 }
 0x4d6   : > { %13562 = vpow2.f32 %v12400_v4  ;;  %v5571_v0 = vadd.f32 %v16027_v24, %v5505_v59  ;;  %v5570_v21 = vadd.f32 %v16027_v24, %v5504_v3  ;;  %v13878_v59 = vmov 1966171168  }
 0x4d7   : > { %v13557_v27 = vpop.eup %13556  ;;  %13564 = vpow2.f32 %v12398_v34  ;;  %v5070_v60 = vpop.xlane.xlu1 %5069  ;;  %v16051_v34 = vsub.s32 0, %v16044_v63  ;;  %v8130_v3 = vunpack.c.l.s4 %v13878_v59 }
 0x4d8   : > { %v5067_v26 = vpop.xlane.xlu0 %5066  ;;  %v13559_v18 = vpop.eup %13558  ;;  %v5822_v19 = vadd.f32 1.0, %v13557_v27  ;;  %v12402_v36 = vmul.f32 -1.442695, %v5571_v0  ;;  %v5507_v7 = vadd.f32 %v15717_v35, %v5070_v60  ;;  %v12401_v48 = vmul.f32 -1.442695, %v5570_v21 }
 0x4d9   : > { %v5506_v2 = vadd.f32 %v15707_v42, %v5067_v26  ;;  %v5821_v20 = vadd.f32 1.0, %v13559_v18  ;;  %v16056_v26 = vsub.s32 1, %v16044_v63 }
 0x4da   : > { %13566 = vrcp.f32 %v5822_v19  ;;  %v5573_v62 = vadd.f32 %v16027_v24, %v5507_v7  ;;  %v16061_v7 = vsub.s32 2, %v16044_v63 }
 0x4db   : > { %v5572_v53 = vadd.f32 %v16027_v24, %v5506_v2  ;;  %v5076_v28 = vpop.xlane.xlu1 %5075  ;;  %13568 = vpow2.f32 %v12402_v36 }
 0x4dc   : > { %v5073_v4 = vpop.xlane.xlu0 %5072  ;;  %v13561_v27 = vpop.eup %13560  ;;  %v12404_v0 = vmul.f32 -1.442695, %v5573_v62  ;;  %v5509_v35 = vadd.f32 %v15713_v51, %v5076_v28  ;;  %13570 = vpow2.f32 %v12401_v48  ;;  %v16064_v51 = vsub.s32 3, %v16044_v63 }
 0x4dd   : > { %v5508_v42 = vadd.f32 %v15719_v41, %v5073_v4  ;;  %v5824_v21 = vadd.f32 1.0, %v13561_v27  ;;  %v12403_v60 = vmul.f32 -1.442695, %v5572_v53  ;;  %v16067_v41 = vsub.s32 4, %v16044_v63 }
 0x4de   : > { %13572 = vpow2.f32 %v12404_v0  ;;  %v5575_v18 = vadd.f32 %v16027_v24, %v5509_v35  ;;  %v8131_v48 = vunpack.c.0.s8 %v8130_v3  ;;  %v16071_v4 = vsub.s32 5, %v16044_v63 }
 0x4df   : > { %v5574_v19 = vadd.f32 %v16027_v24, %v5508_v42  ;;  %13574 = vrcp.f32 %v5821_v20  ;;  %v5082_v36 = vpop.xlane.xlu1 %5081  ;;  %v16076_v3 = vsub.s32 6, %v16044_v63 }
 0x4e0   : > { %v5079_v2 = vpop.xlane.xlu0 %5078  ;;  %v13563_v62 = vpop.eup %13562  ;;  %13576 = vpow2.f32 %v12403_v60  ;;  %v12406_v53 = vmul.f32 -1.442695, %v5575_v18  ;;  %v5511_v28 = vadd.f32 %v15730_v29, %v5082_v36  ;;  %v16080_v36 = vsub.s32 7, %v16044_v63 }
 0x4e1   : > { %v13565_v59 = vpop.eup %13564  ;;  %13578 = vrcp.f32 %v5824_v21  ;;  %v5825_v20 = vadd.f32 1.0, %v13563_v62  ;;  %v12405_v27 = vmul.f32 -1.442695, %v5574_v19  ;;  %v5510_v0 = vadd.f32 %v15715_v50, %v5079_v2 }
 0x4e2   : > { %v5823_v35 = vadd.f32 1.0, %v13565_v59  ;;  %13580 = vpow2.f32 %v12406_v53  ;;  %v5577_v42 = vadd.f32 %v16027_v24, %v5511_v28  ;;  %v16083_v21 = vsub.s32 %v8131_v48, %v16044_v63 }
 0x4e3   : > { %13582 = vrcp.f32 %v5825_v20  ;;  %v5576_v60 = vadd.f32 %v16027_v24, %v5510_v0  ;;  %v5088_v29 = vpop.xlane.xlu1 %5087 }
 0x4e4   : > { %v5085_v18 = vpop.xlane.xlu0 %5084  ;;  %18209 = vst [vmem:[#allocation29_spill] sm:$0xff] %v16083_v21  ;;  %v16085_v19 = vpop.eup %13566  ;;  %13584 = vrcp.f32 %v5823_v35  ;;  %v12408_v50 = vmul.f32 -1.442695, %v5577_v42  ;;  %v5513_v2 = vadd.f32 %v15721_v25, %v5088_v29 }
 0x4e5   : > { %v5512_v62 = vadd.f32 %v15733_v8, %v5085_v18  ;;  %13586 = vpow2.f32 %v12405_v27  ;;  %v12407_v53 = vmul.f32 -1.442695, %v5576_v60  ;;  %v6112_v28 = vrot.slane %v16085_v19, %v16051_v34  ;;  %v13569_v20 = vpop.eup %13568 }
 0x4e6   : > { %v6116_v59 = vrot.slane %v16085_v19, %v16056_v26  ;;  %13588 = vpow2.f32 %v12408_v50  ;;  %v5579_v48 = vadd.f32 %v16027_v24, %v5513_v2  ;;  %v6120_v35 = vrot.slane %v16085_v19, %v16061_v7  ;;  %v13571_v25 = vpop.eup %13570 }
 0x4e7   : > { %v5578_v0 = vadd.f32 %v16027_v24, %v5512_v62  ;;  %v5827_v42 = vadd.f32 1.0, %v13569_v20  ;;  %13590 = vpow2.f32 %v12407_v53  ;;  %v5094_v8 = vpop.xlane.xlu1 %5093  ;;  %v6124_v60 = vrot.slane %v16085_v19, %v16064_v51 }
 0x4e8   : > { %v5091_v27 = vpop.xlane.xlu0 %5090  ;;  %v6128_v29 = vrot.slane %v16085_v19, %v16067_v41  ;;  %v13573_v18 = vpop.eup %13572  ;;  %v5826_v50 = vadd.f32 1.0, %v13571_v25  ;;  %v12410_v14 = vmul.f32 -1.442695, %v5579_v48  ;;  %v5515_v62 = vadd.f32 %v15756_v45, %v5094_v8 }
 0x4e9   : > { %v12409_v2 = vmul.f32 -1.442695, %v5578_v0  ;;  %v16102_v63 = vpop.eup %13574  ;;  %13592 = vrcp.f32 %v5827_v42  ;;  %v5829_v44 = vadd.f32 1.0, %v13573_v18  ;;  %v5514_v53 = vadd.f32 %v15723_v32, %v5091_v27 }
 0x4ea   : > { %v6132_v20 = vrot.slane %v16085_v19, %v16071_v4  ;;  %v13577_v10 = vpop.eup %13576  ;;  %13594 = vrcp.f32 %v5826_v50  ;;  %v5581_v52 = vadd.f32 %v16027_v24, %v5515_v62  ;;  %v6136_v25 = vrot.slane %v16085_v19, %v16076_v3 }
 0x4eb   : > { %v6140_v48 = vrot.slane %v16085_v19, %v16080_v36  ;;  %v16112_v45 = vpop.eup %13578  ;;  %13596 = vrcp.f32 %v5829_v44  ;;  %v5828_v0 = vadd.f32 1.0, %v13577_v10  ;;  %v5580_v42 = vadd.f32 %v16027_v24, %v5514_v53  ;;  %v5100_v32 = vpop.xlane.xlu1 %5099 }
 0x4ec   : > { %v5097_v8 = vpop.xlane.xlu0 %5096  ;;  %v8174_v27 = vcombine.low %v6112_v28, %v6116_v59  ;;  %v13581_v18 = vpop.eup %13580  ;;  %13598 = vpow2.f32 %v12410_v14  ;;  %v12412_v50 = vmul.f32 -1.442695, %v5581_v52  ;;  %v5517_v62 = vadd.f32 %v15745_v31, %v5100_v32 }
 0x4ed   : > { %v5516_v9 = vadd.f32 %v15759_v17, %v5097_v8  ;;  %v16117_v43 = vpop.eup %13582  ;;  %13600 = vrcp.f32 %v5828_v0  ;;  %v5831_v19 = vadd.f32 1.0, %v13581_v18  ;;  %v12411_v15 = vmul.f32 -1.442695, %v5580_v42 }
 0x4ee   : > { %v8175_v46 = vcombine.low %v6120_v35, %v6124_v60  ;;  %v16119_v44 = vpop.eup %13584  ;;  %13602 = vpow2.f32 %v12409_v2  ;;  %v5583_v10 = vadd.f32 %v16027_v24, %v5517_v62  ;;  %v8176_v59 = vcombine.low %v6128_v29, %v6132_v20 }
 0x4ef   : > { %v5582_v28 = vadd.f32 %v16027_v24, %v5516_v9  ;;  %v13587_v14 = vpop.eup %13586  ;;  %13604 = vrcp.f32 %v5831_v19  ;;  %v5106_v52 = vpop.xlane.xlu1 %5105  ;;  %v8177_v53 = vcombine.low %v6136_v25, %v6140_v48  ;;  %v8184_v17 = vrot.slane %v8174_v27, %v16083_v21 }
 0x4f0   : > { %v5103_v31 = vpop.xlane.xlu0 %5102  ;;  %v8191_v0 = vrot.slane %v8175_v46, %v16083_v21  ;;  %v13589_v32 = vpop.eup %13588  ;;  %v5830_v42 = vadd.f32 1.0, %v13587_v14  ;;  %13606 = vpow2.f32 %v12412_v50  ;;  %v12414_v35 = vmul.f32 -1.442695, %v5583_v10 }
 0x4f1   : > { %v12413_v60 = vmul.f32 -1.442695, %v5582_v28  ;;  %v13591_v2 = vpop.eup %13590  ;;  %v5833_v8 = vadd.f32 1.0, %v13589_v32  ;;  %13608 = vpow2.f32 %v12411_v15  ;;  %v5519_v9 = vadd.f32 %v15782_v56, %v5106_v52 }
 0x4f2   : > { %v5518_v29 = vadd.f32 %v15748_v22, %v5103_v31  ;;  %13610 = vrcp.f32 %v5830_v42  ;;  %v5832_v20 = vadd.f32 1.0, %v13591_v2  ;;  %v8198_v25 = vrot.slane %v8176_v59, %v16083_v21 }
 0x4f3   : > { %v8205_v48 = vrot.slane %v8177_v53, %v16083_v21  ;;  %v16129_v27 = vpop.eup %13592  ;;  %13612 = vrcp.f32 %v5833_v8  ;;  %v5585_v46 = vadd.f32 %v16027_v24, %v5519_v9  ;;  %v8206_v50 = vcombine.low %v8184_v17, %v8191_v0 }
 0x4f4   : > { %v5584_v18 = vadd.f32 %v16027_v24, %v5518_v29  ;;  %v16133_v62 = vpop.eup %13594  ;;  %13614 = vrcp.f32 %v5832_v20  ;;  %v6080_v22 = vrot.slane %v16102_v63, %v16051_v34  ;;  %v6084_v15 = vrot.slane %v16102_v63, %v16056_v26 }
 0x4f5   : > { %v8207_v56 = vcombine.low %v8198_v25, %v8205_v48  ;;  %v16139_v19 = vpop.eup %13596  ;;  %13616 = vpow2.f32 %v12414_v35  ;;  %v12416_v10 = vmul.f32 -1.442695, %v5585_v46  ;;  %v8214_v59 = vrot.slane %v8206_v50, %v16083_v21  ;;  %v5112_v35 = vpop.xlane.xlu1 %5111 }
 0x4f6   : > { %v12415_v28 = vmul.f32 -1.442695, %v5584_v18  ;;  %v13599_v14 = vpop.eup %13598  ;;  %13618 = vpow2.f32 %v12413_v60  ;;  %v6088_v31 = vrot.slane %v16102_v63, %v16061_v7  ;;  %v6092_v53 = vrot.slane %v16102_v63, %v16064_v51  ;;  %v5109_v60 = vpop.xlane.xlu0 %5108 }
 0x4f7   : > { %v8221_v52 = vrot.slane %v8207_v56, %v16083_v21  ;;  %v16147_v17 = vpop.eup %13600  ;;  %v5835_v0 = vadd.f32 1.0, %v13599_v14  ;;  %13620 = vpow2.f32 %v12416_v10  ;;  %v6096_v32 = vrot.slane %v16102_v63, %v16067_v41 }
 0x4f8   : > { %v6100_v42 = vrot.slane %v16102_v63, %v16071_v4  ;;  %v13603_v2 = vpop.eup %13602  ;;  %13622 = vpow2.f32 %v12415_v28  ;;  %v6104_v9 = vrot.slane %v16102_v63, %v16076_v3  ;;  %v6108_v29 = vrot.slane %v16102_v63, %v16080_v36 }
 0x4f9   : > { %v8222_v8 = vcombine.low %v8214_v59, %v8221_v52  ;;  %v16157_v20 = vpop.eup %13604  ;;  %13624 = vrcp.f32 %v5835_v0  ;;  %v5834_v25 = vadd.f32 1.0, %v13603_v2  ;;  %v8125_v48 = vcombine.low %v6080_v22, %v6084_v15 }
 0x4fa   : > { %v8126_v46 = vcombine.low %v6088_v31, %v6092_v53  ;;  %v13607_v18 = vpop.eup %13606  ;;  %v8127_v50 = vcombine.low %v6096_v32, %v6100_v42  ;;  %v8128_v56 = vcombine.low %v6104_v9, %v6108_v29  ;;  %v5521_v10 = vadd.f32 %v15769_v6, %v5112_v35 }
 0x4fb   : > { %11265 = vperm.xlu0 %13534, %v8222_v8   ;;  %v5520_v28 = vadd.f32 %v15785_v49, %v5109_v60  ;;  %v13609_v59 = vpop.eup %13608  ;;  %13626 = vrcp.f32 %v5834_v25  ;;  %v5837_v14 = vadd.f32 1.0, %v13607_v18  ;;  %v8135_v52 = vrot.slane %v8125_v48, %v16083_v21 }
 0x4fc   : > { %v8142_v63 = vrot.slane %v8126_v46, %v16083_v21  ;;  %v16163_v13 = vpop.eup %13610  ;;  %v5836_v0 = vadd.f32 1.0, %v13609_v59  ;;  %v8149_v22 = vrot.slane %v8127_v50, %v16083_v21  ;;  %v8156_v15 = vrot.slane %v8128_v56, %v16083_v21 }
 0x4fd   : > { %v5587_v31 = vadd.f32 %v16027_v24, %v5521_v10  ;;  %v16168_v53 = vpop.eup %13612  ;;  %13628 = vrcp.f32 %v5837_v14  ;;  %v5586_v49 = vadd.f32 %v16027_v24, %v5520_v28  ;;  %v6176_v32 = vrot.slane %v16112_v45, %v16051_v34 }
 0x4fe   : > { %v8157_v6 = vcombine.low %v8135_v52, %v8142_v63  ;;  %v16173_v42 = vpop.eup %13614  ;;  %13630 = vrcp.f32 %v5836_v0  ;;  %v8158_v35 = vcombine.low %v8149_v22, %v8156_v15  ;;  %v6180_v2 = vrot.slane %v16112_v45, %v16056_v26  ;;  %v5118_v52 = vpop.xlane.xlu1 %5117 }
 0x4ff   : > { %v12418_v60 = vmul.f32 -1.442695, %v5587_v31  ;;  %v13617_v8 = vpop.eup %13616  ;;  %v12417_v29 = vmul.f32 -1.442695, %v5586_v49  ;;  %v6184_v25 = vrot.slane %v16112_v45, %v16061_v7  ;;  %v6188_v48 = vrot.slane %v16112_v45, %v16064_v51  ;;  %v5115_v31 = vpop.xlane.xlu0 %5114 }
 0x500   : > { %v8165_v9 = vrot.slane %v8157_v6, %v16083_v21  ;;  %v13619_v46 = vpop.eup %13618  ;;  %v5839_v18 = vadd.f32 1.0, %v13617_v8  ;;  %v8172_v50 = vrot.slane %v8158_v35, %v16083_v21  ;;  %v6192_v56 = vrot.slane %v16112_v45, %v16067_v41 }
 0x501   : > { %13632 = vpow2.f32 %v12418_v60  ;;  %v13621_v10 = vpop.eup %13620  ;;  %v5838_v28 = vadd.f32 1.0, %v13619_v46  ;;  %v6196_v59 = vrot.slane %v16112_v45, %v16071_v4  ;;  %v6200_v14 = vrot.slane %v16112_v45, %v16076_v3 }
 0x502   : > { %13634 = vpow2.f32 %v12417_v29  ;;  %v13623_v63 = vpop.eup %13622  ;;  %v5841_v0 = vadd.f32 1.0, %v13621_v10  ;;  %v8173_v22 = vcombine.low %v8165_v9, %v8172_v50  ;;  %v6204_v15 = vrot.slane %v16112_v45, %v16080_v36 }
 0x503   : > { %13636 = vrcp.f32 %v5839_v18  ;;  %v16191_v6 = vpop.eup %13624  ;;  %v5840_v49 = vadd.f32 1.0, %v13623_v63  ;;  %v8272_v35 = vcombine.low %v6176_v32, %v6180_v2  ;;  %v8273_v60 = vcombine.low %v6184_v25, %v6188_v48 }
 0x504   : > { %13638 = vrcp.f32 %v5838_v28  ;;  %11262 = vperm.xlu1 %13535, %v8173_v22   ;;  %v8274_v8 = vcombine.low %v6192_v56, %v6196_v59  ;;  %v8275_v29 = vcombine.low %v6200_v14, %v6204_v15  ;;  %v5523_v46 = vadd.f32 %v15808_v12, %v5118_v52 }
 0x505   : > { %13640 = vrcp.f32 %v5841_v0  ;;  %v16194_v57 = vpop.eup %13626  ;;  %v8282_v9 = vrot.slane %v8272_v35, %v16083_v21  ;;  %v8289_v45 = vrot.slane %v8273_v60, %v16083_v21  ;;  %v5522_v18 = vadd.f32 %v15772_v58, %v5115_v31 }
 0x506   : > { %13642 = vrcp.f32 %v5840_v49  ;;  %v8296_v50 = vrot.slane %v8274_v8, %v16083_v21  ;;  %v8303_v32 = vrot.slane %v8275_v29, %v16083_v21  ;;  %v5589_v2 = vadd.f32 %v16027_v24, %v5523_v46 }
 0x507   : > { %v6208_v25 = vrot.slane %v16117_v43, %v16051_v34  ;;  %v16204_v48 = vpop.eup %13628  ;;  %v8304_v12 = vcombine.low %v8282_v9, %v8289_v45  ;;  %v5588_v56 = vadd.f32 %v16027_v24, %v5522_v18  ;;  %v6212_v10 = vrot.slane %v16117_v43, %v16056_v26 }
 0x508   : > { %v6216_v58 = vrot.slane %v16117_v43, %v16061_v7  ;;  %v16211_v28 = vpop.eup %13630  ;;  %v8305_v59 = vcombine.low %v8296_v50, %v8303_v32  ;;  %v12420_v14 = vmul.f32 -1.442695, %v5589_v2  ;;  %v6220_v52 = vrot.slane %v16117_v43, %v16064_v51 }
 0x509   : > { %v6224_v63 = vrot.slane %v16117_v43, %v16067_v41  ;;  %v8312_v0 = vrot.slane %v8304_v12, %v16083_v21  ;;  %v12419_v22 = vmul.f32 -1.442695, %v5588_v56  ;;  %v6228_v15 = vrot.slane %v16117_v43, %v16071_v4 }
 0x50a   : > { %v6232_v31 = vrot.slane %v16117_v43, %v16076_v3  ;;  %v8319_v35 = vrot.slane %v8305_v59, %v16083_v21  ;;  %13644 = vpow2.f32 %v12420_v14  ;;  %v6236_v60 = vrot.slane %v16117_v43, %v16080_v36 }
 0x50b   : > { %v13633_v49 = vpop.eup %13632  ;;  %v8321_v8 = vcombine.low %v6208_v25, %v6212_v10  ;;  %13646 = vpow2.f32 %v12419_v22  ;;  %v8322_v9 = vcombine.low %v6216_v58, %v6220_v52  ;;  %v8323_v45 = vcombine.low %v6224_v63, %v6228_v15  ;;  %v5124_v63 = vpop.xlane.xlu1 %5123 }
 0x50c   : > { %v13635_v29 = vpop.eup %13634  ;;  %v5843_v46 = vadd.f32 1.0, %v13633_v49  ;;  %v8320_v32 = vcombine.low %v8312_v0, %v8319_v35  ;;  %v8324_v2 = vcombine.low %v6232_v31, %v6236_v60  ;;  %v6144_v25 = vrot.slane %v16119_v44, %v16051_v34  ;;  %v5121_v35 = vpop.xlane.xlu0 %5120 }
 0x50d   : > { %v16225_v18 = vpop.eup %13636  ;;  %v5842_v50 = vadd.f32 1.0, %v13635_v29  ;;  %v8331_v12 = vrot.slane %v8321_v8, %v16083_v21  ;;  %v8338_v59 = vrot.slane %v8322_v9, %v16083_v21  ;;  %v8345_v43 = vrot.slane %v8323_v45, %v16083_v21 }
 0x50e   : > { %v16228_v56 = vpop.eup %13638  ;;  %13648 = vrcp.f32 %v5843_v46  ;;  %11271 = vperm.xlu1 %13535, %v8320_v32   ;;  %v8352_v58 = vrot.slane %v8324_v2, %v16083_v21  ;;  %v6148_v14 = vrot.slane %v16119_v44, %v16056_v26  ;;  %v6152_v52 = vrot.slane %v16119_v44, %v16061_v7 }
 0x50f   : > { %v16234_v10 = vpop.eup %13640  ;;  %13650 = vrcp.f32 %v5842_v50  ;;  %v8353_v22 = vcombine.low %v8331_v12, %v8338_v59  ;;  %v6156_v15 = vrot.slane %v16119_v44, %v16064_v51  ;;  %v6160_v31 = vrot.slane %v16119_v44, %v16067_v41 }
 0x510   : > { %v16241_v0 = vpop.eup %13642  ;;  %v6164_v49 = vrot.slane %v16119_v44, %v16071_v4  ;;  %v8354_v60 = vcombine.low %v8345_v43, %v8352_v58  ;;  %v6168_v8 = vrot.slane %v16119_v44, %v16076_v3  ;;  %v6172_v29 = vrot.slane %v16119_v44, %v16080_v36 }
 0x511   : > { %18210 = vst [vmem:[#allocation31_spill] sm:$0xff] %v16241_v0  ;;  %v8223_v46 = vcombine.low %v6144_v25, %v6148_v14  ;;  %v8361_v9 = vrot.slane %v8353_v22, %v16083_v21  ;;  %v8224_v45 = vcombine.low %v6152_v52, %v6156_v15  ;;  %v5525_v32 = vadd.f32 %v15795_v33, %v5124_v63 }
 0x512   : > { %v8225_v50 = vcombine.low %v6160_v31, %v6164_v49  ;;  %v8368_v2 = vrot.slane %v8354_v60, %v16083_v21  ;;  %v8226_v12 = vcombine.low %v6168_v8, %v6172_v29  ;;  %v5524_v43 = vadd.f32 %v15811_v39, %v5121_v35 }
 0x513   : > { %v8233_v59 = vrot.slane %v8223_v46, %v16083_v21  ;;  %v8240_v58 = vrot.slane %v8224_v45, %v16083_v21  ;;  %v5591_v44 = vadd.f32 %v16027_v24, %v5525_v32  ;;  %v6272_v25 = vrot.slane %v16129_v27, %v16051_v34 }
 0x514   : > { %v8247_v0 = vrot.slane %v8225_v50, %v16083_v21  ;;  %v13645_v14 = vpop.eup %13644  ;;  %v8369_v52 = vcombine.low %v8361_v9, %v8368_v2  ;;  %v8254_v33 = vrot.slane %v8226_v12, %v16083_v21  ;;  %v5590_v63 = vadd.f32 %v16027_v24, %v5524_v43 }
 0x515   : > { %v6276_v22 = vrot.slane %v16129_v27, %v16056_v26  ;;  %v13647_v15 = vpop.eup %13646  ;;  %v5845_v39 = vadd.f32 1.0, %v13645_v14  ;;  %v8255_v31 = vcombine.low %v8233_v59, %v8240_v58  ;;  %v12422_v49 = vmul.f32 -1.442695, %v5591_v44 }
 0x516   : > { %v6280_v35 = vrot.slane %v16129_v27, %v16061_v7  ;;  %v5844_v60 = vadd.f32 1.0, %v13647_v15  ;;  %11274 = vperm.xlu0 %13534, %v8369_v52   ;;  %v8256_v8 = vcombine.low %v8247_v0, %v8254_v33  ;;  %v12421_v29 = vmul.f32 -1.442695, %v5590_v63 }
 0x517   : > { %v6284_v46 = vrot.slane %v16129_v27, %v16064_v51  ;;  %13652 = vrcp.f32 %v5845_v39  ;;  %v8263_v45 = vrot.slane %v8255_v31, %v16083_v21  ;;  %v6288_v50 = vrot.slane %v16129_v27, %v16067_v41 }
 0x518   : > { %v16271_v9 = vpop.eup %13648  ;;  %v6292_v32 = vrot.slane %v16129_v27, %v16071_v4  ;;  %13654 = vrcp.f32 %v5844_v60  ;;  %v8270_v0 = vrot.slane %v8256_v8, %v16083_v21  ;;  %v6296_v12 = vrot.slane %v16129_v27, %v16076_v3  ;;  %v5127_v60 = vpop.xlane.xlu0 %5126 }
 0x519   : > { %v16278_v2 = vpop.eup %13650  ;;  %v6300_v59 = vrot.slane %v16129_v27, %v16080_v36  ;;  %13656 = vpow2.f32 %v12422_v49  ;;  %v8419_v43 = vcombine.low %v6272_v25, %v6276_v22  ;;  %v8420_v58 = vcombine.low %v6280_v35, %v6284_v46  ;;  %v5130_v27 = vpop.xlane.xlu1 %5129 }
 0x51a   : > { %v8421_v44 = vcombine.low %v6288_v50, %v6292_v32  ;;  %v8271_v14 = vcombine.low %v8263_v45, %v8270_v0  ;;  %13658 = vpow2.f32 %v12421_v29  ;;  %v6240_v33 = vrot.slane %v16133_v62, %v16051_v34 }
 0x51b   : > { %v8422_v52 = vcombine.low %v6296_v12, %v6300_v59  ;;  %v8429_v63 = vrot.slane %v8419_v43, %v16083_v21  ;;  %v8436_v15 = vrot.slane %v8420_v58, %v16083_v21  ;;  %v6244_v31 = vrot.slane %v16133_v62, %v16056_v26 }
 0x51c   : > { %v8443_v39 = vrot.slane %v8421_v44, %v16083_v21  ;;  %11268 = vperm.xlu1 %13535, %v8271_v14   ;;  %v6248_v22 = vrot.slane %v16133_v62, %v16061_v7  ;;  %v6252_v49 = vrot.slane %v16133_v62, %v16064_v51  ;;  %v6256_v35 = vrot.slane %v16133_v62, %v16067_v41 }
 0x51d   : > { %v8450_v25 = vrot.slane %v8422_v52, %v16083_v21  ;;  %v8451_v8 = vcombine.low %v8429_v63, %v8436_v15  ;;  %v6260_v29 = vrot.slane %v16133_v62, %v16071_v4  ;;  %v6264_v46 = vrot.slane %v16133_v62, %v16076_v3 }
 0x51e   : > { %v6268_v45 = vrot.slane %v16133_v62, %v16080_v36  ;;  %v8370_v32 = vcombine.low %v6240_v33, %v6244_v31  ;;  %v8371_v0 = vcombine.low %v6248_v22, %v6252_v49  ;;  %v5527_v12 = vadd.f32 %v15834_v1, %v5130_v27 }
 0x51f   : > { %v8452_v50 = vcombine.low %v8443_v39, %v8450_v25  ;;  %v8459_v59 = vrot.slane %v8451_v8, %v16083_v21  ;;  %v8372_v43 = vcombine.low %v6256_v35, %v6260_v29  ;;  %v5526_v44 = vadd.f32 %v15798_v47, %v5127_v60 }
 0x520   : > { %v8373_v58 = vcombine.low %v6264_v46, %v6268_v45  ;;  %v8380_v52 = vrot.slane %v8370_v32, %v16083_v21  ;;  %v8387_v63 = vrot.slane %v8371_v0, %v16083_v21  ;;  %v5593_v15 = vadd.f32 %v16027_v24, %v5527_v12 }
 0x521   : > { %v8466_v14 = vrot.slane %v8452_v50, %v16083_v21  ;;  %v16312_v62 = vpop.eup %13652  ;;  %v8394_v33 = vrot.slane %v8372_v43, %v16083_v21  ;;  %v5592_v39 = vadd.f32 %v16027_v24, %v5526_v44  ;;  %v6336_v31 = vrot.slane %v16139_v19, %v16051_v34 }
 0x522   : > { %v8401_v1 = vrot.slane %v8373_v58, %v16083_v21  ;;  %v16319_v47 = vpop.eup %13654  ;;  %v8402_v25 = vcombine.low %v8380_v52, %v8387_v63  ;;  %v12424_v22 = vmul.f32 -1.442695, %v5593_v15  ;;  %v6340_v49 = vrot.slane %v16139_v19, %v16056_v26 }
 0x523   : > { %v8467_v27 = vcombine.low %v8459_v59, %v8466_v14  ;;  %v13657_v35 = vpop.eup %13656  ;;  %v12423_v8 = vmul.f32 -1.442695, %v5592_v39  ;;  %v6344_v29 = vrot.slane %v16139_v19, %v16061_v7  ;;  %v6348_v46 = vrot.slane %v16139_v19, %v16064_v51 }
 0x524   : > { %v8403_v60 = vcombine.low %v8394_v33, %v8401_v1  ;;  %v13659_v45 = vpop.eup %13658  ;;  %v5847_v50 = vadd.f32 1.0, %v13657_v35  ;;  %v8410_v32 = vrot.slane %v8402_v25, %v16083_v21  ;;  %13660 = vpow2.f32 %v12424_v22  ;;  %v5133_v35 = vpop.xlane.xlu0 %5132 }
 0x525   : > { %11280 = vperm.xlu0 %13534, %v8467_v27   ;;  %v6352_v0 = vrot.slane %v16139_v19, %v16067_v41  ;;  %v5846_v12 = vadd.f32 1.0, %v13659_v45  ;;  %13662 = vpow2.f32 %v12423_v8  ;;  %v6356_v43 = vrot.slane %v16139_v19, %v16071_v4 }
 0x526   : > { %v8417_v59 = vrot.slane %v8403_v60, %v16083_v21  ;;  %13664 = vrcp.f32 %v5847_v50  ;;  %v6360_v58 = vrot.slane %v16139_v19, %v16076_v3  ;;  %v6364_v44 = vrot.slane %v16139_v19, %v16080_v36 }
 0x527   : > { %v8517_v14 = vcombine.low %v6336_v31, %v6340_v49  ;;  %13666 = vrcp.f32 %v5846_v12  ;;  %v8518_v63 = vcombine.low %v6344_v29, %v6348_v46  ;;  %v8519_v15 = vcombine.low %v6352_v0, %v6356_v43  ;;  %v5136_v49 = vpop.xlane.xlu1 %5135 }
 0x528   : > { %v8418_v52 = vcombine.low %v8410_v32, %v8417_v59  ;;  %v8520_v33 = vcombine.low %v6360_v58, %v6364_v44  ;;  %v6304_v39 = vrot.slane %v16147_v17, %v16051_v34  ;;  %v6308_v27 = vrot.slane %v16147_v17, %v16056_v26 }
 0x529   : > { %v8527_v1 = vrot.slane %v8517_v14, %v16083_v21  ;;  %v8534_v25 = vrot.slane %v8518_v63, %v16083_v21  ;;  %v8541_v22 = vrot.slane %v8519_v15, %v16083_v21  ;;  %v6312_v19 = vrot.slane %v16147_v17, %v16061_v7 }
 0x52a   : > { %11277 = vperm.xlu1 %13535, %v8418_v52   ;;  %v6316_v31 = vrot.slane %v16147_v17, %v16064_v51  ;;  %v8548_v60 = vrot.slane %v8520_v33, %v16083_v21  ;;  %v6320_v8 = vrot.slane %v16147_v17, %v16067_v41  ;;  %v6324_v29 = vrot.slane %v16147_v17, %v16071_v4 }
 0x52b   : > { %v6328_v46 = vrot.slane %v16147_v17, %v16076_v3  ;;  %v8549_v45 = vcombine.low %v8527_v1, %v8534_v25  ;;  %v6332_v50 = vrot.slane %v16147_v17, %v16080_v36  ;;  %v8468_v32 = vcombine.low %v6304_v39, %v6308_v27 }
 0x52c   : > { %v8469_v0 = vcombine.low %v6312_v19, %v6316_v31  ;;  %v8550_v12 = vcombine.low %v8541_v22, %v8548_v60  ;;  %v8470_v59 = vcombine.low %v6320_v8, %v6324_v29  ;;  %v5529_v43 = vadd.f32 %v15821_v61, %v5136_v49 }
 0x52d   : > { %v5528_v58 = vadd.f32 %v15837_v30, %v5133_v35  ;;  %v8557_v44 = vrot.slane %v8549_v45, %v16083_v21  ;;  %v8471_v14 = vcombine.low %v6328_v46, %v6332_v50  ;;  %v8478_v52 = vrot.slane %v8468_v32, %v16083_v21 }
 0x52e   : > { %v8485_v63 = vrot.slane %v8469_v0, %v16083_v21  ;;  %v13661_v15 = vpop.eup %13660  ;;  %v8564_v33 = vrot.slane %v8550_v12, %v16083_v21  ;;  %v8492_v17 = vrot.slane %v8470_v59, %v16083_v21  ;;  %v5595_v1 = vadd.f32 %v16027_v24, %v5529_v43 }
 0x52f   : > { %v5594_v39 = vadd.f32 %v16027_v24, %v5528_v58  ;;  %v13663_v27 = vpop.eup %13662  ;;  %v5849_v61 = vadd.f32 1.0, %v13661_v15  ;;  %v8499_v30 = vrot.slane %v8471_v14, %v16083_v21  ;;  %v6400_v22 = vrot.slane %v16157_v20, %v16051_v34 }
 0x530   : > { %v8500_v25 = vcombine.low %v8478_v52, %v8485_v63  ;;  %v16369_v19 = vpop.eup %13664  ;;  %v5848_v31 = vadd.f32 1.0, %v13663_v27  ;;  %v8565_v49 = vcombine.low %v8557_v44, %v8564_v33  ;;  %v12426_v35 = vmul.f32 -1.442695, %v5595_v1 }
 0x531   : > { %v12425_v60 = vmul.f32 -1.442695, %v5594_v39  ;;  %v16371_v8 = vpop.eup %13666  ;;  %13668 = vrcp.f32 %v5849_v61  ;;  %v8501_v29 = vcombine.low %v8492_v17, %v8499_v30  ;;  %v6404_v45 = vrot.slane %v16157_v20, %v16056_v26  ;;  %v5142_v61 = vpop.xlane.xlu1 %5141 }
 0x532   : > { %v8508_v46 = vrot.slane %v8500_v25, %v16083_v21  ;;  %13670 = vrcp.f32 %v5848_v31  ;;  %11286 = vperm.xlu0 %13534, %v8565_v49   ;;  %v6408_v50 = vrot.slane %v16157_v20, %v16061_v7  ;;  %v6412_v32 = vrot.slane %v16157_v20, %v16064_v51  ;;  %v5139_v31 = vpop.xlane.xlu0 %5138 }
 0x533   : > { %v6416_v0 = vrot.slane %v16157_v20, %v16067_v41  ;;  %v8515_v12 = vrot.slane %v8501_v29, %v16083_v21  ;;  %13672 = vpow2.f32 %v12426_v35  ;;  %v6420_v59 = vrot.slane %v16157_v20, %v16071_v4 }
 0x534   : > { %v6424_v43 = vrot.slane %v16157_v20, %v16076_v3  ;;  %13674 = vpow2.f32 %v12425_v60  ;;  %v6428_v58 = vrot.slane %v16157_v20, %v16080_v36  ;;  %v8615_v44 = vcombine.low %v6400_v22, %v6404_v45 }
 0x535   : > { %v8616_v14 = vcombine.low %v6408_v50, %v6412_v32  ;;  %v8516_v52 = vcombine.low %v8508_v46, %v8515_v12  ;;  %v8617_v63 = vcombine.low %v6416_v0, %v6420_v59  ;;  %v6368_v15 = vrot.slane %v16163_v13, %v16051_v34 }
 0x536   : > { %v6372_v33 = vrot.slane %v16163_v13, %v16056_v26  ;;  %v8618_v17 = vcombine.low %v6424_v43, %v6428_v58  ;;  %v8625_v1 = vrot.slane %v8615_v44, %v16083_v21  ;;  %v6376_v27 = vrot.slane %v16163_v13, %v16061_v7 }
 0x537   : > { %v8632_v39 = vrot.slane %v8616_v14, %v16083_v21  ;;  %11283 = vperm.xlu1 %13535, %v8516_v52   ;;  %v8639_v20 = vrot.slane %v8617_v63, %v16083_v21  ;;  %v6380_v30 = vrot.slane %v16163_v13, %v16064_v51  ;;  %v6384_v25 = vrot.slane %v16163_v13, %v16067_v41 }
 0x538   : > { %v6388_v22 = vrot.slane %v16163_v13, %v16071_v4  ;;  %v8646_v49 = vrot.slane %v8618_v17, %v16083_v21  ;;  %v6392_v60 = vrot.slane %v16163_v13, %v16076_v3  ;;  %v6396_v29 = vrot.slane %v16163_v13, %v16080_v36 }
 0x539   : > { %v8647_v35 = vcombine.low %v8625_v1, %v8632_v39  ;;  %v8566_v46 = vcombine.low %v6368_v15, %v6372_v33  ;;  %v8567_v45 = vcombine.low %v6376_v27, %v6380_v30  ;;  %v5531_v32 = vadd.f32 %v15860_v40, %v5142_v61 }
 0x53a   : > { %v8568_v50 = vcombine.low %v6384_v25, %v6388_v22  ;;  %v8648_v0 = vcombine.low %v8639_v20, %v8646_v49  ;;  %v8569_v59 = vcombine.low %v6392_v60, %v6396_v29  ;;  %v5530_v43 = vadd.f32 %v15824_v23, %v5139_v31 }
 0x53b   : > { %v8655_v12 = vrot.slane %v8647_v35, %v16083_v21  ;;  %v16412_v58 = vpop.eup %13668  ;;  %v8576_v44 = vrot.slane %v8566_v46, %v16083_v21  ;;  %v8583_v14 = vrot.slane %v8567_v45, %v16083_v21  ;;  %v5597_v13 = vadd.f32 %v16027_v24, %v5531_v32 }
 0x53c   : > { %v8590_v52 = vrot.slane %v8568_v50, %v16083_v21  ;;  %v16418_v63 = vpop.eup %13670  ;;  %v8662_v40 = vrot.slane %v8648_v0, %v16083_v21  ;;  %v8597_v15 = vrot.slane %v8569_v59, %v16083_v21  ;;  %v5596_v33 = vadd.f32 %v16027_v24, %v5530_v43 }
 0x53d   : > { %v6464_v23 = vrot.slane %v16168_v53, %v16051_v34  ;;  %v13673_v17 = vpop.eup %13672  ;;  %v8598_v1 = vcombine.low %v8576_v44, %v8583_v14  ;;  %v12428_v39 = vmul.f32 -1.442695, %v5597_v13  ;;  %v6468_v27 = vrot.slane %v16168_v53, %v16056_v26 }
 0x53e   : > { %v6472_v61 = vrot.slane %v16168_v53, %v16061_v7  ;;  %v13675_v20 = vpop.eup %13674  ;;  %v5851_v30 = vadd.f32 1.0, %v13673_v17  ;;  %v8663_v25 = vcombine.low %v8655_v12, %v8662_v40  ;;  %v8599_v22 = vcombine.low %v8590_v52, %v8597_v15  ;;  %v5145_v17 = vpop.xlane.xlu0 %5144 }
 0x53f   : > { %v12427_v31 = vmul.f32 -1.442695, %v5596_v33  ;;  %v5850_v49 = vadd.f32 1.0, %v13675_v20  ;;  %v8606_v35 = vrot.slane %v8598_v1, %v16083_v21  ;;  %13676 = vpow2.f32 %v12428_v39 }
 0x540   : > { %v6476_v60 = vrot.slane %v16168_v53, %v16064_v51  ;;  %13678 = vrcp.f32 %v5851_v30  ;;  %11292 = vperm.xlu0 %13534, %v8663_v25   ;;  %v8613_v29 = vrot.slane %v8599_v22, %v16083_v21  ;;  %v6480_v46 = vrot.slane %v16168_v53, %v16067_v41 }
 0x541   : > { %v6484_v45 = vrot.slane %v16168_v53, %v16071_v4  ;;  %13680 = vrcp.f32 %v5850_v49  ;;  %v6488_v50 = vrot.slane %v16168_v53, %v16076_v3  ;;  %v6492_v32 = vrot.slane %v16168_v53, %v16080_v36 }
 0x542   : > { %v8713_v0 = vcombine.low %v6464_v23, %v6468_v27  ;;  %v8614_v12 = vcombine.low %v8606_v35, %v8613_v29  ;;  %13682 = vpow2.f32 %v12427_v31  ;;  %v8714_v59 = vcombine.low %v6472_v61, %v6476_v60  ;;  %v5148_v23 = vpop.xlane.xlu1 %5147 }
 0x543   : > { %v8715_v43 = vcombine.low %v6480_v46, %v6484_v45  ;;  %v8716_v44 = vcombine.low %v6488_v50, %v6492_v32  ;;  %v6432_v52 = vrot.slane %v16173_v42, %v16051_v34  ;;  %v6436_v13 = vrot.slane %v16173_v42, %v16056_v26 }
 0x544   : > { %v8723_v14 = vrot.slane %v8713_v0, %v16083_v21  ;;  %11289 = vperm.xlu1 %13535, %v8614_v12   ;;  %v8730_v40 = vrot.slane %v8714_v59, %v16083_v21  ;;  %v6440_v53 = vrot.slane %v16173_v42, %v16061_v7  ;;  %v6444_v33 = vrot.slane %v16173_v42, %v16064_v51 }
 0x545   : > { %v8737_v15 = vrot.slane %v8715_v43, %v16083_v21  ;;  %v8744_v1 = vrot.slane %v8716_v44, %v16083_v21  ;;  %v6448_v39 = vrot.slane %v16173_v42, %v16067_v41  ;;  %v6452_v27 = vrot.slane %v16173_v42, %v16071_v4 }
 0x546   : > { %v6456_v61 = vrot.slane %v16173_v42, %v16076_v3  ;;  %v8745_v20 = vcombine.low %v8723_v14, %v8730_v40  ;;  %v6460_v30 = vrot.slane %v16173_v42, %v16080_v36  ;;  %v8664_v25 = vcombine.low %v6432_v52, %v6436_v13 }
 0x547   : > { %v8665_v22 = vcombine.low %v6440_v53, %v6444_v33  ;;  %v8746_v31 = vcombine.low %v8737_v15, %v8744_v1  ;;  %v8666_v49 = vcombine.low %v6448_v39, %v6452_v27  ;;  %v5533_v35 = vadd.f32 %v15847_v16, %v5148_v23 }
 0x548   : > { %v5532_v60 = vadd.f32 %v15863_v11, %v5145_v17  ;;  %v8753_v29 = vrot.slane %v8745_v20, %v16083_v21  ;;  %v8667_v46 = vcombine.low %v6456_v61, %v6460_v30  ;;  %v8674_v45 = vrot.slane %v8664_v25, %v16083_v21 }
 0x549   : > { %v8681_v50 = vrot.slane %v8665_v22, %v16083_v21  ;;  %v13677_v32 = vpop.eup %13676  ;;  %v8760_v0 = vrot.slane %v8746_v31, %v16083_v21  ;;  %v8688_v42 = vrot.slane %v8666_v49, %v16083_v21  ;;  %v5599_v12 = vadd.f32 %v16027_v24, %v5533_v35 }
 0x54a   : > { %v5598_v59 = vadd.f32 %v16027_v24, %v5532_v60  ;;  %v16470_v43 = vpop.eup %13678  ;;  %v5853_v16 = vadd.f32 1.0, %v13677_v32  ;;  %v8695_v11 = vrot.slane %v8667_v46, %v16083_v21  ;;  %v6528_v14 = vrot.slane %v16191_v6, %v16051_v34 }
 0x54b   : > { %v8696_v44 = vcombine.low %v8674_v45, %v8681_v50  ;;  %v16475_v52 = vpop.eup %13680  ;;  %v8761_v13 = vcombine.low %v8753_v29, %v8760_v0  ;;  %v12430_v40 = vmul.f32 -1.442695, %v5599_v12  ;;  %v6532_v53 = vrot.slane %v16191_v6, %v16056_v26 }
 0x54c   : > { %v12429_v15 = vmul.f32 -1.442695, %v5598_v59  ;;  %v13683_v33 = vpop.eup %13682  ;;  %13684 = vrcp.f32 %v5853_v16  ;;  %v8697_v23 = vcombine.low %v8688_v42, %v8695_v11  ;;  %v6536_v1 = vrot.slane %v16191_v6, %v16061_v7  ;;  %v5154_v42 = vpop.xlane.xlu1 %5153 }
 0x54d   : > { %v8704_v17 = vrot.slane %v8696_v44, %v16083_v21  ;;  %v5852_v39 = vadd.f32 1.0, %v13683_v33  ;;  %11298 = vperm.xlu0 %13534, %v8761_v13   ;;  %13686 = vpow2.f32 %v12430_v40  ;;  %v6540_v27 = vrot.slane %v16191_v6, %v16064_v51  ;;  %v5151_v11 = vpop.xlane.xlu0 %5150 }
 0x54e   : > { %v6544_v61 = vrot.slane %v16191_v6, %v16067_v41  ;;  %v8711_v20 = vrot.slane %v8697_v23, %v16083_v21  ;;  %13688 = vpow2.f32 %v12429_v15  ;;  %v6548_v30 = vrot.slane %v16191_v6, %v16071_v4 }
 0x54f   : > { %v6552_v25 = vrot.slane %v16191_v6, %v16076_v3  ;;  %13690 = vrcp.f32 %v5852_v39  ;;  %v6556_v22 = vrot.slane %v16191_v6, %v16080_v36  ;;  %v8811_v31 = vcombine.low %v6528_v14, %v6532_v53 }
 0x550   : > { %v8812_v49 = vcombine.low %v6536_v1, %v6540_v27  ;;  %v8712_v35 = vcombine.low %v8704_v17, %v8711_v20  ;;  %v8813_v60 = vcombine.low %v6544_v61, %v6548_v30  ;;  %v6496_v29 = vrot.slane %v16194_v57, %v16051_v34 }
 0x551   : > { %v6500_v46 = vrot.slane %v16194_v57, %v16056_v26  ;;  %v8814_v45 = vcombine.low %v6552_v25, %v6556_v22  ;;  %v8821_v50 = vrot.slane %v8811_v31, %v16083_v21  ;;  %v6504_v0 = vrot.slane %v16194_v57, %v16061_v7 }
 0x552   : > { %v8828_v32 = vrot.slane %v8812_v49, %v16083_v21  ;;  %11295 = vperm.xlu1 %13535, %v8712_v35   ;;  %v8835_v6 = vrot.slane %v8813_v60, %v16083_v21  ;;  %v6508_v12 = vrot.slane %v16194_v57, %v16064_v51  ;;  %v6512_v59 = vrot.slane %v16194_v57, %v16067_v41 }
 0x553   : > { %v6516_v16 = vrot.slane %v16194_v57, %v16071_v4  ;;  %v8842_v44 = vrot.slane %v8814_v45, %v16083_v21  ;;  %v6520_v13 = vrot.slane %v16194_v57, %v16076_v3  ;;  %v6524_v40 = vrot.slane %v16194_v57, %v16080_v36 }
 0x554   : > { %v8843_v14 = vcombine.low %v8821_v50, %v8828_v32  ;;  %v8762_v15 = vcombine.low %v6496_v29, %v6500_v46  ;;  %v8763_v53 = vcombine.low %v6504_v0, %v6508_v12  ;;  %v5535_v23 = vadd.f32 %v15886_v54, %v5154_v42 }
 0x555   : > { %v8764_v33 = vcombine.low %v6512_v59, %v6516_v16  ;;  %v8844_v17 = vcombine.low %v8835_v6, %v8842_v44  ;;  %v8765_v39 = vcombine.low %v6520_v13, %v6524_v40  ;;  %v5534_v27 = vadd.f32 %v15850_v5, %v5151_v11 }
 0x556   : > { %v8851_v1 = vrot.slane %v8843_v14, %v16083_v21  ;;  %v16516_v61 = vpop.eup %13684  ;;  %v8772_v20 = vrot.slane %v8762_v15, %v16083_v21  ;;  %v8779_v30 = vrot.slane %v8763_v53, %v16083_v21  ;;  %v5601_v57 = vadd.f32 %v16027_v24, %v5535_v23 }
 0x557   : > { %v8786_v25 = vrot.slane %v8764_v33, %v16083_v21  ;;  %v13687_v22 = vpop.eup %13686  ;;  %v8858_v31 = vrot.slane %v8844_v17, %v16083_v21  ;;  %v8793_v54 = vrot.slane %v8765_v39, %v16083_v21  ;;  %v5600_v49 = vadd.f32 %v16027_v24, %v5534_v27 }
 0x558   : > { %v6592_v5 = vrot.slane %v16204_v48, %v16051_v34  ;;  %v13689_v35 = vpop.eup %13688  ;;  %v5855_v60 = vadd.f32 1.0, %v13687_v22  ;;  %v8794_v29 = vcombine.low %v8772_v20, %v8779_v30  ;;  %v12432_v46 = vmul.f32 -1.442695, %v5601_v57  ;;  %v5160_v57 = vpop.xlane.xlu1 %5159 }
 0x559   : > { %v6596_v45 = vrot.slane %v16204_v48, %v16056_v26  ;;  %v16529_v50 = vpop.eup %13690  ;;  %v5854_v32 = vadd.f32 1.0, %v13689_v35  ;;  %v8859_v0 = vcombine.low %v8851_v1, %v8858_v31  ;;  %v8795_v42 = vcombine.low %v8786_v25, %v8793_v54  ;;  %v5157_v22 = vpop.xlane.xlu0 %5156 }
 0x55a   : > { %v12431_v6 = vmul.f32 -1.442695, %v5600_v49  ;;  %13692 = vrcp.f32 %v5855_v60  ;;  %v8802_v12 = vrot.slane %v8794_v29, %v16083_v21  ;;  %v6600_v59 = vrot.slane %v16204_v48, %v16061_v7 }
 0x55b   : > { %v6604_v16 = vrot.slane %v16204_v48, %v16064_v51  ;;  %13694 = vrcp.f32 %v5854_v32  ;;  %11304 = vperm.xlu0 %13534, %v8859_v0   ;;  %v8809_v11 = vrot.slane %v8795_v42, %v16083_v21  ;;  %v6608_v44 = vrot.slane %v16204_v48, %v16067_v41 }
 0x55c   : > { %v6612_v14 = vrot.slane %v16204_v48, %v16071_v4  ;;  %13696 = vpow2.f32 %v12432_v46  ;;  %v6616_v13 = vrot.slane %v16204_v48, %v16076_v3  ;;  %v6620_v40 = vrot.slane %v16204_v48, %v16080_v36 }
 0x55d   : > { %v8909_v15 = vcombine.low %v6592_v5, %v6596_v45  ;;  %v8810_v53 = vcombine.low %v8802_v12, %v8809_v11  ;;  %13698 = vpow2.f32 %v12431_v6  ;;  %v8910_v33 = vcombine.low %v6600_v59, %v6604_v16 }
 0x55e   : > { %v8911_v23 = vcombine.low %v6608_v44, %v6612_v14  ;;  %v8912_v17 = vcombine.low %v6616_v13, %v6620_v40  ;;  %v6560_v39 = vrot.slane %v16211_v28, %v16051_v34  ;;  %v6564_v27 = vrot.slane %v16211_v28, %v16056_v26 }
 0x55f   : > { %v8919_v1 = vrot.slane %v8909_v15, %v16083_v21  ;;  %11301 = vperm.xlu1 %13535, %v8810_v53   ;;  %v8926_v20 = vrot.slane %v8910_v33, %v16083_v21  ;;  %v6568_v48 = vrot.slane %v16211_v28, %v16061_v7  ;;  %v6572_v25 = vrot.slane %v16211_v28, %v16064_v51 }
 0x560   : > { %v8933_v30 = vrot.slane %v8911_v23, %v16083_v21  ;;  %v8940_v31 = vrot.slane %v8912_v17, %v16083_v21  ;;  %v6576_v54 = vrot.slane %v16211_v28, %v16067_v41  ;;  %v6580_v49 = vrot.slane %v16211_v28, %v16071_v4 }
 0x561   : > { %v6584_v5 = vrot.slane %v16211_v28, %v16076_v3  ;;  %v8941_v35 = vcombine.low %v8919_v1, %v8926_v20  ;;  %v6588_v60 = vrot.slane %v16211_v28, %v16080_v36  ;;  %v8860_v29 = vcombine.low %v6560_v39, %v6564_v27 }
 0x562   : > { %v8861_v46 = vcombine.low %v6568_v48, %v6572_v25  ;;  %v8942_v45 = vcombine.low %v8933_v30, %v8940_v31  ;;  %v8862_v32 = vcombine.low %v6576_v54, %v6580_v49  ;;  %v5537_v0 = vadd.f32 %v15873_v37, %v5160_v57 }
 0x563   : > { %v5536_v42 = vadd.f32 %v15889_v38, %v5157_v22  ;;  %v8949_v6 = vrot.slane %v8941_v35, %v16083_v21  ;;  %v8863_v12 = vcombine.low %v6584_v5, %v6588_v60  ;;  %v8870_v59 = vrot.slane %v8860_v29, %v16083_v21 }
 0x564   : > { %v8877_v16 = vrot.slane %v8861_v46, %v16083_v21  ;;  %v16570_v11 = vpop.eup %13692  ;;  %v8956_v44 = vrot.slane %v8942_v45, %v16083_v21  ;;  %v8884_v28 = vrot.slane %v8862_v32, %v16083_v21  ;;  %v5603_v14 = vadd.f32 %v16027_v24, %v5537_v0 }
 0x565   : > { %v5602_v13 = vadd.f32 %v16027_v24, %v5536_v42  ;;  %v16576_v37 = vpop.eup %13694  ;;  %v8891_v38 = vrot.slane %v8863_v12, %v16083_v21  ;;  %v6656_v15 = vrot.slane %v16225_v18, %v16051_v34  ;;  %v6660_v53 = vrot.slane %v16225_v18, %v16056_v26 }
 0x566   : > { %v8892_v40 = vcombine.low %v8870_v59, %v8877_v16  ;;  %v13697_v33 = vpop.eup %13696  ;;  %v8957_v23 = vcombine.low %v8949_v6, %v8956_v44  ;;  %v12434_v17 = vmul.f32 -1.442695, %v5603_v14  ;;  %v6664_v39 = vrot.slane %v16225_v18, %v16061_v7  ;;  %v5163_v14 = vpop.xlane.xlu0 %5162 }
 0x567   : > { %v12433_v1 = vmul.f32 -1.442695, %v5602_v13  ;;  %v13699_v27 = vpop.eup %13698  ;;  %v5857_v20 = vadd.f32 1.0, %v13697_v33  ;;  %v8893_v30 = vcombine.low %v8884_v28, %v8891_v38  ;;  %v6668_v25 = vrot.slane %v16225_v18, %v16064_v51 }
 0x568   : > { %v8900_v48 = vrot.slane %v8892_v40, %v16083_v21  ;;  %v5856_v57 = vadd.f32 1.0, %v13699_v27  ;;  %11310 = vperm.xlu0 %13534, %v8957_v23   ;;  %13700 = vpow2.f32 %v12434_v17  ;;  %v6672_v22 = vrot.slane %v16225_v18, %v16067_v41 }
 0x569   : > { %v6676_v31 = vrot.slane %v16225_v18, %v16071_v4  ;;  %13702 = vrcp.f32 %v5857_v20  ;;  %v8907_v54 = vrot.slane %v8893_v30, %v16083_v21  ;;  %v6680_v49 = vrot.slane %v16225_v18, %v16076_v3  ;;  %v18211_v20 = vld [vmem:[#allocation10_spill] sm:$0xff] }
 0x56a   : > { %v6684_v5 = vrot.slane %v16225_v18, %v16080_v36  ;;  %13704 = vrcp.f32 %v5856_v57  ;;  %v9007_v35 = vcombine.low %v6656_v15, %v6660_v53  ;;  %v9008_v60 = vcombine.low %v6664_v39, %v6668_v25  ;;  %v5166_v18 = vpop.xlane.xlu1 %5165 }
 0x56b   : > { %v9009_v29 = vcombine.low %v6672_v22, %v6676_v31  ;;  %v8908_v46 = vcombine.low %v8900_v48, %v8907_v54  ;;  %13706 = vpow2.f32 %v12433_v1  ;;  %v6624_v32 = vrot.slane %v16228_v56, %v16051_v34 }
 0x56c   : > { %v9010_v45 = vcombine.low %v6680_v49, %v6684_v5  ;;  %v9017_v0 = vrot.slane %v9007_v35, %v16083_v21  ;;  %v9024_v42 = vrot.slane %v9008_v60, %v16083_v21  ;;  %v6628_v12 = vrot.slane %v16228_v56, %v16056_v26 }
 0x56d   : > { %v9031_v6 = vrot.slane %v9009_v29, %v16083_v21  ;;  %11307 = vperm.xlu1 %13535, %v8908_v46   ;;  %v6632_v16 = vrot.slane %v16228_v56, %v16061_v7  ;;  %v6636_v44 = vrot.slane %v16228_v56, %v16064_v51  ;;  %v6640_v28 = vrot.slane %v16228_v56, %v16067_v41 }
 0x56e   : > { %v9038_v59 = vrot.slane %v9010_v45, %v16083_v21  ;;  %v9039_v13 = vcombine.low %v9017_v0, %v9024_v42  ;;  %v6644_v38 = vrot.slane %v16228_v56, %v16071_v4  ;;  %v6648_v40 = vrot.slane %v16228_v56, %v16076_v3 }
 0x56f   : > { %v6652_v15 = vrot.slane %v16228_v56, %v16080_v36  ;;  %v8958_v33 = vcombine.low %v6624_v32, %v6628_v12  ;;  %v8959_v23 = vcombine.low %v6632_v16, %v6636_v44  ;;  %v5539_v17 = vadd.f32 %v15912_v55, %v5166_v18 }
 0x570   : > { %v9040_v53 = vcombine.low %v9031_v6, %v9038_v59  ;;  %v9047_v1 = vrot.slane %v9039_v13, %v16083_v21  ;;  %v8960_v39 = vcombine.low %v6640_v28, %v6644_v38  ;;  %v5538_v30 = vadd.f32 %v18211_v20, %v5163_v14 }
 0x571   : > { %v8961_v27 = vcombine.low %v6648_v40, %v6652_v15  ;;  %v8968_v25 = vrot.slane %v8958_v33, %v16083_v21  ;;  %v8975_v57 = vrot.slane %v8959_v23, %v16083_v21  ;;  %v5605_v22 = vadd.f32 %v16027_v24, %v5539_v17 }
 0x572   : > { %v9054_v48 = vrot.slane %v9040_v53, %v16083_v21  ;;  %v13701_v56 = vpop.eup %13700  ;;  %v8982_v31 = vrot.slane %v8960_v39, %v16083_v21  ;;  %v5604_v55 = vadd.f32 %v16027_v24, %v5538_v30  ;;  %v6720_v49 = vrot.slane %v16234_v10, %v16051_v34 }
 0x573   : > { %v8989_v54 = vrot.slane %v8961_v27, %v16083_v21  ;;  %v16629_v5 = vpop.eup %13702  ;;  %v5859_v35 = vadd.f32 1.0, %v13701_v56  ;;  %v8990_v29 = vcombine.low %v8968_v25, %v8975_v57  ;;  %v12436_v46 = vmul.f32 -1.442695, %v5605_v22  ;;  %v5172_v25 = vpop.xlane.xlu1 %5171 }
 0x574   : > { %v9055_v60 = vcombine.low %v9047_v1, %v9054_v48  ;;  %v16631_v45 = vpop.eup %13704  ;;  %v12435_v0 = vmul.f32 -1.442695, %v5604_v55  ;;  %v6724_v42 = vrot.slane %v16234_v10, %v16056_v26  ;;  %v6728_v6 = vrot.slane %v16234_v10, %v16061_v7  ;;  %v18212_v1 = vld [vmem:[#allocation31_spill] sm:$0xff]  ;;  %v5169_v57 = vpop.xlane.xlu0 %5168 }
 0x575   : > { %v8991_v32 = vcombine.low %v8982_v31, %v8989_v54  ;;  %v13707_v12 = vpop.eup %13706  ;;  %13708 = vrcp.f32 %v5859_v35  ;;  %v8998_v18 = vrot.slane %v8990_v29, %v16083_v21  ;;  %v6732_v59 = vrot.slane %v16234_v10, %v16064_v51 }
 0x576   : > { %11316 = vperm.xlu0 %13534, %v9055_v60   ;;  %v6736_v16 = vrot.slane %v16234_v10, %v16067_v41  ;;  %v5858_v44 = vadd.f32 1.0, %v13707_v12  ;;  %13710 = vpow2.f32 %v12436_v46  ;;  %v6740_v14 = vrot.slane %v16234_v10, %v16071_v4 }
 0x577   : > { %v9005_v28 = vrot.slane %v8991_v32, %v16083_v21  ;;  %13712 = vpow2.f32 %v12435_v0  ;;  %v6744_v13 = vrot.slane %v16234_v10, %v16076_v3  ;;  %v6748_v38 = vrot.slane %v16234_v10, %v16080_v36  ;;  %v18213_v32 = vld [vmem:[#allocation41_spill] sm:$0xff] }
 0x578   : > { %v9105_v40 = vcombine.low %v6720_v49, %v6724_v42  ;;  %13714 = vrcp.f32 %v5858_v44  ;;  %v9106_v53 = vcombine.low %v6728_v6, %v6732_v59  ;;  %v9107_v33 = vcombine.low %v6736_v16, %v6740_v14  ;;  %v18214_v42 = vld [vmem:[#allocation40_spill] sm:$0xff] }
 0x579   : > { %v9006_v15 = vcombine.low %v8998_v18, %v9005_v28  ;;  %v9108_v23 = vcombine.low %v6744_v13, %v6748_v38  ;;  %v6688_v39 = vrot.slane %v18212_v1, %v16051_v34  ;;  %v6692_v27 = vrot.slane %v18212_v1, %v16056_v26 }
 0x57a   : > { %v9115_v17 = vrot.slane %v9105_v40, %v16083_v21  ;;  %v9122_v20 = vrot.slane %v9106_v53, %v16083_v21  ;;  %v9129_v30 = vrot.slane %v9107_v33, %v16083_v21  ;;  %v6696_v10 = vrot.slane %v18212_v1, %v16061_v7 }
 0x57b   : > { %11313 = vperm.xlu1 %13535, %v9006_v15   ;;  %v6700_v48 = vrot.slane %v18212_v1, %v16064_v51  ;;  %v9136_v22 = vrot.slane %v9108_v23, %v16083_v21  ;;  %v6704_v56 = vrot.slane %v18212_v1, %v16067_v41  ;;  %v6708_v31 = vrot.slane %v18212_v1, %v16071_v4 }
 0x57c   : > { %v6712_v54 = vrot.slane %v18212_v1, %v16076_v3  ;;  %v9137_v55 = vcombine.low %v9115_v17, %v9122_v20  ;;  %v6716_v49 = vrot.slane %v18212_v1, %v16080_v36  ;;  %v9056_v35 = vcombine.low %v6688_v39, %v6692_v27 }
 0x57d   : > { %v9057_v60 = vcombine.low %v6696_v10, %v6700_v48  ;;  %v9138_v29 = vcombine.low %v9129_v30, %v9136_v22  ;;  %v9058_v46 = vcombine.low %v6704_v56, %v6708_v31  ;;  %v5541_v0 = vadd.f32 %v18213_v32, %v5172_v25 }
 0x57e   : > { %v5540_v6 = vadd.f32 %v18214_v42, %v5169_v57  ;;  %v9145_v12 = vrot.slane %v9137_v55, %v16083_v21  ;;  %v9059_v18 = vcombine.low %v6712_v54, %v6716_v49  ;;  %v9066_v59 = vrot.slane %v9056_v35, %v16083_v21 }
 0x57f   : > { %v9073_v16 = vrot.slane %v9057_v60, %v16083_v21  ;;  %v16674_v44 = vpop.eup %13708  ;;  %v9152_v28 = vrot.slane %v9138_v29, %v16083_v21  ;;  %v9080_v14 = vrot.slane %v9058_v46, %v16083_v21  ;;  %v5607_v13 = vadd.f32 %v16027_v24, %v5541_v0 }
 0x580   : > { %v5606_v38 = vadd.f32 %v16027_v24, %v5540_v6  ;;  %v13711_v40 = vpop.eup %13710  ;;  %v9087_v15 = vrot.slane %v9059_v18, %v16083_v21  ;;  %v6784_v33 = vrot.slane %v16271_v9, %v16051_v34  ;;  %v6788_v23 = vrot.slane %v16271_v9, %v16056_v26 }
 0x581   : > { %v9088_v53 = vcombine.low %v9066_v59, %v9073_v16  ;;  %v13713_v17 = vpop.eup %13712  ;;  %v5861_v1 = vadd.f32 1.0, %v13711_v40  ;;  %v9153_v39 = vcombine.low %v9145_v12, %v9152_v28  ;;  %v12438_v27 = vmul.f32 -1.442695, %v5607_v13  ;;  %v5175_v13 = vpop.xlane.xlu0 %5174 }
 0x582   : > { %v12437_v20 = vmul.f32 -1.442695, %v5606_v38  ;;  %v16685_v30 = vpop.eup %13714  ;;  %v5860_v10 = vadd.f32 1.0, %v13713_v17  ;;  %v9089_v48 = vcombine.low %v9080_v14, %v9087_v15  ;;  %v6792_v57 = vrot.slane %v16271_v9, %v16061_v7 }
 0x583   : > { %v9096_v25 = vrot.slane %v9088_v53, %v16083_v21  ;;  %13716 = vrcp.f32 %v5861_v1  ;;  %11322 = vperm.xlu0 %13534, %v9153_v39   ;;  %v6796_v22 = vrot.slane %v16271_v9, %v16064_v51  ;;  %v6800_v56 = vrot.slane %v16271_v9, %v16067_v41  ;;  %v18215_v1 = vld [vmem:[#allocation11_spill] sm:$0xff] }
 0x584   : > { %v6804_v31 = vrot.slane %v16271_v9, %v16071_v4  ;;  %13718 = vrcp.f32 %v5860_v10  ;;  %v9103_v54 = vrot.slane %v9089_v48, %v16083_v21  ;;  %v6808_v55 = vrot.slane %v16271_v9, %v16076_v3  ;;  %v18216_v48 = vld [vmem:[#allocation43_spill] sm:$0xff] }
 0x585   : > { %v6812_v49 = vrot.slane %v16271_v9, %v16080_v36  ;;  %13720 = vpow2.f32 %v12438_v27  ;;  %v9203_v35 = vcombine.low %v6784_v33, %v6788_v23  ;;  %v9204_v60 = vcombine.low %v6792_v57, %v6796_v22  ;;  %v5178_v9 = vpop.xlane.xlu1 %5177 }
 0x586   : > { %v9205_v29 = vcombine.low %v6800_v56, %v6804_v31  ;;  %v9104_v46 = vcombine.low %v9096_v25, %v9103_v54  ;;  %13722 = vpow2.f32 %v12437_v20  ;;  %v6752_v0 = vrot.slane %v16278_v2, %v16051_v34 }
 0x587   : > { %v9206_v32 = vcombine.low %v6808_v55, %v6812_v49  ;;  %v9213_v42 = vrot.slane %v9203_v35, %v16083_v21  ;;  %v9220_v6 = vrot.slane %v9204_v60, %v16083_v21  ;;  %v6756_v18 = vrot.slane %v16278_v2, %v16056_v26 }
 0x588   : > { %v9227_v12 = vrot.slane %v9205_v29, %v16083_v21  ;;  %11319 = vperm.xlu1 %13535, %v9104_v46   ;;  %v6760_v16 = vrot.slane %v16278_v2, %v16061_v7  ;;  %v6764_v28 = vrot.slane %v16278_v2, %v16064_v51  ;;  %v6768_v14 = vrot.slane %v16278_v2, %v16067_v41 }
 0x589   : > { %v9234_v59 = vrot.slane %v9206_v32, %v16083_v21  ;;  %v9235_v38 = vcombine.low %v9213_v42, %v9220_v6  ;;  %v6772_v40 = vrot.slane %v16278_v2, %v16071_v4  ;;  %v6776_v15 = vrot.slane %v16278_v2, %v16076_v3 }
 0x58a   : > { %v6780_v53 = vrot.slane %v16278_v2, %v16080_v36  ;;  %v9154_v23 = vcombine.low %v6752_v0, %v6756_v18  ;;  %v9155_v17 = vcombine.low %v6760_v16, %v6764_v28  ;;  %v5543_v39 = vadd.f32 %v18215_v1, %v5178_v9 }
 0x58b   : > { %v9236_v33 = vcombine.low %v9227_v12, %v9234_v59  ;;  %v9243_v27 = vrot.slane %v9235_v38, %v16083_v21  ;;  %v9156_v20 = vcombine.low %v6768_v14, %v6772_v40  ;;  %v5542_v25 = vadd.f32 %v18216_v48, %v5175_v13 }
 0x58c   : > { %v9157_v10 = vcombine.low %v6776_v15, %v6780_v53  ;;  %v9164_v22 = vrot.slane %v9154_v23, %v16083_v21  ;;  %v9171_v56 = vrot.slane %v9155_v17, %v16083_v21  ;;  %v5609_v31 = vadd.f32 %v16027_v24, %v5543_v39 }
 0x58d   : > { %v9250_v57 = vrot.slane %v9236_v33, %v16083_v21  ;;  %v16728_v2 = vpop.eup %13716  ;;  %v9178_v54 = vrot.slane %v9156_v20, %v16083_v21  ;;  %v5608_v49 = vadd.f32 %v16027_v24, %v5542_v25  ;;  %v6848_v35 = vrot.slane %v16312_v62, %v16051_v34 }
 0x58e   : > { %v9185_v55 = vrot.slane %v9157_v10, %v16083_v21  ;;  %v16735_v60 = vpop.eup %13718  ;;  %v9186_v46 = vcombine.low %v9164_v22, %v9171_v56  ;;  %v12440_v32 = vmul.f32 -1.442695, %v5609_v31  ;;  %v6852_v0 = vrot.slane %v16312_v62, %v16056_v26  ;;  %v5184_v22 = vpop.xlane.xlu1 %5183 }
 0x58f   : > { %v9251_v29 = vcombine.low %v9243_v27, %v9250_v57  ;;  %v13721_v42 = vpop.eup %13720  ;;  %v12439_v12 = vmul.f32 -1.442695, %v5608_v49  ;;  %v6856_v18 = vrot.slane %v16312_v62, %v16061_v7  ;;  %v6860_v9 = vrot.slane %v16312_v62, %v16064_v51  ;;  %v5181_v56 = vpop.xlane.xlu0 %5180 }
 0x590   : > { %v9187_v6 = vcombine.low %v9178_v54, %v9185_v55  ;;  %v13723_v59 = vpop.eup %13722  ;;  %v5863_v16 = vadd.f32 1.0, %v13721_v42  ;;  %v9194_v28 = vrot.slane %v9186_v46, %v16083_v21  ;;  %13724 = vpow2.f32 %v12440_v32 }
 0x591   : > { %11328 = vperm.xlu0 %13534, %v9251_v29   ;;  %v6864_v14 = vrot.slane %v16312_v62, %v16067_v41  ;;  %13726 = vpow2.f32 %v12439_v12  ;;  %v6868_v38 = vrot.slane %v16312_v62, %v16071_v4  ;;  %v5862_v40 = vadd.f32 1.0, %v13723_v59 }
 0x592   : > { %v9201_v13 = vrot.slane %v9187_v6, %v16083_v21  ;;  %v6872_v15 = vrot.slane %v16312_v62, %v16076_v3  ;;  %v6876_v53 = vrot.slane %v16312_v62, %v16080_v36  ;;  %v9301_v33 = vcombine.low %v6848_v35, %v6852_v0  ;;  %v18217_v6 = vld [vmem:[#allocation42_spill] sm:$0xff] }
 0x593   : > { %13728 = vrcp.f32 %v5863_v16  ;;  %v9302_v17 = vcombine.low %v6856_v18, %v6860_v9  ;;  %v9303_v1 = vcombine.low %v6864_v14, %v6868_v38  ;;  %v6816_v20 = vrot.slane %v16319_v47, %v16051_v34  ;;  %v18218_v18 = vld [vmem:[#allocation7_spill] sm:$0xff] }
 0x594   : > { %v9202_v23 = vcombine.low %v9194_v28, %v9201_v13  ;;  %v9304_v39 = vcombine.low %v6872_v15, %v6876_v53  ;;  %v9311_v27 = vrot.slane %v9301_v33, %v16083_v21  ;;  %v6820_v10 = vrot.slane %v16319_v47, %v16056_v26 }
 0x595   : > { %v9318_v48 = vrot.slane %v9302_v17, %v16083_v21  ;;  %v9325_v25 = vrot.slane %v9303_v1, %v16083_v21  ;;  %v6824_v62 = vrot.slane %v16319_v47, %v16061_v7  ;;  %v6828_v57 = vrot.slane %v16319_v47, %v16064_v51 }
 0x596   : > { %11325 = vperm.xlu1 %13535, %v9202_v23   ;;  %v9332_v31 = vrot.slane %v9304_v39, %v16083_v21  ;;  %v6832_v54 = vrot.slane %v16319_v47, %v16067_v41  ;;  %v6836_v55 = vrot.slane %v16319_v47, %v16071_v4  ;;  %v6840_v49 = vrot.slane %v16319_v47, %v16076_v3 }
 0x597   : > { %v9333_v35 = vcombine.low %v9311_v27, %v9318_v48  ;;  %v6844_v29 = vrot.slane %v16319_v47, %v16080_v36  ;;  %v9252_v46 = vcombine.low %v6816_v20, %v6820_v10  ;;  %v9253_v32 = vcombine.low %v6824_v62, %v6828_v57 }
 0x598   : > { %v9334_v0 = vcombine.low %v9325_v25, %v9332_v31  ;;  %v9254_v42 = vcombine.low %v6832_v54, %v6836_v55  ;;  %v5545_v12 = vadd.f32 %v18217_v6, %v5184_v22  ;;  %v5544_v9 = vadd.f32 %v18218_v18, %v5181_v56 }
 0x599   : > { %v9341_v59 = vrot.slane %v9333_v35, %v16083_v21  ;;  %v9255_v16 = vcombine.low %v6840_v49, %v6844_v29  ;;  %v9262_v28 = vrot.slane %v9252_v46, %v16083_v21  ;;  %v9269_v14 = vrot.slane %v9253_v32, %v16083_v21 }
 0x59a   : > { %v13725_v13 = vpop.eup %13724  ;;  %v9348_v38 = vrot.slane %v9334_v0, %v16083_v21  ;;  %v9276_v47 = vrot.slane %v9254_v42, %v16083_v21  ;;  %v5611_v15 = vadd.f32 %v16027_v24, %v5545_v12  ;;  %v5610_v53 = vadd.f32 %v16027_v24, %v5544_v9 }
 0x59b   : > { %v13727_v33 = vpop.eup %13726  ;;  %13730 = vrcp.f32 %v5862_v40  ;;  %v9283_v23 = vrot.slane %v9255_v16, %v16083_v21  ;;  %v9284_v17 = vcombine.low %v9262_v28, %v9269_v14  ;;  %v6912_v20 = vrot.slane %v16369_v19, %v16051_v34  ;;  %v5190_v16 = vpop.xlane.xlu1 %5189 }
 0x59c   : > { %v9349_v1 = vcombine.low %v9341_v59, %v9348_v38  ;;  %v12442_v39 = vmul.f32 -1.442695, %v5611_v15  ;;  %v12441_v27 = vmul.f32 -1.442695, %v5610_v53  ;;  %v5865_v48 = vadd.f32 1.0, %v13725_v13  ;;  %v5187_v38 = vpop.xlane.xlu0 %5186 }
 0x59d   : > { %v16785_v10 = vpop.eup %13728  ;;  %v9285_v25 = vcombine.low %v9276_v47, %v9283_v23  ;;  %v9292_v62 = vrot.slane %v9284_v17, %v16083_v21  ;;  %v6916_v57 = vrot.slane %v16369_v19, %v16056_v26  ;;  %v5864_v22 = vadd.f32 1.0, %v13727_v33 }
 0x59e   : > { %11334 = vperm.xlu0 %13534, %v9349_v1   ;;  %v6920_v40 = vrot.slane %v16369_v19, %v16061_v7  ;;  %v6924_v56 = vrot.slane %v16369_v19, %v16064_v51  ;;  %v6928_v31 = vrot.slane %v16369_v19, %v16067_v41  ;;  %13732 = vpow2.f32 %v12442_v39 }
 0x59f   : > { %v9299_v54 = vrot.slane %v9285_v25, %v16083_v21  ;;  %v6932_v55 = vrot.slane %v16369_v19, %v16071_v4  ;;  %v6936_v49 = vrot.slane %v16369_v19, %v16076_v3  ;;  %13734 = vpow2.f32 %v12441_v27  ;;  %v18219_v27 = vld [vmem:[#allocation15_spill] sm:$0xff] }
 0x5a0   : > { %v6940_v35 = vrot.slane %v16369_v19, %v16080_v36  ;;  %v9399_v29 = vcombine.low %v6912_v20, %v6916_v57  ;;  %v9400_v46 = vcombine.low %v6920_v40, %v6924_v56  ;;  %v6880_v42 = vrot.slane %v16371_v8, %v16051_v34  ;;  %v18220_v40 = vld [vmem:[#allocation8_spill] sm:$0xff] }
 0x5a1   : > { %v9300_v32 = vcombine.low %v9292_v62, %v9299_v54  ;;  %v9401_v0 = vcombine.low %v6928_v31, %v6932_v55  ;;  %v6884_v6 = vrot.slane %v16371_v8, %v16056_v26  ;;  %v6888_v59 = vrot.slane %v16371_v8, %v16061_v7 }
 0x5a2   : > { %v9402_v12 = vcombine.low %v6936_v49, %v6940_v35  ;;  %v9409_v18 = vrot.slane %v9399_v29, %v16083_v21  ;;  %v9416_v9 = vrot.slane %v9400_v46, %v16083_v21  ;;  %v6892_v28 = vrot.slane %v16371_v8, %v16064_v51 }
 0x5a3   : > { %11331 = vperm.xlu1 %13535, %v9300_v32   ;;  %v9423_v19 = vrot.slane %v9401_v0, %v16083_v21  ;;  %v6896_v14 = vrot.slane %v16371_v8, %v16067_v41  ;;  %v6900_v13 = vrot.slane %v16371_v8, %v16071_v4  ;;  %v6904_v53 = vrot.slane %v16371_v8, %v16076_v3 }
 0x5a4   : > { %v9430_v47 = vrot.slane %v9402_v12, %v16083_v21  ;;  %v9431_v15 = vcombine.low %v9409_v18, %v9416_v9  ;;  %v6908_v33 = vrot.slane %v16371_v8, %v16080_v36  ;;  %v9350_v17 = vcombine.low %v6880_v42, %v6884_v6 }
 0x5a5   : > { %v16823_v23 = vpop.eup %13730  ;;  %v9351_v1 = vcombine.low %v6888_v59, %v6892_v28  ;;  %v9352_v39 = vcombine.low %v6896_v14, %v6900_v13  ;;  %v5547_v20 = vadd.f32 %v18219_v27, %v5190_v16  ;;  %v5546_v56 = vadd.f32 %v18220_v40, %v5187_v38 }
 0x5a6   : > { %v9432_v25 = vcombine.low %v9423_v19, %v9430_v47  ;;  %v9439_v62 = vrot.slane %v9431_v15, %v16083_v21  ;;  %v9353_v57 = vcombine.low %v6904_v53, %v6908_v33  ;;  %v9360_v31 = vrot.slane %v9350_v17, %v16083_v21 }
 0x5a7   : > { %v9367_v54 = vrot.slane %v9351_v1, %v16083_v21  ;;  %v9374_v55 = vrot.slane %v9352_v39, %v16083_v21  ;;  %v5613_v8 = vadd.f32 %v16027_v24, %v5547_v20  ;;  %13736 = vrcp.f32 %v5865_v48 }
 0x5a8   : > { %v9446_v49 = vrot.slane %v9432_v25, %v16083_v21  ;;  %v9381_v35 = vrot.slane %v9353_v57, %v16083_v21  ;;  %v5612_v29 = vadd.f32 %v16027_v24, %v5546_v56  ;;  %v13733_v46 = vpop.eup %13732  ;;  %v6976_v42 = vrot.slane %v16412_v58, %v16051_v34  ;;  %v5196_v56 = vpop.xlane.xlu1 %5195 }
 0x5a9   : > { %v9382_v32 = vcombine.low %v9360_v31, %v9367_v54  ;;  %v12444_v0 = vmul.f32 -1.442695, %v5613_v8  ;;  %v6980_v6 = vrot.slane %v16412_v58, %v16056_v26  ;;  %v13735_v12 = vpop.eup %13734  ;;  %v6984_v48 = vrot.slane %v16412_v58, %v16061_v7  ;;  %v5193_v31 = vpop.xlane.xlu0 %5192 }
 0x5aa   : > { %v9447_v18 = vcombine.low %v9439_v62, %v9446_v49  ;;  %v9383_v9 = vcombine.low %v9374_v55, %v9381_v35  ;;  %v12443_v59 = vmul.f32 -1.442695, %v5612_v29  ;;  %13738 = vrcp.f32 %v5864_v22 }
 0x5ab   : > { %v5867_v16 = vadd.f32 1.0, %v13733_v46  ;;  %v9390_v19 = vrot.slane %v9382_v32, %v16083_v21  ;;  %v6988_v28 = vrot.slane %v16412_v58, %v16064_v51  ;;  %13740 = vpow2.f32 %v12444_v0 }
 0x5ac   : > { %11340 = vperm.xlu0 %13534, %v9447_v18   ;;  %v9397_v14 = vrot.slane %v9383_v9, %v16083_v21  ;;  %v6992_v13 = vrot.slane %v16412_v58, %v16067_v41  ;;  %v6996_v38 = vrot.slane %v16412_v58, %v16071_v4  ;;  %v5866_v47 = vadd.f32 1.0, %v13735_v12  ;;  %v18221_v12 = vld [vmem:[#allocation9_spill] sm:$0xff]  ;;  %v18222_v9 = vld [vmem:[#allocation12_spill] sm:$0xff] }
 0x5ad   : > { %v7000_v22 = vrot.slane %v16412_v58, %v16076_v3  ;;  %v7004_v15 = vrot.slane %v16412_v58, %v16080_v36  ;;  %v9497_v53 = vcombine.low %v6976_v42, %v6980_v6  ;;  %13742 = vpow2.f32 %v12443_v59 }
 0x5ae   : > { %v9398_v33 = vcombine.low %v9390_v19, %v9397_v14  ;;  %v9498_v17 = vcombine.low %v6984_v48, %v6988_v28  ;;  %v9499_v1 = vcombine.low %v6992_v13, %v6996_v38  ;;  %v6944_v20 = vrot.slane %v16418_v63, %v16051_v34 }
 0x5af   : > { %v9500_v39 = vcombine.low %v7000_v22, %v7004_v15  ;;  %v9507_v27 = vrot.slane %v9497_v53, %v16083_v21  ;;  %v6948_v25 = vrot.slane %v16418_v63, %v16056_v26  ;;  %v6952_v58 = vrot.slane %v16418_v63, %v16061_v7 }
 0x5b0   : > { %11337 = vperm.xlu1 %13535, %v9398_v33   ;;  %v9514_v62 = vrot.slane %v9498_v17, %v16083_v21  ;;  %v9521_v57 = vrot.slane %v9499_v1, %v16083_v21  ;;  %v6956_v40 = vrot.slane %v16418_v63, %v16064_v51  ;;  %v6960_v55 = vrot.slane %v16418_v63, %v16067_v41 }
 0x5b1   : > { %v9528_v54 = vrot.slane %v9500_v39, %v16083_v21  ;;  %v6964_v8 = vrot.slane %v16418_v63, %v16071_v4  ;;  %v6968_v49 = vrot.slane %v16418_v63, %v16076_v3  ;;  %v16871_v35 = vpop.eup %13736  ;;  %v6972_v46 = vrot.slane %v16418_v63, %v16080_v36 }
 0x5b2   : > { %v9529_v29 = vcombine.low %v9507_v27, %v9514_v62  ;;  %v9448_v32 = vcombine.low %v6944_v20, %v6948_v25  ;;  %v9449_v0 = vcombine.low %v6952_v58, %v6956_v40  ;;  %v5549_v18 = vadd.f32 %v18221_v12, %v5196_v56 }
 0x5b3   : > { %v9530_v42 = vcombine.low %v9521_v57, %v9528_v54  ;;  %v9450_v6 = vcombine.low %v6960_v55, %v6964_v8  ;;  %v5548_v59 = vadd.f32 %v18222_v9, %v5193_v31  ;;  %v9451_v19 = vcombine.low %v6968_v49, %v6972_v46 }
 0x5b4   : > { %v9537_v48 = vrot.slane %v9529_v29, %v16083_v21  ;;  %v9458_v28 = vrot.slane %v9448_v32, %v16083_v21  ;;  %v9465_v14 = vrot.slane %v9449_v0, %v16083_v21  ;;  %v16880_v13 = vpop.eup %13738  ;;  %v5615_v22 = vadd.f32 %v16027_v24, %v5549_v18 }
 0x5b5   : > { %v9544_v38 = vrot.slane %v9530_v42, %v16083_v21  ;;  %v9472_v63 = vrot.slane %v9450_v6, %v16083_v21  ;;  %v5614_v15 = vadd.f32 %v16027_v24, %v5548_v59  ;;  %v13741_v53 = vpop.eup %13740  ;;  %13744 = vrcp.f32 %v5867_v16 }
 0x5b6   : > { %v9479_v33 = vrot.slane %v9451_v19, %v16083_v21  ;;  %v9480_v17 = vcombine.low %v9458_v28, %v9465_v14  ;;  %v7040_v1 = vrot.slane %v16470_v43, %v16051_v34  ;;  %v12446_v27 = vmul.f32 -1.442695, %v5615_v22 }
 0x5b7   : > { %v9545_v39 = vcombine.low %v9537_v48, %v9544_v38  ;;  %v12445_v20 = vmul.f32 -1.442695, %v5614_v15  ;;  %v7044_v25 = vrot.slane %v16470_v43, %v16056_v26  ;;  %v13743_v62 = vpop.eup %13742  ;;  %13746 = vrcp.f32 %v5866_v47  ;;  %v5202_v48 = vpop.xlane.xlu1 %5201 }
 0x5b8   : > { %v9481_v57 = vcombine.low %v9472_v63, %v9479_v33  ;;  %v9488_v58 = vrot.slane %v9480_v17, %v16083_v21  ;;  %v7048_v16 = vrot.slane %v16470_v43, %v16061_v7  ;;  %v5869_v40 = vadd.f32 1.0, %v13741_v53  ;;  %v5199_v38 = vpop.xlane.xlu0 %5198 }
 0x5b9   : > { %11346 = vperm.xlu0 %13534, %v9545_v39   ;;  %13748 = vpow2.f32 %v12446_v27  ;;  %v7052_v56 = vrot.slane %v16470_v43, %v16064_v51  ;;  %v7056_v31 = vrot.slane %v16470_v43, %v16067_v41  ;;  %v7060_v47 = vrot.slane %v16470_v43, %v16071_v4  ;;  %v18223_v27 = vld [vmem:[#allocation19_spill] sm:$0xff] }
 0x5ba   : > { %v9495_v54 = vrot.slane %v9481_v57, %v16083_v21  ;;  %13750 = vpow2.f32 %v12445_v20  ;;  %v7064_v55 = vrot.slane %v16470_v43, %v16076_v3  ;;  %v5868_v8 = vadd.f32 1.0, %v13743_v62 }
 0x5bb   : > { %v7068_v49 = vrot.slane %v16470_v43, %v16080_v36  ;;  %v9595_v29 = vcombine.low %v7040_v1, %v7044_v25  ;;  %v9596_v46 = vcombine.low %v7048_v16, %v7052_v56  ;;  %v9597_v0 = vcombine.low %v7056_v31, %v7060_v47 }
 0x5bc   : > { %v9496_v32 = vcombine.low %v9488_v58, %v9495_v54  ;;  %v7008_v42 = vrot.slane %v16475_v52, %v16051_v34  ;;  %v7012_v6 = vrot.slane %v16475_v52, %v16056_v26  ;;  %v7016_v59 = vrot.slane %v16475_v52, %v16061_v7  ;;  %v18224_v58 = vld [vmem:[#allocation13_spill] sm:$0xff] }
 0x5bd   : > { %v9598_v12 = vcombine.low %v7064_v55, %v7068_v49  ;;  %v9605_v18 = vrot.slane %v9595_v29, %v16083_v21  ;;  %v9612_v9 = vrot.slane %v9596_v46, %v16083_v21  ;;  %v9619_v43 = vrot.slane %v9597_v0, %v16083_v21 }
 0x5be   : > { %11343 = vperm.xlu1 %13535, %v9496_v32   ;;  %v7020_v19 = vrot.slane %v16475_v52, %v16064_v51  ;;  %v7024_v28 = vrot.slane %v16475_v52, %v16067_v41  ;;  %v7028_v14 = vrot.slane %v16475_v52, %v16071_v4  ;;  %v7032_v15 = vrot.slane %v16475_v52, %v16076_v3 }
 0x5bf   : > { %v9626_v63 = vrot.slane %v9598_v12, %v16083_v21  ;;  %v9627_v22 = vcombine.low %v9605_v18, %v9612_v9  ;;  %v7036_v53 = vrot.slane %v16475_v52, %v16080_v36  ;;  %v16925_v33 = vpop.eup %13744  ;;  %v9546_v17 = vcombine.low %v7008_v42, %v7012_v6 }
 0x5c0   : > { %v9547_v1 = vcombine.low %v7016_v59, %v7020_v19  ;;  %v9548_v39 = vcombine.low %v7024_v28, %v7028_v14  ;;  %v5551_v20 = vadd.f32 %v18223_v27, %v5202_v48  ;;  %v5550_v16 = vadd.f32 %v18224_v58, %v5199_v38 }
 0x5c1   : > { %v9628_v25 = vcombine.low %v9619_v43, %v9626_v63  ;;  %v9635_v62 = vrot.slane %v9627_v22, %v16083_v21  ;;  %v9549_v57 = vcombine.low %v7032_v15, %v7036_v53  ;;  %v16930_v56 = vpop.eup %13746  ;;  %v9556_v31 = vrot.slane %v9546_v17, %v16083_v21 }
 0x5c2   : > { %v9563_v54 = vrot.slane %v9547_v1, %v16083_v21  ;;  %v9570_v52 = vrot.slane %v9548_v39, %v16083_v21  ;;  %v5617_v47 = vadd.f32 %v16027_v24, %v5551_v20  ;;  %13752 = vrcp.f32 %v5869_v40 }
 0x5c3   : > { %v13749_v55 = vpop.eup %13748  ;;  %v9642_v49 = vrot.slane %v9628_v25, %v16083_v21  ;;  %v9577_v29 = vrot.slane %v9549_v57, %v16083_v21  ;;  %v5616_v0 = vadd.f32 %v16027_v24, %v5550_v16  ;;  %v7104_v42 = vrot.slane %v16516_v61, %v16051_v34  ;;  %v5208_v16 = vpop.xlane.xlu1 %5207 }
 0x5c4   : > { %v13751_v46 = vpop.eup %13750  ;;  %v9578_v32 = vcombine.low %v9556_v31, %v9563_v54  ;;  %v7108_v6 = vrot.slane %v16516_v61, %v16056_v26  ;;  %13754 = vrcp.f32 %v5868_v8  ;;  %v12448_v9 = vmul.f32 -1.442695, %v5617_v47  ;;  %v5205_v31 = vpop.xlane.xlu0 %5204 }
 0x5c5   : > { %v9643_v12 = vcombine.low %v9635_v62, %v9642_v49  ;;  %v9579_v18 = vcombine.low %v9570_v52, %v9577_v29  ;;  %v5871_v59 = vadd.f32 1.0, %v13749_v55  ;;  %v7112_v48 = vrot.slane %v16516_v61, %v16061_v7 }
 0x5c6   : > { %v9586_v40 = vrot.slane %v9578_v32, %v16083_v21  ;;  %v7116_v43 = vrot.slane %v16516_v61, %v16064_v51  ;;  %v5870_v19 = vadd.f32 1.0, %v13751_v46  ;;  %v7120_v14 = vrot.slane %v16516_v61, %v16067_v41 }
 0x5c7   : > { %11352 = vperm.xlu0 %13534, %v9643_v12   ;;  %v9593_v28 = vrot.slane %v9579_v18, %v16083_v21  ;;  %v7124_v8 = vrot.slane %v16516_v61, %v16071_v4  ;;  %v12447_v38 = vmul.f32 -1.442695, %v5616_v0  ;;  %v7128_v63 = vrot.slane %v16516_v61, %v16076_v3  ;;  %v18225_v12 = vld [vmem:[#allocation14_spill] sm:$0xff] }
 0x5c8   : > { %v7132_v22 = vrot.slane %v16516_v61, %v16080_v36  ;;  %v9693_v15 = vcombine.low %v7104_v42, %v7108_v6  ;;  %13756 = vpow2.f32 %v12448_v9  ;;  %v9694_v17 = vcombine.low %v7112_v48, %v7116_v43  ;;  %v18226_v9 = vld [vmem:[#allocation16_spill] sm:$0xff] }
 0x5c9   : > { %v9594_v53 = vcombine.low %v9586_v40, %v9593_v28  ;;  %v9695_v1 = vcombine.low %v7120_v14, %v7124_v8  ;;  %v7072_v20 = vrot.slane %v16529_v50, %v16051_v34  ;;  %v7076_v25 = vrot.slane %v16529_v50, %v16056_v26 }
 0x5ca   : > { %v9696_v39 = vcombine.low %v7128_v63, %v7132_v22  ;;  %v9703_v27 = vrot.slane %v9693_v15, %v16083_v21  ;;  %v9710_v62 = vrot.slane %v9694_v17, %v16083_v21  ;;  %v7080_v61 = vrot.slane %v16529_v50, %v16061_v7 }
 0x5cb   : > { %11349 = vperm.xlu1 %13535, %v9594_v53   ;;  %v9717_v57 = vrot.slane %v9695_v1, %v16083_v21  ;;  %v7084_v58 = vrot.slane %v16529_v50, %v16064_v51  ;;  %v7088_v52 = vrot.slane %v16529_v50, %v16067_v41  ;;  %v7092_v47 = vrot.slane %v16529_v50, %v16071_v4 }
 0x5cc   : > { %v9724_v54 = vrot.slane %v9696_v39, %v16083_v21  ;;  %v7096_v55 = vrot.slane %v16529_v50, %v16076_v3  ;;  %v16975_v49 = vpop.eup %13752  ;;  %v9725_v29 = vcombine.low %v9703_v27, %v9710_v62  ;;  %v7100_v46 = vrot.slane %v16529_v50, %v16080_v36 }
 0x5cd   : > { %v9644_v32 = vcombine.low %v7072_v20, %v7076_v25  ;;  %v9645_v0 = vcombine.low %v7080_v61, %v7084_v58  ;;  %v9646_v6 = vcombine.low %v7088_v52, %v7092_v47  ;;  %v5553_v18 = vadd.f32 %v18225_v12, %v5208_v16 }
 0x5ce   : > { %v9726_v42 = vcombine.low %v9717_v57, %v9724_v54  ;;  %v5552_v40 = vadd.f32 %v18226_v9, %v5205_v31  ;;  %v16981_v48 = vpop.eup %13754  ;;  %v9733_v43 = vrot.slane %v9725_v29, %v16083_v21  ;;  %v9647_v28 = vcombine.low %v7096_v55, %v7100_v46 }
 0x5cf   : > { %v9654_v14 = vrot.slane %v9644_v32, %v16083_v21  ;;  %v9661_v8 = vrot.slane %v9645_v0, %v16083_v21  ;;  %13758 = vpow2.f32 %v12447_v38  ;;  %v9668_v63 = vrot.slane %v9646_v6, %v16083_v21 }
 0x5d0   : > { %v9740_v50 = vrot.slane %v9726_v42, %v16083_v21  ;;  %v5619_v22 = vadd.f32 %v16027_v24, %v5553_v18  ;;  %v9675_v15 = vrot.slane %v9647_v28, %v16083_v21  ;;  %v5618_v17 = vadd.f32 %v16027_v24, %v5552_v40 }
 0x5d1   : > { %v9676_v53 = vcombine.low %v9654_v14, %v9661_v8  ;;  %v7168_v1 = vrot.slane %v16570_v11, %v16051_v34  ;;  %v7172_v20 = vrot.slane %v16570_v11, %v16056_v26  ;;  %v7176_v38 = vrot.slane %v16570_v11, %v16061_v7  ;;  %v5211_v14 = vpop.xlane.xlu0 %5210 }
 0x5d2   : > { %v9741_v39 = vcombine.low %v9733_v43, %v9740_v50  ;;  %v12450_v27 = vmul.f32 -1.442695, %v5619_v22  ;;  %v13757_v25 = vpop.eup %13756  ;;  %13760 = vrcp.f32 %v5871_v59  ;;  %v9677_v62 = vcombine.low %v9668_v63, %v9675_v15 }
 0x5d3   : > { %v9684_v57 = vrot.slane %v9676_v53, %v16083_v21  ;;  %v7180_v61 = vrot.slane %v16570_v11, %v16064_v51  ;;  %13762 = vrcp.f32 %v5870_v19  ;;  %v7184_v58 = vrot.slane %v16570_v11, %v16067_v41 }
 0x5d4   : > { %11358 = vperm.xlu0 %13534, %v9741_v39   ;;  %v7188_v16 = vrot.slane %v16570_v11, %v16071_v4  ;;  %v9691_v31 = vrot.slane %v9677_v62, %v16083_v21  ;;  %13764 = vpow2.f32 %v12450_v27  ;;  %v7192_v59 = vrot.slane %v16570_v11, %v16076_v3  ;;  %v18227_v39 = vld [vmem:[#allocation23_spill] sm:$0xff]  ;;  %v18228_v62 = vld [vmem:[#allocation17_spill] sm:$0xff] }
 0x5d5   : > { %v7196_v54 = vrot.slane %v16570_v11, %v16080_v36  ;;  %v12449_v52 = vmul.f32 -1.442695, %v5618_v17  ;;  %v9791_v47 = vcombine.low %v7168_v1, %v7172_v20  ;;  %v9792_v55 = vcombine.low %v7176_v38, %v7180_v61  ;;  %v5214_v11 = vpop.xlane.xlu1 %5213 }
 0x5d6   : > { %v9793_v19 = vcombine.low %v7184_v58, %v7188_v16  ;;  %v5873_v29 = vadd.f32 1.0, %v13757_v25  ;;  %v9692_v46 = vcombine.low %v9684_v57, %v9691_v31  ;;  %v7136_v0 = vrot.slane %v16576_v37, %v16051_v34 }
 0x5d7   : > { %v9794_v32 = vcombine.low %v7192_v59, %v7196_v54  ;;  %v9801_v42 = vrot.slane %v9791_v47, %v16083_v21  ;;  %v9808_v6 = vrot.slane %v9792_v55, %v16083_v21  ;;  %v7140_v18 = vrot.slane %v16576_v37, %v16056_v26 }
 0x5d8   : > { %v9815_v12 = vrot.slane %v9793_v19, %v16083_v21  ;;  %11355 = vperm.xlu1 %13535, %v9692_v46   ;;  %v7144_v40 = vrot.slane %v16576_v37, %v16061_v7  ;;  %v7148_v43 = vrot.slane %v16576_v37, %v16064_v51  ;;  %v7152_v28 = vrot.slane %v16576_v37, %v16067_v41 }
 0x5d9   : > { %v9822_v9 = vrot.slane %v9794_v32, %v16083_v21  ;;  %v13759_v8 = vpop.eup %13758  ;;  %v9823_v50 = vcombine.low %v9801_v42, %v9808_v6  ;;  %v7156_v63 = vrot.slane %v16576_v37, %v16071_v4  ;;  %v7160_v22 = vrot.slane %v16576_v37, %v16076_v3 }
 0x5da   : > { %v7164_v15 = vrot.slane %v16576_v37, %v16080_v36  ;;  %v9742_v17 = vcombine.low %v7136_v0, %v7140_v18  ;;  %v9743_v1 = vcombine.low %v7144_v40, %v7148_v43  ;;  %v5555_v27 = vadd.f32 %v18227_v39, %v5214_v11 }
 0x5db   : > { %v9824_v53 = vcombine.low %v9815_v12, %v9822_v9  ;;  %v9831_v20 = vrot.slane %v9823_v50, %v16083_v21  ;;  %v9744_v38 = vcombine.low %v7152_v28, %v7156_v63  ;;  %v5554_v57 = vadd.f32 %v18228_v62, %v5211_v14  ;;  %v5220_v62 = vpop.xlane.xlu1 %5219 }
 0x5dc   : > { %v9745_v25 = vcombine.low %v7160_v22, %v7164_v15  ;;  %v17032_v61 = vpop.eup %13760  ;;  %v9752_v16 = vrot.slane %v9742_v17, %v16083_v21  ;;  %v9759_v31 = vrot.slane %v9743_v1, %v16083_v21  ;;  %v5621_v37 = vadd.f32 %v16027_v24, %v5555_v27 }
 0x5dd   : > { %v9838_v58 = vrot.slane %v9824_v53, %v16083_v21  ;;  %v17038_v59 = vpop.eup %13762  ;;  %v5872_v54 = vadd.f32 1.0, %v13759_v8  ;;  %13766 = vpow2.f32 %v12449_v52  ;;  %v9766_v47 = vrot.slane %v9744_v38, %v16083_v21 }
 0x5de   : > { %v9773_v55 = vrot.slane %v9745_v25, %v16083_v21  ;;  %v13765_v19 = vpop.eup %13764  ;;  %v9774_v32 = vcombine.low %v9752_v16, %v9759_v31  ;;  %v12452_v0 = vmul.f32 -1.442695, %v5621_v37  ;;  %v7232_v42 = vrot.slane %v16629_v5, %v16051_v34 }
 0x5df   : > { %v9839_v46 = vcombine.low %v9831_v20, %v9838_v58  ;;  %v5620_v12 = vadd.f32 %v16027_v24, %v5554_v57  ;;  %v7236_v18 = vrot.slane %v16629_v5, %v16056_v26  ;;  %v7240_v52 = vrot.slane %v16629_v5, %v16061_v7  ;;  %v5217_v57 = vpop.xlane.xlu0 %5216 }
 0x5e0   : > { %v9775_v6 = vcombine.low %v9766_v47, %v9773_v55  ;;  %13768 = vrcp.f32 %v5873_v29  ;;  %v9782_v11 = vrot.slane %v9774_v32, %v16083_v21  ;;  %v7244_v9 = vrot.slane %v16629_v5, %v16064_v51 }
 0x5e1   : > { %11364 = vperm.xlu0 %13534, %v9839_v46   ;;  %v7248_v40 = vrot.slane %v16629_v5, %v16067_v41  ;;  %13770 = vrcp.f32 %v5872_v54  ;;  %v5875_v43 = vadd.f32 1.0, %v13765_v19  ;;  %v7252_v14 = vrot.slane %v16629_v5, %v16071_v4 }
 0x5e2   : > { %v9789_v28 = vrot.slane %v9775_v6, %v16083_v21  ;;  %13772 = vpow2.f32 %v12452_v0  ;;  %v7256_v29 = vrot.slane %v16629_v5, %v16076_v3  ;;  %v7260_v8 = vrot.slane %v16629_v5, %v16080_v36 }
 0x5e3   : > { %v9889_v50 = vcombine.low %v7232_v42, %v7236_v18  ;;  %v12451_v22 = vmul.f32 -1.442695, %v5620_v12  ;;  %v9890_v15 = vcombine.low %v7240_v52, %v7244_v9  ;;  %v9891_v53 = vcombine.low %v7248_v40, %v7252_v14  ;;  %v18229_v42 = vld [vmem:[#allocation18_spill] sm:$0xff]  ;;  %v18230_v12 = vld [vmem:[#allocation20_spill] sm:$0xff] }
 0x5e4   : > { %v9790_v63 = vcombine.low %v9782_v11, %v9789_v28  ;;  %v9892_v17 = vcombine.low %v7256_v29, %v7260_v8  ;;  %v7200_v39 = vrot.slane %v16631_v45, %v16051_v34  ;;  %v7204_v27 = vrot.slane %v16631_v45, %v16056_v26 }
 0x5e5   : > { %v9899_v1 = vrot.slane %v9889_v50, %v16083_v21  ;;  %v9906_v20 = vrot.slane %v9890_v15, %v16083_v21  ;;  %v9913_v38 = vrot.slane %v9891_v53, %v16083_v21  ;;  %v7208_v5 = vrot.slane %v16631_v45, %v16061_v7 }
 0x5e6   : > { %11361 = vperm.xlu1 %13535, %v9790_v63   ;;  %v7212_v25 = vrot.slane %v16631_v45, %v16064_v51  ;;  %v9920_v58 = vrot.slane %v9892_v17, %v16083_v21  ;;  %v7216_v16 = vrot.slane %v16631_v45, %v16067_v41  ;;  %v7220_v31 = vrot.slane %v16631_v45, %v16071_v4 }
 0x5e7   : > { %v7224_v37 = vrot.slane %v16631_v45, %v16076_v3  ;;  %v13767_v54 = vpop.eup %13766  ;;  %v9921_v47 = vcombine.low %v9899_v1, %v9906_v20  ;;  %v7228_v55 = vrot.slane %v16631_v45, %v16080_v36  ;;  %v9840_v19 = vcombine.low %v7200_v39, %v7204_v27 }
 0x5e8   : > { %v9841_v46 = vcombine.low %v7208_v5, %v7212_v25  ;;  %v9922_v32 = vcombine.low %v9913_v38, %v9920_v58  ;;  %v9842_v0 = vcombine.low %v7216_v16, %v7220_v31  ;;  %v5557_v6 = vadd.f32 %v18229_v42, %v5220_v62 }
 0x5e9   : > { %v5556_v18 = vadd.f32 %v18230_v12, %v5217_v57  ;;  %v9929_v52 = vrot.slane %v9921_v47, %v16083_v21  ;;  %v9843_v11 = vcombine.low %v7224_v37, %v7228_v55  ;;  %v9850_v9 = vrot.slane %v9840_v19, %v16083_v21 }
 0x5ea   : > { %v9857_v40 = vrot.slane %v9841_v46, %v16083_v21  ;;  %v17086_v28 = vpop.eup %13768  ;;  %v9936_v14 = vrot.slane %v9922_v32, %v16083_v21  ;;  %v9864_v45 = vrot.slane %v9842_v0, %v16083_v21  ;;  %v5623_v29 = vadd.f32 %v16027_v24, %v5557_v6 }
 0x5eb   : > { %v5622_v8 = vadd.f32 %v16027_v24, %v5556_v18  ;;  %v17092_v50 = vpop.eup %13770  ;;  %13774 = vrcp.f32 %v5875_v43  ;;  %v17094_v63 = vadd.f32 1.0, %v13767_v54  ;;  %v9871_v15 = vrot.slane %v9843_v11, %v16083_v21 }
 0x5ec   : > { %v9872_v53 = vcombine.low %v9850_v9, %v9857_v40  ;;  %v13773_v17 = vpop.eup %13772  ;;  %v9937_v1 = vcombine.low %v9929_v52, %v9936_v14  ;;  %v12454_v39 = vmul.f32 -1.442695, %v5623_v29  ;;  %v7296_v27 = vrot.slane %v16674_v44, %v16051_v34  ;;  %v5223_v40 = vpop.xlane.xlu0 %5222 }
 0x5ed   : > { %v7300_v20 = vrot.slane %v16674_v44, %v16056_v26  ;;  %v9873_v38 = vcombine.low %v9864_v45, %v9871_v15  ;;  %v12453_v25 = vmul.f32 -1.442695, %v5622_v8  ;;  %v7304_v43 = vrot.slane %v16674_v44, %v16061_v7 }
 0x5ee   : > { %v9880_v5 = vrot.slane %v9872_v53, %v16083_v21  ;;  %13776 = vpow2.f32 %v12451_v22  ;;  %11370 = vperm.xlu0 %13534, %v9937_v1   ;;  %v7308_v62 = vrot.slane %v16674_v44, %v16064_v51  ;;  %v7312_v57 = vrot.slane %v16674_v44, %v16067_v41 }
 0x5ef   : > { %v7316_v58 = vrot.slane %v16674_v44, %v16071_v4  ;;  %v5877_v16 = vadd.f32 1.0, %v13773_v17  ;;  %v9887_v31 = vrot.slane %v9873_v38, %v16083_v21  ;;  %v7320_v37 = vrot.slane %v16674_v44, %v16076_v3 }
 0x5f0   : > { %v7324_v54 = vrot.slane %v16674_v44, %v16080_v36  ;;  %13778 = vpow2.f32 %v12454_v39  ;;  %v9987_v22 = vcombine.low %v7296_v27, %v7300_v20  ;;  %v9988_v47 = vcombine.low %v7304_v43, %v7308_v62  ;;  %v5226_v44 = vpop.xlane.xlu1 %5225  ;;  %v18231_v39 = vld [vmem:[#allocation27_spill] sm:$0xff] }
 0x5f1   : > { %v9989_v55 = vcombine.low %v7312_v57, %v7316_v58  ;;  %v9888_v19 = vcombine.low %v9880_v5, %v9887_v31  ;;  %13780 = vpow2.f32 %v12453_v25  ;;  %v7264_v32 = vrot.slane %v16685_v30, %v16051_v34  ;;  %v18232_v25 = vld [vmem:[#allocation21_spill] sm:$0xff] }
 0x5f2   : > { %v9990_v46 = vcombine.low %v7320_v37, %v7324_v54  ;;  %v9997_v0 = vrot.slane %v9987_v22, %v16083_v21  ;;  %v10004_v42 = vrot.slane %v9988_v47, %v16083_v21  ;;  %v7268_v12 = vrot.slane %v16685_v30, %v16056_v26 }
 0x5f3   : > { %v10011_v6 = vrot.slane %v9989_v55, %v16083_v21  ;;  %11367 = vperm.xlu1 %13535, %v9888_v19   ;;  %v7272_v52 = vrot.slane %v16685_v30, %v16061_v7  ;;  %v7276_v11 = vrot.slane %v16685_v30, %v16064_v51  ;;  %v7280_v9 = vrot.slane %v16685_v30, %v16067_v41 }
 0x5f4   : > { %v10018_v18 = vrot.slane %v9990_v46, %v16083_v21  ;;  %v10019_v14 = vcombine.low %v9997_v0, %v10004_v42  ;;  %v7284_v45 = vrot.slane %v16685_v30, %v16071_v4  ;;  %v7288_v29 = vrot.slane %v16685_v30, %v16076_v3 }
 0x5f5   : > { %v7292_v8 = vrot.slane %v16685_v30, %v16080_v36  ;;  %v17135_v15 = vpop.eup %13774  ;;  %v9938_v17 = vcombine.low %v7264_v32, %v7268_v12  ;;  %v9939_v1 = vcombine.low %v7272_v52, %v7276_v11  ;;  %v5559_v27 = vadd.f32 %v18231_v39, %v5226_v44 }
 0x5f6   : > { %v10020_v53 = vcombine.low %v10011_v6, %v10018_v18  ;;  %v10027_v20 = vrot.slane %v10019_v14, %v16083_v21  ;;  %v9940_v38 = vcombine.low %v7280_v9, %v7284_v45  ;;  %v5558_v43 = vadd.f32 %v18232_v25, %v5223_v40 }
 0x5f7   : > { %v9941_v5 = vcombine.low %v7288_v29, %v7292_v8  ;;  %v9948_v57 = vrot.slane %v9938_v17, %v16083_v21  ;;  %v9955_v58 = vrot.slane %v9939_v1, %v16083_v21  ;;  %v5625_v30 = vadd.f32 %v16027_v24, %v5559_v27 }
 0x5f8   : > { %v10034_v62 = vrot.slane %v10020_v53, %v16083_v21  ;;  %v13777_v31 = vpop.eup %13776  ;;  %v9962_v37 = vrot.slane %v9940_v38, %v16083_v21  ;;  %v5624_v22 = vadd.f32 %v16027_v24, %v5558_v43  ;;  %v7360_v47 = vrot.slane %v16728_v2, %v16051_v34  ;;  %v5229_v43 = vpop.xlane.xlu0 %5228 }
 0x5f9   : > { %v9969_v54 = vrot.slane %v9941_v5, %v16083_v21  ;;  %v9970_v19 = vcombine.low %v9948_v57, %v9955_v58  ;;  %v12456_v46 = vmul.f32 -1.442695, %v5625_v30  ;;  %v7364_v32 = vrot.slane %v16728_v2, %v16056_v26 }
 0x5fa   : > { %v10035_v55 = vcombine.low %v10027_v20, %v10034_v62  ;;  %v13779_v0 = vpop.eup %13778  ;;  %v12455_v6 = vmul.f32 -1.442695, %v5624_v22  ;;  %v7368_v12 = vrot.slane %v16728_v2, %v16061_v7  ;;  %v7372_v44 = vrot.slane %v16728_v2, %v16064_v51 }
 0x5fb   : > { %v9971_v42 = vcombine.low %v9962_v37, %v9969_v54  ;;  %v13781_v18 = vpop.eup %13780  ;;  %13782 = vrcp.f32 %v17094_v63  ;;  %v5876_v52 = vadd.f32 1.0, %v13777_v31  ;;  %v9978_v11 = vrot.slane %v9970_v19, %v16083_v21 }
 0x5fc   : > { %11376 = vperm.xlu0 %13534, %v10035_v55   ;;  %v7376_v9 = vrot.slane %v16728_v2, %v16067_v41  ;;  %13784 = vrcp.f32 %v5877_v16  ;;  %v5879_v40 = vadd.f32 1.0, %v13779_v0  ;;  %v7380_v45 = vrot.slane %v16728_v2, %v16071_v4 }
 0x5fd   : > { %v9985_v14 = vrot.slane %v9971_v42, %v16083_v21  ;;  %13786 = vpow2.f32 %v12456_v46  ;;  %v7384_v29 = vrot.slane %v16728_v2, %v16076_v3  ;;  %v7388_v63 = vrot.slane %v16728_v2, %v16080_v36 }
 0x5fe   : > { %v10085_v8 = vcombine.low %v7360_v47, %v7364_v32  ;;  %13788 = vpow2.f32 %v12455_v6  ;;  %v10086_v17 = vcombine.low %v7368_v12, %v7372_v44  ;;  %v10087_v1 = vcombine.low %v7376_v9, %v7380_v45  ;;  %v5232_v47 = vpop.xlane.xlu1 %5231  ;;  %v18233_v32 = vld [vmem:[#allocation24_spill] sm:$0xff] }
 0x5ff   : > { %v9986_v53 = vcombine.low %v9978_v11, %v9985_v14  ;;  %v10088_v39 = vcombine.low %v7384_v29, %v7388_v63  ;;  %v7328_v27 = vrot.slane %v16735_v60, %v16051_v34  ;;  %v7332_v20 = vrot.slane %v16735_v60, %v16056_v26  ;;  %v18234_v14 = vld [vmem:[#allocation22_spill] sm:$0xff] }
 0x600   : > { %v10095_v16 = vrot.slane %v10085_v8, %v16083_v21  ;;  %v10102_v38 = vrot.slane %v10086_v17, %v16083_v21  ;;  %v10109_v5 = vrot.slane %v10087_v1, %v16083_v21  ;;  %v7336_v2 = vrot.slane %v16735_v60, %v16061_v7 }
 0x601   : > { %11373 = vperm.xlu1 %13535, %v9986_v53   ;;  %v7340_v25 = vrot.slane %v16735_v60, %v16064_v51  ;;  %v10116_v62 = vrot.slane %v10088_v39, %v16083_v21  ;;  %v7344_v57 = vrot.slane %v16735_v60, %v16067_v41  ;;  %v7348_v58 = vrot.slane %v16735_v60, %v16071_v4 }
 0x602   : > { %v7352_v30 = vrot.slane %v16735_v60, %v16076_v3  ;;  %v10117_v31 = vcombine.low %v10095_v16, %v10102_v38  ;;  %v7356_v37 = vrot.slane %v16735_v60, %v16080_v36  ;;  %v10036_v54 = vcombine.low %v7328_v27, %v7332_v20 }
 0x603   : > { %v10037_v22 = vcombine.low %v7336_v2, %v7340_v25  ;;  %v5878_v55 = vadd.f32 1.0, %v13781_v18  ;;  %v10118_v19 = vcombine.low %v10109_v5, %v10116_v62  ;;  %v10038_v46 = vcombine.low %v7344_v57, %v7348_v58 }
 0x604   : > { %v5560_v0 = vadd.f32 %v18233_v32, %v5229_v43  ;;  %v10125_v42 = vrot.slane %v10117_v31, %v16083_v21  ;;  %v10039_v6 = vcombine.low %v7352_v30, %v7356_v37  ;;  %v10046_v12 = vrot.slane %v10036_v54, %v16083_v21  ;;  %v5235_v37 = vpop.xlane.xlu0 %5234 }
 0x605   : > { %v10053_v44 = vrot.slane %v10037_v22, %v16083_v21  ;;  %v17190_v11 = vpop.eup %13782  ;;  %v10132_v9 = vrot.slane %v10118_v19, %v16083_v21  ;;  %v10060_v60 = vrot.slane %v10038_v46, %v16083_v21  ;;  %v5561_v45 = vadd.f32 %v18234_v14, %v5232_v47 }
 0x606   : > { %v5626_v18 = vadd.f32 %v16027_v24, %v5560_v0  ;;  %v17196_v29 = vpop.eup %13784  ;;  %13790 = vrcp.f32 %v5876_v52  ;;  %v10067_v63 = vrot.slane %v10039_v6, %v16083_v21  ;;  %v7392_v39 = vrot.slane %v16823_v23, %v16051_v34 }
 0x607   : > { %v10068_v8 = vcombine.low %v10046_v12, %v10053_v44  ;;  %v13787_v53 = vpop.eup %13786  ;;  %13792 = vrcp.f32 %v5879_v40  ;;  %v10133_v17 = vcombine.low %v10125_v42, %v10132_v9  ;;  %v7396_v38 = vrot.slane %v16823_v23, %v16056_v26  ;;  %v18235_v42 = vld [vmem:[#allocation25_spill] sm:$0xff] }
 0x608   : > { %v12457_v1 = vmul.f32 -1.442695, %v5626_v18  ;;  %v13789_v16 = vpop.eup %13788  ;;  %13794 = vrcp.f32 %v5878_v55  ;;  %v10069_v27 = vcombine.low %v10060_v60, %v10067_v63  ;;  %v5627_v52 = vadd.f32 %v16027_v24, %v5561_v45 }
 0x609   : > { %v10076_v20 = vrot.slane %v10068_v8, %v16083_v21  ;;  %11382 = vperm.xlu0 %13534, %v10133_v17   ;;  %v7400_v5 = vrot.slane %v16823_v23, %v16061_v7  ;;  %v7404_v40 = vrot.slane %v16823_v23, %v16064_v51  ;;  %v7408_v2 = vrot.slane %v16823_v23, %v16067_v41 }
 0x60a   : > { %v17211_v25 = vadd.f32 1.0, %v13787_v53  ;;  %v10083_v43 = vrot.slane %v10069_v27, %v16083_v21  ;;  %v7412_v62 = vrot.slane %v16823_v23, %v16071_v4  ;;  %v7416_v57 = vrot.slane %v16823_v23, %v16076_v3 }
 0x60b   : > { %13796 = vpow2.f32 %v12457_v1  ;;  %v7420_v58 = vrot.slane %v16823_v23, %v16080_v36  ;;  %v10134_v30 = vcombine.low %v7392_v39, %v7396_v38  ;;  %v10135_v31 = vcombine.low %v7400_v5, %v7404_v40 }
 0x60c   : > { %v5880_v54 = vadd.f32 1.0, %v13789_v16  ;;  %v10084_v22 = vcombine.low %v10076_v20, %v10083_v43  ;;  %v10136_v47 = vcombine.low %v7408_v2, %v7412_v62  ;;  %v7456_v55 = vrot.slane %v16880_v13, %v16051_v34 }
 0x60d   : > { %v10137_v19 = vcombine.low %v7416_v57, %v7420_v58  ;;  %v10144_v46 = vrot.slane %v10134_v30, %v16083_v21  ;;  %v10151_v32 = vrot.slane %v10135_v31, %v16083_v21  ;;  %v7460_v0 = vrot.slane %v16880_v13, %v16056_v26 }
 0x60e   : > { %11379 = vperm.xlu1 %13535, %v10084_v22   ;;  %v10158_v23 = vrot.slane %v10136_v47, %v16083_v21  ;;  %v5562_v6 = vadd.f32 %v18235_v42, %v5235_v37  ;;  %v7464_v12 = vrot.slane %v16880_v13, %v16061_v7  ;;  %v7468_v44 = vrot.slane %v16880_v13, %v16064_v51 }
 0x60f   : > { %v10165_v9 = vrot.slane %v10137_v19, %v16083_v21  ;;  %v10166_v60 = vcombine.low %v10144_v46, %v10151_v32  ;;  %v7472_v14 = vrot.slane %v16880_v13, %v16067_v41  ;;  %v7476_v45 = vrot.slane %v16880_v13, %v16071_v4 }
 0x610   : > { %v17237_v18 = vpop.eup %13790  ;;  %v12458_v63 = vmul.f32 -1.442695, %v5627_v52  ;;  %v7480_v8 = vrot.slane %v16880_v13, %v16076_v3  ;;  %v7484_v53 = vrot.slane %v16880_v13, %v16080_v36  ;;  %v10232_v17 = vcombine.low %v7456_v55, %v7460_v0 }
 0x611   : > { %v17243_v1 = vpop.eup %13792  ;;  %v10167_v39 = vcombine.low %v10158_v23, %v10165_v9  ;;  %v10174_v16 = vrot.slane %v10166_v60, %v16083_v21  ;;  %v10233_v27 = vcombine.low %v7464_v12, %v7468_v44  ;;  %v10234_v20 = vcombine.low %v7472_v14, %v7476_v45 }
 0x612   : > { %v17246_v38 = vpop.eup %13794  ;;  %v5628_v5 = vadd.f32 %v16027_v24, %v5562_v6  ;;  %v10235_v40 = vcombine.low %v7480_v8, %v7484_v53  ;;  %v10242_v52 = vrot.slane %v10232_v17, %v16083_v21  ;;  %v7424_v2 = vrot.slane %v16785_v10, %v16051_v34 }
 0x613   : > { %v10181_v13 = vrot.slane %v10167_v39, %v16083_v21  ;;  %v10249_v43 = vrot.slane %v10233_v27, %v16083_v21  ;;  %v10256_v62 = vrot.slane %v10234_v20, %v16083_v21  ;;  %v7428_v57 = vrot.slane %v16785_v10, %v16056_v26 }
 0x614   : > { %v10263_v58 = vrot.slane %v10235_v40, %v16083_v21  ;;  %v7432_v24 = vrot.slane %v16785_v10, %v16061_v7  ;;  %v7436_v30 = vrot.slane %v16785_v10, %v16064_v51  ;;  %v7440_v31 = vrot.slane %v16785_v10, %v16067_v41 }
 0x615   : > { %v13797_v37 = vpop.eup %13796  ;;  %13798 = vrcp.f32 %v5880_v54  ;;  %v10182_v22 = vcombine.low %v10174_v16, %v10181_v13  ;;  %v10264_v47 = vcombine.low %v10242_v52, %v10249_v43  ;;  %v7444_v55 = vrot.slane %v16785_v10, %v16071_v4 }
 0x616   : > { %13800 = vpow2.f32 %v12458_v63  ;;  %v10265_v19 = vcombine.low %v10256_v62, %v10263_v58  ;;  %v7448_v46 = vrot.slane %v16785_v10, %v16076_v3  ;;  %v7452_v32 = vrot.slane %v16785_v10, %v16080_v36 }
 0x617   : > { %11385 = vperm.xlu1 %13535, %v10182_v22   ;;  %v12459_v0 = vmul.f32 -1.442695, %v5628_v5  ;;  %v10272_v23 = vrot.slane %v10264_v47, %v16083_v21  ;;  %v10183_v42 = vcombine.low %v7424_v2, %v7428_v57  ;;  %v10184_v6 = vcombine.low %v7432_v24, %v7436_v30 }
 0x618   : > { %v5882_v54 = vadd.f32 1.0, %v13797_v37  ;;  %v10279_v12 = vrot.slane %v10265_v19, %v16083_v21  ;;  %v10185_v44 = vcombine.low %v7440_v31, %v7444_v55  ;;  %v10186_v9 = vcombine.low %v7448_v46, %v7452_v32 }
 0x619   : > { %v10193_v60 = vrot.slane %v10183_v42, %v16083_v21  ;;  %v10200_v14 = vrot.slane %v10184_v6, %v16083_v21  ;;  %v7520_v45 = vrot.slane %v16930_v56, %v16051_v34  ;;  %v7524_v10 = vrot.slane %v16930_v56, %v16056_v26 }
 0x61a   : > { %v10280_v63 = vcombine.low %v10272_v23, %v10279_v12  ;;  %v10207_v8 = vrot.slane %v10185_v44, %v16083_v21  ;;  %v10214_v53 = vrot.slane %v10186_v9, %v16083_v21  ;;  %v7528_v17 = vrot.slane %v16930_v56, %v16061_v7 }
 0x61b   : > { %v10215_v39 = vcombine.low %v10193_v60, %v10200_v14  ;;  %v7532_v16 = vrot.slane %v16930_v56, %v16064_v51  ;;  %v7536_v27 = vrot.slane %v16930_v56, %v16067_v41  ;;  %v7540_v20 = vrot.slane %v16930_v56, %v16071_v4 }
 0x61c   : > { %11391 = vperm.xlu0 %13534, %v10280_v63   ;;  %v10216_v5 = vcombine.low %v10207_v8, %v10214_v53  ;;  %v7544_v40 = vrot.slane %v16930_v56, %v16076_v3  ;;  %v7548_v52 = vrot.slane %v16930_v56, %v16080_v36  ;;  %v10330_v2 = vcombine.low %v7520_v45, %v7524_v10 }
 0x61d   : > { %13802 = vpow2.f32 %v12459_v0  ;;  %v10223_v13 = vrot.slane %v10215_v39, %v16083_v21  ;;  %v10331_v43 = vcombine.low %v7528_v17, %v7532_v16  ;;  %v10332_v62 = vcombine.low %v7536_v27, %v7540_v20 }
 0x61e   : > { %v10230_v57 = vrot.slane %v10216_v5, %v16083_v21  ;;  %v10333_v58 = vcombine.low %v7544_v40, %v7548_v52  ;;  %v10340_v24 = vrot.slane %v10330_v2, %v16083_v21  ;;  %v7488_v30 = vrot.slane %v16871_v35, %v16051_v34 }
 0x61f   : > { %v17297_v31 = vpop.eup %13798  ;;  %13804 = vrcp.f32 %v5882_v54  ;;  %v10347_v37 = vrot.slane %v10331_v43, %v16083_v21  ;;  %v10354_v56 = vrot.slane %v10332_v62, %v16083_v21  ;;  %v7492_v22 = vrot.slane %v16871_v35, %v16056_v26 }
 0x620   : > { %v17303_v47 = vpop.eup %13800  ;;  %v10231_v55 = vcombine.low %v10223_v13, %v10230_v57  ;;  %v10361_v19 = vrot.slane %v10333_v58, %v16083_v21  ;;  %v7496_v46 = vrot.slane %v16871_v35, %v16061_v7  ;;  %v7500_v32 = vrot.slane %v16871_v35, %v16064_v51 }
 0x621   : > { %v10362_v0 = vcombine.low %v10340_v24, %v10347_v37  ;;  %v7504_v23 = vrot.slane %v16871_v35, %v16067_v41  ;;  %v7508_v42 = vrot.slane %v16871_v35, %v16071_v4  ;;  %v7512_v6 = vrot.slane %v16871_v35, %v16076_v3 }
 0x622   : > { %11388 = vperm.xlu0 %13534, %v10231_v55   ;;  %v10363_v54 = vcombine.low %v10354_v56, %v10361_v19  ;;  %v7516_v12 = vrot.slane %v16871_v35, %v16080_v36  ;;  %v10281_v44 = vcombine.low %v7488_v30, %v7492_v22  ;;  %v10282_v9 = vcombine.low %v7496_v46, %v7500_v32 }
 0x623   : > { %v10370_v60 = vrot.slane %v10362_v0, %v16083_v21  ;;  %v10283_v14 = vcombine.low %v7504_v23, %v7508_v42  ;;  %v7648_v45 = vrot.slane %v17038_v59, %v16051_v34  ;;  %v7652_v10 = vrot.slane %v17038_v59, %v16056_v26 }
 0x624   : > { %v10377_v63 = vrot.slane %v10363_v54, %v16083_v21  ;;  %v10284_v8 = vcombine.low %v7512_v6, %v7516_v12  ;;  %v10291_v53 = vrot.slane %v10281_v44, %v16083_v21  ;;  %v10298_v17 = vrot.slane %v10282_v9, %v16083_v21 }
 0x625   : > { %v10305_v35 = vrot.slane %v10283_v14, %v16083_v21  ;;  %v7656_v39 = vrot.slane %v17038_v59, %v16061_v7  ;;  %v7660_v16 = vrot.slane %v17038_v59, %v16064_v51  ;;  %v7664_v27 = vrot.slane %v17038_v59, %v16067_v41 }
 0x626   : > { %v10378_v20 = vcombine.low %v10370_v60, %v10377_v63  ;;  %v10312_v5 = vrot.slane %v10284_v8, %v16083_v21  ;;  %v10313_v40 = vcombine.low %v10291_v53, %v10298_v17  ;;  %v7668_v52 = vrot.slane %v17038_v59, %v16071_v4 }
 0x627   : > { %v17336_v2 = vpop.eup %13802  ;;  %v7672_v13 = vrot.slane %v17038_v59, %v16076_v3  ;;  %v7676_v43 = vrot.slane %v17038_v59, %v16080_v36  ;;  %v10526_v62 = vcombine.low %v7648_v45, %v7652_v10  ;;  %v10527_v57 = vcombine.low %v7656_v39, %v7660_v16 }
 0x628   : > { %11397 = vperm.xlu0 %13534, %v10378_v20   ;;  %v10314_v58 = vcombine.low %v10305_v35, %v10312_v5  ;;  %v10321_v24 = vrot.slane %v10313_v40, %v16083_v21  ;;  %v10528_v30 = vcombine.low %v7664_v27, %v7668_v52  ;;  %v7616_v37 = vrot.slane %v16975_v49, %v16051_v34 }
 0x629   : > { %v17345_v56 = vpop.eup %13804  ;;  %v10529_v22 = vcombine.low %v7672_v13, %v7676_v43  ;;  %v10536_v55 = vrot.slane %v10526_v62, %v16083_v21  ;;  %v10543_v19 = vrot.slane %v10527_v57, %v16083_v21  ;;  %v7620_v59 = vrot.slane %v16975_v49, %v16056_v26 }
 0x62a   : > { %v10328_v46 = vrot.slane %v10314_v58, %v16083_v21  ;;  %v10550_v32 = vrot.slane %v10528_v30, %v16083_v21  ;;  %v7624_v0 = vrot.slane %v16975_v49, %v16061_v7  ;;  %v7628_v23 = vrot.slane %v16975_v49, %v16064_v51 }
 0x62b   : > { %v10557_v42 = vrot.slane %v10529_v22, %v16083_v21  ;;  %v10558_v6 = vcombine.low %v10536_v55, %v10543_v19  ;;  %v7632_v54 = vrot.slane %v16975_v49, %v16067_v41  ;;  %v7636_v12 = vrot.slane %v16975_v49, %v16071_v4 }
 0x62c   : > { %v10329_v44 = vcombine.low %v10321_v24, %v10328_v46  ;;  %v7640_v9 = vrot.slane %v16975_v49, %v16076_v3  ;;  %v7644_v60 = vrot.slane %v16975_v49, %v16080_v36  ;;  %v10477_v14 = vcombine.low %v7616_v37, %v7620_v59 }
 0x62d   : > { %v10559_v45 = vcombine.low %v10550_v32, %v10557_v42  ;;  %v10566_v10 = vrot.slane %v10558_v6, %v16083_v21  ;;  %v10478_v63 = vcombine.low %v7624_v0, %v7628_v23  ;;  %v10479_v8 = vcombine.low %v7632_v54, %v7636_v12 }
 0x62e   : > { %11394 = vperm.xlu0 %13534, %v10329_v44   ;;  %v10480_v53 = vcombine.low %v7640_v9, %v7644_v60  ;;  %v10487_v17 = vrot.slane %v10477_v14, %v16083_v21  ;;  %v7712_v35 = vrot.slane %v17092_v50, %v16051_v34  ;;  %v7716_v39 = vrot.slane %v17092_v50, %v16056_v26 }
 0x62f   : > { %v10573_v16 = vrot.slane %v10559_v45, %v16083_v21  ;;  %v10494_v49 = vrot.slane %v10478_v63, %v16083_v21  ;;  %v10501_v27 = vrot.slane %v10479_v8, %v16083_v21  ;;  %v7720_v20 = vrot.slane %v17092_v50, %v16061_v7 }
 0x630   : > { %v10508_v5 = vrot.slane %v10480_v53, %v16083_v21  ;;  %v7724_v40 = vrot.slane %v17092_v50, %v16064_v51  ;;  %v7728_v52 = vrot.slane %v17092_v50, %v16067_v41  ;;  %v7732_v13 = vrot.slane %v17092_v50, %v16071_v4 }
 0x631   : > { %v10574_v43 = vcombine.low %v10566_v10, %v10573_v16  ;;  %v10509_v62 = vcombine.low %v10487_v17, %v10494_v49  ;;  %v7736_v57 = vrot.slane %v17092_v50, %v16076_v3  ;;  %v7740_v58 = vrot.slane %v17092_v50, %v16080_v36 }
 0x632   : > { %v10510_v24 = vcombine.low %v10501_v27, %v10508_v5  ;;  %v10624_v30 = vcombine.low %v7712_v35, %v7716_v39  ;;  %v10625_v37 = vcombine.low %v7720_v20, %v7724_v40  ;;  %v10626_v22 = vcombine.low %v7728_v52, %v7732_v13 }
 0x633   : > { %11409 = vperm.xlu1 %13535, %v10574_v43   ;;  %v10517_v55 = vrot.slane %v10509_v62, %v16083_v21  ;;  %v10627_v19 = vcombine.low %v7736_v57, %v7740_v58  ;;  %v7680_v59 = vrot.slane %v17032_v61, %v16051_v34  ;;  %v7684_v46 = vrot.slane %v17032_v61, %v16056_v26 }
 0x634   : > { %v10524_v32 = vrot.slane %v10510_v24, %v16083_v21  ;;  %v10634_v0 = vrot.slane %v10624_v30, %v16083_v21  ;;  %v10641_v50 = vrot.slane %v10625_v37, %v16083_v21  ;;  %v10648_v23 = vrot.slane %v10626_v22, %v16083_v21 }
 0x635   : > { %v10655_v42 = vrot.slane %v10627_v19, %v16083_v21  ;;  %v7688_v6 = vrot.slane %v17032_v61, %v16061_v7  ;;  %v7692_v54 = vrot.slane %v17032_v61, %v16064_v51  ;;  %v7696_v12 = vrot.slane %v17032_v61, %v16067_v41 }
 0x636   : > { %v10525_v44 = vcombine.low %v10517_v55, %v10524_v32  ;;  %v10656_v9 = vcombine.low %v10634_v0, %v10641_v50  ;;  %v7700_v60 = vrot.slane %v17032_v61, %v16071_v4  ;;  %v7704_v14 = vrot.slane %v17032_v61, %v16076_v3 }
 0x637   : > { %v10657_v45 = vcombine.low %v10648_v23, %v10655_v42  ;;  %v7708_v10 = vrot.slane %v17032_v61, %v16080_v36  ;;  %v10575_v63 = vcombine.low %v7680_v59, %v7684_v46  ;;  %v10576_v8 = vcombine.low %v7688_v6, %v7692_v54  ;;  %v17445_v54 = vpop.permute.xlu1 %11262 }
 0x638   : > { %11406 = vperm.xlu0 %13534, %v10525_v44   ;;  %v10664_v53 = vrot.slane %v10656_v9, %v16083_v21  ;;  %v10577_v17 = vcombine.low %v7696_v12, %v7700_v60  ;;  %v7776_v35 = vrot.slane %v17190_v11, %v16051_v34  ;;  %v7780_v39 = vrot.slane %v17190_v11, %v16056_v26 }
 0x639   : > { %v10671_v16 = vrot.slane %v10657_v45, %v16083_v21  ;;  %v10578_v49 = vcombine.low %v7704_v14, %v7708_v10  ;;  %v10585_v27 = vrot.slane %v10575_v63, %v16083_v21  ;;  %v10592_v20 = vrot.slane %v10576_v8, %v16083_v21 }
 0x63a   : > { %v10599_v61 = vrot.slane %v10577_v17, %v16083_v21  ;;  %v7784_v5 = vrot.slane %v17190_v11, %v16061_v7  ;;  %v7788_v40 = vrot.slane %v17190_v11, %v16064_v51  ;;  %v7792_v52 = vrot.slane %v17190_v11, %v16067_v41 }
 0x63b   : > { %v10672_v13 = vcombine.low %v10664_v53, %v10671_v16  ;;  %v10606_v43 = vrot.slane %v10578_v49, %v16083_v21  ;;  %v10607_v62 = vcombine.low %v10585_v27, %v10592_v20  ;;  %v7796_v57 = vrot.slane %v17190_v11, %v16071_v4 }
 0x63c   : > { %v7800_v58 = vrot.slane %v17190_v11, %v16076_v3  ;;  %v7804_v24 = vrot.slane %v17190_v11, %v16080_v36  ;;  %v10722_v30 = vcombine.low %v7776_v35, %v7780_v39  ;;  %v10723_v37 = vcombine.low %v7784_v5, %v7788_v40 }
 0x63d   : > { %11415 = vperm.xlu1 %13535, %v10672_v13   ;;  %v10608_v22 = vcombine.low %v10599_v61, %v10606_v43  ;;  %v10615_v55 = vrot.slane %v10607_v62, %v16083_v21  ;;  %v10724_v19 = vcombine.low %v7792_v52, %v7796_v57  ;;  %v7744_v59 = vrot.slane %v17086_v28, %v16051_v34  ;;  %v17474_v62 = vpop.permute.xlu1 %11271 }
 0x63e   : > { %v10725_v46 = vcombine.low %v7800_v58, %v7804_v24  ;;  %v10732_v32 = vrot.slane %v10722_v30, %v16083_v21  ;;  %v10739_v0 = vrot.slane %v10723_v37, %v16083_v21  ;;  %v7748_v50 = vrot.slane %v17086_v28, %v16056_v26 }
 0x63f   : > { %v10622_v11 = vrot.slane %v10608_v22, %v16083_v21  ;;  %v10746_v23 = vrot.slane %v10724_v19, %v16083_v21  ;;  %v7752_v42 = vrot.slane %v17086_v28, %v16061_v7  ;;  %v7756_v6 = vrot.slane %v17086_v28, %v16064_v51 }
 0x640   : > { %v10753_v12 = vrot.slane %v10725_v46, %v16083_v21  ;;  %v10754_v44 = vcombine.low %v10732_v32, %v10739_v0  ;;  %v7760_v9 = vrot.slane %v17086_v28, %v16067_v41  ;;  %v7764_v60 = vrot.slane %v17086_v28, %v16071_v4 }
 0x641   : > { %v10623_v14 = vcombine.low %v10615_v55, %v10622_v11  ;;  %v7768_v45 = vrot.slane %v17086_v28, %v16076_v3  ;;  %v7772_v10 = vrot.slane %v17086_v28, %v16080_v36  ;;  %v10673_v63 = vcombine.low %v7744_v59, %v7748_v50 }
 0x642   : > { %v10755_v8 = vcombine.low %v10746_v23, %v10753_v12  ;;  %v10762_v53 = vrot.slane %v10754_v44, %v16083_v21  ;;  %v10674_v17 = vcombine.low %v7752_v42, %v7756_v6  ;;  %v10675_v35 = vcombine.low %v7760_v9, %v7764_v60 }
 0x643   : > { %11412 = vperm.xlu0 %13534, %v10623_v14   ;;  %v10676_v39 = vcombine.low %v7768_v45, %v7772_v10  ;;  %v10683_v16 = vrot.slane %v10673_v63, %v16083_v21  ;;  %v7840_v49 = vrot.slane %v17237_v18, %v16051_v34  ;;  %v7844_v27 = vrot.slane %v17237_v18, %v16056_v26  ;;  %v17500_v10 = vpop.permute.xlu1 %11268 }
 0x644   : > { %v10769_v20 = vrot.slane %v10755_v8, %v16083_v21  ;;  %v10690_v28 = vrot.slane %v10674_v17, %v16083_v21  ;;  %v10697_v61 = vrot.slane %v10675_v35, %v16083_v21  ;;  %v7848_v5 = vrot.slane %v17237_v18, %v16061_v7  ;;  %v17504_v35 = vpop.permute.xlu0 %11265 }
 0x645   : > { %v10704_v40 = vrot.slane %v10676_v39, %v16083_v21  ;;  %v7852_v52 = vrot.slane %v17237_v18, %v16064_v51  ;;  %v7856_v13 = vrot.slane %v17237_v18, %v16067_v41  ;;  %v7860_v43 = vrot.slane %v17237_v18, %v16071_v4 }
 0x646   : > { %v10770_v57 = vcombine.low %v10762_v53, %v10769_v20  ;;  %v10705_v58 = vcombine.low %v10683_v16, %v10690_v28  ;;  %v7864_v24 = vrot.slane %v17237_v18, %v16076_v3  ;;  %v7868_v30 = vrot.slane %v17237_v18, %v16080_v36 }
 0x647   : > { %v10706_v37 = vcombine.low %v10697_v61, %v10704_v40  ;;  %v10820_v22 = vcombine.low %v7840_v49, %v7844_v27  ;;  %v10821_v55 = vcombine.low %v7848_v5, %v7852_v52  ;;  %v10822_v19 = vcombine.low %v7856_v13, %v7860_v43 }
 0x648   : > { %11421 = vperm.xlu1 %13535, %v10770_v57   ;;  %v10713_v59 = vrot.slane %v10705_v58, %v16083_v21  ;;  %v10823_v46 = vcombine.low %v7864_v24, %v7868_v30  ;;  %v7808_v32 = vrot.slane %v17135_v15, %v16051_v34  ;;  %v7812_v0 = vrot.slane %v17135_v15, %v16056_v26  ;;  %v17524_v30 = vpop.permute.xlu0 %11274 }
 0x649   : > { %v10720_v50 = vrot.slane %v10706_v37, %v16083_v21  ;;  %v10830_v11 = vrot.slane %v10820_v22, %v16083_v21  ;;  %v10837_v18 = vrot.slane %v10821_v55, %v16083_v21  ;;  %v10844_v23 = vrot.slane %v10822_v19, %v16083_v21 }
 0x64a   : > { %v10851_v42 = vrot.slane %v10823_v46, %v16083_v21  ;;  %v7816_v6 = vrot.slane %v17135_v15, %v16061_v7  ;;  %v7820_v12 = vrot.slane %v17135_v15, %v16064_v51  ;;  %v7824_v44 = vrot.slane %v17135_v15, %v16067_v41 }
 0x64b   : > { %v10721_v9 = vcombine.low %v10713_v59, %v10720_v50  ;;  %v10852_v60 = vcombine.low %v10830_v11, %v10837_v18  ;;  %v7828_v14 = vrot.slane %v17135_v15, %v16071_v4  ;;  %v7832_v45 = vrot.slane %v17135_v15, %v16076_v3  ;;  %v17530_v59 = vpop.permute.xlu1 %11277 }
 0x64c   : > { %v10853_v63 = vcombine.low %v10844_v23, %v10851_v42  ;;  %v7836_v8 = vrot.slane %v17135_v15, %v16080_v36  ;;  %v10771_v53 = vcombine.low %v7808_v32, %v7812_v0  ;;  %v10772_v17 = vcombine.low %v7816_v6, %v7820_v12 }
 0x64d   : > { %11418 = vperm.xlu0 %13534, %v10721_v9   ;;  %v10860_v39 = vrot.slane %v10852_v60, %v16083_v21  ;;  %v10773_v16 = vcombine.low %v7824_v44, %v7828_v14  ;;  %v7904_v49 = vrot.slane %v17246_v38, %v16051_v34  ;;  %v7908_v27 = vrot.slane %v17246_v38, %v16056_v26 }
 0x64e   : > { %v10867_v20 = vrot.slane %v10853_v63, %v16083_v21  ;;  %v10774_v28 = vcombine.low %v7832_v45, %v7836_v8  ;;  %v10781_v61 = vrot.slane %v10771_v53, %v16083_v21  ;;  %v10788_v15 = vrot.slane %v10772_v17, %v16083_v21 }
 0x64f   : > { %v10795_v5 = vrot.slane %v10773_v16, %v16083_v21  ;;  %v7912_v40 = vrot.slane %v17246_v38, %v16061_v7  ;;  %v7916_v52 = vrot.slane %v17246_v38, %v16064_v51  ;;  %v7920_v13 = vrot.slane %v17246_v38, %v16067_v41 }
 0x650   : > { %v10868_v43 = vcombine.low %v10860_v39, %v10867_v20  ;;  %v10802_v57 = vrot.slane %v10774_v28, %v16083_v21  ;;  %v10803_v58 = vcombine.low %v10781_v61, %v10788_v15  ;;  %v7924_v24 = vrot.slane %v17246_v38, %v16071_v4  ;;  %v17554_v39 = vpop.permute.xlu0 %11280  ;;  %v17557_v28 = vpop.permute.xlu1 %11283 }
 0x651   : > { %v7928_v37 = vrot.slane %v17246_v38, %v16076_v3  ;;  %v7932_v22 = vrot.slane %v17246_v38, %v16080_v36  ;;  %v10918_v55 = vcombine.low %v7904_v49, %v7908_v27  ;;  %v10919_v19 = vcombine.low %v7912_v40, %v7916_v52 }
 0x652   : > { %11427 = vperm.xlu1 %13535, %v10868_v43   ;;  %v10804_v46 = vcombine.low %v10795_v5, %v10802_v57  ;;  %v10811_v32 = vrot.slane %v10803_v58, %v16083_v21  ;;  %v10920_v0 = vcombine.low %v7920_v13, %v7924_v24  ;;  %v7872_v50 = vrot.slane %v17196_v29, %v16051_v34 }
 0x653   : > { %v10921_v11 = vcombine.low %v7928_v37, %v7932_v22  ;;  %v10928_v18 = vrot.slane %v10918_v55, %v16083_v21  ;;  %v10935_v23 = vrot.slane %v10919_v19, %v16083_v21  ;;  %v7876_v38 = vrot.slane %v17196_v29, %v16056_v26 }
 0x654   : > { %v10818_v42 = vrot.slane %v10804_v46, %v16083_v21  ;;  %v10942_v6 = vrot.slane %v10920_v0, %v16083_v21  ;;  %v7880_v12 = vrot.slane %v17196_v29, %v16061_v7  ;;  %v7884_v44 = vrot.slane %v17196_v29, %v16064_v51 }
 0x655   : > { %v10949_v9 = vrot.slane %v10921_v11, %v16083_v21  ;;  %v10950_v60 = vcombine.low %v10928_v18, %v10935_v23  ;;  %v7888_v14 = vrot.slane %v17196_v29, %v16067_v41  ;;  %v7892_v45 = vrot.slane %v17196_v29, %v16071_v4  ;;  %v17580_v18 = vpop.permute.xlu0 %11286 }
 0x656   : > { %v10819_v63 = vcombine.low %v10811_v32, %v10818_v42  ;;  %v7896_v8 = vrot.slane %v17196_v29, %v16076_v3  ;;  %v7900_v53 = vrot.slane %v17196_v29, %v16080_v36  ;;  %v10869_v17 = vcombine.low %v7872_v50, %v7876_v38 }
 0x657   : > { %v10951_v16 = vcombine.low %v10942_v6, %v10949_v9  ;;  %v10958_v49 = vrot.slane %v10950_v60, %v16083_v21  ;;  %v10870_v27 = vcombine.low %v7880_v12, %v7884_v44  ;;  %v10871_v20 = vcombine.low %v7888_v14, %v7892_v45  ;;  %v17587_v12 = vpop.permute.xlu1 %11289 }
 0x658   : > { %11424 = vperm.xlu0 %13534, %v10819_v63   ;;  %v10872_v61 = vcombine.low %v7896_v8, %v7900_v53  ;;  %v10879_v15 = vrot.slane %v10869_v17, %v16083_v21  ;;  %v7968_v5 = vrot.slane %v17297_v31, %v16051_v34  ;;  %v7972_v29 = vrot.slane %v17297_v31, %v16056_v26 }
 0x659   : > { %v10965_v40 = vrot.slane %v10951_v16, %v16083_v21  ;;  %v10886_v52 = vrot.slane %v10870_v27, %v16083_v21  ;;  %v10893_v13 = vrot.slane %v10871_v20, %v16083_v21  ;;  %v7976_v43 = vrot.slane %v17297_v31, %v16061_v7 }
 0x65a   : > { %v10900_v57 = vrot.slane %v10872_v61, %v16083_v21  ;;  %v7980_v58 = vrot.slane %v17297_v31, %v16064_v51  ;;  %v7984_v24 = vrot.slane %v17297_v31, %v16067_v41  ;;  %v7988_v37 = vrot.slane %v17297_v31, %v16071_v4 }
 0x65b   : > { %v10966_v22 = vcombine.low %v10958_v49, %v10965_v40  ;;  %v10901_v55 = vcombine.low %v10879_v15, %v10886_v52  ;;  %v7992_v19 = vrot.slane %v17297_v31, %v16076_v3  ;;  %v7996_v46 = vrot.slane %v17297_v31, %v16080_v36 }
 0x65c   : > { %v10902_v32 = vcombine.low %v10893_v13, %v10900_v57  ;;  %v11016_v0 = vcombine.low %v7968_v5, %v7972_v29  ;;  %v11017_v50 = vcombine.low %v7976_v43, %v7980_v58  ;;  %v11018_v11 = vcombine.low %v7984_v24, %v7988_v37  ;;  %v17611_v13 = vpop.permute.xlu0 %11292  ;;  %v17616_v24 = vpop.permute.xlu1 %11295 }
 0x65d   : > { %11433 = vperm.xlu1 %13535, %v10966_v22   ;;  %v10909_v23 = vrot.slane %v10901_v55, %v16083_v21  ;;  %v11019_v38 = vcombine.low %v7992_v19, %v7996_v46  ;;  %v7552_v42 = vrot.slane %v16925_v33, %v16051_v34  ;;  %v7556_v6 = vrot.slane %v16925_v33, %v16056_v26 }
 0x65e   : > { %v10916_v31 = vrot.slane %v10902_v32, %v16083_v21  ;;  %v11026_v44 = vrot.slane %v11016_v0, %v16083_v21  ;;  %v11033_v9 = vrot.slane %v11017_v50, %v16083_v21  ;;  %v11040_v60 = vrot.slane %v11018_v11, %v16083_v21 }
 0x65f   : > { %v11047_v14 = vrot.slane %v11019_v38, %v16083_v21  ;;  %v7560_v45 = vrot.slane %v16925_v33, %v16061_v7  ;;  %v7564_v63 = vrot.slane %v16925_v33, %v16064_v51  ;;  %v7568_v8 = vrot.slane %v16925_v33, %v16067_v41 }
 0x660   : > { %v10917_v53 = vcombine.low %v10909_v23, %v10916_v31  ;;  %v11048_v17 = vcombine.low %v11026_v44, %v11033_v9  ;;  %v7572_v16 = vrot.slane %v16925_v33, %v16071_v4  ;;  %v7576_v49 = vrot.slane %v16925_v33, %v16076_v3 }
 0x661   : > { %v11049_v27 = vcombine.low %v11040_v60, %v11047_v14  ;;  %v7580_v20 = vrot.slane %v16925_v33, %v16080_v36  ;;  %v10379_v61 = vcombine.low %v7552_v42, %v7556_v6  ;;  %v10380_v15 = vcombine.low %v7560_v45, %v7564_v63  ;;  %v17636_v45 = vpop.permute.xlu0 %11298 }
 0x662   : > { %11430 = vperm.xlu0 %13534, %v10917_v53   ;;  %v11056_v5 = vrot.slane %v11048_v17, %v16083_v21  ;;  %v10381_v29 = vcombine.low %v7568_v8, %v7572_v16  ;;  %v7936_v40 = vrot.slane %v17243_v1, %v16051_v34  ;;  %v7940_v52 = vrot.slane %v17243_v1, %v16056_v26  ;;  %v17641_v53 = vpop.permute.xlu1 %11301 }
 0x663   : > { %v11063_v43 = vrot.slane %v11049_v27, %v16083_v21  ;;  %v10382_v57 = vcombine.low %v7576_v49, %v7580_v20  ;;  %v10389_v58 = vrot.slane %v10379_v61, %v16083_v21  ;;  %v10396_v33 = vrot.slane %v10380_v15, %v16083_v21 }
 0x664   : > { %v10403_v37 = vrot.slane %v10381_v29, %v16083_v21  ;;  %v7944_v22 = vrot.slane %v17243_v1, %v16061_v7  ;;  %v7948_v55 = vrot.slane %v17243_v1, %v16064_v51  ;;  %v7952_v19 = vrot.slane %v17243_v1, %v16067_v41 }
 0x665   : > { %v11064_v46 = vcombine.low %v11056_v5, %v11063_v43  ;;  %v10410_v32 = vrot.slane %v10382_v57, %v16083_v21  ;;  %v10411_v0 = vcombine.low %v10389_v58, %v10396_v33  ;;  %v7956_v50 = vrot.slane %v17243_v1, %v16071_v4 }
 0x666   : > { %v7960_v11 = vrot.slane %v17243_v1, %v16076_v3  ;;  %v7964_v23 = vrot.slane %v17243_v1, %v16080_v36  ;;  %v10967_v38 = vcombine.low %v7936_v40, %v7940_v52  ;;  %v10968_v42 = vcombine.low %v7944_v22, %v7948_v55 }
 0x667   : > { %11439 = vperm.xlu1 %13535, %v11064_v46   ;;  %v10412_v6 = vcombine.low %v10403_v37, %v10410_v32  ;;  %v10419_v31 = vrot.slane %v10411_v0, %v16083_v21  ;;  %v10969_v44 = vcombine.low %v7952_v19, %v7956_v50  ;;  %13806 = vrcp.f32 %v17211_v25  ;;  %v17664_v37 = vpop.permute.xlu0 %11304  ;;  %v17670_v32 = vpop.permute.xlu1 %11307 }
 0x668   : > { %v10970_v9 = vcombine.low %v7960_v11, %v7964_v23  ;;  %v10977_v60 = vrot.slane %v10967_v38, %v16083_v21  ;;  %v10984_v14 = vrot.slane %v10968_v42, %v16083_v21  ;;  %v5883_v63 = vadd.f32 1.0, %v17303_v47 }
 0x669   : > { %v10426_v1 = vrot.slane %v10412_v6, %v16083_v21  ;;  %v10991_v8 = vrot.slane %v10969_v44, %v16083_v21  ;;  %v7584_v25 = vrot.slane %v16981_v48, %v16051_v34  ;;  %v7588_v27 = vrot.slane %v16981_v48, %v16056_v26 }
 0x66a   : > { %v10998_v17 = vrot.slane %v10970_v9, %v16083_v21  ;;  %v10999_v16 = vcombine.low %v10977_v60, %v10984_v14  ;;  %v7592_v20 = vrot.slane %v16981_v48, %v16061_v7  ;;  %v7596_v15 = vrot.slane %v16981_v48, %v16064_v51 }
 0x66b   : > { %v10427_v49 = vcombine.low %v10419_v31, %v10426_v1  ;;  %v7600_v5 = vrot.slane %v16981_v48, %v16067_v41  ;;  %13808 = vrcp.f32 %v5883_v63  ;;  %v7604_v29 = vrot.slane %v16981_v48, %v16071_v4 }
 0x66c   : > { %v11000_v47 = vcombine.low %v10991_v8, %v10998_v17  ;;  %v11007_v61 = vrot.slane %v10999_v16, %v16083_v21  ;;  %v7608_v40 = vrot.slane %v16981_v48, %v16076_v3  ;;  %v7612_v52 = vrot.slane %v16981_v48, %v16080_v36 }
 0x66d   : > { %11400 = vperm.xlu0 %13534, %v10427_v49   ;;  %v10428_v57 = vcombine.low %v7584_v25, %v7588_v27  ;;  %v10429_v58 = vcombine.low %v7592_v20, %v7596_v15  ;;  %v8032_v33 = vrot.slane %v17345_v56, %v16051_v34  ;;  %v10430_v22 = vcombine.low %v7600_v5, %v7604_v29  ;;  %v17689_v27 = vpop.permute.xlu0 %11310  ;;  %v17695_v15 = vpop.permute.xlu1 %11313 }
 0x66e   : > { %v11014_v43 = vrot.slane %v11000_v47, %v16083_v21  ;;  %v10431_v55 = vcombine.low %v7608_v40, %v7612_v52  ;;  %v8036_v19 = vrot.slane %v17345_v56, %v16056_v26  ;;  %v8040_v46 = vrot.slane %v17345_v56, %v16061_v7 }
 0x66f   : > { %v10438_v0 = vrot.slane %v10428_v57, %v16083_v21  ;;  %v10445_v50 = vrot.slane %v10429_v58, %v16083_v21  ;;  %v8044_v11 = vrot.slane %v17345_v56, %v16064_v51  ;;  %v10452_v23 = vrot.slane %v10430_v22, %v16083_v21 }
 0x670   : > { %v11015_v48 = vcombine.low %v11007_v61, %v11014_v43  ;;  %v10459_v38 = vrot.slane %v10431_v55, %v16083_v21  ;;  %v8048_v42 = vrot.slane %v17345_v56, %v16067_v41  ;;  %v8052_v6 = vrot.slane %v17345_v56, %v16071_v4 }
 0x671   : > { %v13807_v31 = vpop.eup %13806  ;;  %v10460_v44 = vcombine.low %v10438_v0, %v10445_v50  ;;  %v8056_v9 = vrot.slane %v17345_v56, %v16076_v3  ;;  %v8060_v60 = vrot.slane %v17345_v56, %v16080_v36  ;;  %v11114_v14 = vcombine.low %v8032_v33, %v8036_v19 }
 0x672   : > { %11436 = vperm.xlu1 %13535, %v11015_v48   ;;  %v5884_v63 = vadd.f32 1.0, %v17336_v2  ;;  %v10461_v1 = vcombine.low %v10452_v23, %v10459_v38  ;;  %v11115_v8 = vcombine.low %v8040_v46, %v8044_v11  ;;  %v11116_v17 = vcombine.low %v8048_v42, %v8052_v6  ;;  %v17707_v38 = vpop.permute.xlu0 %11316 }
 0x673   : > { %v10468_v16 = vrot.slane %v10460_v44, %v16083_v21  ;;  %v11117_v25 = vcombine.low %v8056_v9, %v8060_v60  ;;  %v11124_v49 = vrot.slane %v11114_v14, %v16083_v21  ;;  %v8000_v56 = vrot.slane %v13807_v31, %v16051_v34  ;;  %v17711_v44 = vpop.permute.xlu1 %11319 }
 0x674   : > { %v10475_v20 = vrot.slane %v10461_v1, %v16083_v21  ;;  %v11131_v47 = vrot.slane %v11115_v8, %v16083_v21  ;;  %v11138_v61 = vrot.slane %v11116_v17, %v16083_v21  ;;  %v8004_v5 = vrot.slane %v13807_v31, %v16056_v26 }
 0x675   : > { %v11145_v2 = vrot.slane %v11117_v25, %v16083_v21  ;;  %v8008_v29 = vrot.slane %v13807_v31, %v16061_v7  ;;  %v8012_v40 = vrot.slane %v13807_v31, %v16064_v51  ;;  %v13809_v52 = vpop.eup %13808  ;;  %13810 = vrcp.f32 %v5884_v63 }
 0x676   : > { %v10476_v43 = vcombine.low %v10468_v16, %v10475_v20  ;;  %v11146_v57 = vcombine.low %v11124_v49, %v11131_v47  ;;  %v8016_v58 = vrot.slane %v13807_v31, %v16067_v41  ;;  %v8020_v22 = vrot.slane %v13807_v31, %v16071_v4 }
 0x677   : > { %v11147_v33 = vcombine.low %v11138_v61, %v11145_v2  ;;  %v8024_v55 = vrot.slane %v13807_v31, %v16076_v3  ;;  %v8028_v19 = vrot.slane %v13807_v31, %v16080_v36  ;;  %v11065_v48 = vcombine.low %v8000_v56, %v8004_v5  ;;  %v17723_v61 = vpop.permute.xlu0 %11322 }
 0x678   : > { %11403 = vperm.xlu0 %13534, %v10476_v43   ;;  %v11154_v46 = vrot.slane %v11146_v57, %v16083_v21  ;;  %v11066_v0 = vcombine.low %v8008_v29, %v8012_v40  ;;  %v11067_v11 = vcombine.low %v8016_v58, %v8020_v22  ;;  %v8064_v63 = vrot.slane %v13809_v52, %v16051_v34  ;;  %v17727_v43 = vpop.permute.xlu1 %11325 }
 0x679   : > { %v11161_v50 = vrot.slane %v11147_v33, %v16083_v21  ;;  %v11068_v23 = vcombine.low %v8024_v55, %v8028_v19  ;;  %v11075_v42 = vrot.slane %v11065_v48, %v16083_v21  ;;  %v8068_v8 = vrot.slane %v13809_v52, %v16056_v26 }
 0x67a   : > { %v11082_v6 = vrot.slane %v11066_v0, %v16083_v21  ;;  %v11089_v31 = vrot.slane %v11067_v11, %v16083_v21  ;;  %v8072_v17 = vrot.slane %v13809_v52, %v16061_v7  ;;  %v8076_v25 = vrot.slane %v13809_v52, %v16064_v51 }
 0x67b   : > { %v11162_v9 = vcombine.low %v11154_v46, %v11161_v50  ;;  %v11096_v60 = vrot.slane %v11068_v23, %v16083_v21  ;;  %v8080_v49 = vrot.slane %v13809_v52, %v16067_v41  ;;  %v8084_v47 = vrot.slane %v13809_v52, %v16071_v4  ;;  %v17737_v23 = vpop.permute.xlu0 %11328 }
 0x67c   : > { %v11097_v14 = vcombine.low %v11075_v42, %v11082_v6  ;;  %v8088_v2 = vrot.slane %v13809_v52, %v16076_v3  ;;  %v8092_v5 = vrot.slane %v13809_v52, %v16080_v36  ;;  %v11163_v29 = vcombine.low %v8064_v63, %v8068_v8 }
 0x67d   : > { %11445 = vperm.xlu1 %13535, %v11162_v9   ;;  %v11098_v1 = vcombine.low %v11089_v31, %v11096_v60  ;;  %v11164_v40 = vcombine.low %v8072_v17, %v8076_v25  ;;  %v11165_v58 = vcombine.low %v8080_v49, %v8084_v47  ;;  %v17742_v60 = vpop.permute.xlu1 %11331  ;;  %v18236_v49 = vld [vmem:[#allocation6_spill] sm:$0xff] }
 0x67e   : > { %v11105_v16 = vrot.slane %v11097_v14, %v16083_v21  ;;  %v11166_v33 = vcombine.low %v8088_v2, %v8092_v5  ;;  %v11173_v22 = vrot.slane %v11163_v29, %v16083_v21  ;;  %v11464_v5 = vadd.s32 4294967280, %v18236_v49 }
 0x67f   : > { %v11112_v20 = vrot.slane %v11098_v1, %v16083_v21  ;;  %v13811_v56 = vpop.eup %13810  ;;  %v11180_v55 = vrot.slane %v11164_v40, %v16083_v21  ;;  %v11187_v19 = vrot.slane %v11165_v58, %v16083_v21  ;;  %v17751_v25 = vpop.permute.xlu0 %11334  ;;  %v11478_v40 = vadd.s32 4294967264, %v18236_v49  ;;  %v18237_v58 = vld [vmem:[#allocation26_spill] sm:$0xff] }
 0x680   : > { %v11194_v46 = vrot.slane %v11166_v33, %v16083_v21  ;;  %v8096_v0 = vrot.slane %v13811_v56, %v16051_v34  ;;  %v8100_v52 = vrot.slane %v13811_v56, %v16056_v26  ;;  %v8104_v50 = vrot.slane %v13811_v56, %v16061_v7 }
 0x681   : > { %v11113_v57 = vcombine.low %v11105_v16, %v11112_v20  ;;  %v11195_v48 = vcombine.low %v11173_v22, %v11180_v55  ;;  %v8108_v11 = vrot.slane %v13811_v56, %v16064_v51  ;;  %v8112_v9 = vrot.slane %v13811_v56, %v16067_v41 }
 0x682   : > { %v11196_v42 = vcombine.low %v11187_v19, %v11194_v46  ;;  %v8116_v31 = vrot.slane %v13811_v56, %v16071_v4  ;;  %v8120_v14 = vrot.slane %v13811_v56, %v16076_v3  ;;  %v8124_v34 = vrot.slane %v13811_v56, %v16080_v36  ;;  %v17753_v36 = vpop.permute.xlu1 %11337 }
 0x683   : > { %11442 = vperm.xlu1 %13535, %v11113_v57   ;;  %v11203_v6 = vrot.slane %v11195_v48, %v16083_v21  ;;  %v11212_v7 = vcombine.low %v8096_v0, %v8100_v52  ;;  %v11213_v63 = vcombine.low %v8104_v50, %v8108_v11  ;;  %v11457_v20 = vadd.s32 4294967288, %v18236_v49  ;;  %v17770_v46 = vpop.permute.xlu0 %11340 }
 0x684   : > { %v11210_v26 = vrot.slane %v11196_v42, %v16083_v21  ;;  %v11214_v51 = vcombine.low %v8112_v9, %v8116_v31  ;;  %v11215_v1 = vcombine.low %v8120_v14, %v8124_v34  ;;  %v11471_v56 = vadd.s32 4294967272, %v18236_v49 }
 0x685   : > { %v11222_v17 = vrot.slane %v11212_v7, %v16083_v21  ;;  %v11229_v16 = vrot.slane %v11213_v63, %v16083_v21  ;;  %v11485_v57 = vadd.s32 4294967256, %v18236_v49  ;;  %v17763_v33 = vsub.s32 %v11457_v20, %v18237_v58 }
 0x686   : > { %v11211_v8 = vcombine.low %v11203_v6, %v11210_v26  ;;  %v11236_v41 = vrot.slane %v11214_v51, %v16083_v21  ;;  %v11243_v4 = vrot.slane %v11215_v1, %v16083_v21  ;;  %v17767_v22 = vsub.s32 %v18236_v49, %v18237_v58  ;;  %v17776_v52 = vpop.permute.xlu1 %11343 }
 0x687   : > { %v11244_v3 = vcombine.low %v11222_v17, %v11229_v16  ;;  %v11492_v55 = vadd.s32 4294967248, %v18236_v49  ;;  %v17773_v48 = vsub.s32 %v11471_v56, %v18237_v58  ;;  %v11499_v0 = vadd.s32 4294967240, %v18236_v49  ;;  %v11347_v17 = vpop.permute.xlu0 %11346 }
 0x688   : > { %11448 = vperm.xlu1 %13535, %v11211_v8   ;;  %v11245_v47 = vcombine.low %v11236_v41, %v11243_v4  ;;  %v17779_v50 = vsub.s32 %v11464_v5, %v18237_v58  ;;  %v11506_v11 = vadd.s32 4294967232, %v18236_v49  ;;  %v17783_v42 = vsub.s32 %v11478_v40, %v18237_v58 }
 0x689   : > { %v11252_v2 = vrot.slane %v11244_v3, %v16083_v21  ;;  %v17786_v6 = vsub.s32 %v11485_v57, %v18237_v58  ;;  %v17789_v9 = vsub.s32 %v11492_v55, %v18237_v58  ;;  %v11513_v31 = vadd.s32 4294967224, %v18236_v49 }
 0x68a   : > { %v11259_v29 = vrot.slane %v11245_v47, %v16083_v21  ;;  %v11565_v14 = vrot.slane %v17689_v27, %v17767_v22  ;;  %v11569_v34 = vrot.slane %v17695_v15, %v17763_v33  ;;  %v17797_v26 = vsub.s32 %v11499_v0, %v18237_v58  ;;  %v11350_v4 = vpop.permute.xlu1 %11349 }
 0x68b   : > { %v11520_v7 = vadd.s32 4294967216, %v18236_v49  ;;  %v11574_v63 = vrot.slane %v17707_v38, %v17779_v50  ;;  %v11579_v51 = vrot.slane %v17711_v44, %v17773_v48  ;;  %v17805_v1 = vsub.s32 %v11506_v11, %v18237_v58  ;;  %v11353_v11 = vpop.permute.xlu0 %11352 }
 0x68c   : > { %v11260_v19 = vcombine.low %v11252_v2, %v11259_v29  ;;  %v11527_v8 = vadd.s32 4294967208, %v18236_v49  ;;  %v11570_v27 = vsel %vm11462_vm5, %v11569_v34, %v11565_v14  ;;  %v11584_v15 = vrot.slane %v17723_v61, %v17783_v42 }
 0x68d   : > { %v11534_v16 = vadd.s32 4294967200, %v18236_v49  ;;  %v11575_v41 = vsel %vm11469_vm1, %v11574_v63, %v11570_v27  ;;  %v11589_v38 = vrot.slane %v17727_v43, %v17786_v6  ;;  %v11594_v44 = vrot.slane %v17737_v23, %v17789_v9 }
 0x68e   : > { %11451 = vperm.xlu1 %13535, %v11260_v19   ;;  %v17818_v3 = vsub.s32 %v11513_v31, %v18237_v58  ;;  %v11541_v20 = vadd.s32 4294967192, %v18236_v49  ;;  %v11580_v47 = vsel %vm11476_vm2, %v11579_v51, %v11575_v41  ;;  %v11599_v61 = vrot.slane %v17742_v60, %v17797_v26  ;;  %v11356_v34 = vpop.permute.xlu1 %11355 }
 0x68f   : > { %v17825_v56 = vsub.s32 %v11520_v7, %v18237_v58  ;;  %v11548_v2 = vadd.s32 4294967184, %v18236_v49  ;;  %v11585_v43 = vsel %vm11483_vm3, %v11584_v15, %v11580_v47  ;;  %v11604_v23 = vrot.slane %v17751_v25, %v17805_v1  ;;  %v11359_v41 = vpop.permute.xlu0 %11358 }
 0x690   : > { %v17832_v5 = vsub.s32 %v11527_v8, %v18237_v58  ;;  %v11555_v29 = vadd.s32 4294967176, %v18236_v49  ;;  %v11590_v40 = vsel %vm11490_vm6, %v11589_v38, %v11585_v43  ;;  %v11609_v60 = vrot.slane %v17753_v36, %v17818_v3 }
 0x691   : > { %v17839_v57 = vsub.s32 %v11534_v16, %v18237_v58  ;;  %v11595_v55 = vsel %vm11497_vm7, %v11594_v44, %v11590_v40  ;;  %v11614_v19 = vrot.slane %v17770_v46, %v17825_v56  ;;  %v17845_v25 = vsub.s32 %v11541_v20, %v18237_v58 }
 0x692   : > { %v11600_v49 = vsel %vm11504_vm8, %v11599_v61, %v11595_v55  ;;  %v11619_v0 = vrot.slane %v17776_v52, %v17832_v5  ;;  %v17851_v36 = vsub.s32 %v11548_v2, %v18237_v58  ;;  %v17856_v46 = vsub.s32 %v11555_v29, %v18237_v58  ;;  %v11362_v38 = vpop.permute.xlu1 %11361 }
 0x693   : > { %v11605_v31 = vsel %vm11511_vm9, %v11604_v23, %v11600_v49  ;;  %v11624_v14 = vrot.slane %v11347_v17, %v17839_v57  ;;  %v11629_v63 = vrot.slane %v11350_v4, %v17845_v25  ;;  %v11365_v44 = vpop.permute.xlu0 %11364 }
 0x694   : > { %v11610_v7 = vsel %vm11518_vm10, %v11609_v60, %v11605_v31  ;;  %v11634_v51 = vrot.slane %v11353_v11, %v17851_v36  ;;  %v11639_v27 = vrot.slane %v11356_v34, %v17856_v46 }
 0x695   : > { %v11615_v52 = vsel %vm11525_vm11, %v11614_v19, %v11610_v7  ;;  %v11461_v7 = vrot.slane %v17504_v35, %v17763_v33 }
 0x696   : > { %v11620_v8 = vsel %vm11532_vm12, %v11619_v0, %v11615_v52  ;;  %v11368_v4 = vpop.permute.xlu1 %11367  ;;  %v11468_v52 = vrot.slane %v17500_v10, %v17779_v50  ;;  %v11482_v10 = vrot.slane %v17524_v30, %v17783_v42 }
 0x697   : > { %v11625_v15 = vsel %vm11539_vm13, %v11624_v14, %v11620_v8  ;;  %v11371_v20 = vpop.permute.xlu0 %11370 }
 0x698   : > { %v11630_v58 = vsel %vm11546_vm14, %v11629_v63, %v11625_v15  ;;  %v11456_v63 = vrot.slane %v17445_v54, %v17767_v22 }
 0x699   : > { %v11635_v17 = vsel %vm11553_vm15, %v11634_v51, %v11630_v58  ;;  %v11475_v58 = vrot.slane %v17474_v62, %v17773_v48  ;;  %v11653_v62 = vrot.slane %v11365_v44, %v17779_v50  ;;  %v11663_v44 = vrot.slane %v11371_v20, %v17783_v42 }
 0x69a   : > { %v17868_v16 = vsel %vm11560_vm0, %v11639_v27, %v11635_v17  ;;  %v17870_v47 = vpop.permute.xlu1 %11373  ;;  %v11463_v51 = vsel %vm11462_vm5, %v11461_v7, %v11456_v63  ;;  %v11648_v17 = vrot.slane %v11362_v38, %v17763_v33  ;;  %v11644_v7 = vrot.slane %v11359_v41, %v17767_v22 }
 0x69b   : > { %v17872_v61 = vpop.permute.xlu0 %11376  ;;  %v11470_v27 = vsel %vm11469_vm1, %v11468_v52, %v11463_v51  ;;  %v11489_v52 = vrot.slane %v17530_v59, %v17786_v6 }
 0x69c   : > { %v11477_v21 = vsel %vm11476_vm2, %v11475_v58, %v11470_v27  ;;  %v11658_v27 = vrot.slane %v11368_v4, %v17773_v48 }
 0x69d   : > { %v11484_v38 = vsel %vm11483_vm3, %v11482_v10, %v11477_v21  ;;  %v11503_v21 = vrot.slane %v17557_v28, %v17797_v26  ;;  %v11510_v28 = vrot.slane %v17580_v18, %v17805_v1  ;;  %v11673_v10 = vrot.slane %v17872_v61, %v17789_v9 }
 0x69e   : > { %v17874_v2 = vpop.permute.xlu1 %11379 }
 0x69f   : > { %v17876_v43 = vpop.permute.xlu0 %11382 }
 0x6a2   : > { %v17880_v29 = vpop.permute.xlu1 %11385 }
 0x6a3   : > { %v17878_v23 = vpop.permute.xlu0 %11391 }
 0x6a7   : > { %v17882_v60 = vpop.permute.xlu0 %11388 }
 0x6ab   : > { %v17884_v19 = vpop.permute.xlu0 %11397 }
 0x6af   : > { %v17886_v0 = vpop.permute.xlu0 %11394 }
 0x6b2   : > { %v11410_v40 = vpop.permute.xlu1 %11409 }
 0x6b3   : > { %v11727_v63 = vrot.slane %v11410_v40, %v17763_v33  ;;  %v11496_v33 = vrot.slane %v17554_v39, %v17789_v9  ;;  %v11668_v40 = vrot.slane %v17870_v47, %v17786_v6  ;;  %v11517_v47 = vrot.slane %v17587_v12, %v17818_v3 }
 0x6b7   : > { %v11407_v31 = vpop.permute.xlu0 %11406 }
 0x6b8   : > { %v11723_v35 = vrot.slane %v11407_v31, %v17767_v22  ;;  %v11649_v31 = vsel %vm11462_vm5, %v11648_v17, %v11644_v7 }
 0x6b9   : > { %v11654_v41 = vsel %vm11469_vm1, %v11653_v62, %v11649_v31  ;;  %v11531_v31 = vrot.slane %v17616_v24, %v17832_v5 }
 0x6ba   : > { %v11659_v4 = vsel %vm11476_vm2, %v11658_v27, %v11654_v41  ;;  %v11552_v41 = vrot.slane %v17664_v37, %v17851_v36  ;;  %v11708_v37 = vrot.slane %v17884_v19, %v17845_v25 }
 0x6bc   : > { %v11416_v55 = vpop.permute.xlu1 %11415 }
 0x6bd   : > { %v11737_v59 = vrot.slane %v11416_v55, %v17773_v48 }
 0x6c2   : > { %v11413_v34 = vpop.permute.xlu0 %11412 }
 0x6c3   : > { %v11732_v54 = vrot.slane %v11413_v34, %v17779_v50  ;;  %v11728_v34 = vsel %vm11462_vm5, %v11727_v63, %v11723_v35  ;;  %v11491_v50 = vsel %vm11490_vm6, %v11489_v52, %v11484_v38  ;;  %v11678_v63 = vrot.slane %v17874_v2, %v17797_v26 }
 0x6c4   : > { %v11498_v17 = vsel %vm11497_vm7, %v11496_v33, %v11491_v50  ;;  %v11683_v2 = vrot.slane %v17876_v43, %v17805_v1  ;;  %v11538_v43 = vrot.slane %v17636_v45, %v17839_v57  ;;  %v11698_v50 = vrot.slane %v17878_v23, %v17832_v5 }
 0x6c5   : > { %v11733_v30 = vsel %vm11469_vm1, %v11732_v54, %v11728_v34  ;;  %v11505_v35 = vsel %vm11504_vm8, %v11503_v21, %v11498_v17  ;;  %v11664_v54 = vsel %vm11483_vm3, %v11663_v44, %v11659_v4  ;;  %v11688_v34 = vrot.slane %v17880_v29, %v17818_v3 }
 0x6c6   : > { %v11669_v7 = vsel %vm11490_vm6, %v11668_v40, %v11664_v54  ;;  %v11512_v52 = vsel %vm11511_vm9, %v11510_v28, %v11505_v35  ;;  %v11559_v4 = vrot.slane %v17670_v32, %v17856_v46 }
 0x6c7   : > { %v11422_v49 = vpop.permute.xlu1 %11421  ;;  %v11519_v62 = vsel %vm11518_vm10, %v11517_v47, %v11512_v52  ;;  %v11674_v61 = vsel %vm11497_vm7, %v11673_v10, %v11669_v7  ;;  %v18238_v10 = vld [vmem:[#allocation29_spill] sm:$0xff] }
 0x6c8   : > { %v11679_v27 = vsel %vm11504_vm8, %v11678_v63, %v11674_v61 }
 0x6c9   : > { %v11684_v29 = vsel %vm11511_vm9, %v11683_v2, %v11679_v27 }
 0x6ca   : > { %v11689_v33 = vsel %vm11518_vm10, %v11688_v34, %v11684_v29 }
 0x6cc   : > { %v11419_v15 = vpop.permute.xlu0 %11418 }
 0x6cd   : > { %v11742_v22 = vrot.slane %v11419_v15, %v17783_v42  ;;  %v11738_v15 = vsel %vm11476_vm2, %v11737_v59, %v11733_v30  ;;  %v11747_v42 = vrot.slane %v11422_v49, %v17786_v6 }
 0x6cf   : > { %v11743_v39 = vsel %vm11483_vm3, %v11742_v22, %v11738_v15 }
 0x6d0   : > { %v11748_v18 = vsel %vm11490_vm6, %v11747_v42, %v11743_v39 }
 0x6d1   : > { %v17888_v11 = vpop.permute.xlu1 %11427 }
 0x6d2   : > { %v11757_v12 = vrot.slane %v17888_v11, %v17797_v26  ;;  %v11693_v11 = vrot.slane %v17882_v60, %v17825_v56  ;;  %v11545_v60 = vrot.slane %v17641_v53, %v17845_v25 }
 0x6d7   : > { %v11425_v58 = vpop.permute.xlu0 %11424 }
 0x6d8   : > { %v11752_v48 = vrot.slane %v11425_v58, %v17789_v9  ;;  %v11524_v9 = vrot.slane %v17611_v13, %v17825_v56 }
 0x6da   : > { %v11753_v6 = vsel %vm11497_vm7, %v11752_v48, %v11748_v18  ;;  %v11526_v24 = vsel %vm11525_vm11, %v11524_v9, %v11519_v62  ;;  %v18239_v18 = vlaneseq }
 0x6db   : > { %v11758_v26 = vsel %vm11504_vm8, %v11757_v12, %v11753_v6  ;;  %v11533_v22 = vsel %vm11532_vm12, %v11531_v31, %v11526_v24 }
 0x6dc   : > { %v17890_v14 = vpop.permute.xlu1 %11433  ;;  %v11540_v21 = vsel %vm11539_vm13, %v11538_v43, %v11533_v22  ;;  %vm11826_vm4 = vcmp.lt.s32.totalorder %v18239_v18, 512 }
 0x6e1   : > { %v11431_v20 = vpop.permute.xlu0 %11430 }
 0x6e2   : > { %v11762_v49 = vrot.slane %v11431_v20, %v17805_v1  ;;  %v11767_v1 = vrot.slane %v17890_v14, %v17818_v3  ;;  %v11703_v3 = vrot.slane %v17886_v0, %v17839_v57  ;;  %v11547_v0 = vsel %vm11546_vm14, %v11545_v60, %v11540_v21 }
 0x6e3   : > { %v11554_v48 = vsel %vm11553_vm15, %v11552_v41, %v11547_v0 }
 0x6e4   : > { %v11763_v13 = vsel %vm11511_vm9, %v11762_v49, %v11758_v26  ;;  %v11561_v28 = vsel %vm11560_vm0, %v11559_v4, %v11554_v48 }
 0x6e5   : > { %v11799_v19 = vcombine.low %v11561_v28, %v17868_v16 }
 0x6e6   : > { %v17899_v8 = vpop.permute.xlu1 %11439 }
 0x6e7   : > { %v11777_v53 = vrot.slane %v17899_v8, %v17832_v5  ;;  %v11807_v7 = vrot.slane %v11799_v19, %v18238_v10 }
 0x6ec   : > { %v11401_v30 = vpop.permute.xlu0 %11400 }
 0x6ed   : > { %v11713_v15 = vrot.slane %v11401_v30, %v17851_v36 }
 0x6f1   : > { %v11437_v51 = vpop.permute.xlu1 %11436 }
 0x6f2   : > { %v11772_v58 = vrot.slane %v11437_v51, %v17825_v56  ;;  %v11768_v56 = vsel %vm11518_vm10, %v11767_v1, %v11763_v13  ;;  %v11694_v51 = vsel %vm11525_vm11, %v11693_v11, %v11689_v33 }
 0x6f4   : > { %v11773_v14 = vsel %vm11525_vm11, %v11772_v58, %v11768_v56 }
 0x6f5   : > { %v11778_v40 = vsel %vm11532_vm12, %v11777_v53, %v11773_v14 }
 0x6f7   : > { %v11404_v44 = vpop.permute.xlu0 %11403 }
 0x6f8   : > { %v11718_v32 = vrot.slane %v11404_v44, %v17856_v46 }
 0x6fc   : > { %v17935_v55 = vpop.permute.xlu1 %11445 }
 0x6fd   : > { %v11787_v39 = vrot.slane %v17935_v55, %v17845_v25 }
 0x702   : > { %v11443_v38 = vpop.permute.xlu1 %11442 }
 0x703   : > { %v11782_v45 = vrot.slane %v11443_v38, %v17839_v57  ;;  %v11699_v57 = vsel %vm11532_vm12, %v11698_v50, %v11694_v51 }
 0x704   : > { %v11704_v23 = vsel %vm11539_vm13, %v11703_v3, %v11699_v57 }
 0x705   : > { %v11783_v5 = vsel %vm11539_vm13, %v11782_v45, %v11778_v40  ;;  %v11709_v42 = vsel %vm11546_vm14, %v11708_v37, %v11704_v23 }
 0x706   : > { %v11788_v20 = vsel %vm11546_vm14, %v11787_v39, %v11783_v5  ;;  %v11714_v35 = vsel %vm11553_vm15, %v11713_v15, %v11709_v42 }
 0x707   : > { %v11449_v59 = vpop.permute.xlu1 %11448  ;;  %v11719_v55 = vsel %vm11560_vm0, %v11718_v32, %v11714_v35 }
 0x708   : > { %v11792_v8 = vrot.slane %v11449_v59, %v17851_v36 }
 0x70a   : > { %v11793_v25 = vsel %vm11553_vm15, %v11792_v8, %v11788_v20 }
 0x70d   : > { %v11452_v17 = vpop.permute.xlu1 %11451 }
 0x70e   : > { %v11797_v36 = vrot.slane %v11452_v17, %v17856_v46 }
 0x710   : > { %v11798_v47 = vsel %vm11560_vm0, %v11797_v36, %v11793_v25 }
 0x711   : > { %v11800_v54 = vcombine.low %v11719_v55, %v11798_v47 }
 0x713   : > { %v11814_v63 = vrot.slane %v11800_v54, %v18238_v10 }
 0x715   : > { %v11815_v46 = vcombine.low %v11807_v7, %v11814_v63 }
 0x717   : > { %v11822_v16 = vrot.slane %v11815_v46, %v18238_v10 }
 0x719   : > { %11828 = vst.msk [vmem:[%s478_s22] sm:$0xf] %vm11826_vm4, %v11822_v16 }
 0x71a   : > { %13825 = shalt.err (!%p13822_p3)
}
 0x71b   : > { %s13826_s26 = scalar_lea.hbm %s18028_s19, 64  ;;  %s13830_s28 = scalar_lea.hbm %s18084_s14, 256 }
 0x71c   : > { %p13827_p4 = scmp.ne.s32.totalorder %s18028_s19, %s13826_s26  ;;  %p13831_p9 = scmp.lt.u32.totalorder %s18028_s19, %s18084_s14 }
 0x71d   : > { %p13832_p10 = scmp.lt.u32.totalorder %s13830_s28, %s13826_s26  ;;  %p13834_p12 = scmp.lt.u32.totalorder %s13826_s26, %s18028_s19 }
 0x71e   : > { %p13828_p7 = pnand %p13827_p4, %p13993_p5 }
 0x71f   : > { %p13833_p11 = por %p13832_p10, %p13831_p9 }
 0x720   : > { %p13829_p8 = pneg %p13828_p7 }
 0x721   : > { %p13835_p13 = por %p13834_p12, %p13833_p11 }
 0x723   : > { %p13836_p0 = pnand %p13835_p13, %p13829_p8 }
 0x725   : > { %13839 = shalt.err (!%p13836_p0)
}
 0x726   : > { %13492 = dma.vmem_to_hbm [thread:$0]  (%p13993_p5), %s18030_s21, 64, %s18028_s19, %s11830_s27  }
 0x727 PF: > { %p13498_p1 = scmp.ge.s32.totalorder %s13874_s18, 2  ;;  %s11856_s0 = sand.u32 1, %s13862_s15  }
 0x728   : > { %s11857_s2 = scalar_lea.sflag [#allocation4], %s11856_s0 }
 0x729   : > { %p13495_p2 = pnand %p13498_p1, %p13997_p6 }
 0x72b   : > { %13857 = dma.done.wait (!%p13495_p2), %s11857_s2, 64  }
 0x72c   : > { %13859 = vsyncadd (!%p13495_p2), %s11857_s2, 4294967232  ;;  %p25_p3 = scmp.ge.s32.totalorder %s13981_s20, 6   ;;  %s18240_s15 = smov %s13866_s16 }
 0x72d   : > { %s18241_s16 = smov %s13870_s17  ;;  %s18242_s17 = smov %s13991_s23 }
 0x72e   : > { %s18243_s18 = smov %s13981_s20  ;;  %27 = sbr.rel (!%p25_p3) target bundleno = 8 (0x8), region = 114 }
 0x735   :  { %11862 = vsyncpa [#allocation4], 1 }
 0x736   :  { %11864 = vsyncpa [#allocation4 + $0x1], 1 }

</bundles_post_ra>
